<compile_context>
chip_gen: v7x
topology: tpu7x:2x2x1
jax: 0.10.0
libtpu: 0.0.40
codegen_flags: <defaults>
</compile_context>

<pallas_src>
import functools
import math

import jax
import jax.numpy as jnp
from jax.experimental import pallas as pl
from jax.experimental.pallas import tpu as pltpu


# ------------------------- in-kernel helper math ---------------------------

def _layer_norm(x, g, b, eps=1e-5):
    # x: (M, D) f32, g/b: (1, D) f32.  Statistics kept in f32 (v5e has no bf16
    # VPU); the cross-lane mean/var runs on the XLU slot.
    mu = jnp.mean(x, axis=-1, keepdims=True)
    xc = x - mu
    var = jnp.mean(xc * xc, axis=-1, keepdims=True)
    return xc * jax.lax.rsqrt(var + eps) * g + b


# ----------------------------- fused kernel --------------------------------

def _fused_decoder_kernel(*refs, nlayers, nhead):
    (x_ref, mem_ref, mask_ref, pad_ref, pe_ref,
     wq_s_ref, bq_s_ref, wk_s_ref, bk_s_ref, wv_s_ref, bv_s_ref,
     wo_s_ref, bo_s_ref,
     wq_c_ref, bq_c_ref, wk_c_ref, bk_c_ref, wv_c_ref, bv_c_ref,
     wo_c_ref, bo_c_ref,
     w1_ref, b1_ref, w2_ref, b2_ref,
     ln1g_ref, ln1b_ref, ln2g_ref, ln2b_ref, ln3g_ref, ln3b_ref,
     linw_ref, linb_ref,
     out_ref) = refs

    D = x_ref.shape[-1]
    B, T = pad_ref.shape
    S = mem_ref.shape[0] // B
    dh = D // nhead
    scale = 1.0 / math.sqrt(dh)

    # PE add fused into the kernel (dropout after PE is identity / eval mode).
    x = x_ref[...] + pe_ref[...]                  # (B*T, D) f32
    mem = mem_ref[...]                            # (B*S, D) f32
    base_mask = mask_ref[...]                     # (T, T)  additive tgt_mask
    pad = pad_ref[...]                            # (B, T)  additive key-pad bias

    # Per-batch additive self-attn mask and head-broadcast bf16 memory —
    # hoisted out of the layer loop (JAX does not CSE broadcasts).
    self_masks = [base_mask + pad[b:b + 1, :] for b in range(B)]
    mem_h = [jnp.broadcast_to(
        mem[b * S:(b + 1) * S, :].astype(jnp.bfloat16)[None], (nhead, S, D))
        for b in range(B)]

    def heads(x2d):
        # (M, D) f32 -> (H, M, D) bf16 via a leading-dim broadcast (no lane
        # slicing, no transpose).
        return jnp.broadcast_to(x2d.astype(jnp.bfloat16)[None],
                                (nhead,) + x2d.shape)

    def mm(a, w_bf16, b):
        # bf16 operands -> MXU, f32 accumulation; bias added in f32.
        return jnp.dot(a.astype(jnp.bfloat16), w_bf16,
                       preferred_element_type=jnp.float32) + b

    def mha(q_h, kv_h, wq, bq, wk, bk, wv, bv, wo, bo, add_mask):
        # q_h: (H, Tq, D) bf16, kv_h: (H, Tk, D) bf16.
        # Weights are head-major bf16: wq/wk/wv (H, D, dh), wo (H, dh, D).
        # All dot_generals below are canonical leading-batch batched matmuls.
        q = jnp.einsum('htd,hdk->htk', q_h, wq,
                       preferred_element_type=jnp.float32) + bq      # (H,Tq,dh)
        k = jnp.einsum('htd,hdk->htk', kv_h, wk,
                       preferred_element_type=jnp.float32) + bk      # (H,Tk,dh)
        v = jnp.einsum('htd,hdk->htk', kv_h, wv,
                       preferred_element_type=jnp.float32) + bv      # (H,Tk,dh)

        s = jnp.einsum('hqd,hkd->hqk', q.astype(jnp.bfloat16),
                       k.astype(jnp.bfloat16),
                       preferred_element_type=jnp.float32) * scale   # (H,Tq,Tk)
        if add_mask is not None:
            s = s + add_mask[None]          # (T, T) broadcast over heads
        # Softmax in f32; approx reciprocal goes to the EUP slot.
        s = s - jnp.max(s, axis=-1, keepdims=True)
        p = jnp.exp(s)
        p = p * pl.reciprocal(jnp.sum(p, axis=-1, keepdims=True), approx=True)

        o = jnp.einsum('hqk,hkd->hqd', p.astype(jnp.bfloat16),
                       v.astype(jnp.bfloat16),
                       preferred_element_type=jnp.float32)           # (H,Tq,dh)
        # Output projection folded per head: concat_h(o_h) @ Wo == sum_h o_h @ Wo[h]
        ob = jnp.einsum('htd,hdk->htk', o.astype(jnp.bfloat16), wo,
                        preferred_element_type=jnp.float32)          # (H,Tq,D)
        return jnp.sum(ob, axis=0) + bo                              # (Tq, D)

    # TODO(synk): all dropout layers (PE dropout, per-layer dropouts, the
    # F.dropout before the final linear) are stochastic in training mode;
    # implemented as identity (eval / inference semantics).
    # NOTE: static Python layer loop is fine at nlayers=2; for large nlayers
    # switch to a layer grid axis (streamed weights) or lax.fori_loop to bound
    # trace size / vreg live ranges and VMEM residency (esp. v7x 64 MiB).
    for l in range(nlayers):
        # ---- self-attention + residual + LN1 ----
        sa_rows = []
        for b in range(B):
            xh = heads(x[b * T:(b + 1) * T, :])
            sa_rows.append(mha(xh, xh,
                               wq_s_ref[l], bq_s_ref[l], wk_s_ref[l],
                               bk_s_ref[l], wv_s_ref[l], bv_s_ref[l],
                               wo_s_ref[l], bo_s_ref[l], self_masks[b]))
        sa = jnp.concatenate(sa_rows, axis=0)                        # (B*T, D)
        x = _layer_norm(x + sa, ln1g_ref[l], ln1b_ref[l])

        # ---- cross-attention + residual + LN2 (no mask -> never built) ----
        ca_rows = []
        for b in range(B):
            xh = heads(x[b * T:(b + 1) * T, :])
            ca_rows.append(mha(xh, mem_h[b],
                               wq_c_ref[l], bq_c_ref[l], wk_c_ref[l],
                               bk_c_ref[l], wv_c_ref[l], bv_c_ref[l],
                               wo_c_ref[l], bo_c_ref[l], None))
        ca = jnp.concatenate(ca_rows, axis=0)
        x = _layer_norm(x + ca, ln2g_ref[l], ln2b_ref[l])

        # ---- feed-forward (ReLU) + residual + LN3, on the full (B*T, D) slab
        h1 = jnp.maximum(mm(x, w1_ref[l], b1_ref[l]), 0.0)
        ff = mm(h1, w2_ref[l], b2_ref[l])
        x = _layer_norm(x + ff, ln3g_ref[l], ln3b_ref[l])

    # ---- final linear: output is lane-dense (nout padded to 128 lanes) ----
    out_ref[...] = mm(x, linw_ref[...], linb_ref[...])


# ------------------------------- JAX glue ----------------------------------

def positional_encoding(T, D):
    # Interleaved sin/cos built without scatters.
    pos = jnp.arange(T, dtype=jnp.float32)[:, None]
    div = jnp.exp(jnp.arange(0, D, 2, dtype=jnp.float32)
                  * (-math.log(10000.0) / D))
    ang = pos * div                                         # (T, D/2)
    return jnp.stack([jnp.sin(ang), jnp.cos(ang)], axis=-1).reshape(T, D)


def _prep_weights(params, nhead):
    """Reshape to head-major layouts and pre-cast matmul weights to bf16."""
    L, D, _ = params["wq_s"].shape
    nout = params["lin_w"].shape[-1]
    dh = D // nhead
    nout_pad = ((nout + 127) // 128) * 128

    def qkv_w(w):   # (L, D, D) -> (L, H, D, dh), bf16 (output features by head)
        return w.reshape(L, D, nhead, dh).transpose(0, 2, 1, 3).astype(jnp.bfloat16)

    def qkv_b(b):   # (L, D) -> (L, H, 1, dh), f32
        return b.reshape(L, nhead, 1, dh)

    def out_w(w):   # (L, D, D) -> (L, H, dh, D), bf16 (input features by head)
        return w.reshape(L, nhead, dh, D).astype(jnp.bfloat16)

    def row(b):     # (L, X) -> (L, 1, X), f32
        return b.reshape(L, 1, -1)

    lin_w = jnp.pad(params["lin_w"], ((0, 0), (0, nout_pad - nout))).astype(jnp.bfloat16)
    lin_b = jnp.pad(params["lin_b"], (0, nout_pad - nout)).reshape(1, nout_pad)

    weights = [
        qkv_w(params["wq_s"]), qkv_b(params["bq_s"]),
        qkv_w(params["wk_s"]), qkv_b(params["bk_s"]),
        qkv_w(params["wv_s"]), qkv_b(params["bv_s"]),
        out_w(params["wo_s"]), row(params["bo_s"]),
        qkv_w(params["wq_c"]), qkv_b(params["bq_c"]),
        qkv_w(params["wk_c"]), qkv_b(params["bk_c"]),
        qkv_w(params["wv_c"]), qkv_b(params["bv_c"]),
        out_w(params["wo_c"]), row(params["bo_c"]),
        params["w1"].astype(jnp.bfloat16), row(params["b1"]),
        params["w2"].astype(jnp.bfloat16), row(params["b2"]),
        row(params["ln1_g"]), row(params["ln1_b"]),
        row(params["ln2_g"]), row(params["ln2_b"]),
        row(params["ln3_g"]), row(params["ln3_b"]),
        lin_w, lin_b,
    ]
    return weights, nout, nout_pad


def my_transformer_decoder(tgt, memory, tgt_mask, tgt_key_padding_mask,
                           params, nhead):
    B, T, D = tgt.shape
    S = memory.shape[1]
    L = params["w1"].shape[0]

    weights, nout, nout_pad = _prep_weights(params, nhead)

    # Batch folded in the wrapper: kernel works on (B*T, D) / (B*S, D) slabs.
    x_flat = tgt.reshape(B * T, D).astype(jnp.float32)
    mem_flat = memory.reshape(B * S, D).astype(jnp.float32)
    pe = jnp.tile(positional_encoding(T, D), (B, 1))                 # (B*T, D)
    mask = tgt_mask.astype(jnp.float32)                              # (T, T)
    pad = jnp.where(tgt_key_padding_mask, -1e9, 0.0).astype(jnp.float32)  # (B, T)

    inputs = [x_flat, mem_flat, mask, pad, pe] + weights
    vmem = pl.BlockSpec(memory_space=pltpu.MemorySpace.VMEM)

    # Single invocation (no grid): everything (weights included, ~40 KB bf16)
    # is VMEM-resident; no per-step pipeline overhead.  vmem_limit is ample
    # for this toy config — recompute from block sizes when scaling T/S/D/L.
    out = pl.pallas_call(
        functools.partial(_fused_decoder_kernel, nlayers=L, nhead=nhead),
        out_shape=jax.ShapeDtypeStruct((B * T, nout_pad), jnp.float32),
        in_specs=[vmem] * len(inputs),
        out_specs=vmem,
        compiler_params=pltpu.CompilerParams(
            vmem_limit_bytes=32 * 1024 * 1024),
    )(*inputs)

    return out[:, :nout].reshape(B, T, nout)


# --------------------------- deterministic init ----------------------------

def init_params(key, ninp, nout, nhid, nlayers):
    key_box = [key]

    def nxt():
        key_box[0], sub = jax.random.split(key_box[0])
        return sub

    def w(shape):
        return jax.random.normal(nxt(), shape, jnp.float32) * 0.05

    def stack_w(shape):
        return jnp.stack([w(shape) for _ in range(nlayers)])

    D, L = ninp, nlayers
    params = dict(
        # self-attention (separate Q/K/V — D < 128 so fusion is not used)
        wq_s=stack_w((D, D)), bq_s=jnp.zeros((L, D), jnp.float32),
        wk_s=stack_w((D, D)), bk_s=jnp.zeros((L, D), jnp.float32),
        wv_s=stack_w((D, D)), bv_s=jnp.zeros((L, D), jnp.float32),
        wo_s=stack_w((D, D)), bo_s=jnp.zeros((L, D), jnp.float32),
        # cross-attention
        wq_c=stack_w((D, D)), bq_c=jnp.zeros((L, D), jnp.float32),
        wk_c=stack_w((D, D)), bk_c=jnp.zeros((L, D), jnp.float32),
        wv_c=stack_w((D, D)), bv_c=jnp.zeros((L, D), jnp.float32),
        wo_c=stack_w((D, D)), bo_c=jnp.zeros((L, D), jnp.float32),
        # feed-forward
        w1=stack_w((D, nhid)), b1=jnp.zeros((L, nhid), jnp.float32),
        w2=stack_w((nhid, D)), b2=jnp.zeros((L, D), jnp.float32),
        # layer norms
        ln1_g=jnp.ones((L, D), jnp.float32), ln1_b=jnp.zeros((L, D), jnp.float32),
        ln2_g=jnp.ones((L, D), jnp.float32), ln2_b=jnp.zeros((L, D), jnp.float32),
        ln3_g=jnp.ones((L, D), jnp.float32), ln3_b=jnp.zeros((L, D), jnp.float32),
        # final linear
        lin_w=w((D, nout)), lin_b=jnp.zeros((nout,), jnp.float32),
    )
    return params


# ---------------------------------- main -----------------------------------

if __name__ == "__main__":
    ninp, nout, nhead, nhid, nlayers = 32, 16, 4, 64, 2
    B, T, S = 2, 8, 8

    key = jax.random.PRNGKey(0)
    k1, k2, kp = jax.random.split(key, 3)
    tgt = jax.random.normal(k1, (B, T, ninp), jnp.float32)
    memory = jax.random.normal(k2, (B, S, ninp), jnp.float32)

    # causal additive mask (like generate_square_subsequent_mask, with -1e9
    # instead of -inf to keep softmax NaN-free)
    tgt_mask = jnp.where(jnp.triu(jnp.ones((T, T), bool), k=1),
                         -1e9, 0.0).astype(jnp.float32)
    # last two target positions are padded keys
    tgt_key_padding_mask = jnp.zeros((B, T), bool).at[:, T - 2:].set(True)

    params = init_params(kp, ninp, nout, nhid, nlayers)

    out = my_transformer_decoder(tgt, memory, tgt_mask, tgt_key_padding_mask,
                                 params, nhead)
    out = jax.block_until_ready(out)

    # Host-side equivalents of the module's isnan asserts.
    assert out.shape == (B, T, nout), out.shape
    assert not bool(jnp.isnan(out).any()), "NaN in output"
    print("KERNEL_OK")
</pallas_src>

<mosaic_0001>
module attributes {stable_mosaic.version = 11 : i64} {
  func.func @_fused_decoder_kernel(%arg0: memref<16x32xf32, #tpu.memory_space<vmem>>, %arg1: memref<16x32xf32, #tpu.memory_space<vmem>>, %arg2: memref<8x8xf32, #tpu.memory_space<vmem>>, %arg3: memref<2x8xf32, #tpu.memory_space<vmem>>, %arg4: memref<16x32xf32, #tpu.memory_space<vmem>>, %arg5: memref<2x4x32x8xbf16, #tpu.memory_space<vmem>>, %arg6: memref<2x4x1x8xf32, #tpu.memory_space<vmem>>, %arg7: memref<2x4x32x8xbf16, #tpu.memory_space<vmem>>, %arg8: memref<2x4x1x8xf32, #tpu.memory_space<vmem>>, %arg9: memref<2x4x32x8xbf16, #tpu.memory_space<vmem>>, %arg10: memref<2x4x1x8xf32, #tpu.memory_space<vmem>>, %arg11: memref<2x4x8x32xbf16, #tpu.memory_space<vmem>>, %arg12: memref<2x1x32xf32, #tpu.memory_space<vmem>>, %arg13: memref<2x4x32x8xbf16, #tpu.memory_space<vmem>>, %arg14: memref<2x4x1x8xf32, #tpu.memory_space<vmem>>, %arg15: memref<2x4x32x8xbf16, #tpu.memory_space<vmem>>, %arg16: memref<2x4x1x8xf32, #tpu.memory_space<vmem>>, %arg17: memref<2x4x32x8xbf16, #tpu.memory_space<vmem>>, %arg18: memref<2x4x1x8xf32, #tpu.memory_space<vmem>>, %arg19: memref<2x4x8x32xbf16, #tpu.memory_space<vmem>>, %arg20: memref<2x1x32xf32, #tpu.memory_space<vmem>>, %arg21: memref<2x32x64xbf16, #tpu.memory_space<vmem>>, %arg22: memref<2x1x64xf32, #tpu.memory_space<vmem>>, %arg23: memref<2x64x32xbf16, #tpu.memory_space<vmem>>, %arg24: memref<2x1x32xf32, #tpu.memory_space<vmem>>, %arg25: memref<2x1x32xf32, #tpu.memory_space<vmem>>, %arg26: memref<2x1x32xf32, #tpu.memory_space<vmem>>, %arg27: memref<2x1x32xf32, #tpu.memory_space<vmem>>, %arg28: memref<2x1x32xf32, #tpu.memory_space<vmem>>, %arg29: memref<2x1x32xf32, #tpu.memory_space<vmem>>, %arg30: memref<2x1x32xf32, #tpu.memory_space<vmem>>, %arg31: memref<32x128xbf16, #tpu.memory_space<vmem>>, %arg32: memref<1x128xf32, #tpu.memory_space<vmem>>, %arg33: memref<16x128xf32, #tpu.memory_space<vmem>>) attributes {dimension_semantics = [], scalar_prefetch = 0 : i64, scratch_operands = 0 : i64, tpu.core_type = #tpu.core_type<tc>} {
    %c0 = arith.constant 0 : index
    %c0_0 = arith.constant 0 : index
    %0 = vector.load %arg0[%c0, %c0_0] : memref<16x32xf32, #tpu.memory_space<vmem>>, vector<16x32xf32>
    %c0_1 = arith.constant 0 : index
    %c0_2 = arith.constant 0 : index
    %1 = vector.load %arg4[%c0_1, %c0_2] : memref<16x32xf32, #tpu.memory_space<vmem>>, vector<16x32xf32>
    %2 = arith.addf %0, %1 : vector<16x32xf32>
    %c0_3 = arith.constant 0 : index
    %c0_4 = arith.constant 0 : index
    %3 = vector.load %arg1[%c0_3, %c0_4] : memref<16x32xf32, #tpu.memory_space<vmem>>, vector<16x32xf32>
    %c0_5 = arith.constant 0 : index
    %c0_6 = arith.constant 0 : index
    %4 = vector.load %arg2[%c0_5, %c0_6] : memref<8x8xf32, #tpu.memory_space<vmem>>, vector<8x8xf32>
    %c0_7 = arith.constant 0 : index
    %c0_8 = arith.constant 0 : index
    %5 = vector.load %arg3[%c0_7, %c0_8] : memref<2x8xf32, #tpu.memory_space<vmem>>, vector<2x8xf32>
    %6 = vector.extract_strided_slice %5 {offsets = [0, 0], sizes = [1, 8], strides = [1, 1]} : vector<2x8xf32> to vector<1x8xf32>
    %7 = vector.broadcast %6 : vector<1x8xf32> to vector<8x8xf32>
    %8 = arith.addf %4, %7 : vector<8x8xf32>
    %9 = vector.extract_strided_slice %5 {offsets = [1, 0], sizes = [1, 8], strides = [1, 1]} : vector<2x8xf32> to vector<1x8xf32>
    %10 = vector.broadcast %9 : vector<1x8xf32> to vector<8x8xf32>
    %11 = arith.addf %4, %10 : vector<8x8xf32>
    %12 = vector.extract_strided_slice %3 {offsets = [0, 0], sizes = [8, 32], strides = [1, 1]} : vector<16x32xf32> to vector<8x32xf32>
    %13 = arith.truncf %12 : vector<8x32xf32> to vector<8x32xbf16>
    %14 = vector.shape_cast %13 : vector<8x32xbf16> to vector<1x8x32xbf16>
    %15 = vector.shape_cast %14 : vector<1x8x32xbf16> to vector<1x8x32xbf16>
    %16 = vector.broadcast %15 : vector<1x8x32xbf16> to vector<4x8x32xbf16>
    %17 = vector.extract_strided_slice %3 {offsets = [8, 0], sizes = [8, 32], strides = [1, 1]} : vector<16x32xf32> to vector<8x32xf32>
    %18 = arith.truncf %17 : vector<8x32xf32> to vector<8x32xbf16>
    %19 = vector.shape_cast %18 : vector<8x32xbf16> to vector<1x8x32xbf16>
    %20 = vector.shape_cast %19 : vector<1x8x32xbf16> to vector<1x8x32xbf16>
    %21 = vector.broadcast %20 : vector<1x8x32xbf16> to vector<4x8x32xbf16>
    %22 = vector.extract_strided_slice %2 {offsets = [0, 0], sizes = [8, 32], strides = [1, 1]} : vector<16x32xf32> to vector<8x32xf32>
    %23 = arith.truncf %22 : vector<8x32xf32> to vector<8x32xbf16>
    %24 = vector.shape_cast %23 : vector<8x32xbf16> to vector<1x8x32xbf16>
    %25 = vector.shape_cast %24 : vector<1x8x32xbf16> to vector<1x8x32xbf16>
    %26 = vector.broadcast %25 : vector<1x8x32xbf16> to vector<4x8x32xbf16>
    %c0_9 = arith.constant 0 : index
    %c0_10 = arith.constant 0 : index
    %c0_11 = arith.constant 0 : index
    %c0_12 = arith.constant 0 : index
    %27 = vector.load %arg5[%c0_9, %c0_10, %c0_11, %c0_12] : memref<2x4x32x8xbf16, #tpu.memory_space<vmem>>, vector<1x4x32x8xbf16>
    %28 = vector.shape_cast %27 : vector<1x4x32x8xbf16> to vector<4x32x8xbf16>
    %c0_13 = arith.constant 0 : index
    %c0_14 = arith.constant 0 : index
    %c0_15 = arith.constant 0 : index
    %c0_16 = arith.constant 0 : index
    %29 = vector.load %arg6[%c0_13, %c0_14, %c0_15, %c0_16] : memref<2x4x1x8xf32, #tpu.memory_space<vmem>>, vector<1x4x1x8xf32>
    %30 = vector.shape_cast %29 : vector<1x4x1x8xf32> to vector<4x1x8xf32>
    %c0_17 = arith.constant 0 : index
    %c0_18 = arith.constant 0 : index
    %c0_19 = arith.constant 0 : index
    %c0_20 = arith.constant 0 : index
    %31 = vector.load %arg7[%c0_17, %c0_18, %c0_19, %c0_20] : memref<2x4x32x8xbf16, #tpu.memory_space<vmem>>, vector<1x4x32x8xbf16>
    %32 = vector.shape_cast %31 : vector<1x4x32x8xbf16> to vector<4x32x8xbf16>
    %c0_21 = arith.constant 0 : index
    %c0_22 = arith.constant 0 : index
    %c0_23 = arith.constant 0 : index
    %c0_24 = arith.constant 0 : index
    %33 = vector.load %arg8[%c0_21, %c0_22, %c0_23, %c0_24] : memref<2x4x1x8xf32, #tpu.memory_space<vmem>>, vector<1x4x1x8xf32>
    %34 = vector.shape_cast %33 : vector<1x4x1x8xf32> to vector<4x1x8xf32>
    %c0_25 = arith.constant 0 : index
    %c0_26 = arith.constant 0 : index
    %c0_27 = arith.constant 0 : index
    %c0_28 = arith.constant 0 : index
    %35 = vector.load %arg9[%c0_25, %c0_26, %c0_27, %c0_28] : memref<2x4x32x8xbf16, #tpu.memory_space<vmem>>, vector<1x4x32x8xbf16>
    %36 = vector.shape_cast %35 : vector<1x4x32x8xbf16> to vector<4x32x8xbf16>
    %c0_29 = arith.constant 0 : index
    %c0_30 = arith.constant 0 : index
    %c0_31 = arith.constant 0 : index
    %c0_32 = arith.constant 0 : index
    %37 = vector.load %arg10[%c0_29, %c0_30, %c0_31, %c0_32] : memref<2x4x1x8xf32, #tpu.memory_space<vmem>>, vector<1x4x1x8xf32>
    %38 = vector.shape_cast %37 : vector<1x4x1x8xf32> to vector<4x1x8xf32>
    %c0_33 = arith.constant 0 : index
    %c0_34 = arith.constant 0 : index
    %c0_35 = arith.constant 0 : index
    %c0_36 = arith.constant 0 : index
    %39 = vector.load %arg11[%c0_33, %c0_34, %c0_35, %c0_36] : memref<2x4x8x32xbf16, #tpu.memory_space<vmem>>, vector<1x4x8x32xbf16>
    %40 = vector.shape_cast %39 : vector<1x4x8x32xbf16> to vector<4x8x32xbf16>
    %c0_37 = arith.constant 0 : index
    %c0_38 = arith.constant 0 : index
    %c0_39 = arith.constant 0 : index
    %41 = vector.load %arg12[%c0_37, %c0_38, %c0_39] : memref<2x1x32xf32, #tpu.memory_space<vmem>>, vector<1x1x32xf32>
    %42 = vector.shape_cast %41 : vector<1x1x32xf32> to vector<1x32xf32>
    "tpu.trace_start"() <{level = 10 : i32, message = "htd,hdk->htk"}> : () -> ()
    %cst = arith.constant dense<0.000000e+00> : vector<4x8x8xf32>
    %43 = tpu.matmul %26, %28, %cst {dimension_numbers = #tpu.dot_dimension_numbers<[2], [1], [1], [2], [0, 0, 0, 1, 1, 2], [0], [0]>} : vector<4x8x32xbf16>, vector<4x32x8xbf16>, vector<4x8x8xf32> -> vector<4x8x8xf32>
    "tpu.trace_stop"() : () -> ()
    %44 = vector.broadcast %30 : vector<4x1x8xf32> to vector<4x8x8xf32>
    %45 = arith.addf %43, %44 : vector<4x8x8xf32>
    "tpu.trace_start"() <{level = 10 : i32, message = "htd,hdk->htk"}> : () -> ()
    %cst_40 = arith.constant dense<0.000000e+00> : vector<4x8x8xf32>
    %46 = tpu.matmul %26, %32, %cst_40 {dimension_numbers = #tpu.dot_dimension_numbers<[2], [1], [1], [2], [0, 0, 0, 1, 1, 2], [0], [0]>} : vector<4x8x32xbf16>, vector<4x32x8xbf16>, vector<4x8x8xf32> -> vector<4x8x8xf32>
    "tpu.trace_stop"() : () -> ()
    %47 = vector.broadcast %34 : vector<4x1x8xf32> to vector<4x8x8xf32>
    %48 = arith.addf %46, %47 : vector<4x8x8xf32>
    "tpu.trace_start"() <{level = 10 : i32, message = "htd,hdk->htk"}> : () -> ()
    %cst_41 = arith.constant dense<0.000000e+00> : vector<4x8x8xf32>
    %49 = tpu.matmul %26, %36, %cst_41 {dimension_numbers = #tpu.dot_dimension_numbers<[2], [1], [1], [2], [0, 0, 0, 1, 1, 2], [0], [0]>} : vector<4x8x32xbf16>, vector<4x32x8xbf16>, vector<4x8x8xf32> -> vector<4x8x8xf32>
    "tpu.trace_stop"() : () -> ()
    %50 = vector.broadcast %38 : vector<4x1x8xf32> to vector<4x8x8xf32>
    %51 = arith.addf %49, %50 : vector<4x8x8xf32>
    %52 = arith.truncf %45 : vector<4x8x8xf32> to vector<4x8x8xbf16>
    %53 = arith.truncf %48 : vector<4x8x8xf32> to vector<4x8x8xbf16>
    "tpu.trace_start"() <{level = 10 : i32, message = "hqd,hkd->hqk"}> : () -> ()
    %cst_42 = arith.constant dense<0.000000e+00> : vector<4x8x8xf32>
    %54 = tpu.matmul %52, %53, %cst_42 {dimension_numbers = #tpu.dot_dimension_numbers<[2], [2], [1], [1], [0, 0, 0, 1, 1, 1], [0], [0]>} : vector<4x8x8xbf16>, vector<4x8x8xbf16>, vector<4x8x8xf32> -> vector<4x8x8xf32>
    "tpu.trace_stop"() : () -> ()
    %cst_43 = arith.constant 0.353553385 : f32
    %55 = vector.broadcast %cst_43 : f32 to vector<4x8x8xf32>
    %56 = arith.mulf %54, %55 : vector<4x8x8xf32>
    %57 = vector.shape_cast %8 : vector<8x8xf32> to vector<1x8x8xf32>
    %58 = vector.broadcast %57 : vector<1x8x8xf32> to vector<4x8x8xf32>
    %59 = arith.addf %56, %58 : vector<4x8x8xf32>
    %cst_44 = arith.constant dense<0xFF800000> : vector<4x8xf32>
    %60 = vector.multi_reduction <maximumf>, %59, %cst_44 [2] : vector<4x8x8xf32> to vector<4x8xf32>
    %61 = vector.shape_cast %60 : vector<4x8xf32> to vector<4x8x1xf32>
    %62 = vector.broadcast %61 : vector<4x8x1xf32> to vector<4x8x8xf32>
    %63 = arith.subf %59, %62 : vector<4x8x8xf32>
    %64 = math.exp %63 : vector<4x8x8xf32>
    %cst_45 = arith.constant dense<0.000000e+00> : vector<4x8xf32>
    %65 = vector.multi_reduction <add>, %64, %cst_45 [2] : vector<4x8x8xf32> to vector<4x8xf32>
    %66 = vector.shape_cast %65 : vector<4x8xf32> to vector<4x8x1xf32>
    %67 = tpu.reciprocal %66 {approx = true} : vector<4x8x1xf32> -> vector<4x8x1xf32>
    %68 = vector.broadcast %67 : vector<4x8x1xf32> to vector<4x8x8xf32>
    %69 = arith.mulf %64, %68 : vector<4x8x8xf32>
    %70 = arith.truncf %69 : vector<4x8x8xf32> to vector<4x8x8xbf16>
    %71 = arith.truncf %51 : vector<4x8x8xf32> to vector<4x8x8xbf16>
    "tpu.trace_start"() <{level = 10 : i32, message = "hqk,hkd->hqd"}> : () -> ()
    %cst_46 = arith.constant dense<0.000000e+00> : vector<4x8x8xf32>
    %72 = tpu.matmul %70, %71, %cst_46 {dimension_numbers = #tpu.dot_dimension_numbers<[2], [1], [1], [2], [0, 0, 0, 1, 1, 2], [0], [0]>} : vector<4x8x8xbf16>, vector<4x8x8xbf16>, vector<4x8x8xf32> -> vector<4x8x8xf32>
    "tpu.trace_stop"() : () -> ()
    %73 = arith.truncf %72 : vector<4x8x8xf32> to vector<4x8x8xbf16>
    "tpu.trace_start"() <{level = 10 : i32, message = "htd,hdk->htk"}> : () -> ()
    %cst_47 = arith.constant dense<0.000000e+00> : vector<4x8x32xf32>
    %74 = tpu.matmul %73, %40, %cst_47 {dimension_numbers = #tpu.dot_dimension_numbers<[2], [1], [1], [2], [0, 0, 0, 1, 1, 2], [0], [0]>} : vector<4x8x8xbf16>, vector<4x8x32xbf16>, vector<4x8x32xf32> -> vector<4x8x32xf32>
    "tpu.trace_stop"() : () -> ()
    %cst_48 = arith.constant dense<0.000000e+00> : vector<8x32xf32>
    %75 = vector.multi_reduction <add>, %74, %cst_48 [0] : vector<4x8x32xf32> to vector<8x32xf32>
    %76 = vector.broadcast %42 : vector<1x32xf32> to vector<8x32xf32>
    %77 = arith.addf %75, %76 : vector<8x32xf32>
    %78 = vector.extract_strided_slice %2 {offsets = [8, 0], sizes = [8, 32], strides = [1, 1]} : vector<16x32xf32> to vector<8x32xf32>
    %79 = arith.truncf %78 : vector<8x32xf32> to vector<8x32xbf16>
    %80 = vector.shape_cast %79 : vector<8x32xbf16> to vector<1x8x32xbf16>
    %81 = vector.shape_cast %80 : vector<1x8x32xbf16> to vector<1x8x32xbf16>
    %82 = vector.broadcast %81 : vector<1x8x32xbf16> to vector<4x8x32xbf16>
    %c0_49 = arith.constant 0 : index
    %c0_50 = arith.constant 0 : index
    %c0_51 = arith.constant 0 : index
    %c0_52 = arith.constant 0 : index
    %83 = vector.load %arg5[%c0_49, %c0_50, %c0_51, %c0_52] : memref<2x4x32x8xbf16, #tpu.memory_space<vmem>>, vector<1x4x32x8xbf16>
    %84 = vector.shape_cast %83 : vector<1x4x32x8xbf16> to vector<4x32x8xbf16>
    %c0_53 = arith.constant 0 : index
    %c0_54 = arith.constant 0 : index
    %c0_55 = arith.constant 0 : index
    %c0_56 = arith.constant 0 : index
    %85 = vector.load %arg6[%c0_53, %c0_54, %c0_55, %c0_56] : memref<2x4x1x8xf32, #tpu.memory_space<vmem>>, vector<1x4x1x8xf32>
    %86 = vector.shape_cast %85 : vector<1x4x1x8xf32> to vector<4x1x8xf32>
    %c0_57 = arith.constant 0 : index
    %c0_58 = arith.constant 0 : index
    %c0_59 = arith.constant 0 : index
    %c0_60 = arith.constant 0 : index
    %87 = vector.load %arg7[%c0_57, %c0_58, %c0_59, %c0_60] : memref<2x4x32x8xbf16, #tpu.memory_space<vmem>>, vector<1x4x32x8xbf16>
    %88 = vector.shape_cast %87 : vector<1x4x32x8xbf16> to vector<4x32x8xbf16>
    %c0_61 = arith.constant 0 : index
    %c0_62 = arith.constant 0 : index
    %c0_63 = arith.constant 0 : index
    %c0_64 = arith.constant 0 : index
    %89 = vector.load %arg8[%c0_61, %c0_62, %c0_63, %c0_64] : memref<2x4x1x8xf32, #tpu.memory_space<vmem>>, vector<1x4x1x8xf32>
    %90 = vector.shape_cast %89 : vector<1x4x1x8xf32> to vector<4x1x8xf32>
    %c0_65 = arith.constant 0 : index
    %c0_66 = arith.constant 0 : index
    %c0_67 = arith.constant 0 : index
    %c0_68 = arith.constant 0 : index
    %91 = vector.load %arg9[%c0_65, %c0_66, %c0_67, %c0_68] : memref<2x4x32x8xbf16, #tpu.memory_space<vmem>>, vector<1x4x32x8xbf16>
    %92 = vector.shape_cast %91 : vector<1x4x32x8xbf16> to vector<4x32x8xbf16>
    %c0_69 = arith.constant 0 : index
    %c0_70 = arith.constant 0 : index
    %c0_71 = arith.constant 0 : index
    %c0_72 = arith.constant 0 : index
    %93 = vector.load %arg10[%c0_69, %c0_70, %c0_71, %c0_72] : memref<2x4x1x8xf32, #tpu.memory_space<vmem>>, vector<1x4x1x8xf32>
    %94 = vector.shape_cast %93 : vector<1x4x1x8xf32> to vector<4x1x8xf32>
    %c0_73 = arith.constant 0 : index
    %c0_74 = arith.constant 0 : index
    %c0_75 = arith.constant 0 : index
    %c0_76 = arith.constant 0 : index
    %95 = vector.load %arg11[%c0_73, %c0_74, %c0_75, %c0_76] : memref<2x4x8x32xbf16, #tpu.memory_space<vmem>>, vector<1x4x8x32xbf16>
    %96 = vector.shape_cast %95 : vector<1x4x8x32xbf16> to vector<4x8x32xbf16>
    %c0_77 = arith.constant 0 : index
    %c0_78 = arith.constant 0 : index
    %c0_79 = arith.constant 0 : index
    %97 = vector.load %arg12[%c0_77, %c0_78, %c0_79] : memref<2x1x32xf32, #tpu.memory_space<vmem>>, vector<1x1x32xf32>
    %98 = vector.shape_cast %97 : vector<1x1x32xf32> to vector<1x32xf32>
    "tpu.trace_start"() <{level = 10 : i32, message = "htd,hdk->htk"}> : () -> ()
    %cst_80 = arith.constant dense<0.000000e+00> : vector<4x8x8xf32>
    %99 = tpu.matmul %82, %84, %cst_80 {dimension_numbers = #tpu.dot_dimension_numbers<[2], [1], [1], [2], [0, 0, 0, 1, 1, 2], [0], [0]>} : vector<4x8x32xbf16>, vector<4x32x8xbf16>, vector<4x8x8xf32> -> vector<4x8x8xf32>
    "tpu.trace_stop"() : () -> ()
    %100 = vector.broadcast %86 : vector<4x1x8xf32> to vector<4x8x8xf32>
    %101 = arith.addf %99, %100 : vector<4x8x8xf32>
    "tpu.trace_start"() <{level = 10 : i32, message = "htd,hdk->htk"}> : () -> ()
    %cst_81 = arith.constant dense<0.000000e+00> : vector<4x8x8xf32>
    %102 = tpu.matmul %82, %88, %cst_81 {dimension_numbers = #tpu.dot_dimension_numbers<[2], [1], [1], [2], [0, 0, 0, 1, 1, 2], [0], [0]>} : vector<4x8x32xbf16>, vector<4x32x8xbf16>, vector<4x8x8xf32> -> vector<4x8x8xf32>
    "tpu.trace_stop"() : () -> ()
    %103 = vector.broadcast %90 : vector<4x1x8xf32> to vector<4x8x8xf32>
    %104 = arith.addf %102, %103 : vector<4x8x8xf32>
    "tpu.trace_start"() <{level = 10 : i32, message = "htd,hdk->htk"}> : () -> ()
    %cst_82 = arith.constant dense<0.000000e+00> : vector<4x8x8xf32>
    %105 = tpu.matmul %82, %92, %cst_82 {dimension_numbers = #tpu.dot_dimension_numbers<[2], [1], [1], [2], [0, 0, 0, 1, 1, 2], [0], [0]>} : vector<4x8x32xbf16>, vector<4x32x8xbf16>, vector<4x8x8xf32> -> vector<4x8x8xf32>
    "tpu.trace_stop"() : () -> ()
    %106 = vector.broadcast %94 : vector<4x1x8xf32> to vector<4x8x8xf32>
    %107 = arith.addf %105, %106 : vector<4x8x8xf32>
    %108 = arith.truncf %101 : vector<4x8x8xf32> to vector<4x8x8xbf16>
    %109 = arith.truncf %104 : vector<4x8x8xf32> to vector<4x8x8xbf16>
    "tpu.trace_start"() <{level = 10 : i32, message = "hqd,hkd->hqk"}> : () -> ()
    %cst_83 = arith.constant dense<0.000000e+00> : vector<4x8x8xf32>
    %110 = tpu.matmul %108, %109, %cst_83 {dimension_numbers = #tpu.dot_dimension_numbers<[2], [2], [1], [1], [0, 0, 0, 1, 1, 1], [0], [0]>} : vector<4x8x8xbf16>, vector<4x8x8xbf16>, vector<4x8x8xf32> -> vector<4x8x8xf32>
    "tpu.trace_stop"() : () -> ()
    %cst_84 = arith.constant 0.353553385 : f32
    %111 = vector.broadcast %cst_84 : f32 to vector<4x8x8xf32>
    %112 = arith.mulf %110, %111 : vector<4x8x8xf32>
    %113 = vector.shape_cast %11 : vector<8x8xf32> to vector<1x8x8xf32>
    %114 = vector.broadcast %113 : vector<1x8x8xf32> to vector<4x8x8xf32>
    %115 = arith.addf %112, %114 : vector<4x8x8xf32>
    %cst_85 = arith.constant dense<0xFF800000> : vector<4x8xf32>
    %116 = vector.multi_reduction <maximumf>, %115, %cst_85 [2] : vector<4x8x8xf32> to vector<4x8xf32>
    %117 = vector.shape_cast %116 : vector<4x8xf32> to vector<4x8x1xf32>
    %118 = vector.broadcast %117 : vector<4x8x1xf32> to vector<4x8x8xf32>
    %119 = arith.subf %115, %118 : vector<4x8x8xf32>
    %120 = math.exp %119 : vector<4x8x8xf32>
    %cst_86 = arith.constant dense<0.000000e+00> : vector<4x8xf32>
    %121 = vector.multi_reduction <add>, %120, %cst_86 [2] : vector<4x8x8xf32> to vector<4x8xf32>
    %122 = vector.shape_cast %121 : vector<4x8xf32> to vector<4x8x1xf32>
    %123 = tpu.reciprocal %122 {approx = true} : vector<4x8x1xf32> -> vector<4x8x1xf32>
    %124 = vector.broadcast %123 : vector<4x8x1xf32> to vector<4x8x8xf32>
    %125 = arith.mulf %120, %124 : vector<4x8x8xf32>
    %126 = arith.truncf %125 : vector<4x8x8xf32> to vector<4x8x8xbf16>
    %127 = arith.truncf %107 : vector<4x8x8xf32> to vector<4x8x8xbf16>
    "tpu.trace_start"() <{level = 10 : i32, message = "hqk,hkd->hqd"}> : () -> ()
    %cst_87 = arith.constant dense<0.000000e+00> : vector<4x8x8xf32>
    %128 = tpu.matmul %126, %127, %cst_87 {dimension_numbers = #tpu.dot_dimension_numbers<[2], [1], [1], [2], [0, 0, 0, 1, 1, 2], [0], [0]>} : vector<4x8x8xbf16>, vector<4x8x8xbf16>, vector<4x8x8xf32> -> vector<4x8x8xf32>
    "tpu.trace_stop"() : () -> ()
    %129 = arith.truncf %128 : vector<4x8x8xf32> to vector<4x8x8xbf16>
    "tpu.trace_start"() <{level = 10 : i32, message = "htd,hdk->htk"}> : () -> ()
    %cst_88 = arith.constant dense<0.000000e+00> : vector<4x8x32xf32>
    %130 = tpu.matmul %129, %96, %cst_88 {dimension_numbers = #tpu.dot_dimension_numbers<[2], [1], [1], [2], [0, 0, 0, 1, 1, 2], [0], [0]>} : vector<4x8x8xbf16>, vector<4x8x32xbf16>, vector<4x8x32xf32> -> vector<4x8x32xf32>
    "tpu.trace_stop"() : () -> ()
    %cst_89 = arith.constant dense<0.000000e+00> : vector<8x32xf32>
    %131 = vector.multi_reduction <add>, %130, %cst_89 [0] : vector<4x8x32xf32> to vector<8x32xf32>
    %132 = vector.broadcast %98 : vector<1x32xf32> to vector<8x32xf32>
    %133 = arith.addf %131, %132 : vector<8x32xf32>
    %134 = tpu.concatenate %77, %133 in 0 : vector<8x32xf32>, vector<8x32xf32> -> vector<16x32xf32>
    %135 = arith.addf %2, %134 : vector<16x32xf32>
    %c0_90 = arith.constant 0 : index
    %c0_91 = arith.constant 0 : index
    %c0_92 = arith.constant 0 : index
    %136 = vector.load %arg25[%c0_90, %c0_91, %c0_92] : memref<2x1x32xf32, #tpu.memory_space<vmem>>, vector<1x1x32xf32>
    %137 = vector.shape_cast %136 : vector<1x1x32xf32> to vector<1x32xf32>
    %c0_93 = arith.constant 0 : index
    %c0_94 = arith.constant 0 : index
    %c0_95 = arith.constant 0 : index
    %138 = vector.load %arg26[%c0_93, %c0_94, %c0_95] : memref<2x1x32xf32, #tpu.memory_space<vmem>>, vector<1x1x32xf32>
    %139 = vector.shape_cast %138 : vector<1x1x32xf32> to vector<1x32xf32>
    %cst_96 = arith.constant dense<0.000000e+00> : vector<16xf32>
    %140 = vector.multi_reduction <add>, %135, %cst_96 [1] : vector<16x32xf32> to vector<16xf32>
    %141 = vector.shape_cast %140 : vector<16xf32> to vector<16x1xf32>
    %cst_97 = arith.constant 3.200000e+01 : f32
    %142 = vector.broadcast %cst_97 : f32 to vector<16x1xf32>
    %143 = arith.divf %141, %142 : vector<16x1xf32>
    %144 = vector.broadcast %143 : vector<16x1xf32> to vector<16x32xf32>
    %145 = arith.subf %135, %144 : vector<16x32xf32>
    %146 = arith.mulf %145, %145 : vector<16x32xf32>
    %cst_98 = arith.constant dense<0.000000e+00> : vector<16xf32>
    %147 = vector.multi_reduction <add>, %146, %cst_98 [1] : vector<16x32xf32> to vector<16xf32>
    %148 = vector.shape_cast %147 : vector<16xf32> to vector<16x1xf32>
    %cst_99 = arith.constant 3.200000e+01 : f32
    %149 = vector.broadcast %cst_99 : f32 to vector<16x1xf32>
    %150 = arith.divf %148, %149 : vector<16x1xf32>
    %cst_100 = arith.constant 9.99999974E-6 : f32
    %151 = vector.broadcast %cst_100 : f32 to vector<16x1xf32>
    %152 = arith.addf %150, %151 : vector<16x1xf32>
    %153 = math.rsqrt %152 : vector<16x1xf32>
    %154 = vector.broadcast %153 : vector<16x1xf32> to vector<16x32xf32>
    %155 = arith.mulf %145, %154 : vector<16x32xf32>
    %156 = vector.broadcast %137 : vector<1x32xf32> to vector<16x32xf32>
    %157 = arith.mulf %155, %156 : vector<16x32xf32>
    %158 = vector.broadcast %139 : vector<1x32xf32> to vector<16x32xf32>
    %159 = arith.addf %157, %158 : vector<16x32xf32>
    %160 = vector.extract_strided_slice %159 {offsets = [0, 0], sizes = [8, 32], strides = [1, 1]} : vector<16x32xf32> to vector<8x32xf32>
    %161 = arith.truncf %160 : vector<8x32xf32> to vector<8x32xbf16>
    %162 = vector.shape_cast %161 : vector<8x32xbf16> to vector<1x8x32xbf16>
    %163 = vector.shape_cast %162 : vector<1x8x32xbf16> to vector<1x8x32xbf16>
    %164 = vector.broadcast %163 : vector<1x8x32xbf16> to vector<4x8x32xbf16>
    %c0_101 = arith.constant 0 : index
    %c0_102 = arith.constant 0 : index
    %c0_103 = arith.constant 0 : index
    %c0_104 = arith.constant 0 : index
    %165 = vector.load %arg13[%c0_101, %c0_102, %c0_103, %c0_104] : memref<2x4x32x8xbf16, #tpu.memory_space<vmem>>, vector<1x4x32x8xbf16>
    %166 = vector.shape_cast %165 : vector<1x4x32x8xbf16> to vector<4x32x8xbf16>
    %c0_105 = arith.constant 0 : index
    %c0_106 = arith.constant 0 : index
    %c0_107 = arith.constant 0 : index
    %c0_108 = arith.constant 0 : index
    %167 = vector.load %arg14[%c0_105, %c0_106, %c0_107, %c0_108] : memref<2x4x1x8xf32, #tpu.memory_space<vmem>>, vector<1x4x1x8xf32>
    %168 = vector.shape_cast %167 : vector<1x4x1x8xf32> to vector<4x1x8xf32>
    %c0_109 = arith.constant 0 : index
    %c0_110 = arith.constant 0 : index
    %c0_111 = arith.constant 0 : index
    %c0_112 = arith.constant 0 : index
    %169 = vector.load %arg15[%c0_109, %c0_110, %c0_111, %c0_112] : memref<2x4x32x8xbf16, #tpu.memory_space<vmem>>, vector<1x4x32x8xbf16>
    %170 = vector.shape_cast %169 : vector<1x4x32x8xbf16> to vector<4x32x8xbf16>
    %c0_113 = arith.constant 0 : index
    %c0_114 = arith.constant 0 : index
    %c0_115 = arith.constant 0 : index
    %c0_116 = arith.constant 0 : index
    %171 = vector.load %arg16[%c0_113, %c0_114, %c0_115, %c0_116] : memref<2x4x1x8xf32, #tpu.memory_space<vmem>>, vector<1x4x1x8xf32>
    %172 = vector.shape_cast %171 : vector<1x4x1x8xf32> to vector<4x1x8xf32>
    %c0_117 = arith.constant 0 : index
    %c0_118 = arith.constant 0 : index
    %c0_119 = arith.constant 0 : index
    %c0_120 = arith.constant 0 : index
    %173 = vector.load %arg17[%c0_117, %c0_118, %c0_119, %c0_120] : memref<2x4x32x8xbf16, #tpu.memory_space<vmem>>, vector<1x4x32x8xbf16>
    %174 = vector.shape_cast %173 : vector<1x4x32x8xbf16> to vector<4x32x8xbf16>
    %c0_121 = arith.constant 0 : index
    %c0_122 = arith.constant 0 : index
    %c0_123 = arith.constant 0 : index
    %c0_124 = arith.constant 0 : index
    %175 = vector.load %arg18[%c0_121, %c0_122, %c0_123, %c0_124] : memref<2x4x1x8xf32, #tpu.memory_space<vmem>>, vector<1x4x1x8xf32>
    %176 = vector.shape_cast %175 : vector<1x4x1x8xf32> to vector<4x1x8xf32>
    %c0_125 = arith.constant 0 : index
    %c0_126 = arith.constant 0 : index
    %c0_127 = arith.constant 0 : index
    %c0_128 = arith.constant 0 : index
    %177 = vector.load %arg19[%c0_125, %c0_126, %c0_127, %c0_128] : memref<2x4x8x32xbf16, #tpu.memory_space<vmem>>, vector<1x4x8x32xbf16>
    %178 = vector.shape_cast %177 : vector<1x4x8x32xbf16> to vector<4x8x32xbf16>
    %c0_129 = arith.constant 0 : index
    %c0_130 = arith.constant 0 : index
    %c0_131 = arith.constant 0 : index
    %179 = vector.load %arg20[%c0_129, %c0_130, %c0_131] : memref<2x1x32xf32, #tpu.memory_space<vmem>>, vector<1x1x32xf32>
    %180 = vector.shape_cast %179 : vector<1x1x32xf32> to vector<1x32xf32>
    "tpu.trace_start"() <{level = 10 : i32, message = "htd,hdk->htk"}> : () -> ()
    %cst_132 = arith.constant dense<0.000000e+00> : vector<4x8x8xf32>
    %181 = tpu.matmul %164, %166, %cst_132 {dimension_numbers = #tpu.dot_dimension_numbers<[2], [1], [1], [2], [0, 0, 0, 1, 1, 2], [0], [0]>} : vector<4x8x32xbf16>, vector<4x32x8xbf16>, vector<4x8x8xf32> -> vector<4x8x8xf32>
    "tpu.trace_stop"() : () -> ()
    %182 = vector.broadcast %168 : vector<4x1x8xf32> to vector<4x8x8xf32>
    %183 = arith.addf %181, %182 : vector<4x8x8xf32>
    "tpu.trace_start"() <{level = 10 : i32, message = "htd,hdk->htk"}> : () -> ()
    %cst_133 = arith.constant dense<0.000000e+00> : vector<4x8x8xf32>
    %184 = tpu.matmul %16, %170, %cst_133 {dimension_numbers = #tpu.dot_dimension_numbers<[2], [1], [1], [2], [0, 0, 0, 1, 1, 2], [0], [0]>} : vector<4x8x32xbf16>, vector<4x32x8xbf16>, vector<4x8x8xf32> -> vector<4x8x8xf32>
    "tpu.trace_stop"() : () -> ()
    %185 = vector.broadcast %172 : vector<4x1x8xf32> to vector<4x8x8xf32>
    %186 = arith.addf %184, %185 : vector<4x8x8xf32>
    "tpu.trace_start"() <{level = 10 : i32, message = "htd,hdk->htk"}> : () -> ()
    %cst_134 = arith.constant dense<0.000000e+00> : vector<4x8x8xf32>
    %187 = tpu.matmul %16, %174, %cst_134 {dimension_numbers = #tpu.dot_dimension_numbers<[2], [1], [1], [2], [0, 0, 0, 1, 1, 2], [0], [0]>} : vector<4x8x32xbf16>, vector<4x32x8xbf16>, vector<4x8x8xf32> -> vector<4x8x8xf32>
    "tpu.trace_stop"() : () -> ()
    %188 = vector.broadcast %176 : vector<4x1x8xf32> to vector<4x8x8xf32>
    %189 = arith.addf %187, %188 : vector<4x8x8xf32>
    %190 = arith.truncf %183 : vector<4x8x8xf32> to vector<4x8x8xbf16>
    %191 = arith.truncf %186 : vector<4x8x8xf32> to vector<4x8x8xbf16>
    "tpu.trace_start"() <{level = 10 : i32, message = "hqd,hkd->hqk"}> : () -> ()
    %cst_135 = arith.constant dense<0.000000e+00> : vector<4x8x8xf32>
    %192 = tpu.matmul %190, %191, %cst_135 {dimension_numbers = #tpu.dot_dimension_numbers<[2], [2], [1], [1], [0, 0, 0, 1, 1, 1], [0], [0]>} : vector<4x8x8xbf16>, vector<4x8x8xbf16>, vector<4x8x8xf32> -> vector<4x8x8xf32>
    "tpu.trace_stop"() : () -> ()
    %cst_136 = arith.constant 0.353553385 : f32
    %193 = vector.broadcast %cst_136 : f32 to vector<4x8x8xf32>
    %194 = arith.mulf %192, %193 : vector<4x8x8xf32>
    %cst_137 = arith.constant dense<0xFF800000> : vector<4x8xf32>
    %195 = vector.multi_reduction <maximumf>, %194, %cst_137 [2] : vector<4x8x8xf32> to vector<4x8xf32>
    %196 = vector.shape_cast %195 : vector<4x8xf32> to vector<4x8x1xf32>
    %197 = vector.broadcast %196 : vector<4x8x1xf32> to vector<4x8x8xf32>
    %198 = arith.subf %194, %197 : vector<4x8x8xf32>
    %199 = math.exp %198 : vector<4x8x8xf32>
    %cst_138 = arith.constant dense<0.000000e+00> : vector<4x8xf32>
    %200 = vector.multi_reduction <add>, %199, %cst_138 [2] : vector<4x8x8xf32> to vector<4x8xf32>
    %201 = vector.shape_cast %200 : vector<4x8xf32> to vector<4x8x1xf32>
    %202 = tpu.reciprocal %201 {approx = true} : vector<4x8x1xf32> -> vector<4x8x1xf32>
    %203 = vector.broadcast %202 : vector<4x8x1xf32> to vector<4x8x8xf32>
    %204 = arith.mulf %199, %203 : vector<4x8x8xf32>
    %205 = arith.truncf %204 : vector<4x8x8xf32> to vector<4x8x8xbf16>
    %206 = arith.truncf %189 : vector<4x8x8xf32> to vector<4x8x8xbf16>
    "tpu.trace_start"() <{level = 10 : i32, message = "hqk,hkd->hqd"}> : () -> ()
    %cst_139 = arith.constant dense<0.000000e+00> : vector<4x8x8xf32>
    %207 = tpu.matmul %205, %206, %cst_139 {dimension_numbers = #tpu.dot_dimension_numbers<[2], [1], [1], [2], [0, 0, 0, 1, 1, 2], [0], [0]>} : vector<4x8x8xbf16>, vector<4x8x8xbf16>, vector<4x8x8xf32> -> vector<4x8x8xf32>
    "tpu.trace_stop"() : () -> ()
    %208 = arith.truncf %207 : vector<4x8x8xf32> to vector<4x8x8xbf16>
    "tpu.trace_start"() <{level = 10 : i32, message = "htd,hdk->htk"}> : () -> ()
    %cst_140 = arith.constant dense<0.000000e+00> : vector<4x8x32xf32>
    %209 = tpu.matmul %208, %178, %cst_140 {dimension_numbers = #tpu.dot_dimension_numbers<[2], [1], [1], [2], [0, 0, 0, 1, 1, 2], [0], [0]>} : vector<4x8x8xbf16>, vector<4x8x32xbf16>, vector<4x8x32xf32> -> vector<4x8x32xf32>
    "tpu.trace_stop"() : () -> ()
    %cst_141 = arith.constant dense<0.000000e+00> : vector<8x32xf32>
    %210 = vector.multi_reduction <add>, %209, %cst_141 [0] : vector<4x8x32xf32> to vector<8x32xf32>
    %211 = vector.broadcast %180 : vector<1x32xf32> to vector<8x32xf32>
    %212 = arith.addf %210, %211 : vector<8x32xf32>
    %213 = vector.extract_strided_slice %159 {offsets = [8, 0], sizes = [8, 32], strides = [1, 1]} : vector<16x32xf32> to vector<8x32xf32>
    %214 = arith.truncf %213 : vector<8x32xf32> to vector<8x32xbf16>
    %215 = vector.shape_cast %214 : vector<8x32xbf16> to vector<1x8x32xbf16>
    %216 = vector.shape_cast %215 : vector<1x8x32xbf16> to vector<1x8x32xbf16>
    %217 = vector.broadcast %216 : vector<1x8x32xbf16> to vector<4x8x32xbf16>
    %c0_142 = arith.constant 0 : index
    %c0_143 = arith.constant 0 : index
    %c0_144 = arith.constant 0 : index
    %c0_145 = arith.constant 0 : index
    %218 = vector.load %arg13[%c0_142, %c0_143, %c0_144, %c0_145] : memref<2x4x32x8xbf16, #tpu.memory_space<vmem>>, vector<1x4x32x8xbf16>
    %219 = vector.shape_cast %218 : vector<1x4x32x8xbf16> to vector<4x32x8xbf16>
    %c0_146 = arith.constant 0 : index
    %c0_147 = arith.constant 0 : index
    %c0_148 = arith.constant 0 : index
    %c0_149 = arith.constant 0 : index
    %220 = vector.load %arg14[%c0_146, %c0_147, %c0_148, %c0_149] : memref<2x4x1x8xf32, #tpu.memory_space<vmem>>, vector<1x4x1x8xf32>
    %221 = vector.shape_cast %220 : vector<1x4x1x8xf32> to vector<4x1x8xf32>
    %c0_150 = arith.constant 0 : index
    %c0_151 = arith.constant 0 : index
    %c0_152 = arith.constant 0 : index
    %c0_153 = arith.constant 0 : index
    %222 = vector.load %arg15[%c0_150, %c0_151, %c0_152, %c0_153] : memref<2x4x32x8xbf16, #tpu.memory_space<vmem>>, vector<1x4x32x8xbf16>
    %223 = vector.shape_cast %222 : vector<1x4x32x8xbf16> to vector<4x32x8xbf16>
    %c0_154 = arith.constant 0 : index
    %c0_155 = arith.constant 0 : index
    %c0_156 = arith.constant 0 : index
    %c0_157 = arith.constant 0 : index
    %224 = vector.load %arg16[%c0_154, %c0_155, %c0_156, %c0_157] : memref<2x4x1x8xf32, #tpu.memory_space<vmem>>, vector<1x4x1x8xf32>
    %225 = vector.shape_cast %224 : vector<1x4x1x8xf32> to vector<4x1x8xf32>
    %c0_158 = arith.constant 0 : index
    %c0_159 = arith.constant 0 : index
    %c0_160 = arith.constant 0 : index
    %c0_161 = arith.constant 0 : index
    %226 = vector.load %arg17[%c0_158, %c0_159, %c0_160, %c0_161] : memref<2x4x32x8xbf16, #tpu.memory_space<vmem>>, vector<1x4x32x8xbf16>
    %227 = vector.shape_cast %226 : vector<1x4x32x8xbf16> to vector<4x32x8xbf16>
    %c0_162 = arith.constant 0 : index
    %c0_163 = arith.constant 0 : index
    %c0_164 = arith.constant 0 : index
    %c0_165 = arith.constant 0 : index
    %228 = vector.load %arg18[%c0_162, %c0_163, %c0_164, %c0_165] : memref<2x4x1x8xf32, #tpu.memory_space<vmem>>, vector<1x4x1x8xf32>
    %229 = vector.shape_cast %228 : vector<1x4x1x8xf32> to vector<4x1x8xf32>
    %c0_166 = arith.constant 0 : index
    %c0_167 = arith.constant 0 : index
    %c0_168 = arith.constant 0 : index
    %c0_169 = arith.constant 0 : index
    %230 = vector.load %arg19[%c0_166, %c0_167, %c0_168, %c0_169] : memref<2x4x8x32xbf16, #tpu.memory_space<vmem>>, vector<1x4x8x32xbf16>
    %231 = vector.shape_cast %230 : vector<1x4x8x32xbf16> to vector<4x8x32xbf16>
    %c0_170 = arith.constant 0 : index
    %c0_171 = arith.constant 0 : index
    %c0_172 = arith.constant 0 : index
    %232 = vector.load %arg20[%c0_170, %c0_171, %c0_172] : memref<2x1x32xf32, #tpu.memory_space<vmem>>, vector<1x1x32xf32>
    %233 = vector.shape_cast %232 : vector<1x1x32xf32> to vector<1x32xf32>
    "tpu.trace_start"() <{level = 10 : i32, message = "htd,hdk->htk"}> : () -> ()
    %cst_173 = arith.constant dense<0.000000e+00> : vector<4x8x8xf32>
    %234 = tpu.matmul %217, %219, %cst_173 {dimension_numbers = #tpu.dot_dimension_numbers<[2], [1], [1], [2], [0, 0, 0, 1, 1, 2], [0], [0]>} : vector<4x8x32xbf16>, vector<4x32x8xbf16>, vector<4x8x8xf32> -> vector<4x8x8xf32>
    "tpu.trace_stop"() : () -> ()
    %235 = vector.broadcast %221 : vector<4x1x8xf32> to vector<4x8x8xf32>
    %236 = arith.addf %234, %235 : vector<4x8x8xf32>
    "tpu.trace_start"() <{level = 10 : i32, message = "htd,hdk->htk"}> : () -> ()
    %cst_174 = arith.constant dense<0.000000e+00> : vector<4x8x8xf32>
    %237 = tpu.matmul %21, %223, %cst_174 {dimension_numbers = #tpu.dot_dimension_numbers<[2], [1], [1], [2], [0, 0, 0, 1, 1, 2], [0], [0]>} : vector<4x8x32xbf16>, vector<4x32x8xbf16>, vector<4x8x8xf32> -> vector<4x8x8xf32>
    "tpu.trace_stop"() : () -> ()
    %238 = vector.broadcast %225 : vector<4x1x8xf32> to vector<4x8x8xf32>
    %239 = arith.addf %237, %238 : vector<4x8x8xf32>
    "tpu.trace_start"() <{level = 10 : i32, message = "htd,hdk->htk"}> : () -> ()
    %cst_175 = arith.constant dense<0.000000e+00> : vector<4x8x8xf32>
    %240 = tpu.matmul %21, %227, %cst_175 {dimension_numbers = #tpu.dot_dimension_numbers<[2], [1], [1], [2], [0, 0, 0, 1, 1, 2], [0], [0]>} : vector<4x8x32xbf16>, vector<4x32x8xbf16>, vector<4x8x8xf32> -> vector<4x8x8xf32>
    "tpu.trace_stop"() : () -> ()
    %241 = vector.broadcast %229 : vector<4x1x8xf32> to vector<4x8x8xf32>
    %242 = arith.addf %240, %241 : vector<4x8x8xf32>
    %243 = arith.truncf %236 : vector<4x8x8xf32> to vector<4x8x8xbf16>
    %244 = arith.truncf %239 : vector<4x8x8xf32> to vector<4x8x8xbf16>
    "tpu.trace_start"() <{level = 10 : i32, message = "hqd,hkd->hqk"}> : () -> ()
    %cst_176 = arith.constant dense<0.000000e+00> : vector<4x8x8xf32>
    %245 = tpu.matmul %243, %244, %cst_176 {dimension_numbers = #tpu.dot_dimension_numbers<[2], [2], [1], [1], [0, 0, 0, 1, 1, 1], [0], [0]>} : vector<4x8x8xbf16>, vector<4x8x8xbf16>, vector<4x8x8xf32> -> vector<4x8x8xf32>
    "tpu.trace_stop"() : () -> ()
    %cst_177 = arith.constant 0.353553385 : f32
    %246 = vector.broadcast %cst_177 : f32 to vector<4x8x8xf32>
    %247 = arith.mulf %245, %246 : vector<4x8x8xf32>
    %cst_178 = arith.constant dense<0xFF800000> : vector<4x8xf32>
    %248 = vector.multi_reduction <maximumf>, %247, %cst_178 [2] : vector<4x8x8xf32> to vector<4x8xf32>
    %249 = vector.shape_cast %248 : vector<4x8xf32> to vector<4x8x1xf32>
    %250 = vector.broadcast %249 : vector<4x8x1xf32> to vector<4x8x8xf32>
    %251 = arith.subf %247, %250 : vector<4x8x8xf32>
    %252 = math.exp %251 : vector<4x8x8xf32>
    %cst_179 = arith.constant dense<0.000000e+00> : vector<4x8xf32>
    %253 = vector.multi_reduction <add>, %252, %cst_179 [2] : vector<4x8x8xf32> to vector<4x8xf32>
    %254 = vector.shape_cast %253 : vector<4x8xf32> to vector<4x8x1xf32>
    %255 = tpu.reciprocal %254 {approx = true} : vector<4x8x1xf32> -> vector<4x8x1xf32>
    %256 = vector.broadcast %255 : vector<4x8x1xf32> to vector<4x8x8xf32>
    %257 = arith.mulf %252, %256 : vector<4x8x8xf32>
    %258 = arith.truncf %257 : vector<4x8x8xf32> to vector<4x8x8xbf16>
    %259 = arith.truncf %242 : vector<4x8x8xf32> to vector<4x8x8xbf16>
    "tpu.trace_start"() <{level = 10 : i32, message = "hqk,hkd->hqd"}> : () -> ()
    %cst_180 = arith.constant dense<0.000000e+00> : vector<4x8x8xf32>
    %260 = tpu.matmul %258, %259, %cst_180 {dimension_numbers = #tpu.dot_dimension_numbers<[2], [1], [1], [2], [0, 0, 0, 1, 1, 2], [0], [0]>} : vector<4x8x8xbf16>, vector<4x8x8xbf16>, vector<4x8x8xf32> -> vector<4x8x8xf32>
    "tpu.trace_stop"() : () -> ()
    %261 = arith.truncf %260 : vector<4x8x8xf32> to vector<4x8x8xbf16>
    "tpu.trace_start"() <{level = 10 : i32, message = "htd,hdk->htk"}> : () -> ()
    %cst_181 = arith.constant dense<0.000000e+00> : vector<4x8x32xf32>
    %262 = tpu.matmul %261, %231, %cst_181 {dimension_numbers = #tpu.dot_dimension_numbers<[2], [1], [1], [2], [0, 0, 0, 1, 1, 2], [0], [0]>} : vector<4x8x8xbf16>, vector<4x8x32xbf16>, vector<4x8x32xf32> -> vector<4x8x32xf32>
    "tpu.trace_stop"() : () -> ()
    %cst_182 = arith.constant dense<0.000000e+00> : vector<8x32xf32>
    %263 = vector.multi_reduction <add>, %262, %cst_182 [0] : vector<4x8x32xf32> to vector<8x32xf32>
    %264 = vector.broadcast %233 : vector<1x32xf32> to vector<8x32xf32>
    %265 = arith.addf %263, %264 : vector<8x32xf32>
    %266 = tpu.concatenate %212, %265 in 0 : vector<8x32xf32>, vector<8x32xf32> -> vector<16x32xf32>
    %267 = arith.addf %159, %266 : vector<16x32xf32>
    %c0_183 = arith.constant 0 : index
    %c0_184 = arith.constant 0 : index
    %c0_185 = arith.constant 0 : index
    %268 = vector.load %arg27[%c0_183, %c0_184, %c0_185] : memref<2x1x32xf32, #tpu.memory_space<vmem>>, vector<1x1x32xf32>
    %269 = vector.shape_cast %268 : vector<1x1x32xf32> to vector<1x32xf32>
    %c0_186 = arith.constant 0 : index
    %c0_187 = arith.constant 0 : index
    %c0_188 = arith.constant 0 : index
    %270 = vector.load %arg28[%c0_186, %c0_187, %c0_188] : memref<2x1x32xf32, #tpu.memory_space<vmem>>, vector<1x1x32xf32>
    %271 = vector.shape_cast %270 : vector<1x1x32xf32> to vector<1x32xf32>
    %cst_189 = arith.constant dense<0.000000e+00> : vector<16xf32>
    %272 = vector.multi_reduction <add>, %267, %cst_189 [1] : vector<16x32xf32> to vector<16xf32>
    %273 = vector.shape_cast %272 : vector<16xf32> to vector<16x1xf32>
    %cst_190 = arith.constant 3.200000e+01 : f32
    %274 = vector.broadcast %cst_190 : f32 to vector<16x1xf32>
    %275 = arith.divf %273, %274 : vector<16x1xf32>
    %276 = vector.broadcast %275 : vector<16x1xf32> to vector<16x32xf32>
    %277 = arith.subf %267, %276 : vector<16x32xf32>
    %278 = arith.mulf %277, %277 : vector<16x32xf32>
    %cst_191 = arith.constant dense<0.000000e+00> : vector<16xf32>
    %279 = vector.multi_reduction <add>, %278, %cst_191 [1] : vector<16x32xf32> to vector<16xf32>
    %280 = vector.shape_cast %279 : vector<16xf32> to vector<16x1xf32>
    %cst_192 = arith.constant 3.200000e+01 : f32
    %281 = vector.broadcast %cst_192 : f32 to vector<16x1xf32>
    %282 = arith.divf %280, %281 : vector<16x1xf32>
    %cst_193 = arith.constant 9.99999974E-6 : f32
    %283 = vector.broadcast %cst_193 : f32 to vector<16x1xf32>
    %284 = arith.addf %282, %283 : vector<16x1xf32>
    %285 = math.rsqrt %284 : vector<16x1xf32>
    %286 = vector.broadcast %285 : vector<16x1xf32> to vector<16x32xf32>
    %287 = arith.mulf %277, %286 : vector<16x32xf32>
    %288 = vector.broadcast %269 : vector<1x32xf32> to vector<16x32xf32>
    %289 = arith.mulf %287, %288 : vector<16x32xf32>
    %290 = vector.broadcast %271 : vector<1x32xf32> to vector<16x32xf32>
    %291 = arith.addf %289, %290 : vector<16x32xf32>
    %c0_194 = arith.constant 0 : index
    %c0_195 = arith.constant 0 : index
    %c0_196 = arith.constant 0 : index
    %292 = vector.load %arg21[%c0_194, %c0_195, %c0_196] : memref<2x32x64xbf16, #tpu.memory_space<vmem>>, vector<1x32x64xbf16>
    %293 = vector.shape_cast %292 : vector<1x32x64xbf16> to vector<32x64xbf16>
    %c0_197 = arith.constant 0 : index
    %c0_198 = arith.constant 0 : index
    %c0_199 = arith.constant 0 : index
    %294 = vector.load %arg22[%c0_197, %c0_198, %c0_199] : memref<2x1x64xf32, #tpu.memory_space<vmem>>, vector<1x1x64xf32>
    %295 = vector.shape_cast %294 : vector<1x1x64xf32> to vector<1x64xf32>
    %296 = arith.truncf %291 : vector<16x32xf32> to vector<16x32xbf16>
    %cst_200 = arith.constant dense<0.000000e+00> : vector<16x64xf32>
    %297 = tpu.matmul %296, %293, %cst_200 {dimension_numbers = #tpu.dot_dimension_numbers<[1], [0], [0], [1], [0, 0, 1, 1], [], []>} : vector<16x32xbf16>, vector<32x64xbf16>, vector<16x64xf32> -> vector<16x64xf32>
    %298 = vector.broadcast %295 : vector<1x64xf32> to vector<16x64xf32>
    %299 = arith.addf %297, %298 : vector<16x64xf32>
    %cst_201 = arith.constant 0.000000e+00 : f32
    %300 = vector.broadcast %cst_201 : f32 to vector<16x64xf32>
    %301 = arith.maximumf %299, %300 : vector<16x64xf32>
    %c0_202 = arith.constant 0 : index
    %c0_203 = arith.constant 0 : index
    %c0_204 = arith.constant 0 : index
    %302 = vector.load %arg23[%c0_202, %c0_203, %c0_204] : memref<2x64x32xbf16, #tpu.memory_space<vmem>>, vector<1x64x32xbf16>
    %303 = vector.shape_cast %302 : vector<1x64x32xbf16> to vector<64x32xbf16>
    %c0_205 = arith.constant 0 : index
    %c0_206 = arith.constant 0 : index
    %c0_207 = arith.constant 0 : index
    %304 = vector.load %arg24[%c0_205, %c0_206, %c0_207] : memref<2x1x32xf32, #tpu.memory_space<vmem>>, vector<1x1x32xf32>
    %305 = vector.shape_cast %304 : vector<1x1x32xf32> to vector<1x32xf32>
    %306 = arith.truncf %301 : vector<16x64xf32> to vector<16x64xbf16>
    %cst_208 = arith.constant dense<0.000000e+00> : vector<16x32xf32>
    %307 = tpu.matmul %306, %303, %cst_208 {dimension_numbers = #tpu.dot_dimension_numbers<[1], [0], [0], [1], [0, 0, 1, 1], [], []>} : vector<16x64xbf16>, vector<64x32xbf16>, vector<16x32xf32> -> vector<16x32xf32>
    %308 = vector.broadcast %305 : vector<1x32xf32> to vector<16x32xf32>
    %309 = arith.addf %307, %308 : vector<16x32xf32>
    %310 = arith.addf %291, %309 : vector<16x32xf32>
    %c0_209 = arith.constant 0 : index
    %c0_210 = arith.constant 0 : index
    %c0_211 = arith.constant 0 : index
    %311 = vector.load %arg29[%c0_209, %c0_210, %c0_211] : memref<2x1x32xf32, #tpu.memory_space<vmem>>, vector<1x1x32xf32>
    %312 = vector.shape_cast %311 : vector<1x1x32xf32> to vector<1x32xf32>
    %c0_212 = arith.constant 0 : index
    %c0_213 = arith.constant 0 : index
    %c0_214 = arith.constant 0 : index
    %313 = vector.load %arg30[%c0_212, %c0_213, %c0_214] : memref<2x1x32xf32, #tpu.memory_space<vmem>>, vector<1x1x32xf32>
    %314 = vector.shape_cast %313 : vector<1x1x32xf32> to vector<1x32xf32>
    %cst_215 = arith.constant dense<0.000000e+00> : vector<16xf32>
    %315 = vector.multi_reduction <add>, %310, %cst_215 [1] : vector<16x32xf32> to vector<16xf32>
    %316 = vector.shape_cast %315 : vector<16xf32> to vector<16x1xf32>
    %cst_216 = arith.constant 3.200000e+01 : f32
    %317 = vector.broadcast %cst_216 : f32 to vector<16x1xf32>
    %318 = arith.divf %316, %317 : vector<16x1xf32>
    %319 = vector.broadcast %318 : vector<16x1xf32> to vector<16x32xf32>
    %320 = arith.subf %310, %319 : vector<16x32xf32>
    %321 = arith.mulf %320, %320 : vector<16x32xf32>
    %cst_217 = arith.constant dense<0.000000e+00> : vector<16xf32>
    %322 = vector.multi_reduction <add>, %321, %cst_217 [1] : vector<16x32xf32> to vector<16xf32>
    %323 = vector.shape_cast %322 : vector<16xf32> to vector<16x1xf32>
    %cst_218 = arith.constant 3.200000e+01 : f32
    %324 = vector.broadcast %cst_218 : f32 to vector<16x1xf32>
    %325 = arith.divf %323, %324 : vector<16x1xf32>
    %cst_219 = arith.constant 9.99999974E-6 : f32
    %326 = vector.broadcast %cst_219 : f32 to vector<16x1xf32>
    %327 = arith.addf %325, %326 : vector<16x1xf32>
    %328 = math.rsqrt %327 : vector<16x1xf32>
    %329 = vector.broadcast %328 : vector<16x1xf32> to vector<16x32xf32>
    %330 = arith.mulf %320, %329 : vector<16x32xf32>
    %331 = vector.broadcast %312 : vector<1x32xf32> to vector<16x32xf32>
    %332 = arith.mulf %330, %331 : vector<16x32xf32>
    %333 = vector.broadcast %314 : vector<1x32xf32> to vector<16x32xf32>
    %334 = arith.addf %332, %333 : vector<16x32xf32>
    %335 = vector.extract_strided_slice %334 {offsets = [0, 0], sizes = [8, 32], strides = [1, 1]} : vector<16x32xf32> to vector<8x32xf32>
    %336 = arith.truncf %335 : vector<8x32xf32> to vector<8x32xbf16>
    %337 = vector.shape_cast %336 : vector<8x32xbf16> to vector<1x8x32xbf16>
    %338 = vector.shape_cast %337 : vector<1x8x32xbf16> to vector<1x8x32xbf16>
    %339 = vector.broadcast %338 : vector<1x8x32xbf16> to vector<4x8x32xbf16>
    %c1 = arith.constant 1 : index
    %c0_220 = arith.constant 0 : index
    %c0_221 = arith.constant 0 : index
    %c0_222 = arith.constant 0 : index
    %340 = vector.load %arg5[%c1, %c0_220, %c0_221, %c0_222] : memref<2x4x32x8xbf16, #tpu.memory_space<vmem>>, vector<1x4x32x8xbf16>
    %341 = vector.shape_cast %340 : vector<1x4x32x8xbf16> to vector<4x32x8xbf16>
    %c1_223 = arith.constant 1 : index
    %c0_224 = arith.constant 0 : index
    %c0_225 = arith.constant 0 : index
    %c0_226 = arith.constant 0 : index
    %342 = vector.load %arg6[%c1_223, %c0_224, %c0_225, %c0_226] : memref<2x4x1x8xf32, #tpu.memory_space<vmem>>, vector<1x4x1x8xf32>
    %343 = vector.shape_cast %342 : vector<1x4x1x8xf32> to vector<4x1x8xf32>
    %c1_227 = arith.constant 1 : index
    %c0_228 = arith.constant 0 : index
    %c0_229 = arith.constant 0 : index
    %c0_230 = arith.constant 0 : index
    %344 = vector.load %arg7[%c1_227, %c0_228, %c0_229, %c0_230] : memref<2x4x32x8xbf16, #tpu.memory_space<vmem>>, vector<1x4x32x8xbf16>
    %345 = vector.shape_cast %344 : vector<1x4x32x8xbf16> to vector<4x32x8xbf16>
    %c1_231 = arith.constant 1 : index
    %c0_232 = arith.constant 0 : index
    %c0_233 = arith.constant 0 : index
    %c0_234 = arith.constant 0 : index
    %346 = vector.load %arg8[%c1_231, %c0_232, %c0_233, %c0_234] : memref<2x4x1x8xf32, #tpu.memory_space<vmem>>, vector<1x4x1x8xf32>
    %347 = vector.shape_cast %346 : vector<1x4x1x8xf32> to vector<4x1x8xf32>
    %c1_235 = arith.constant 1 : index
    %c0_236 = arith.constant 0 : index
    %c0_237 = arith.constant 0 : index
    %c0_238 = arith.constant 0 : index
    %348 = vector.load %arg9[%c1_235, %c0_236, %c0_237, %c0_238] : memref<2x4x32x8xbf16, #tpu.memory_space<vmem>>, vector<1x4x32x8xbf16>
    %349 = vector.shape_cast %348 : vector<1x4x32x8xbf16> to vector<4x32x8xbf16>
    %c1_239 = arith.constant 1 : index
    %c0_240 = arith.constant 0 : index
    %c0_241 = arith.constant 0 : index
    %c0_242 = arith.constant 0 : index
    %350 = vector.load %arg10[%c1_239, %c0_240, %c0_241, %c0_242] : memref<2x4x1x8xf32, #tpu.memory_space<vmem>>, vector<1x4x1x8xf32>
    %351 = vector.shape_cast %350 : vector<1x4x1x8xf32> to vector<4x1x8xf32>
    %c1_243 = arith.constant 1 : index
    %c0_244 = arith.constant 0 : index
    %c0_245 = arith.constant 0 : index
    %c0_246 = arith.constant 0 : index
    %352 = vector.load %arg11[%c1_243, %c0_244, %c0_245, %c0_246] : memref<2x4x8x32xbf16, #tpu.memory_space<vmem>>, vector<1x4x8x32xbf16>
    %353 = vector.shape_cast %352 : vector<1x4x8x32xbf16> to vector<4x8x32xbf16>
    %c1_247 = arith.constant 1 : index
    %c0_248 = arith.constant 0 : index
    %c0_249 = arith.constant 0 : index
    %354 = vector.load %arg12[%c1_247, %c0_248, %c0_249] : memref<2x1x32xf32, #tpu.memory_space<vmem>>, vector<1x1x32xf32>
    %355 = vector.shape_cast %354 : vector<1x1x32xf32> to vector<1x32xf32>
    "tpu.trace_start"() <{level = 10 : i32, message = "htd,hdk->htk"}> : () -> ()
    %cst_250 = arith.constant dense<0.000000e+00> : vector<4x8x8xf32>
    %356 = tpu.matmul %339, %341, %cst_250 {dimension_numbers = #tpu.dot_dimension_numbers<[2], [1], [1], [2], [0, 0, 0, 1, 1, 2], [0], [0]>} : vector<4x8x32xbf16>, vector<4x32x8xbf16>, vector<4x8x8xf32> -> vector<4x8x8xf32>
    "tpu.trace_stop"() : () -> ()
    %357 = vector.broadcast %343 : vector<4x1x8xf32> to vector<4x8x8xf32>
    %358 = arith.addf %356, %357 : vector<4x8x8xf32>
    "tpu.trace_start"() <{level = 10 : i32, message = "htd,hdk->htk"}> : () -> ()
    %cst_251 = arith.constant dense<0.000000e+00> : vector<4x8x8xf32>
    %359 = tpu.matmul %339, %345, %cst_251 {dimension_numbers = #tpu.dot_dimension_numbers<[2], [1], [1], [2], [0, 0, 0, 1, 1, 2], [0], [0]>} : vector<4x8x32xbf16>, vector<4x32x8xbf16>, vector<4x8x8xf32> -> vector<4x8x8xf32>
    "tpu.trace_stop"() : () -> ()
    %360 = vector.broadcast %347 : vector<4x1x8xf32> to vector<4x8x8xf32>
    %361 = arith.addf %359, %360 : vector<4x8x8xf32>
    "tpu.trace_start"() <{level = 10 : i32, message = "htd,hdk->htk"}> : () -> ()
    %cst_252 = arith.constant dense<0.000000e+00> : vector<4x8x8xf32>
    %362 = tpu.matmul %339, %349, %cst_252 {dimension_numbers = #tpu.dot_dimension_numbers<[2], [1], [1], [2], [0, 0, 0, 1, 1, 2], [0], [0]>} : vector<4x8x32xbf16>, vector<4x32x8xbf16>, vector<4x8x8xf32> -> vector<4x8x8xf32>
    "tpu.trace_stop"() : () -> ()
    %363 = vector.broadcast %351 : vector<4x1x8xf32> to vector<4x8x8xf32>
    %364 = arith.addf %362, %363 : vector<4x8x8xf32>
    %365 = arith.truncf %358 : vector<4x8x8xf32> to vector<4x8x8xbf16>
    %366 = arith.truncf %361 : vector<4x8x8xf32> to vector<4x8x8xbf16>
    "tpu.trace_start"() <{level = 10 : i32, message = "hqd,hkd->hqk"}> : () -> ()
    %cst_253 = arith.constant dense<0.000000e+00> : vector<4x8x8xf32>
    %367 = tpu.matmul %365, %366, %cst_253 {dimension_numbers = #tpu.dot_dimension_numbers<[2], [2], [1], [1], [0, 0, 0, 1, 1, 1], [0], [0]>} : vector<4x8x8xbf16>, vector<4x8x8xbf16>, vector<4x8x8xf32> -> vector<4x8x8xf32>
    "tpu.trace_stop"() : () -> ()
    %cst_254 = arith.constant 0.353553385 : f32
    %368 = vector.broadcast %cst_254 : f32 to vector<4x8x8xf32>
    %369 = arith.mulf %367, %368 : vector<4x8x8xf32>
    %370 = vector.shape_cast %8 : vector<8x8xf32> to vector<1x8x8xf32>
    %371 = vector.broadcast %370 : vector<1x8x8xf32> to vector<4x8x8xf32>
    %372 = arith.addf %369, %371 : vector<4x8x8xf32>
    %cst_255 = arith.constant dense<0xFF800000> : vector<4x8xf32>
    %373 = vector.multi_reduction <maximumf>, %372, %cst_255 [2] : vector<4x8x8xf32> to vector<4x8xf32>
    %374 = vector.shape_cast %373 : vector<4x8xf32> to vector<4x8x1xf32>
    %375 = vector.broadcast %374 : vector<4x8x1xf32> to vector<4x8x8xf32>
    %376 = arith.subf %372, %375 : vector<4x8x8xf32>
    %377 = math.exp %376 : vector<4x8x8xf32>
    %cst_256 = arith.constant dense<0.000000e+00> : vector<4x8xf32>
    %378 = vector.multi_reduction <add>, %377, %cst_256 [2] : vector<4x8x8xf32> to vector<4x8xf32>
    %379 = vector.shape_cast %378 : vector<4x8xf32> to vector<4x8x1xf32>
    %380 = tpu.reciprocal %379 {approx = true} : vector<4x8x1xf32> -> vector<4x8x1xf32>
    %381 = vector.broadcast %380 : vector<4x8x1xf32> to vector<4x8x8xf32>
    %382 = arith.mulf %377, %381 : vector<4x8x8xf32>
    %383 = arith.truncf %382 : vector<4x8x8xf32> to vector<4x8x8xbf16>
    %384 = arith.truncf %364 : vector<4x8x8xf32> to vector<4x8x8xbf16>
    "tpu.trace_start"() <{level = 10 : i32, message = "hqk,hkd->hqd"}> : () -> ()
    %cst_257 = arith.constant dense<0.000000e+00> : vector<4x8x8xf32>
    %385 = tpu.matmul %383, %384, %cst_257 {dimension_numbers = #tpu.dot_dimension_numbers<[2], [1], [1], [2], [0, 0, 0, 1, 1, 2], [0], [0]>} : vector<4x8x8xbf16>, vector<4x8x8xbf16>, vector<4x8x8xf32> -> vector<4x8x8xf32>
    "tpu.trace_stop"() : () -> ()
    %386 = arith.truncf %385 : vector<4x8x8xf32> to vector<4x8x8xbf16>
    "tpu.trace_start"() <{level = 10 : i32, message = "htd,hdk->htk"}> : () -> ()
    %cst_258 = arith.constant dense<0.000000e+00> : vector<4x8x32xf32>
    %387 = tpu.matmul %386, %353, %cst_258 {dimension_numbers = #tpu.dot_dimension_numbers<[2], [1], [1], [2], [0, 0, 0, 1, 1, 2], [0], [0]>} : vector<4x8x8xbf16>, vector<4x8x32xbf16>, vector<4x8x32xf32> -> vector<4x8x32xf32>
    "tpu.trace_stop"() : () -> ()
    %cst_259 = arith.constant dense<0.000000e+00> : vector<8x32xf32>
    %388 = vector.multi_reduction <add>, %387, %cst_259 [0] : vector<4x8x32xf32> to vector<8x32xf32>
    %389 = vector.broadcast %355 : vector<1x32xf32> to vector<8x32xf32>
    %390 = arith.addf %388, %389 : vector<8x32xf32>
    %391 = vector.extract_strided_slice %334 {offsets = [8, 0], sizes = [8, 32], strides = [1, 1]} : vector<16x32xf32> to vector<8x32xf32>
    %392 = arith.truncf %391 : vector<8x32xf32> to vector<8x32xbf16>
    %393 = vector.shape_cast %392 : vector<8x32xbf16> to vector<1x8x32xbf16>
    %394 = vector.shape_cast %393 : vector<1x8x32xbf16> to vector<1x8x32xbf16>
    %395 = vector.broadcast %394 : vector<1x8x32xbf16> to vector<4x8x32xbf16>
    %c1_260 = arith.constant 1 : index
    %c0_261 = arith.constant 0 : index
    %c0_262 = arith.constant 0 : index
    %c0_263 = arith.constant 0 : index
    %396 = vector.load %arg5[%c1_260, %c0_261, %c0_262, %c0_263] : memref<2x4x32x8xbf16, #tpu.memory_space<vmem>>, vector<1x4x32x8xbf16>
    %397 = vector.shape_cast %396 : vector<1x4x32x8xbf16> to vector<4x32x8xbf16>
    %c1_264 = arith.constant 1 : index
    %c0_265 = arith.constant 0 : index
    %c0_266 = arith.constant 0 : index
    %c0_267 = arith.constant 0 : index
    %398 = vector.load %arg6[%c1_264, %c0_265, %c0_266, %c0_267] : memref<2x4x1x8xf32, #tpu.memory_space<vmem>>, vector<1x4x1x8xf32>
    %399 = vector.shape_cast %398 : vector<1x4x1x8xf32> to vector<4x1x8xf32>
    %c1_268 = arith.constant 1 : index
    %c0_269 = arith.constant 0 : index
    %c0_270 = arith.constant 0 : index
    %c0_271 = arith.constant 0 : index
    %400 = vector.load %arg7[%c1_268, %c0_269, %c0_270, %c0_271] : memref<2x4x32x8xbf16, #tpu.memory_space<vmem>>, vector<1x4x32x8xbf16>
    %401 = vector.shape_cast %400 : vector<1x4x32x8xbf16> to vector<4x32x8xbf16>
    %c1_272 = arith.constant 1 : index
    %c0_273 = arith.constant 0 : index
    %c0_274 = arith.constant 0 : index
    %c0_275 = arith.constant 0 : index
    %402 = vector.load %arg8[%c1_272, %c0_273, %c0_274, %c0_275] : memref<2x4x1x8xf32, #tpu.memory_space<vmem>>, vector<1x4x1x8xf32>
    %403 = vector.shape_cast %402 : vector<1x4x1x8xf32> to vector<4x1x8xf32>
    %c1_276 = arith.constant 1 : index
    %c0_277 = arith.constant 0 : index
    %c0_278 = arith.constant 0 : index
    %c0_279 = arith.constant 0 : index
    %404 = vector.load %arg9[%c1_276, %c0_277, %c0_278, %c0_279] : memref<2x4x32x8xbf16, #tpu.memory_space<vmem>>, vector<1x4x32x8xbf16>
    %405 = vector.shape_cast %404 : vector<1x4x32x8xbf16> to vector<4x32x8xbf16>
    %c1_280 = arith.constant 1 : index
    %c0_281 = arith.constant 0 : index
    %c0_282 = arith.constant 0 : index
    %c0_283 = arith.constant 0 : index
    %406 = vector.load %arg10[%c1_280, %c0_281, %c0_282, %c0_283] : memref<2x4x1x8xf32, #tpu.memory_space<vmem>>, vector<1x4x1x8xf32>
    %407 = vector.shape_cast %406 : vector<1x4x1x8xf32> to vector<4x1x8xf32>
    %c1_284 = arith.constant 1 : index
    %c0_285 = arith.constant 0 : index
    %c0_286 = arith.constant 0 : index
    %c0_287 = arith.constant 0 : index
    %408 = vector.load %arg11[%c1_284, %c0_285, %c0_286, %c0_287] : memref<2x4x8x32xbf16, #tpu.memory_space<vmem>>, vector<1x4x8x32xbf16>
    %409 = vector.shape_cast %408 : vector<1x4x8x32xbf16> to vector<4x8x32xbf16>
    %c1_288 = arith.constant 1 : index
    %c0_289 = arith.constant 0 : index
    %c0_290 = arith.constant 0 : index
    %410 = vector.load %arg12[%c1_288, %c0_289, %c0_290] : memref<2x1x32xf32, #tpu.memory_space<vmem>>, vector<1x1x32xf32>
    %411 = vector.shape_cast %410 : vector<1x1x32xf32> to vector<1x32xf32>
    "tpu.trace_start"() <{level = 10 : i32, message = "htd,hdk->htk"}> : () -> ()
    %cst_291 = arith.constant dense<0.000000e+00> : vector<4x8x8xf32>
    %412 = tpu.matmul %395, %397, %cst_291 {dimension_numbers = #tpu.dot_dimension_numbers<[2], [1], [1], [2], [0, 0, 0, 1, 1, 2], [0], [0]>} : vector<4x8x32xbf16>, vector<4x32x8xbf16>, vector<4x8x8xf32> -> vector<4x8x8xf32>
    "tpu.trace_stop"() : () -> ()
    %413 = vector.broadcast %399 : vector<4x1x8xf32> to vector<4x8x8xf32>
    %414 = arith.addf %412, %413 : vector<4x8x8xf32>
    "tpu.trace_start"() <{level = 10 : i32, message = "htd,hdk->htk"}> : () -> ()
    %cst_292 = arith.constant dense<0.000000e+00> : vector<4x8x8xf32>
    %415 = tpu.matmul %395, %401, %cst_292 {dimension_numbers = #tpu.dot_dimension_numbers<[2], [1], [1], [2], [0, 0, 0, 1, 1, 2], [0], [0]>} : vector<4x8x32xbf16>, vector<4x32x8xbf16>, vector<4x8x8xf32> -> vector<4x8x8xf32>
    "tpu.trace_stop"() : () -> ()
    %416 = vector.broadcast %403 : vector<4x1x8xf32> to vector<4x8x8xf32>
    %417 = arith.addf %415, %416 : vector<4x8x8xf32>
    "tpu.trace_start"() <{level = 10 : i32, message = "htd,hdk->htk"}> : () -> ()
    %cst_293 = arith.constant dense<0.000000e+00> : vector<4x8x8xf32>
    %418 = tpu.matmul %395, %405, %cst_293 {dimension_numbers = #tpu.dot_dimension_numbers<[2], [1], [1], [2], [0, 0, 0, 1, 1, 2], [0], [0]>} : vector<4x8x32xbf16>, vector<4x32x8xbf16>, vector<4x8x8xf32> -> vector<4x8x8xf32>
    "tpu.trace_stop"() : () -> ()
    %419 = vector.broadcast %407 : vector<4x1x8xf32> to vector<4x8x8xf32>
    %420 = arith.addf %418, %419 : vector<4x8x8xf32>
    %421 = arith.truncf %414 : vector<4x8x8xf32> to vector<4x8x8xbf16>
    %422 = arith.truncf %417 : vector<4x8x8xf32> to vector<4x8x8xbf16>
    "tpu.trace_start"() <{level = 10 : i32, message = "hqd,hkd->hqk"}> : () -> ()
    %cst_294 = arith.constant dense<0.000000e+00> : vector<4x8x8xf32>
    %423 = tpu.matmul %421, %422, %cst_294 {dimension_numbers = #tpu.dot_dimension_numbers<[2], [2], [1], [1], [0, 0, 0, 1, 1, 1], [0], [0]>} : vector<4x8x8xbf16>, vector<4x8x8xbf16>, vector<4x8x8xf32> -> vector<4x8x8xf32>
    "tpu.trace_stop"() : () -> ()
    %cst_295 = arith.constant 0.353553385 : f32
    %424 = vector.broadcast %cst_295 : f32 to vector<4x8x8xf32>
    %425 = arith.mulf %423, %424 : vector<4x8x8xf32>
    %426 = vector.shape_cast %11 : vector<8x8xf32> to vector<1x8x8xf32>
    %427 = vector.broadcast %426 : vector<1x8x8xf32> to vector<4x8x8xf32>
    %428 = arith.addf %425, %427 : vector<4x8x8xf32>
    %cst_296 = arith.constant dense<0xFF800000> : vector<4x8xf32>
    %429 = vector.multi_reduction <maximumf>, %428, %cst_296 [2] : vector<4x8x8xf32> to vector<4x8xf32>
    %430 = vector.shape_cast %429 : vector<4x8xf32> to vector<4x8x1xf32>
    %431 = vector.broadcast %430 : vector<4x8x1xf32> to vector<4x8x8xf32>
    %432 = arith.subf %428, %431 : vector<4x8x8xf32>
    %433 = math.exp %432 : vector<4x8x8xf32>
    %cst_297 = arith.constant dense<0.000000e+00> : vector<4x8xf32>
    %434 = vector.multi_reduction <add>, %433, %cst_297 [2] : vector<4x8x8xf32> to vector<4x8xf32>
    %435 = vector.shape_cast %434 : vector<4x8xf32> to vector<4x8x1xf32>
    %436 = tpu.reciprocal %435 {approx = true} : vector<4x8x1xf32> -> vector<4x8x1xf32>
    %437 = vector.broadcast %436 : vector<4x8x1xf32> to vector<4x8x8xf32>
    %438 = arith.mulf %433, %437 : vector<4x8x8xf32>
    %439 = arith.truncf %438 : vector<4x8x8xf32> to vector<4x8x8xbf16>
    %440 = arith.truncf %420 : vector<4x8x8xf32> to vector<4x8x8xbf16>
    "tpu.trace_start"() <{level = 10 : i32, message = "hqk,hkd->hqd"}> : () -> ()
    %cst_298 = arith.constant dense<0.000000e+00> : vector<4x8x8xf32>
    %441 = tpu.matmul %439, %440, %cst_298 {dimension_numbers = #tpu.dot_dimension_numbers<[2], [1], [1], [2], [0, 0, 0, 1, 1, 2], [0], [0]>} : vector<4x8x8xbf16>, vector<4x8x8xbf16>, vector<4x8x8xf32> -> vector<4x8x8xf32>
    "tpu.trace_stop"() : () -> ()
    %442 = arith.truncf %441 : vector<4x8x8xf32> to vector<4x8x8xbf16>
    "tpu.trace_start"() <{level = 10 : i32, message = "htd,hdk->htk"}> : () -> ()
    %cst_299 = arith.constant dense<0.000000e+00> : vector<4x8x32xf32>
    %443 = tpu.matmul %442, %409, %cst_299 {dimension_numbers = #tpu.dot_dimension_numbers<[2], [1], [1], [2], [0, 0, 0, 1, 1, 2], [0], [0]>} : vector<4x8x8xbf16>, vector<4x8x32xbf16>, vector<4x8x32xf32> -> vector<4x8x32xf32>
    "tpu.trace_stop"() : () -> ()
    %cst_300 = arith.constant dense<0.000000e+00> : vector<8x32xf32>
    %444 = vector.multi_reduction <add>, %443, %cst_300 [0] : vector<4x8x32xf32> to vector<8x32xf32>
    %445 = vector.broadcast %411 : vector<1x32xf32> to vector<8x32xf32>
    %446 = arith.addf %444, %445 : vector<8x32xf32>
    %447 = tpu.concatenate %390, %446 in 0 : vector<8x32xf32>, vector<8x32xf32> -> vector<16x32xf32>
    %448 = arith.addf %334, %447 : vector<16x32xf32>
    %c1_301 = arith.constant 1 : index
    %c0_302 = arith.constant 0 : index
    %c0_303 = arith.constant 0 : index
    %449 = vector.load %arg25[%c1_301, %c0_302, %c0_303] : memref<2x1x32xf32, #tpu.memory_space<vmem>>, vector<1x1x32xf32>
    %450 = vector.shape_cast %449 : vector<1x1x32xf32> to vector<1x32xf32>
    %c1_304 = arith.constant 1 : index
    %c0_305 = arith.constant 0 : index
    %c0_306 = arith.constant 0 : index
    %451 = vector.load %arg26[%c1_304, %c0_305, %c0_306] : memref<2x1x32xf32, #tpu.memory_space<vmem>>, vector<1x1x32xf32>
    %452 = vector.shape_cast %451 : vector<1x1x32xf32> to vector<1x32xf32>
    %cst_307 = arith.constant dense<0.000000e+00> : vector<16xf32>
    %453 = vector.multi_reduction <add>, %448, %cst_307 [1] : vector<16x32xf32> to vector<16xf32>
    %454 = vector.shape_cast %453 : vector<16xf32> to vector<16x1xf32>
    %cst_308 = arith.constant 3.200000e+01 : f32
    %455 = vector.broadcast %cst_308 : f32 to vector<16x1xf32>
    %456 = arith.divf %454, %455 : vector<16x1xf32>
    %457 = vector.broadcast %456 : vector<16x1xf32> to vector<16x32xf32>
    %458 = arith.subf %448, %457 : vector<16x32xf32>
    %459 = arith.mulf %458, %458 : vector<16x32xf32>
    %cst_309 = arith.constant dense<0.000000e+00> : vector<16xf32>
    %460 = vector.multi_reduction <add>, %459, %cst_309 [1] : vector<16x32xf32> to vector<16xf32>
    %461 = vector.shape_cast %460 : vector<16xf32> to vector<16x1xf32>
    %cst_310 = arith.constant 3.200000e+01 : f32
    %462 = vector.broadcast %cst_310 : f32 to vector<16x1xf32>
    %463 = arith.divf %461, %462 : vector<16x1xf32>
    %cst_311 = arith.constant 9.99999974E-6 : f32
    %464 = vector.broadcast %cst_311 : f32 to vector<16x1xf32>
    %465 = arith.addf %463, %464 : vector<16x1xf32>
    %466 = math.rsqrt %465 : vector<16x1xf32>
    %467 = vector.broadcast %466 : vector<16x1xf32> to vector<16x32xf32>
    %468 = arith.mulf %458, %467 : vector<16x32xf32>
    %469 = vector.broadcast %450 : vector<1x32xf32> to vector<16x32xf32>
    %470 = arith.mulf %468, %469 : vector<16x32xf32>
    %471 = vector.broadcast %452 : vector<1x32xf32> to vector<16x32xf32>
    %472 = arith.addf %470, %471 : vector<16x32xf32>
    %473 = vector.extract_strided_slice %472 {offsets = [0, 0], sizes = [8, 32], strides = [1, 1]} : vector<16x32xf32> to vector<8x32xf32>
    %474 = arith.truncf %473 : vector<8x32xf32> to vector<8x32xbf16>
    %475 = vector.shape_cast %474 : vector<8x32xbf16> to vector<1x8x32xbf16>
    %476 = vector.shape_cast %475 : vector<1x8x32xbf16> to vector<1x8x32xbf16>
    %477 = vector.broadcast %476 : vector<1x8x32xbf16> to vector<4x8x32xbf16>
    %c1_312 = arith.constant 1 : index
    %c0_313 = arith.constant 0 : index
    %c0_314 = arith.constant 0 : index
    %c0_315 = arith.constant 0 : index
    %478 = vector.load %arg13[%c1_312, %c0_313, %c0_314, %c0_315] : memref<2x4x32x8xbf16, #tpu.memory_space<vmem>>, vector<1x4x32x8xbf16>
    %479 = vector.shape_cast %478 : vector<1x4x32x8xbf16> to vector<4x32x8xbf16>
    %c1_316 = arith.constant 1 : index
    %c0_317 = arith.constant 0 : index
    %c0_318 = arith.constant 0 : index
    %c0_319 = arith.constant 0 : index
    %480 = vector.load %arg14[%c1_316, %c0_317, %c0_318, %c0_319] : memref<2x4x1x8xf32, #tpu.memory_space<vmem>>, vector<1x4x1x8xf32>
    %481 = vector.shape_cast %480 : vector<1x4x1x8xf32> to vector<4x1x8xf32>
    %c1_320 = arith.constant 1 : index
    %c0_321 = arith.constant 0 : index
    %c0_322 = arith.constant 0 : index
    %c0_323 = arith.constant 0 : index
    %482 = vector.load %arg15[%c1_320, %c0_321, %c0_322, %c0_323] : memref<2x4x32x8xbf16, #tpu.memory_space<vmem>>, vector<1x4x32x8xbf16>
    %483 = vector.shape_cast %482 : vector<1x4x32x8xbf16> to vector<4x32x8xbf16>
    %c1_324 = arith.constant 1 : index
    %c0_325 = arith.constant 0 : index
    %c0_326 = arith.constant 0 : index
    %c0_327 = arith.constant 0 : index
    %484 = vector.load %arg16[%c1_324, %c0_325, %c0_326, %c0_327] : memref<2x4x1x8xf32, #tpu.memory_space<vmem>>, vector<1x4x1x8xf32>
    %485 = vector.shape_cast %484 : vector<1x4x1x8xf32> to vector<4x1x8xf32>
    %c1_328 = arith.constant 1 : index
    %c0_329 = arith.constant 0 : index
    %c0_330 = arith.constant 0 : index
    %c0_331 = arith.constant 0 : index
    %486 = vector.load %arg17[%c1_328, %c0_329, %c0_330, %c0_331] : memref<2x4x32x8xbf16, #tpu.memory_space<vmem>>, vector<1x4x32x8xbf16>
    %487 = vector.shape_cast %486 : vector<1x4x32x8xbf16> to vector<4x32x8xbf16>
    %c1_332 = arith.constant 1 : index
    %c0_333 = arith.constant 0 : index
    %c0_334 = arith.constant 0 : index
    %c0_335 = arith.constant 0 : index
    %488 = vector.load %arg18[%c1_332, %c0_333, %c0_334, %c0_335] : memref<2x4x1x8xf32, #tpu.memory_space<vmem>>, vector<1x4x1x8xf32>
    %489 = vector.shape_cast %488 : vector<1x4x1x8xf32> to vector<4x1x8xf32>
    %c1_336 = arith.constant 1 : index
    %c0_337 = arith.constant 0 : index
    %c0_338 = arith.constant 0 : index
    %c0_339 = arith.constant 0 : index
    %490 = vector.load %arg19[%c1_336, %c0_337, %c0_338, %c0_339] : memref<2x4x8x32xbf16, #tpu.memory_space<vmem>>, vector<1x4x8x32xbf16>
    %491 = vector.shape_cast %490 : vector<1x4x8x32xbf16> to vector<4x8x32xbf16>
    %c1_340 = arith.constant 1 : index
    %c0_341 = arith.constant 0 : index
    %c0_342 = arith.constant 0 : index
    %492 = vector.load %arg20[%c1_340, %c0_341, %c0_342] : memref<2x1x32xf32, #tpu.memory_space<vmem>>, vector<1x1x32xf32>
    %493 = vector.shape_cast %492 : vector<1x1x32xf32> to vector<1x32xf32>
    "tpu.trace_start"() <{level = 10 : i32, message = "htd,hdk->htk"}> : () -> ()
    %cst_343 = arith.constant dense<0.000000e+00> : vector<4x8x8xf32>
    %494 = tpu.matmul %477, %479, %cst_343 {dimension_numbers = #tpu.dot_dimension_numbers<[2], [1], [1], [2], [0, 0, 0, 1, 1, 2], [0], [0]>} : vector<4x8x32xbf16>, vector<4x32x8xbf16>, vector<4x8x8xf32> -> vector<4x8x8xf32>
    "tpu.trace_stop"() : () -> ()
    %495 = vector.broadcast %481 : vector<4x1x8xf32> to vector<4x8x8xf32>
    %496 = arith.addf %494, %495 : vector<4x8x8xf32>
    "tpu.trace_start"() <{level = 10 : i32, message = "htd,hdk->htk"}> : () -> ()
    %cst_344 = arith.constant dense<0.000000e+00> : vector<4x8x8xf32>
    %497 = tpu.matmul %16, %483, %cst_344 {dimension_numbers = #tpu.dot_dimension_numbers<[2], [1], [1], [2], [0, 0, 0, 1, 1, 2], [0], [0]>} : vector<4x8x32xbf16>, vector<4x32x8xbf16>, vector<4x8x8xf32> -> vector<4x8x8xf32>
    "tpu.trace_stop"() : () -> ()
    %498 = vector.broadcast %485 : vector<4x1x8xf32> to vector<4x8x8xf32>
    %499 = arith.addf %497, %498 : vector<4x8x8xf32>
    "tpu.trace_start"() <{level = 10 : i32, message = "htd,hdk->htk"}> : () -> ()
    %cst_345 = arith.constant dense<0.000000e+00> : vector<4x8x8xf32>
    %500 = tpu.matmul %16, %487, %cst_345 {dimension_numbers = #tpu.dot_dimension_numbers<[2], [1], [1], [2], [0, 0, 0, 1, 1, 2], [0], [0]>} : vector<4x8x32xbf16>, vector<4x32x8xbf16>, vector<4x8x8xf32> -> vector<4x8x8xf32>
    "tpu.trace_stop"() : () -> ()
    %501 = vector.broadcast %489 : vector<4x1x8xf32> to vector<4x8x8xf32>
    %502 = arith.addf %500, %501 : vector<4x8x8xf32>
    %503 = arith.truncf %496 : vector<4x8x8xf32> to vector<4x8x8xbf16>
    %504 = arith.truncf %499 : vector<4x8x8xf32> to vector<4x8x8xbf16>
    "tpu.trace_start"() <{level = 10 : i32, message = "hqd,hkd->hqk"}> : () -> ()
    %cst_346 = arith.constant dense<0.000000e+00> : vector<4x8x8xf32>
    %505 = tpu.matmul %503, %504, %cst_346 {dimension_numbers = #tpu.dot_dimension_numbers<[2], [2], [1], [1], [0, 0, 0, 1, 1, 1], [0], [0]>} : vector<4x8x8xbf16>, vector<4x8x8xbf16>, vector<4x8x8xf32> -> vector<4x8x8xf32>
    "tpu.trace_stop"() : () -> ()
    %cst_347 = arith.constant 0.353553385 : f32
    %506 = vector.broadcast %cst_347 : f32 to vector<4x8x8xf32>
    %507 = arith.mulf %505, %506 : vector<4x8x8xf32>
    %cst_348 = arith.constant dense<0xFF800000> : vector<4x8xf32>
    %508 = vector.multi_reduction <maximumf>, %507, %cst_348 [2] : vector<4x8x8xf32> to vector<4x8xf32>
    %509 = vector.shape_cast %508 : vector<4x8xf32> to vector<4x8x1xf32>
    %510 = vector.broadcast %509 : vector<4x8x1xf32> to vector<4x8x8xf32>
    %511 = arith.subf %507, %510 : vector<4x8x8xf32>
    %512 = math.exp %511 : vector<4x8x8xf32>
    %cst_349 = arith.constant dense<0.000000e+00> : vector<4x8xf32>
    %513 = vector.multi_reduction <add>, %512, %cst_349 [2] : vector<4x8x8xf32> to vector<4x8xf32>
    %514 = vector.shape_cast %513 : vector<4x8xf32> to vector<4x8x1xf32>
    %515 = tpu.reciprocal %514 {approx = true} : vector<4x8x1xf32> -> vector<4x8x1xf32>
    %516 = vector.broadcast %515 : vector<4x8x1xf32> to vector<4x8x8xf32>
    %517 = arith.mulf %512, %516 : vector<4x8x8xf32>
    %518 = arith.truncf %517 : vector<4x8x8xf32> to vector<4x8x8xbf16>
    %519 = arith.truncf %502 : vector<4x8x8xf32> to vector<4x8x8xbf16>
    "tpu.trace_start"() <{level = 10 : i32, message = "hqk,hkd->hqd"}> : () -> ()
    %cst_350 = arith.constant dense<0.000000e+00> : vector<4x8x8xf32>
    %520 = tpu.matmul %518, %519, %cst_350 {dimension_numbers = #tpu.dot_dimension_numbers<[2], [1], [1], [2], [0, 0, 0, 1, 1, 2], [0], [0]>} : vector<4x8x8xbf16>, vector<4x8x8xbf16>, vector<4x8x8xf32> -> vector<4x8x8xf32>
    "tpu.trace_stop"() : () -> ()
    %521 = arith.truncf %520 : vector<4x8x8xf32> to vector<4x8x8xbf16>
    "tpu.trace_start"() <{level = 10 : i32, message = "htd,hdk->htk"}> : () -> ()
    %cst_351 = arith.constant dense<0.000000e+00> : vector<4x8x32xf32>
    %522 = tpu.matmul %521, %491, %cst_351 {dimension_numbers = #tpu.dot_dimension_numbers<[2], [1], [1], [2], [0, 0, 0, 1, 1, 2], [0], [0]>} : vector<4x8x8xbf16>, vector<4x8x32xbf16>, vector<4x8x32xf32> -> vector<4x8x32xf32>
    "tpu.trace_stop"() : () -> ()
    %cst_352 = arith.constant dense<0.000000e+00> : vector<8x32xf32>
    %523 = vector.multi_reduction <add>, %522, %cst_352 [0] : vector<4x8x32xf32> to vector<8x32xf32>
    %524 = vector.broadcast %493 : vector<1x32xf32> to vector<8x32xf32>
    %525 = arith.addf %523, %524 : vector<8x32xf32>
    %526 = vector.extract_strided_slice %472 {offsets = [8, 0], sizes = [8, 32], strides = [1, 1]} : vector<16x32xf32> to vector<8x32xf32>
    %527 = arith.truncf %526 : vector<8x32xf32> to vector<8x32xbf16>
    %528 = vector.shape_cast %527 : vector<8x32xbf16> to vector<1x8x32xbf16>
    %529 = vector.shape_cast %528 : vector<1x8x32xbf16> to vector<1x8x32xbf16>
    %530 = vector.broadcast %529 : vector<1x8x32xbf16> to vector<4x8x32xbf16>
    %c1_353 = arith.constant 1 : index
    %c0_354 = arith.constant 0 : index
    %c0_355 = arith.constant 0 : index
    %c0_356 = arith.constant 0 : index
    %531 = vector.load %arg13[%c1_353, %c0_354, %c0_355, %c0_356] : memref<2x4x32x8xbf16, #tpu.memory_space<vmem>>, vector<1x4x32x8xbf16>
    %532 = vector.shape_cast %531 : vector<1x4x32x8xbf16> to vector<4x32x8xbf16>
    %c1_357 = arith.constant 1 : index
    %c0_358 = arith.constant 0 : index
    %c0_359 = arith.constant 0 : index
    %c0_360 = arith.constant 0 : index
    %533 = vector.load %arg14[%c1_357, %c0_358, %c0_359, %c0_360] : memref<2x4x1x8xf32, #tpu.memory_space<vmem>>, vector<1x4x1x8xf32>
    %534 = vector.shape_cast %533 : vector<1x4x1x8xf32> to vector<4x1x8xf32>
    %c1_361 = arith.constant 1 : index
    %c0_362 = arith.constant 0 : index
    %c0_363 = arith.constant 0 : index
    %c0_364 = arith.constant 0 : index
    %535 = vector.load %arg15[%c1_361, %c0_362, %c0_363, %c0_364] : memref<2x4x32x8xbf16, #tpu.memory_space<vmem>>, vector<1x4x32x8xbf16>
    %536 = vector.shape_cast %535 : vector<1x4x32x8xbf16> to vector<4x32x8xbf16>
    %c1_365 = arith.constant 1 : index
    %c0_366 = arith.constant 0 : index
    %c0_367 = arith.constant 0 : index
    %c0_368 = arith.constant 0 : index
    %537 = vector.load %arg16[%c1_365, %c0_366, %c0_367, %c0_368] : memref<2x4x1x8xf32, #tpu.memory_space<vmem>>, vector<1x4x1x8xf32>
    %538 = vector.shape_cast %537 : vector<1x4x1x8xf32> to vector<4x1x8xf32>
    %c1_369 = arith.constant 1 : index
    %c0_370 = arith.constant 0 : index
    %c0_371 = arith.constant 0 : index
    %c0_372 = arith.constant 0 : index
    %539 = vector.load %arg17[%c1_369, %c0_370, %c0_371, %c0_372] : memref<2x4x32x8xbf16, #tpu.memory_space<vmem>>, vector<1x4x32x8xbf16>
    %540 = vector.shape_cast %539 : vector<1x4x32x8xbf16> to vector<4x32x8xbf16>
    %c1_373 = arith.constant 1 : index
    %c0_374 = arith.constant 0 : index
    %c0_375 = arith.constant 0 : index
    %c0_376 = arith.constant 0 : index
    %541 = vector.load %arg18[%c1_373, %c0_374, %c0_375, %c0_376] : memref<2x4x1x8xf32, #tpu.memory_space<vmem>>, vector<1x4x1x8xf32>
    %542 = vector.shape_cast %541 : vector<1x4x1x8xf32> to vector<4x1x8xf32>
    %c1_377 = arith.constant 1 : index
    %c0_378 = arith.constant 0 : index
    %c0_379 = arith.constant 0 : index
    %c0_380 = arith.constant 0 : index
    %543 = vector.load %arg19[%c1_377, %c0_378, %c0_379, %c0_380] : memref<2x4x8x32xbf16, #tpu.memory_space<vmem>>, vector<1x4x8x32xbf16>
    %544 = vector.shape_cast %543 : vector<1x4x8x32xbf16> to vector<4x8x32xbf16>
    %c1_381 = arith.constant 1 : index
    %c0_382 = arith.constant 0 : index
    %c0_383 = arith.constant 0 : index
    %545 = vector.load %arg20[%c1_381, %c0_382, %c0_383] : memref<2x1x32xf32, #tpu.memory_space<vmem>>, vector<1x1x32xf32>
    %546 = vector.shape_cast %545 : vector<1x1x32xf32> to vector<1x32xf32>
    "tpu.trace_start"() <{level = 10 : i32, message = "htd,hdk->htk"}> : () -> ()
    %cst_384 = arith.constant dense<0.000000e+00> : vector<4x8x8xf32>
    %547 = tpu.matmul %530, %532, %cst_384 {dimension_numbers = #tpu.dot_dimension_numbers<[2], [1], [1], [2], [0, 0, 0, 1, 1, 2], [0], [0]>} : vector<4x8x32xbf16>, vector<4x32x8xbf16>, vector<4x8x8xf32> -> vector<4x8x8xf32>
    "tpu.trace_stop"() : () -> ()
    %548 = vector.broadcast %534 : vector<4x1x8xf32> to vector<4x8x8xf32>
    %549 = arith.addf %547, %548 : vector<4x8x8xf32>
    "tpu.trace_start"() <{level = 10 : i32, message = "htd,hdk->htk"}> : () -> ()
    %cst_385 = arith.constant dense<0.000000e+00> : vector<4x8x8xf32>
    %550 = tpu.matmul %21, %536, %cst_385 {dimension_numbers = #tpu.dot_dimension_numbers<[2], [1], [1], [2], [0, 0, 0, 1, 1, 2], [0], [0]>} : vector<4x8x32xbf16>, vector<4x32x8xbf16>, vector<4x8x8xf32> -> vector<4x8x8xf32>
    "tpu.trace_stop"() : () -> ()
    %551 = vector.broadcast %538 : vector<4x1x8xf32> to vector<4x8x8xf32>
    %552 = arith.addf %550, %551 : vector<4x8x8xf32>
    "tpu.trace_start"() <{level = 10 : i32, message = "htd,hdk->htk"}> : () -> ()
    %cst_386 = arith.constant dense<0.000000e+00> : vector<4x8x8xf32>
    %553 = tpu.matmul %21, %540, %cst_386 {dimension_numbers = #tpu.dot_dimension_numbers<[2], [1], [1], [2], [0, 0, 0, 1, 1, 2], [0], [0]>} : vector<4x8x32xbf16>, vector<4x32x8xbf16>, vector<4x8x8xf32> -> vector<4x8x8xf32>
    "tpu.trace_stop"() : () -> ()
    %554 = vector.broadcast %542 : vector<4x1x8xf32> to vector<4x8x8xf32>
    %555 = arith.addf %553, %554 : vector<4x8x8xf32>
    %556 = arith.truncf %549 : vector<4x8x8xf32> to vector<4x8x8xbf16>
    %557 = arith.truncf %552 : vector<4x8x8xf32> to vector<4x8x8xbf16>
    "tpu.trace_start"() <{level = 10 : i32, message = "hqd,hkd->hqk"}> : () -> ()
    %cst_387 = arith.constant dense<0.000000e+00> : vector<4x8x8xf32>
    %558 = tpu.matmul %556, %557, %cst_387 {dimension_numbers = #tpu.dot_dimension_numbers<[2], [2], [1], [1], [0, 0, 0, 1, 1, 1], [0], [0]>} : vector<4x8x8xbf16>, vector<4x8x8xbf16>, vector<4x8x8xf32> -> vector<4x8x8xf32>
    "tpu.trace_stop"() : () -> ()
    %cst_388 = arith.constant 0.353553385 : f32
    %559 = vector.broadcast %cst_388 : f32 to vector<4x8x8xf32>
    %560 = arith.mulf %558, %559 : vector<4x8x8xf32>
    %cst_389 = arith.constant dense<0xFF800000> : vector<4x8xf32>
    %561 = vector.multi_reduction <maximumf>, %560, %cst_389 [2] : vector<4x8x8xf32> to vector<4x8xf32>
    %562 = vector.shape_cast %561 : vector<4x8xf32> to vector<4x8x1xf32>
    %563 = vector.broadcast %562 : vector<4x8x1xf32> to vector<4x8x8xf32>
    %564 = arith.subf %560, %563 : vector<4x8x8xf32>
    %565 = math.exp %564 : vector<4x8x8xf32>
    %cst_390 = arith.constant dense<0.000000e+00> : vector<4x8xf32>
    %566 = vector.multi_reduction <add>, %565, %cst_390 [2] : vector<4x8x8xf32> to vector<4x8xf32>
    %567 = vector.shape_cast %566 : vector<4x8xf32> to vector<4x8x1xf32>
    %568 = tpu.reciprocal %567 {approx = true} : vector<4x8x1xf32> -> vector<4x8x1xf32>
    %569 = vector.broadcast %568 : vector<4x8x1xf32> to vector<4x8x8xf32>
    %570 = arith.mulf %565, %569 : vector<4x8x8xf32>
    %571 = arith.truncf %570 : vector<4x8x8xf32> to vector<4x8x8xbf16>
    %572 = arith.truncf %555 : vector<4x8x8xf32> to vector<4x8x8xbf16>
    "tpu.trace_start"() <{level = 10 : i32, message = "hqk,hkd->hqd"}> : () -> ()
    %cst_391 = arith.constant dense<0.000000e+00> : vector<4x8x8xf32>
    %573 = tpu.matmul %571, %572, %cst_391 {dimension_numbers = #tpu.dot_dimension_numbers<[2], [1], [1], [2], [0, 0, 0, 1, 1, 2], [0], [0]>} : vector<4x8x8xbf16>, vector<4x8x8xbf16>, vector<4x8x8xf32> -> vector<4x8x8xf32>
    "tpu.trace_stop"() : () -> ()
    %574 = arith.truncf %573 : vector<4x8x8xf32> to vector<4x8x8xbf16>
    "tpu.trace_start"() <{level = 10 : i32, message = "htd,hdk->htk"}> : () -> ()
    %cst_392 = arith.constant dense<0.000000e+00> : vector<4x8x32xf32>
    %575 = tpu.matmul %574, %544, %cst_392 {dimension_numbers = #tpu.dot_dimension_numbers<[2], [1], [1], [2], [0, 0, 0, 1, 1, 2], [0], [0]>} : vector<4x8x8xbf16>, vector<4x8x32xbf16>, vector<4x8x32xf32> -> vector<4x8x32xf32>
    "tpu.trace_stop"() : () -> ()
    %cst_393 = arith.constant dense<0.000000e+00> : vector<8x32xf32>
    %576 = vector.multi_reduction <add>, %575, %cst_393 [0] : vector<4x8x32xf32> to vector<8x32xf32>
    %577 = vector.broadcast %546 : vector<1x32xf32> to vector<8x32xf32>
    %578 = arith.addf %576, %577 : vector<8x32xf32>
    %579 = tpu.concatenate %525, %578 in 0 : vector<8x32xf32>, vector<8x32xf32> -> vector<16x32xf32>
    %580 = arith.addf %472, %579 : vector<16x32xf32>
    %c1_394 = arith.constant 1 : index
    %c0_395 = arith.constant 0 : index
    %c0_396 = arith.constant 0 : index
    %581 = vector.load %arg27[%c1_394, %c0_395, %c0_396] : memref<2x1x32xf32, #tpu.memory_space<vmem>>, vector<1x1x32xf32>
    %582 = vector.shape_cast %581 : vector<1x1x32xf32> to vector<1x32xf32>
    %c1_397 = arith.constant 1 : index
    %c0_398 = arith.constant 0 : index
    %c0_399 = arith.constant 0 : index
    %583 = vector.load %arg28[%c1_397, %c0_398, %c0_399] : memref<2x1x32xf32, #tpu.memory_space<vmem>>, vector<1x1x32xf32>
    %584 = vector.shape_cast %583 : vector<1x1x32xf32> to vector<1x32xf32>
    %cst_400 = arith.constant dense<0.000000e+00> : vector<16xf32>
    %585 = vector.multi_reduction <add>, %580, %cst_400 [1] : vector<16x32xf32> to vector<16xf32>
    %586 = vector.shape_cast %585 : vector<16xf32> to vector<16x1xf32>
    %cst_401 = arith.constant 3.200000e+01 : f32
    %587 = vector.broadcast %cst_401 : f32 to vector<16x1xf32>
    %588 = arith.divf %586, %587 : vector<16x1xf32>
    %589 = vector.broadcast %588 : vector<16x1xf32> to vector<16x32xf32>
    %590 = arith.subf %580, %589 : vector<16x32xf32>
    %591 = arith.mulf %590, %590 : vector<16x32xf32>
    %cst_402 = arith.constant dense<0.000000e+00> : vector<16xf32>
    %592 = vector.multi_reduction <add>, %591, %cst_402 [1] : vector<16x32xf32> to vector<16xf32>
    %593 = vector.shape_cast %592 : vector<16xf32> to vector<16x1xf32>
    %cst_403 = arith.constant 3.200000e+01 : f32
    %594 = vector.broadcast %cst_403 : f32 to vector<16x1xf32>
    %595 = arith.divf %593, %594 : vector<16x1xf32>
    %cst_404 = arith.constant 9.99999974E-6 : f32
    %596 = vector.broadcast %cst_404 : f32 to vector<16x1xf32>
    %597 = arith.addf %595, %596 : vector<16x1xf32>
    %598 = math.rsqrt %597 : vector<16x1xf32>
    %599 = vector.broadcast %598 : vector<16x1xf32> to vector<16x32xf32>
    %600 = arith.mulf %590, %599 : vector<16x32xf32>
    %601 = vector.broadcast %582 : vector<1x32xf32> to vector<16x32xf32>
    %602 = arith.mulf %600, %601 : vector<16x32xf32>
    %603 = vector.broadcast %584 : vector<1x32xf32> to vector<16x32xf32>
    %604 = arith.addf %602, %603 : vector<16x32xf32>
    %c1_405 = arith.constant 1 : index
    %c0_406 = arith.constant 0 : index
    %c0_407 = arith.constant 0 : index
    %605 = vector.load %arg21[%c1_405, %c0_406, %c0_407] : memref<2x32x64xbf16, #tpu.memory_space<vmem>>, vector<1x32x64xbf16>
    %606 = vector.shape_cast %605 : vector<1x32x64xbf16> to vector<32x64xbf16>
    %c1_408 = arith.constant 1 : index
    %c0_409 = arith.constant 0 : index
    %c0_410 = arith.constant 0 : index
    %607 = vector.load %arg22[%c1_408, %c0_409, %c0_410] : memref<2x1x64xf32, #tpu.memory_space<vmem>>, vector<1x1x64xf32>
    %608 = vector.shape_cast %607 : vector<1x1x64xf32> to vector<1x64xf32>
    %609 = arith.truncf %604 : vector<16x32xf32> to vector<16x32xbf16>
    %cst_411 = arith.constant dense<0.000000e+00> : vector<16x64xf32>
    %610 = tpu.matmul %609, %606, %cst_411 {dimension_numbers = #tpu.dot_dimension_numbers<[1], [0], [0], [1], [0, 0, 1, 1], [], []>} : vector<16x32xbf16>, vector<32x64xbf16>, vector<16x64xf32> -> vector<16x64xf32>
    %611 = vector.broadcast %608 : vector<1x64xf32> to vector<16x64xf32>
    %612 = arith.addf %610, %611 : vector<16x64xf32>
    %cst_412 = arith.constant 0.000000e+00 : f32
    %613 = vector.broadcast %cst_412 : f32 to vector<16x64xf32>
    %614 = arith.maximumf %612, %613 : vector<16x64xf32>
    %c1_413 = arith.constant 1 : index
    %c0_414 = arith.constant 0 : index
    %c0_415 = arith.constant 0 : index
    %615 = vector.load %arg23[%c1_413, %c0_414, %c0_415] : memref<2x64x32xbf16, #tpu.memory_space<vmem>>, vector<1x64x32xbf16>
    %616 = vector.shape_cast %615 : vector<1x64x32xbf16> to vector<64x32xbf16>
    %c1_416 = arith.constant 1 : index
    %c0_417 = arith.constant 0 : index
    %c0_418 = arith.constant 0 : index
    %617 = vector.load %arg24[%c1_416, %c0_417, %c0_418] : memref<2x1x32xf32, #tpu.memory_space<vmem>>, vector<1x1x32xf32>
    %618 = vector.shape_cast %617 : vector<1x1x32xf32> to vector<1x32xf32>
    %619 = arith.truncf %614 : vector<16x64xf32> to vector<16x64xbf16>
    %cst_419 = arith.constant dense<0.000000e+00> : vector<16x32xf32>
    %620 = tpu.matmul %619, %616, %cst_419 {dimension_numbers = #tpu.dot_dimension_numbers<[1], [0], [0], [1], [0, 0, 1, 1], [], []>} : vector<16x64xbf16>, vector<64x32xbf16>, vector<16x32xf32> -> vector<16x32xf32>
    %621 = vector.broadcast %618 : vector<1x32xf32> to vector<16x32xf32>
    %622 = arith.addf %620, %621 : vector<16x32xf32>
    %623 = arith.addf %604, %622 : vector<16x32xf32>
    %c1_420 = arith.constant 1 : index
    %c0_421 = arith.constant 0 : index
    %c0_422 = arith.constant 0 : index
    %624 = vector.load %arg29[%c1_420, %c0_421, %c0_422] : memref<2x1x32xf32, #tpu.memory_space<vmem>>, vector<1x1x32xf32>
    %625 = vector.shape_cast %624 : vector<1x1x32xf32> to vector<1x32xf32>
    %c1_423 = arith.constant 1 : index
    %c0_424 = arith.constant 0 : index
    %c0_425 = arith.constant 0 : index
    %626 = vector.load %arg30[%c1_423, %c0_424, %c0_425] : memref<2x1x32xf32, #tpu.memory_space<vmem>>, vector<1x1x32xf32>
    %627 = vector.shape_cast %626 : vector<1x1x32xf32> to vector<1x32xf32>
    %cst_426 = arith.constant dense<0.000000e+00> : vector<16xf32>
    %628 = vector.multi_reduction <add>, %623, %cst_426 [1] : vector<16x32xf32> to vector<16xf32>
    %629 = vector.shape_cast %628 : vector<16xf32> to vector<16x1xf32>
    %cst_427 = arith.constant 3.200000e+01 : f32
    %630 = vector.broadcast %cst_427 : f32 to vector<16x1xf32>
    %631 = arith.divf %629, %630 : vector<16x1xf32>
    %632 = vector.broadcast %631 : vector<16x1xf32> to vector<16x32xf32>
    %633 = arith.subf %623, %632 : vector<16x32xf32>
    %634 = arith.mulf %633, %633 : vector<16x32xf32>
    %cst_428 = arith.constant dense<0.000000e+00> : vector<16xf32>
    %635 = vector.multi_reduction <add>, %634, %cst_428 [1] : vector<16x32xf32> to vector<16xf32>
    %636 = vector.shape_cast %635 : vector<16xf32> to vector<16x1xf32>
    %cst_429 = arith.constant 3.200000e+01 : f32
    %637 = vector.broadcast %cst_429 : f32 to vector<16x1xf32>
    %638 = arith.divf %636, %637 : vector<16x1xf32>
    %cst_430 = arith.constant 9.99999974E-6 : f32
    %639 = vector.broadcast %cst_430 : f32 to vector<16x1xf32>
    %640 = arith.addf %638, %639 : vector<16x1xf32>
    %641 = math.rsqrt %640 : vector<16x1xf32>
    %642 = vector.broadcast %641 : vector<16x1xf32> to vector<16x32xf32>
    %643 = arith.mulf %633, %642 : vector<16x32xf32>
    %644 = vector.broadcast %625 : vector<1x32xf32> to vector<16x32xf32>
    %645 = arith.mulf %643, %644 : vector<16x32xf32>
    %646 = vector.broadcast %627 : vector<1x32xf32> to vector<16x32xf32>
    %647 = arith.addf %645, %646 : vector<16x32xf32>
    %c0_431 = arith.constant 0 : index
    %c0_432 = arith.constant 0 : index
    %648 = vector.load %arg31[%c0_431, %c0_432] : memref<32x128xbf16, #tpu.memory_space<vmem>>, vector<32x128xbf16>
    %c0_433 = arith.constant 0 : index
    %c0_434 = arith.constant 0 : index
    %649 = vector.load %arg32[%c0_433, %c0_434] : memref<1x128xf32, #tpu.memory_space<vmem>>, vector<1x128xf32>
    %650 = arith.truncf %647 : vector<16x32xf32> to vector<16x32xbf16>
    %cst_435 = arith.constant dense<0.000000e+00> : vector<16x128xf32>
    %651 = tpu.matmul %650, %648, %cst_435 {dimension_numbers = #tpu.dot_dimension_numbers<[1], [0], [0], [1], [0, 0, 1, 1], [], []>} : vector<16x32xbf16>, vector<32x128xbf16>, vector<16x128xf32> -> vector<16x128xf32>
    %652 = vector.broadcast %649 : vector<1x128xf32> to vector<16x128xf32>
    %653 = arith.addf %651, %652 : vector<16x128xf32>
    %c0_436 = arith.constant 0 : index
    %c0_437 = arith.constant 0 : index
    %654 = vector.load %arg33[%c0_436, %c0_437] : memref<16x128xf32, #tpu.memory_space<vmem>>, vector<16x128xf32>
    tpu.vector_store %arg33[%c0_436, %c0_437], %653 {strides = array<i32>} : memref<16x128xf32, #tpu.memory_space<vmem>>, vector<16x128xf32>,
    return
  }
}

</mosaic_0001>

<bundles_post_ra>
// kernel: tpu_custom_call.1
= control target key start
LH: loop header
LB: loop body
LE: loop exit
PB: predicated region body
PF: predicated region fallthrough
CT: control target
= control target key end

     0   :  { %s15225_s6 = smov 1   ;;  %s15226_s10 = smov 2   ;;  %s17345_s0 = inlined_call_operand.smem [shape: u32[34], index: -1, kind: input, shape index: {}] }
   0x1   :  { %s15271_s5 = sld [smem:[%s17345_s0]]   ;;  %s15227_s14 = smov 3  }
   0x2   :  { %s15276_s9 = sld [smem:[%s17345_s0 + %s15225_s6]]   ;;  %s15228_s18 = smov 4  }
   0x3   :  { %s15281_s13 = sld [smem:[%s17345_s0 + %s15226_s10]]   ;;  %s15229_s22 = smov 5  }
   0x4   :  { %s15286_s17 = sld [smem:[%s17345_s0 + %s15227_s14]]   ;;  %s15230_s26 = smov 6  }
   0x5   :  { %s15291_s21 = sld [smem:[%s17345_s0 + %s15228_s18]]   ;;  %s15231_s30 = smov 7  }
   0x6   :  { %s15296_s25 = sld [smem:[%s17345_s0 + %s15229_s22]]   ;;  %s15232_s4 = smov 8  }
   0x7   :  { %s15301_s29 = sld [smem:[%s17345_s0 + %s15230_s26]]   ;;  %s15233_s10 = smov 9  }
   0x8   :  { %17362 = sst [smem:[#allocation5_spill]] %s15276_s9  ;;  %s15234_s15 = smov 10  }
   0x9   :  { %s15306_s3 = sld [smem:[%s17345_s0 + %s15231_s30]]   ;;  %s15235_s20 = smov 11  }
   0xa   :  { %s15311_s8 = sld [smem:[%s17345_s0 + %s15232_s4]]   ;;  %s15236_s26 = smov 12  }
   0xb   :  { %s15316_s14 = sld [smem:[%s17345_s0 + %s15233_s10]]   ;;  %s15237_s1 = smov 13  }
   0xc   :  { %s15321_s19 = sld [smem:[%s17345_s0 + %s15234_s15]]   ;;  %s15238_s7 = smov 14  }
   0xd   :  { %s15326_s24 = sld [smem:[%s17345_s0 + %s15235_s20]]   ;;  %s15239_s15 = smov 15  }
   0xe   :  { %s15331_s30 = sld [smem:[%s17345_s0 + %s15236_s26]]   ;;  %s15240_s22 = smov 16  }
   0xf   :  { %s15336_s6 = sld [smem:[%s17345_s0 + %s15237_s1]]   ;;  %s15241_s28 = smov 17  }
  0x10   :  { %s15341_s12 = sld [smem:[%s17345_s0 + %s15238_s7]]   ;;  %s15242_s7 = smov 18  }
  0x11   :  { %s15346_s20 = sld [smem:[%s17345_s0 + %s15239_s15]]   ;;  %s15243_s15 = smov 19  }
  0x12   :  { %s15351_s27 = sld [smem:[%s17345_s0 + %s15240_s22]]   ;;  %s15244_s22 = smov 20  }
  0x13   :  { %s15356_s4 = sld [smem:[%s17345_s0 + %s15241_s28]]   ;;  %s15245_s28 = smov 21  }
  0x14   :  { %s15366_s9 = sld [smem:[%s17345_s0 + %s15243_s15]]   ;;  %s15247_s15 = smov 23  }
  0x16   :  { %17363 = sst [smem:[#allocation6_spill]] %s15341_s12 }
  0x17   :  { %17364 = sst [smem:[#allocation7_spill]] %s15346_s20 }
  0x18   :  { %17365 = sst [smem:[#allocation8_spill]] %s15351_s27 }
  0x19   :  { %17366 = sst [smem:[#allocation9_spill]] %s15356_s4 }
  0x1a   :  { %s15361_s12 = sld [smem:[%s17345_s0 + %s15242_s7]]   ;;  %s15246_s7 = smov 22  }
  0x1b   :  { %17368 = sst [smem:[#allocation11_spill]] %s15366_s9 }
  0x1c   :  { %s15371_s27 = sld [smem:[%s17345_s0 + %s15244_s22]]   ;;  %s15248_s22 = smov 24  }
  0x1d   :  { %s15376_s4 = sld [smem:[%s17345_s0 + %s15245_s28]]   ;;  %s15249_s28 = smov 25  }
  0x1e   :  { %s15386_s9 = sld [smem:[%s17345_s0 + %s15247_s15]]   ;;  %s15251_s15 = smov 27  }
  0x20   :  { %17367 = sst [smem:[#allocation10_spill]] %s15361_s12 }
  0x21   :  { %s15381_s12 = sld [smem:[%s17345_s0 + %s15246_s7]]   ;;  %s15250_s7 = smov 26  }
  0x22   :  { %17369 = sst [smem:[#allocation12_spill]] %s15371_s27 }
  0x23   :  { %17370 = sst [smem:[#allocation13_spill]] %s15376_s4 }
  0x24   :  { %17372 = sst [smem:[#allocation15_spill]] %s15386_s9 }
  0x25   :  { %s15391_s27 = sld [smem:[%s17345_s0 + %s15248_s22]]   ;;  %s15252_s22 = smov 28  }
  0x26   :  { %s15396_s4 = sld [smem:[%s17345_s0 + %s15249_s28]]   ;;  %s15253_s28 = smov 29  }
  0x27   :  { %17371 = sst [smem:[#allocation14_spill]] %s15381_s12 }
  0x28   :  { %s15401_s12 = sld [smem:[%s17345_s0 + %s15250_s7]]   ;;  %s15254_s7 = smov 30  }
  0x29   :  { %s15406_s9 = sld [smem:[%s17345_s0 + %s15251_s15]]   ;;  %s15255_s15 = smov 31  }
  0x2a   :  { %s15416_s20 = sld [smem:[%s17345_s0 + %s15253_s28]]   ;;  %s15257_s28 = smov 33  }
  0x2b   :  { %17373 = sst [smem:[#allocation16_spill]] %s15391_s27 }
  0x2c   :  { %s15411_s27 = sld [smem:[%s17345_s0 + %s15252_s22]]   ;;  %s15256_s22 = smov 32  }
  0x2e   :  { %17374 = sst [smem:[#allocation17_spill]] %s15401_s12 }
  0x2f   :  { %17375 = sst [smem:[#allocation18_spill]] %s15406_s9 }
  0x30   :  { %17377 = sst [smem:[#allocation20_spill]] %s15416_s20 }
  0x31   :  { %s15421_s12 = sld [smem:[%s17345_s0 + %s15254_s7]]  }
  0x32   :  { %17376 = sst [smem:[#allocation19_spill]] %s15411_s27 }
  0x33   :  { %s15426_s9 = sld [smem:[%s17345_s0 + %s15255_s15]]  }
  0x34   :  { %s15431_s27 = sld [smem:[%s17345_s0 + %s15256_s22]]  }
  0x35   :  { %s15436_s20 = sld [smem:[%s17345_s0 + %s15257_s28]]  }
  0x36   :  { %v14843_v0 = vld [vmem:[%s15296_s25] sm:$0xff]   ;;  %v15258_v1 = vmov 0.0   ;;  %v14844_v2 = vld [vmem:[%s15296_s25 + $0x10] sm:$0xff]   ;;  %v14845_v3 = vld [vmem:[%s15296_s25 + $0x8] sm:$0xff]   ;;  %vm15259_vm0 = vmmov 0   ;;  %vm264_vm1 = vcmask 261120  }
  0x37   :  { %13413 = vmatprep.subr.bf16.mxu0 %v15258_v1  ;;  %13421 = vmatprep.subr.bf16.mxu1 %v15258_v1  ;;  %v14846_v4 = vld [vmem:[%s15296_s25 + $0x18] sm:$0xff]   ;;  %v140_v5 = vld [vmem:[%s15271_s5] sm:$0xff]  ;;  %v14848_v10 = vld [vmem:[%s15296_s25 + $0x30] sm:$0xff]  }
  0x38   :  { %13414 = vmatpush3.bf16.msra.mxu0 %v14843_v0  ;;  %13417 = vmatprep.mubr.msk.bf16.mxu0 %vm15259_vm0, %v15258_v1  ;;  %v142_v6 = vld [vmem:[%s15291_s21] sm:$0xff]  ;;  %v14849_v11 = vld [vmem:[%s15296_s25 + $0x28] sm:$0xff]   ;;  %v14850_v12 = vld [vmem:[%s15296_s25 + $0x38] sm:$0xff]  }
  0x39   :  { %13422 = vmatpush3.bf16.msra.mxu1 %v14844_v2  ;;  %13415 = vmatprep.subr.bf16.mxu0 %v15258_v1  ;;  %v15452_v7 = vadd.f32 %v142_v6, %v140_v5  ;;  %v14847_v8 = vld [vmem:[%s15296_s25 + $0x20] sm:$0xff]   ;;  %v14852_v14 = vld [vmem:[%s15306_s3 + $0x10] sm:$0xff]   ;;  %v14853_v15 = vld [vmem:[%s15306_s3 + $0x8] sm:$0xff]  }
  0x3a   :  { %13423 = vmatprep.subr.bf16.mxu1 %v15258_v1  ;;  %13425 = vmatprep.mubr.msk.bf16.mxu1 %vm15259_vm0, %v15258_v1  ;;  %v14851_v13 = vld [vmem:[%s15306_s3] sm:$0xff]   ;;  %v14854_v16 = vld [vmem:[%s15306_s3 + $0x18] sm:$0xff]   ;;  %v14856_v18 = vld [vmem:[%s15306_s3 + $0x30] sm:$0xff]  }
  0x3b   :  { %v15457_v9 = vpack.c.bf16 %v15452_v7, %v15452_v7  ;;  %v14855_v17 = vld [vmem:[%s15306_s3 + $0x20] sm:$0xff]   ;;  %v14857_v19 = vld [vmem:[%s15306_s3 + $0x28] sm:$0xff]   ;;  %v14858_v20 = vld [vmem:[%s15306_s3 + $0x38] sm:$0xff]  }
  0x3c   :  { %13416 = vmatpush3.bf16.msra.mxu0 %v14845_v3  ;;  %v14859_v21 = vld [vmem:[%s15316_s14] sm:$0xff]   ;;  %v14860_v22 = vld [vmem:[%s15316_s14 + $0x10] sm:$0xff]   ;;  %v14861_v23 = vld [vmem:[%s15316_s14 + $0x8] sm:$0xff]  }
  0x3d   :  { %13424 = vmatpush3.bf16.msra.mxu1 %v14846_v4  ;;  %13429 = vmatprep.subr.bf16.mxu0 %v15258_v1  ;;  %v14862_v24 = vld [vmem:[%s15316_s14 + $0x18] sm:$0xff]   ;;  %v14863_v25 = vld [vmem:[%s15316_s14 + $0x20] sm:$0xff]   ;;  %v14864_v26 = vld [vmem:[%s15316_s14 + $0x30] sm:$0xff]  }
  0x3e   :  { %13437 = vmatprep.subr.bf16.mxu1 %v15258_v1  ;;  %v14865_v27 = vld [vmem:[%s15316_s14 + $0x28] sm:$0xff]   ;;  %v14866_v28 = vld [vmem:[%s15316_s14 + $0x38] sm:$0xff]  }
  0x3f   :  { %13418 = vmatmul.mubr.msk.bf16.vlgmr.msra.gmra.mrb[0].mxu0 %vm264_vm1, %v15457_v9 }
  0x40   :  { %13426 = vmatmul.mubr.msk.bf16.vlgmr.msra.gmra.mrb[0].mxu1 %vm264_vm1, %v15457_v9  ;;  %13430 = vmatpush3.bf16.msra.mxu0 %v14847_v8 }
  0x41   :  { %13438 = vmatpush3.bf16.msra.mxu1 %v14848_v10  ;;  %13431 = vmatprep.subr.bf16.mxu0 %v15258_v1 }
  0x42   :  { %13439 = vmatprep.subr.bf16.mxu1 %v15258_v1  ;;  %13433 = vmatprep.mubr.msk.bf16.mxu0 %vm15259_vm0, %v15258_v1 }
  0x43   :  { %13441 = vmatprep.mubr.msk.bf16.mxu1 %vm15259_vm0, %v15258_v1 }
  0x44   :  { %13432 = vmatpush3.bf16.msra.mxu0 %v14849_v11 }
  0x45   :  { %13440 = vmatpush3.bf16.msra.mxu1 %v14850_v12  ;;  %13445 = vmatprep.subr.bf16.mxu0 %v15258_v1 }
  0x46   :  { %13453 = vmatprep.subr.bf16.mxu1 %v15258_v1 }
  0x47   :  { %13434 = vmatmul.mubr.msk.bf16.vlgmr.msra.gmra.mrb[4].mxu0 %vm264_vm1, %v15457_v9 }
  0x48   :  { %13442 = vmatmul.mubr.msk.bf16.vlgmr.msra.gmra.mrb[4].mxu1 %vm264_vm1, %v15457_v9  ;;  %13446 = vmatpush3.bf16.msra.mxu0 %v14851_v13 }
  0x49   :  { %13454 = vmatpush3.bf16.msra.mxu1 %v14852_v14  ;;  %13447 = vmatprep.subr.bf16.mxu0 %v15258_v1 }
  0x4a   :  { %13455 = vmatprep.subr.bf16.mxu1 %v15258_v1  ;;  %13449 = vmatprep.mubr.msk.bf16.mxu0 %vm15259_vm0, %v15258_v1 }
  0x4b   :  { %13457 = vmatprep.mubr.msk.bf16.mxu1 %vm15259_vm0, %v15258_v1 }
  0x4c   :  { %13448 = vmatpush3.bf16.msra.mxu0 %v14853_v15 }
  0x4d   :  { %13456 = vmatpush3.bf16.msra.mxu1 %v14854_v16  ;;  %13461 = vmatprep.subr.bf16.mxu0 %v15258_v1 }
  0x4e   :  { %13469 = vmatprep.subr.bf16.mxu1 %v15258_v1 }
  0x4f   :  { %13450 = vmatmul.mubr.msk.bf16.vlgmr.msra.gmra.mrb[8].mxu0 %vm264_vm1, %v15457_v9 }
  0x50   :  { %13458 = vmatmul.mubr.msk.bf16.vlgmr.msra.gmra.mrb[8].mxu1 %vm264_vm1, %v15457_v9  ;;  %13462 = vmatpush3.bf16.msra.mxu0 %v14855_v17 }
  0x51   :  { %13470 = vmatpush3.bf16.msra.mxu1 %v14856_v18  ;;  %13463 = vmatprep.subr.bf16.mxu0 %v15258_v1 }
  0x52   :  { %13471 = vmatprep.subr.bf16.mxu1 %v15258_v1  ;;  %13465 = vmatprep.mubr.msk.bf16.mxu0 %vm15259_vm0, %v15258_v1 }
  0x53   :  { %13473 = vmatprep.mubr.msk.bf16.mxu1 %vm15259_vm0, %v15258_v1 }
  0x54   :  { %13464 = vmatpush3.bf16.msra.mxu0 %v14857_v19 }
  0x55   :  { %13472 = vmatpush3.bf16.msra.mxu1 %v14858_v20  ;;  %13477 = vmatprep.subr.bf16.mxu0 %v15258_v1 }
  0x56   :  { %13485 = vmatprep.subr.bf16.mxu1 %v15258_v1 }
  0x57   :  { %13466 = vmatmul.mubr.msk.bf16.vlgmr.msra.gmra.mrb[12].mxu0 %vm264_vm1, %v15457_v9 }
  0x58   :  { %13474 = vmatmul.mubr.msk.bf16.vlgmr.msra.gmra.mrb[12].mxu1 %vm264_vm1, %v15457_v9  ;;  %13478 = vmatpush3.bf16.msra.mxu0 %v14859_v21 }
  0x59   :  { %13479 = vmatprep.subr.bf16.mxu0 %v15258_v1  ;;  %13481 = vmatprep.mubr.msk.bf16.mxu0 %vm15259_vm0, %v15258_v1 }
  0x5a   :  { %13489 = vmatprep.mubr.msk.bf16.mxu1 %vm15259_vm0, %v15258_v1  ;;  %13486 = vmatpush3.bf16.msra.mxu1 %v14860_v22 }
  0x5b   :  { %13487 = vmatprep.subr.bf16.mxu1 %v15258_v1 }
  0x5c   :  { %13480 = vmatpush3.bf16.msra.mxu0 %v14861_v23 }
  0x5d   :  { %13493 = vmatprep.subr.bf16.mxu0 %v15258_v1 }
  0x5e   :  { %13488 = vmatpush3.bf16.msra.mxu1 %v14862_v24 }
  0x5f   :  { %13482 = vmatmul.mubr.msk.bf16.vlgmr.msra.gmra.mrb[16].mxu0 %vm264_vm1, %v15457_v9  ;;  %13501 = vmatprep.subr.bf16.mxu1 %v15258_v1 }
  0x60   :  { %13497 = vmatprep.mubr.msk.bf16.mxu0 %vm15259_vm0, %v15258_v1  ;;  %13494 = vmatpush3.bf16.msra.mxu0 %v14863_v25 }
  0x61   :  { %13490 = vmatmul.mubr.msk.bf16.vlgmr.msra.gmra.mrb[16].mxu1 %vm264_vm1, %v15457_v9  ;;  %13495 = vmatprep.subr.bf16.mxu0 %v15258_v1 }
  0x62   :  { %13502 = vmatpush3.bf16.msra.mxu1 %v14864_v26  ;;  %13505 = vmatprep.mubr.msk.bf16.mxu1 %vm15259_vm0, %v15258_v1 }
  0x63   :  { %13503 = vmatprep.subr.bf16.mxu1 %v15258_v1 }
  0x64   :  { %13496 = vmatpush3.bf16.msra.mxu0 %v14865_v27 }
  0x65   :  { %13509 = vmatprep.subr.bf16.mxu0 %v15258_v1 }
  0x66   :  { %13504 = vmatpush3.bf16.msra.mxu1 %v14866_v28 }
  0x67   :  { %13515 = vmatprep.subr.bf16.mxu1 %v15258_v1  ;;  %13498 = vmatmul.mubr.msk.bf16.vlgmr.msra.gmra.mrb[20].mxu0 %vm264_vm1, %v15457_v9 }
  0x68   :  { %13511 = vmatprep.mubr.msk.bf16.mxu0 %vm15259_vm0, %v15258_v1 }
  0x69   :  { %13506 = vmatmul.mubr.msk.bf16.vlgmr.msra.gmra.mrb[20].mxu1 %vm264_vm1, %v15457_v9 }
  0x6a   :  { %13517 = vmatprep.mubr.msk.bf16.mxu1 %vm15259_vm0, %v15258_v1 }
  0x6b   :  { %72 = vsyncpa [#allocation3], 0  ;;  %v15549_v45 = vld [vmem:[%s15311_s8] ss:$0 sm:$0xff]  ;;  %v15552_v46 = vld [vmem:[%s15311_s8 + $0x1] ss:$0 sm:$0xff] }
  0x6c   :  { %vm936_vm2 = vcmask 64512   ;;  %v15557_v57 = vld [vmem:[%s15301_s29] ss:$0 sm:$0xff]  ;;  %v15560_v60 = vld [vmem:[%s15301_s29 + $0x1] ss:$0 sm:$0xff]  ;;  %vm1184_vm3 = vcmask 1043456  }
  0x6d   :  { %v15565_v63 = vld [vmem:[%s15311_s8 + $0x2] ss:$0 sm:$0xff]  ;;  %v15569_v2 = vld [vmem:[%s15311_s8 + $0x3] ss:$0 sm:$0xff]  ;;  %v15601_v27 = vld [vmem:[%s15321_s19] ss:$0 sm:$0xff] }
  0x6e   :  { %v15577_v17 = vld [vmem:[%s15301_s29 + $0x2] ss:$0 sm:$0xff]  ;;  %v15580_v20 = vld [vmem:[%s15301_s29 + $0x3] ss:$0 sm:$0xff]  ;;  %s17378_s0 = sld [smem:[#allocation17_spill]]  ;;  %s17383_s7 = sld [smem:[#allocation6_spill]] }
  0x6f   :  { %s17384_s10 = sld [smem:[#allocation10_spill]]  ;;  %s17385_s11 = sld [smem:[#allocation11_spill]]  ;;  %vm5978_vm4 = vcmask 523264  }
  0x70   :  { %s17386_s15 = sld [smem:[#allocation12_spill]]  ;;  %s17387_s16 = sld [smem:[#allocation13_spill]] }
  0x71   :  { %s17388_s18 = sld [smem:[#allocation15_spill]]  ;;  %s17389_s22 = sld [smem:[#allocation18_spill]] }
  0x72   :  { %s17390_s23 = sld [smem:[#allocation19_spill]]  ;;  %s17391_s26 = sld [smem:[#allocation14_spill]] }
  0x73   :  { %s17392_s28 = sld [smem:[#allocation16_spill]]  ;;  %s17393_s1 = sld [smem:[#allocation20_spill]] }
 0x112   :  { %v302_v29 = vpop.f32.mrb[0].mxu0 }
 0x113   :  { %v13419_v30 = vpop.f32.mrb[1].mxu0  ;;  %v354_v31 = vpop.f32.mrb[0].mxu1  ;;  %v303_v0 = vadd.f32 %v15557_v57, %v302_v29  ;;  %v15604_v29 = vld [vmem:[%s15321_s19 + $0x1] ss:$0 sm:$0xff] }
 0x114   :  { %v305_v32 = vpop.f32.mrb[2].mxu0  ;;  %v13427_v33 = vpop.f32.mrb[1].mxu1  ;;  %v355_v3 = vadd.f32 %v15560_v60, %v354_v31 }
 0x115   :  { %v13420_v34 = vpop.f32.mrb[3].mxu0  ;;  %v357_v35 = vpop.f32.mrb[2].mxu1  ;;  %v928_v12 = vpack.c.bf16 %v303_v0, %v303_v0 }
 0x116   :  { %v13428_v36 = vpop.f32.mrb[3].mxu1  ;;  %v929_v16 = vpack.c.bf16 %v355_v3, %v355_v3 }
 0x11a   :  { %v406_v37 = vpop.f32.mrb[4].mxu0 }
 0x11b   :  { %v13435_v38 = vpop.f32.mrb[5].mxu0  ;;  %v458_v39 = vpop.f32.mrb[4].mxu1  ;;  %v407_v23 = vadd.f32 %v15577_v17, %v406_v37 }
 0x11c   :  { %v409_v40 = vpop.f32.mrb[6].mxu0  ;;  %v13443_v41 = vpop.f32.mrb[5].mxu1  ;;  %v459_v24 = vadd.f32 %v15580_v20, %v458_v39 }
 0x11d   :  { %v13436_v42 = vpop.f32.mrb[7].mxu0  ;;  %v461_v43 = vpop.f32.mrb[6].mxu1  ;;  %v930_v25 = vpack.c.bf16 %v407_v23, %v407_v23 }
 0x11e   :  { %v13444_v44 = vpop.f32.mrb[7].mxu1  ;;  %v931_v26 = vpack.c.bf16 %v459_v24, %v459_v24 }
 0x122   :  { %v534_v47 = vpop.f32.mrb[8].mxu0 }
 0x123   :  { %v535_v48 = vadd.f32 %v15549_v45, %v534_v47  ;;  %v586_v49 = vpop.f32.mrb[8].mxu1  ;;  %v13451_v50 = vpop.f32.mrb[9].mxu0 }
 0x124   :  { %v587_v51 = vadd.f32 %v15552_v46, %v586_v49  ;;  %v537_v52 = vpop.f32.mrb[10].mxu0  ;;  %v13459_v53 = vpop.f32.mrb[9].mxu1 }
 0x125   :  { %v932_v54 = vpack.c.bf16 %v535_v48, %v535_v48  ;;  %v13452_v55 = vpop.f32.mrb[11].mxu0  ;;  %v589_v56 = vpop.f32.mrb[10].mxu1  ;;  %v150_v53 = vlaneseq }
 0x126   :  { %v933_v58 = vpack.c.bf16 %v587_v51, %v587_v51  ;;  %v13460_v59 = vpop.f32.mrb[11].mxu1  ;;  %v15620_v56 = vld [vmem:[%s15286_s17] sm:$0x3]  ;;  %s17381_s17 = sld [smem:[#allocation9_spill]] }
 0x127   :  { %v941_v61 = vsel %vm936_vm2, %v932_v54, 0  ;;  %v15616_v54 = vshrl.u32 %v150_v53, 7  ;;  %v15624_v59 = vld [vmem:[%s15281_s13] sm:$0xff]  ;;  %s17380_s13 = sld [smem:[#allocation5_spill]] }
 0x128   :  { %13510 = vmatpush3.bf16.xpose.msra.mxu0 %v941_v61  ;;  %v987_v62 = vsel %vm936_vm2, %v933_v58, 0 }
 0x129   :  { %13516 = vmatpush3.bf16.xpose.msra.mxu1 %v987_v62  ;;  %13521 = vmatprep.subr.bf16.mxu0 %v15258_v1  ;;  %v152_v55 = vsub.s32 0, %v15616_v54 }
 0x12a   :  { %v638_v4 = vpop.f32.mrb[12].mxu0  ;;  %13527 = vmatprep.subr.bf16.mxu1 %v15258_v1 }
 0x12b   :  { %v639_v5 = vadd.f32 %v15565_v63, %v638_v4  ;;  %v690_v6 = vpop.f32.mrb[12].mxu1  ;;  %v13467_v8 = vpop.f32.mrb[13].mxu0  ;;  %v153_v58 = vrot.slane %v15620_v56, %v152_v55 }
 0x12c   :  { %v691_v9 = vadd.f32 %v15569_v2, %v690_v6  ;;  %v641_v10 = vpop.f32.mrb[14].mxu0  ;;  %v13475_v11 = vpop.f32.mrb[13].mxu1 }
 0x12d   :  { %v934_v13 = vpack.c.bf16 %v639_v5, %v639_v5  ;;  %v13468_v14 = vpop.f32.mrb[15].mxu0  ;;  %v693_v15 = vpop.f32.mrb[14].mxu1  ;;  %v15627_v61 = vadd.f32 %v153_v58, %v15624_v59 }
 0x12e   :  { %v935_v18 = vpack.c.bf16 %v691_v9, %v691_v9  ;;  %v13476_v19 = vpop.f32.mrb[15].mxu1 }
 0x12f   :  { %13512 = vmatmul.mubr.msk.bf16.vlgmr.msra.gmra.mrb[24].mxu0 %vm936_vm2, %v928_v12  ;;  %v1033_v21 = vsel %vm936_vm2, %v934_v13, 0 }
 0x130   :  { %13518 = vmatmul.mubr.msk.bf16.vlgmr.msra.gmra.mrb[24].mxu1 %vm936_vm2, %v929_v16  ;;  %13522 = vmatpush3.bf16.xpose.msra.mxu0 %v1033_v21  ;;  %v1079_v22 = vsel %vm936_vm2, %v935_v18, 0 }
 0x131   :  { %13528 = vmatpush3.bf16.xpose.msra.mxu1 %v1079_v22  ;;  %13523 = vmatprep.mubr.msk.bf16.mxu0 %vm15259_vm0, %v15258_v1 }
 0x132   :  { %13529 = vmatprep.mubr.msk.bf16.mxu1 %vm15259_vm0, %v15258_v1  ;;  %13533 = vmatprep.subr.bf16.mxu0 %v15258_v1  ;;  %v766_v28 = vpop.f32.mrb[16].mxu0 }
 0x133   :  { %13539 = vmatprep.subr.bf16.mxu1 %v15258_v1  ;;  %v767_v30 = vadd.f32 %v15601_v27, %v766_v28  ;;  %v13483_v31 = vpop.f32.mrb[17].mxu0 }
 0x134   :  { %v769_v32 = vpop.f32.mrb[18].mxu0  ;;  %v818_v33 = vpop.f32.mrb[16].mxu1 }
 0x135   :  { %v1177_v34 = vpack.c.bf16 %v767_v30, %v767_v30  ;;  %v13484_v35 = vpop.f32.mrb[19].mxu0  ;;  %v819_v36 = vadd.f32 %v15604_v29, %v818_v33  ;;  %v13491_v37 = vpop.f32.mrb[17].mxu1 }
 0x136   :  { %v821_v38 = vpop.f32.mrb[18].mxu1 }
 0x137   :  { %13524 = vmatmul.mubr.msk.bf16.vlgmr.msra.gmra.mrb[28].mxu0 %vm936_vm2, %v930_v25  ;;  %v1178_v39 = vpack.c.bf16 %v819_v36, %v819_v36  ;;  %v13492_v40 = vpop.f32.mrb[19].mxu1  ;;  %v1186_v41 = vsel %vm1184_vm3, %v1177_v34, 0 }
 0x138   :  { %13530 = vmatmul.mubr.msk.bf16.vlgmr.msra.gmra.mrb[28].mxu1 %vm936_vm2, %v931_v26  ;;  %13535 = vmatprep.mubr.msk.bf16.mxu0 %vm15259_vm0, %v15258_v1 }
 0x139   :  { %13541 = vmatprep.mubr.msk.bf16.mxu1 %vm15259_vm0, %v15258_v1  ;;  %13534 = vmatpush3.bf16.msra.mxu0 %v1186_v41  ;;  %v1232_v42 = vsel %vm1184_vm3, %v1178_v39, 0 }
 0x13a   :  { %13545 = vmatprep.subr.bf16.mxu0 %v15258_v1  ;;  %13540 = vmatpush3.bf16.msra.mxu1 %v1232_v42  ;;  %v15612_v43 = vpop.f32.mrb[20].mxu0 }
 0x13b   :  { %13551 = vmatprep.subr.bf16.mxu1 %v15258_v1  ;;  %v13499_v47 = vpop.f32.mrb[21].mxu0 }
 0x13c   :  { %v15614_v44 = vpop.f32.mrb[20].mxu1  ;;  %v873_v49 = vpop.f32.mrb[22].mxu0 }
 0x13d   :  { %v13507_v48 = vpop.f32.mrb[21].mxu1  ;;  %v13500_v51 = vpop.f32.mrb[23].mxu0 }
 0x13e   :  { %v925_v50 = vpop.f32.mrb[22].mxu1 }
 0x13f   :  { %v13508_v52 = vpop.f32.mrb[23].mxu1 }
 0x202   :  { %v977_v62 = vpop.f32.mrb[24].mxu0 }
 0x203   :  { %v1121_v0 = vmul.f32 0.35355338, %v977_v62  ;;  %v1023_v3 = vpop.f32.mrb[24].mxu1  ;;  %v13513_v4 = vpop.f32.mrb[25].mxu0 }
 0x204   :  { %v1122_v5 = vmul.f32 0.35355338, %v1023_v3  ;;  %v13519_v6 = vpop.f32.mrb[25].mxu1  ;;  %v980_v8 = vpop.f32.mrb[26].mxu0 }
 0x205   :  { %v1026_v9 = vpop.f32.mrb[26].mxu1  ;;  %v13514_v10 = vpop.f32.mrb[27].mxu0  ;;  %v1125_v11 = vadd.f32 %v1121_v0, %v15627_v61 }
 0x206   :  { %v13520_v12 = vpop.f32.mrb[27].mxu1  ;;  %v1126_v14 = vadd.f32 %v1122_v5, %v15627_v61  ;;  %v15642_v5 = vld [vmem:[%s15321_s19 + $0x2] ss:$0 sm:$0xff]  ;;  %v15647_v9 = vld [vmem:[%s15321_s19 + $0x3] ss:$0 sm:$0xff] }
 0x207   :  { %v1129_v13 = vsel %vm936_vm2, %v1125_v11, -inf  ;;  %v871_v6 = vadd.f32 %v15642_v5, %v15612_v43  ;;  %v923_v12 = vadd.f32 %v15647_v9, %v15614_v44  ;;  %v223_v44 = vld [vmem:[%s15326_s24] sm:$0xf] }
 0x208   :  { %1130 = vmax.xlane.f32.xlu0 %v1129_v13  ;;  %v1132_v21 = vsel %vm936_vm2, %v1126_v14, -inf }
 0x20a   :  { %v1069_v15 = vpop.f32.mrb[28].mxu0 }
 0x20b   :  { %v1123_v16 = vmul.f32 0.35355338, %v1069_v15  ;;  %v1115_v18 = vpop.f32.mrb[28].mxu1  ;;  %v13525_v19 = vpop.f32.mrb[29].mxu0 }
 0x20c   :  { %v1124_v22 = vmul.f32 0.35355338, %v1115_v18  ;;  %v13531_v23 = vpop.f32.mrb[29].mxu1  ;;  %1133 = vmax.xlane.f32.xlu0 %v1132_v21  ;;  %v1072_v24 = vpop.f32.mrb[30].mxu0  ;;  %v1180_v18 = vpack.c.bf16 %v923_v12, %v923_v12 }
 0x20d   :  { %v1118_v25 = vpop.f32.mrb[30].mxu1  ;;  %v13526_v26 = vpop.f32.mrb[31].mxu0  ;;  %v1127_v28 = vadd.f32 %v1123_v16, %v15627_v61 }
 0x20e   :  { %v13532_v30 = vpop.f32.mrb[31].mxu1  ;;  %v1128_v32 = vadd.f32 %v1124_v22, %v15627_v61  ;;  %v1324_v24 = vsel %vm1184_vm3, %v1180_v18, 0  ;;  %v1374_v26 = vsel %vm1184_vm3, %v223_v44, 0  ;;  %v14870_v18 = vld [vmem:[%s15296_s25 + $0x18] sm:$0xff]   ;;  %v14875_v44 = vld [vmem:[%s15306_s3] sm:$0xff]  }
 0x20f   :  { %v1135_v31 = vsel %vm936_vm2, %v1127_v28, -inf }
 0x210   :  { %1136 = vmax.xlane.f32.xlu1 %v1135_v31  ;;  %v1138_v33 = vsel %vm936_vm2, %v1128_v32, -inf }
 0x214   :  { %1139 = vmax.xlane.f32.xlu1 %v1138_v33 }
 0x295   :  { %v1131_v34 = vpop.xlane.xlu0 %1130 }
 0x296   :  { %v1141_v35 = vsub.f32 %v1125_v11, %v1131_v34  ;;  %v1179_v11 = vpack.c.bf16 %v871_v6, %v871_v6  ;;  %v225_v34 = vld [vmem:[%s15326_s24 + $0x8] sm:$0xf] }
 0x298   :  { %v1145_v36 = vmul.f32 1.442695, %v1141_v35  ;;  %v1278_v43 = vsel %vm1184_vm3, %v1179_v11, 0  ;;  %v14869_v11 = vld [vmem:[%s15296_s25 + $0x10] sm:$0xff]  }
 0x299   :  { %v1134_v37 = vpop.xlane.xlu0 %1133 }
 0x29a   :  { %15049 = vpow2.f32 %v1145_v36  ;;  %v1142_v38 = vsub.f32 %v1126_v14, %v1134_v37 }
 0x29c   :  { %v1147_v39 = vmul.f32 1.442695, %v1142_v38  ;;  %v1466_v38 = vsel %vm1184_vm3, %v225_v34, 0  ;;  %v14885_v34 = vld [vmem:[%s15316_s14 + $0x8] sm:$0xff]  }
 0x29d   :  { %v1137_v40 = vpop.xlane.xlu1 %1136 }
 0x29e   :  { %15051 = vpow2.f32 %v1147_v39  ;;  %v1143_v41 = vsub.f32 %v1127_v28, %v1137_v40  ;;  %v226_v40 = vld [vmem:[%s15326_s24 + $0xc] sm:$0xf] }
 0x2a0   :  { %v1149_v42 = vmul.f32 1.442695, %v1143_v41 }
 0x2a1   :  { %v1140_v47 = vpop.xlane.xlu1 %1139 }
 0x2a2   :  { %15053 = vpow2.f32 %v1149_v42  ;;  %v1144_v48 = vsub.f32 %v1128_v32, %v1140_v47  ;;  %v224_v32 = vld [vmem:[%s15326_s24 + $0x4] sm:$0xf] }
 0x2a3   :  { %v1420_v33 = vsel %vm1184_vm3, %v224_v32, 0  ;;  %v14883_v32 = vld [vmem:[%s15316_s14] sm:$0xff]  }
 0x2a4   :  { %v15050_v49 = vpop.eup %15049  ;;  %v1151_v50 = vmul.f32 1.442695, %v1144_v48 }
 0x2a5   :  { %v1153_v51 = vsel %vm936_vm2, %v15050_v49, 0.0 }
 0x2a6   :  { %15055 = vpow2.f32 %v1151_v50  ;;  %1154 = vadd.xlane.f32.xlu0 %v1153_v51 }
 0x2a8   :  { %v15052_v52 = vpop.eup %15051 }
 0x2a9   :  { %v1156_v53 = vsel %vm936_vm2, %v15052_v52, 0.0 }
 0x2aa   :  { %1157 = vadd.xlane.f32.xlu1 %v1156_v53  ;;  %v14867_v53 = vld [vmem:[%s15296_s25] sm:$0xff]  }
 0x2ac   :  { %v15054_v55 = vpop.eup %15053 }
 0x2ad   :  { %v1159_v58 = vsel %vm936_vm2, %v15054_v55, 0.0 }
 0x2ae   :  { %1160 = vadd.xlane.f32.xlu0 %v1159_v58  ;;  %v143_v58 = vld [vmem:[%s15291_s21 + $0x8] sm:$0xff]  ;;  %s17382_s21 = sld [smem:[#allocation8_spill]] }
 0x2b0   :  { %v15056_v62 = vpop.eup %15055 }
 0x2b1   :  { %v1162_v0 = vsel %vm936_vm2, %v15056_v62, 0.0 }
 0x2b2   :  { %1163 = vadd.xlane.f32.xlu1 %v1162_v0 }
 0x333   :  { %v1155_v3 = vpop.xlane.xlu0 %1154 }
 0x334   :  { %15057 = vrcp.f32 %v1155_v3 }
 0x337   :  { %v1158_v4 = vpop.xlane.xlu1 %1157 }
 0x338   :  { %15059 = vrcp.f32 %v1158_v4 }
 0x33b   :  { %v1161_v8 = vpop.xlane.xlu0 %1160 }
 0x33c   :  { %15061 = vrcp.f32 %v1161_v8 }
 0x33e   :  { %v15058_v10 = vpop.eup %15057 }
 0x33f   :  { %v1169_v13 = vmul.f32 %v15058_v10, %v15050_v49  ;;  %v1164_v14 = vpop.xlane.xlu1 %1163  ;;  %v1512_v49 = vsel %vm1184_vm3, %v226_v40, 0  ;;  %v14868_v10 = vld [vmem:[%s15296_s25 + $0x8] sm:$0xff]  }
 0x340   :  { %15063 = vrcp.f32 %v1164_v14 }
 0x341   :  { %v1173_v15 = vpack.c.bf16 %v1169_v13, %v1169_v13 }
 0x342   :  { %v15060_v16 = vpop.eup %15059 }
 0x343   :  { %v1170_v19 = vmul.f32 %v15060_v16, %v15052_v52  ;;  %13536 = vmatmul.mubr.msk.bf16.vlgmr.msra.gmra.mrb[32].mxu0 %vm936_vm2, %v1173_v15 }
 0x344   :  { %13546 = vmatpush3.bf16.msra.mxu0 %v1278_v43  ;;  %13547 = vmatprep.mubr.msk.bf16.mxu0 %vm15259_vm0, %v15258_v1  ;;  %v14872_v43 = vld [vmem:[%s15296_s25 + $0x28] sm:$0xff]  }
 0x345   :  { %v1174_v21 = vpack.c.bf16 %v1170_v19, %v1170_v19  ;;  %13557 = vmatprep.subr.bf16.mxu0 %v15258_v1  ;;  %v14871_v19 = vld [vmem:[%s15296_s25 + $0x20] sm:$0xff]  }
 0x346   :  { %v15062_v22 = vpop.eup %15061 }
 0x347   :  { %v1171_v23 = vmul.f32 %v15062_v22, %v15054_v55  ;;  %13542 = vmatmul.mubr.msk.bf16.vlgmr.msra.gmra.mrb[32].mxu1 %vm936_vm2, %v1174_v21  ;;  %v141_v55 = vld [vmem:[%s15271_s5 + $0x8] sm:$0xff]  ;;  %v14873_v21 = vld [vmem:[%s15296_s25 + $0x30] sm:$0xff]   ;;  %v14874_v22 = vld [vmem:[%s15296_s25 + $0x38] sm:$0xff]   ;;  %s17379_s5 = sld [smem:[#allocation7_spill]] }
 0x348   :  { %13552 = vmatpush3.bf16.msra.mxu1 %v1324_v24  ;;  %13553 = vmatprep.mubr.msk.bf16.mxu1 %vm15259_vm0, %v15258_v1  ;;  %v15689_v6 = vadd.f32 %v143_v58, %v141_v55  ;;  %v14877_v24 = vld [vmem:[%s15306_s3 + $0x10] sm:$0xff]  }
 0x349   :  { %v1175_v25 = vpack.c.bf16 %v1171_v23, %v1171_v23  ;;  %13563 = vmatprep.subr.bf16.mxu1 %v15258_v1  ;;  %v14876_v23 = vld [vmem:[%s15306_s3 + $0x8] sm:$0xff]  }
 0x34a   :  { %v15064_v28 = vpop.eup %15063  ;;  %v15699_v16 = vpack.c.bf16 %v15689_v6, %v15689_v6 }
 0x34b   :  { %v1172_v30 = vmul.f32 %v15064_v28, %v15056_v62  ;;  %13548 = vmatmul.mubr.msk.bf16.vlgmr.msra.gmra.mrb[36].mxu0 %vm936_vm2, %v1175_v25  ;;  %v14878_v25 = vld [vmem:[%s15306_s3 + $0x18] sm:$0xff]   ;;  %v14880_v28 = vld [vmem:[%s15306_s3 + $0x28] sm:$0xff]  }
 0x34c   :  { %13558 = vmatpush3.bf16.msra.mxu0 %v1374_v26  ;;  %13559 = vmatprep.mubr.msk.bf16.mxu0 %vm15259_vm0, %v15258_v1  ;;  %v14879_v26 = vld [vmem:[%s15306_s3 + $0x20] sm:$0xff]  }
 0x34d   :  { %v1176_v31 = vpack.c.bf16 %v1172_v30, %v1172_v30  ;;  %13569 = vmatprep.subr.bf16.mxu0 %v15258_v1  ;;  %v14881_v30 = vld [vmem:[%s15306_s3 + $0x30] sm:$0xff]  }
 0x34f   :  { %13554 = vmatmul.mubr.msk.bf16.vlgmr.msra.gmra.mrb[36].mxu1 %vm936_vm2, %v1176_v31  ;;  %v14882_v31 = vld [vmem:[%s15306_s3 + $0x38] sm:$0xff]  }
 0x350   :  { %13565 = vmatprep.mubr.msk.bf16.mxu1 %vm15259_vm0, %v15258_v1  ;;  %13564 = vmatpush3.bf16.msra.mxu1 %v1420_v33  ;;  %v14884_v33 = vld [vmem:[%s15316_s14 + $0x10] sm:$0xff]  }
 0x351   :  { %13575 = vmatprep.subr.bf16.mxu1 %v15258_v1 }
 0x416   :  { %v1222_v35 = vpop.f32.mrb[32].mxu0 }
 0x417   :  { %v1366_v36 = vpack.c.bf16 %v1222_v35, %v1222_v35  ;;  %v13537_v37 = vpop.f32.mrb[33].mxu0  ;;  %v14886_v35 = vld [vmem:[%s15316_s14 + $0x18] sm:$0xff]  }
 0x418   :  { %v1225_v39 = vpop.f32.mrb[34].mxu0  ;;  %v14888_v37 = vld [vmem:[%s15316_s14 + $0x28] sm:$0xff]  }
 0x419   :  { %v13538_v41 = vpop.f32.mrb[35].mxu0  ;;  %13560 = vmatmul.mubr.msk.bf16.vlgmr.msra.gmra.mrb[40].mxu0 %vm936_vm2, %v1366_v36  ;;  %v14887_v36 = vld [vmem:[%s15316_s14 + $0x20] sm:$0xff]   ;;  %v14890_v39 = vld [vmem:[%s15316_s14 + $0x38] sm:$0xff]  }
 0x41a   :  { %v1268_v42 = vpop.f32.mrb[32].mxu1  ;;  %13570 = vmatpush3.bf16.msra.mxu0 %v1466_v38  ;;  %13571 = vmatprep.mubr.msk.bf16.mxu0 %vm15259_vm0, %v15258_v1  ;;  %v14889_v38 = vld [vmem:[%s15316_s14 + $0x30] sm:$0xff]  }
 0x41b   :  { %v1367_v47 = vpack.c.bf16 %v1268_v42, %v1268_v42  ;;  %v13543_v48 = vpop.f32.mrb[33].mxu1  ;;  %13581 = vmatprep.subr.bf16.mxu0 %v15258_v1 }
 0x41c   :  { %v1271_v50 = vpop.f32.mrb[34].mxu1 }
 0x41d   :  { %v13544_v51 = vpop.f32.mrb[35].mxu1  ;;  %13566 = vmatmul.mubr.msk.bf16.vlgmr.msra.gmra.mrb[40].mxu1 %vm936_vm2, %v1367_v47 }
 0x41e   :  { %v1314_v52 = vpop.f32.mrb[36].mxu0  ;;  %13576 = vmatpush3.bf16.msra.mxu1 %v1512_v49  ;;  %13577 = vmatprep.mubr.msk.bf16.mxu1 %vm15259_vm0, %v15258_v1 }
 0x41f   :  { %v1368_v62 = vpack.c.bf16 %v1314_v52, %v1314_v52  ;;  %v13549_v0 = vpop.f32.mrb[37].mxu0  ;;  %13589 = vmatprep.subr.bf16.mxu1 %v15258_v1 }
 0x420   :  { %v1317_v3 = vpop.f32.mrb[38].mxu0 }
 0x421   :  { %v13550_v4 = vpop.f32.mrb[39].mxu0  ;;  %13572 = vmatmul.mubr.msk.bf16.vlgmr.msra.gmra.mrb[44].mxu0 %vm936_vm2, %v1368_v62 }
 0x422   :  { %v1360_v8 = vpop.f32.mrb[36].mxu1  ;;  %13582 = vmatpush3.bf16.msra.mxu0 %v14867_v53  ;;  %13585 = vmatprep.mubr.msk.bf16.mxu0 %vm15259_vm0, %v15258_v1 }
 0x423   :  { %v1369_v12 = vpack.c.bf16 %v1360_v8, %v1360_v8  ;;  %v13555_v13 = vpop.f32.mrb[37].mxu1  ;;  %13583 = vmatprep.subr.bf16.mxu0 %v15258_v1 }
 0x424   :  { %v1363_v14 = vpop.f32.mrb[38].mxu1 }
 0x425   :  { %v13556_v15 = vpop.f32.mrb[39].mxu1  ;;  %13578 = vmatmul.mubr.msk.bf16.vlgmr.msra.gmra.mrb[44].mxu1 %vm936_vm2, %v1369_v12 }
 0x426   :  { %13584 = vmatpush3.bf16.msra.mxu0 %v14868_v10  ;;  %13590 = vmatpush3.bf16.msra.mxu1 %v14869_v11 }
 0x427   :  { %13591 = vmatprep.subr.bf16.mxu1 %v15258_v1  ;;  %13597 = vmatprep.subr.bf16.mxu0 %v15258_v1 }
 0x428   :  { %13593 = vmatprep.mubr.msk.bf16.mxu1 %vm15259_vm0, %v15258_v1 }
 0x429   :  { %13586 = vmatmul.mubr.msk.bf16.vlgmr.msra.gmra.mrb[48].mxu0 %vm264_vm1, %v15699_v16 }
 0x42a   :  { %13592 = vmatpush3.bf16.msra.mxu1 %v14870_v18  ;;  %13598 = vmatpush3.bf16.msra.mxu0 %v14871_v19 }
 0x42b   :  { %13599 = vmatprep.subr.bf16.mxu0 %v15258_v1  ;;  %13605 = vmatprep.subr.bf16.mxu1 %v15258_v1 }
 0x42c   :  { %13601 = vmatprep.mubr.msk.bf16.mxu0 %vm15259_vm0, %v15258_v1 }
 0x42d   :  { %13594 = vmatmul.mubr.msk.bf16.vlgmr.msra.gmra.mrb[48].mxu1 %vm264_vm1, %v15699_v16 }
 0x42e   :  { %13600 = vmatpush3.bf16.msra.mxu0 %v14872_v43  ;;  %13606 = vmatpush3.bf16.msra.mxu1 %v14873_v21 }
 0x42f   :  { %13607 = vmatprep.subr.bf16.mxu1 %v15258_v1  ;;  %13613 = vmatprep.subr.bf16.mxu0 %v15258_v1 }
 0x430   :  { %13609 = vmatprep.mubr.msk.bf16.mxu1 %vm15259_vm0, %v15258_v1 }
 0x431   :  { %13602 = vmatmul.mubr.msk.bf16.vlgmr.msra.gmra.mrb[52].mxu0 %vm264_vm1, %v15699_v16 }
 0x432   :  { %13608 = vmatpush3.bf16.msra.mxu1 %v14874_v22  ;;  %13614 = vmatpush3.bf16.msra.mxu0 %v14875_v44 }
 0x433   :  { %13615 = vmatprep.subr.bf16.mxu0 %v15258_v1  ;;  %13621 = vmatprep.subr.bf16.mxu1 %v15258_v1 }
 0x434   :  { %13617 = vmatprep.mubr.msk.bf16.mxu0 %vm15259_vm0, %v15258_v1 }
 0x435   :  { %13610 = vmatmul.mubr.msk.bf16.vlgmr.msra.gmra.mrb[52].mxu1 %vm264_vm1, %v15699_v16 }
 0x436   :  { %13616 = vmatpush3.bf16.msra.mxu0 %v14876_v23  ;;  %13622 = vmatpush3.bf16.msra.mxu1 %v14877_v24 }
 0x437   :  { %13623 = vmatprep.subr.bf16.mxu1 %v15258_v1  ;;  %13629 = vmatprep.subr.bf16.mxu0 %v15258_v1 }
 0x438   :  { %13625 = vmatprep.mubr.msk.bf16.mxu1 %vm15259_vm0, %v15258_v1 }
 0x439   :  { %13618 = vmatmul.mubr.msk.bf16.vlgmr.msra.gmra.mrb[56].mxu0 %vm264_vm1, %v15699_v16 }
 0x43a   :  { %13624 = vmatpush3.bf16.msra.mxu1 %v14878_v25  ;;  %13630 = vmatpush3.bf16.msra.mxu0 %v14879_v26 }
 0x43b   :  { %13631 = vmatprep.subr.bf16.mxu0 %v15258_v1  ;;  %13637 = vmatprep.subr.bf16.mxu1 %v15258_v1 }
 0x43c   :  { %13633 = vmatprep.mubr.msk.bf16.mxu0 %vm15259_vm0, %v15258_v1 }
 0x43d   :  { %13626 = vmatmul.mubr.msk.bf16.vlgmr.msra.gmra.mrb[56].mxu1 %vm264_vm1, %v15699_v16 }
 0x43e   :  { %13632 = vmatpush3.bf16.msra.mxu0 %v14880_v28  ;;  %13638 = vmatpush3.bf16.msra.mxu1 %v14881_v30 }
 0x43f   :  { %13639 = vmatprep.subr.bf16.mxu1 %v15258_v1  ;;  %13641 = vmatprep.mubr.msk.bf16.mxu1 %vm15259_vm0, %v15258_v1 }
 0x440   :  { %13645 = vmatprep.subr.bf16.mxu0 %v15258_v1 }
 0x441   :  { %13634 = vmatmul.mubr.msk.bf16.vlgmr.msra.gmra.mrb[60].mxu0 %vm264_vm1, %v15699_v16 }
 0x442   :  { %13640 = vmatpush3.bf16.msra.mxu1 %v14882_v31  ;;  %13649 = vmatprep.mubr.msk.bf16.mxu0 %vm15259_vm0, %v15258_v1 }
 0x443   :  { %13653 = vmatprep.subr.bf16.mxu1 %v15258_v1  ;;  %13646 = vmatpush3.bf16.msra.mxu0 %v14883_v32 }
 0x444   :  { %13647 = vmatprep.subr.bf16.mxu0 %v15258_v1 }
 0x445   :  { %13642 = vmatmul.mubr.msk.bf16.vlgmr.msra.gmra.mrb[60].mxu1 %vm264_vm1, %v15699_v16 }
 0x446   :  { %13657 = vmatprep.mubr.msk.bf16.mxu1 %vm15259_vm0, %v15258_v1  ;;  %13654 = vmatpush3.bf16.msra.mxu1 %v14884_v33 }
 0x447   :  { %13655 = vmatprep.subr.bf16.mxu1 %v15258_v1  ;;  %13648 = vmatpush3.bf16.msra.mxu0 %v14885_v34 }
 0x448   :  { %13661 = vmatprep.subr.bf16.mxu0 %v15258_v1 }
 0x44a   :  { %13656 = vmatpush3.bf16.msra.mxu1 %v14886_v35  ;;  %13650 = vmatmul.mubr.msk.bf16.vlgmr.msra.gmra.mrb[64].mxu0 %vm264_vm1, %v15699_v16 }
 0x44b   :  { %13669 = vmatprep.subr.bf16.mxu1 %v15258_v1  ;;  %13662 = vmatpush3.bf16.msra.mxu0 %v14887_v36 }
 0x44c   :  { %13665 = vmatprep.mubr.msk.bf16.mxu0 %vm15259_vm0, %v15258_v1  ;;  %13663 = vmatprep.subr.bf16.mxu0 %v15258_v1 }
 0x44d   :  { %13658 = vmatmul.mubr.msk.bf16.vlgmr.msra.gmra.mrb[64].mxu1 %vm264_vm1, %v15699_v16 }
 0x44e   :  { %13673 = vmatprep.mubr.msk.bf16.mxu1 %vm15259_vm0, %v15258_v1  ;;  %13670 = vmatpush3.bf16.msra.mxu1 %v14889_v38 }
 0x44f   :  { %13664 = vmatpush3.bf16.msra.mxu0 %v14888_v37  ;;  %13671 = vmatprep.subr.bf16.mxu1 %v15258_v1 }
 0x450   :  { %13677 = vmatprep.subr.bf16.mxu0 %v15258_v1 }
 0x452   :  { %13666 = vmatmul.mubr.msk.bf16.vlgmr.msra.gmra.mrb[68].mxu0 %vm264_vm1, %v15699_v16  ;;  %13672 = vmatpush3.bf16.msra.mxu1 %v14890_v39 }
 0x453   :  { %13679 = vmatprep.mubr.msk.bf16.mxu0 %vm15259_vm0, %v15258_v1  ;;  %13683 = vmatprep.subr.bf16.mxu1 %v15258_v1 }
 0x455   :  { %13674 = vmatmul.mubr.msk.bf16.vlgmr.msra.gmra.mrb[68].mxu1 %vm264_vm1, %v15699_v16 }
 0x456   :  { %13685 = vmatprep.mubr.msk.bf16.mxu1 %vm15259_vm0, %v15258_v1 }
 0x4ec   :  { %v1410_v40 = vpop.f32.mrb[40].mxu0 }
 0x4ed   :  { %v13561_v41 = vpop.f32.mrb[41].mxu0  ;;  %v1554_v49 = vsel %vm264_vm1, %v1410_v40, 0.0 }
 0x4ee   :  { %v1413_v42 = vpop.f32.mrb[42].mxu0 }
 0x4ef   :  { %v13562_v47 = vpop.f32.mrb[43].mxu0 }
 0x4f0   :  { %v1456_v48 = vpop.f32.mrb[40].mxu1 }
 0x4f1   :  { %v1555_v50 = vsel %vm264_vm1, %v1456_v48, 0.0  ;;  %v13567_v51 = vpop.f32.mrb[41].mxu1 }
 0x4f2   :  { %v1556_v52 = vadd.f32 %v1555_v50, %v1554_v49  ;;  %v1459_v53 = vpop.f32.mrb[42].mxu1 }
 0x4f3   :  { %v13568_v55 = vpop.f32.mrb[43].mxu1 }
 0x4f4   :  { %v1502_v58 = vpop.f32.mrb[44].mxu0 }
 0x4f5   :  { %v1557_v62 = vsel %vm264_vm1, %v1502_v58, 0.0  ;;  %v13573_v0 = vpop.f32.mrb[45].mxu0 }
 0x4f6   :  { %v1558_v3 = vadd.f32 %v1557_v62, %v1556_v52  ;;  %v1505_v4 = vpop.f32.mrb[46].mxu0 }
 0x4f7   :  { %v13574_v8 = vpop.f32.mrb[47].mxu0 }
 0x4f8   :  { %v1548_v10 = vpop.f32.mrb[44].mxu1 }
 0x4f9   :  { %v1559_v11 = vsel %vm264_vm1, %v1548_v10, 0.0  ;;  %v13579_v12 = vpop.f32.mrb[45].mxu1 }
 0x4fa   :  { %v15799_v13 = vadd.f32 %v1559_v11, %v1558_v3  ;;  %v1551_v14 = vpop.f32.mrb[46].mxu1 }
 0x4fb   :  { %v13580_v15 = vpop.f32.mrb[47].mxu1 }
 0x4fc   :  { %v1707_v16 = vpop.f32.mrb[48].mxu0 }
 0x4fd   :  { %v13587_v18 = vpop.f32.mrb[49].mxu0  ;;  %v1708_v49 = vadd.f32 %v15557_v57, %v1707_v16 }
 0x4fe   :  { %v1710_v19 = vpop.f32.mrb[50].mxu0 }
 0x4ff   :  { %v13588_v43 = vpop.f32.mrb[51].mxu0 }
 0x500   :  { %v1759_v21 = vpop.f32.mrb[48].mxu1 }
 0x501   :  { %v13595_v22 = vpop.f32.mrb[49].mxu1  ;;  %v1760_v62 = vadd.f32 %v15560_v60, %v1759_v21 }
 0x502   :  { %v1762_v44 = vpop.f32.mrb[50].mxu1 }
 0x503   :  { %v13596_v23 = vpop.f32.mrb[51].mxu1  ;;  %v2334_v11 = vpack.c.bf16 %v1760_v62, %v1760_v62 }
 0x504   :  { %v1811_v24 = vpop.f32.mrb[52].mxu0 }
 0x505   :  { %v13603_v25 = vpop.f32.mrb[53].mxu0  ;;  %v1812_v60 = vadd.f32 %v15577_v17, %v1811_v24 }
 0x506   :  { %v1814_v26 = vpop.f32.mrb[54].mxu0 }
 0x507   :  { %v13604_v28 = vpop.f32.mrb[55].mxu0  ;;  %v2335_v15 = vpack.c.bf16 %v1812_v60, %v1812_v60 }
 0x508   :  { %v1863_v30 = vpop.f32.mrb[52].mxu1 }
 0x509   :  { %v13611_v31 = vpop.f32.mrb[53].mxu1  ;;  %v1864_v16 = vadd.f32 %v15580_v20, %v1863_v30 }
 0x50a   :  { %v1866_v32 = vpop.f32.mrb[54].mxu1 }
 0x50b   :  { %v13612_v33 = vpop.f32.mrb[55].mxu1  ;;  %v2336_v17 = vpack.c.bf16 %v1864_v16, %v1864_v16 }
 0x50c   :  { %v1939_v34 = vpop.f32.mrb[56].mxu0 }
 0x50d   :  { %v1940_v35 = vadd.f32 %v15549_v45, %v1939_v34  ;;  %v13619_v36 = vpop.f32.mrb[57].mxu0 }
 0x50e   :  { %v1942_v37 = vpop.f32.mrb[58].mxu0 }
 0x50f   :  { %v2337_v38 = vpack.c.bf16 %v1940_v35, %v1940_v35  ;;  %v13620_v39 = vpop.f32.mrb[59].mxu0 }
 0x510   :  { %v1991_v40 = vpop.f32.mrb[56].mxu1 }
 0x511   :  { %v1992_v41 = vadd.f32 %v15552_v46, %v1991_v40  ;;  %v13627_v42 = vpop.f32.mrb[57].mxu1  ;;  %v2345_v47 = vsel %vm936_vm2, %v2337_v38, 0  ;;  %v2333_v46 = vpack.c.bf16 %v1708_v49, %v1708_v49  ;;  %v157_v38 = vsub.s32 1, %v15616_v54 }
 0x512   :  { %v1994_v48 = vpop.f32.mrb[58].mxu1  ;;  %13678 = vmatpush3.bf16.xpose.msra.mxu0 %v2345_v47 }
 0x513   :  { %v2338_v50 = vpack.c.bf16 %v1992_v41, %v1992_v41  ;;  %v13628_v51 = vpop.f32.mrb[59].mxu1  ;;  %13689 = vmatprep.subr.bf16.mxu0 %v15258_v1  ;;  %v158_v39 = vrot.slane %v15620_v56, %v157_v38 }
 0x514   :  { %v2043_v52 = vpop.f32.mrb[60].mxu0 }
 0x515   :  { %v2044_v45 = vadd.f32 %v15565_v63, %v2043_v52  ;;  %v13635_v53 = vpop.f32.mrb[61].mxu0  ;;  %v2391_v55 = vsel %vm936_vm2, %v2338_v50, 0  ;;  %v15842_v40 = vadd.f32 %v158_v39, %v15624_v59 }
 0x516   :  { %v2046_v58 = vpop.f32.mrb[62].mxu0  ;;  %13684 = vmatpush3.bf16.xpose.msra.mxu1 %v2391_v55 }
 0x517   :  { %v2339_v0 = vpack.c.bf16 %v2044_v45, %v2044_v45  ;;  %v13636_v3 = vpop.f32.mrb[63].mxu0  ;;  %13695 = vmatprep.subr.bf16.mxu1 %v15258_v1 }
 0x518   :  { %v2095_v57 = vpop.f32.mrb[60].mxu1 }
 0x519   :  { %v2096_v4 = vadd.f32 %v15569_v2, %v2095_v57  ;;  %v13643_v8 = vpop.f32.mrb[61].mxu1  ;;  %13680 = vmatmul.mubr.msk.bf16.vlgmr.msra.gmra.mrb[72].mxu0 %vm936_vm2, %v2333_v46  ;;  %v2437_v63 = vsel %vm936_vm2, %v2339_v0, 0 }
 0x51a   :  { %v2098_v10 = vpop.f32.mrb[62].mxu1  ;;  %13690 = vmatpush3.bf16.xpose.msra.mxu0 %v2437_v63  ;;  %13691 = vmatprep.mubr.msk.bf16.mxu0 %vm15259_vm0, %v15258_v1 }
 0x51b   :  { %v2340_v12 = vpack.c.bf16 %v2096_v4, %v2096_v4  ;;  %v13644_v14 = vpop.f32.mrb[63].mxu1  ;;  %13701 = vmatprep.subr.bf16.mxu0 %v15258_v1 }
 0x51d   :  { %13686 = vmatmul.mubr.msk.bf16.vlgmr.msra.gmra.mrb[72].mxu1 %vm936_vm2, %v2334_v11  ;;  %v2483_v2 = vsel %vm936_vm2, %v2340_v12, 0  ;;  %v2171_v18 = vpop.f32.mrb[64].mxu0 }
 0x51e   :  { %13696 = vmatpush3.bf16.xpose.msra.mxu1 %v2483_v2  ;;  %13697 = vmatprep.mubr.msk.bf16.mxu1 %vm15259_vm0, %v15258_v1  ;;  %v2172_v19 = vadd.f32 %v15601_v27, %v2171_v18  ;;  %v13651_v43 = vpop.f32.mrb[65].mxu0 }
 0x51f   :  { %13707 = vmatprep.subr.bf16.mxu1 %v15258_v1  ;;  %v2174_v21 = vpop.f32.mrb[66].mxu0 }
 0x520   :  { %v2223_v22 = vpop.f32.mrb[64].mxu1  ;;  %v2581_v20 = vpack.c.bf16 %v2172_v19, %v2172_v19  ;;  %v13652_v23 = vpop.f32.mrb[67].mxu0 }
 0x521   :  { %13692 = vmatmul.mubr.msk.bf16.vlgmr.msra.gmra.mrb[76].mxu0 %vm936_vm2, %v2335_v15  ;;  %v2224_v44 = vadd.f32 %v15604_v29, %v2223_v22  ;;  %v13659_v24 = vpop.f32.mrb[65].mxu1 }
 0x522   :  { %13703 = vmatprep.mubr.msk.bf16.mxu0 %vm15259_vm0, %v15258_v1  ;;  %v2226_v25 = vpop.f32.mrb[66].mxu1  ;;  %v2589_v30 = vsel %vm1184_vm3, %v2581_v20, 0 }
 0x523   :  { %v2582_v26 = vpack.c.bf16 %v2224_v44, %v2224_v44  ;;  %v13660_v28 = vpop.f32.mrb[67].mxu1  ;;  %13702 = vmatpush3.bf16.msra.mxu0 %v2589_v30 }
 0x524   :  { %13713 = vmatprep.subr.bf16.mxu0 %v15258_v1 }
 0x525   :  { %13698 = vmatmul.mubr.msk.bf16.vlgmr.msra.gmra.mrb[76].mxu1 %vm936_vm2, %v2336_v17  ;;  %v2635_v31 = vsel %vm1184_vm3, %v2582_v26, 0  ;;  %v15834_v27 = vpop.f32.mrb[68].mxu0  ;;  %v15854_v26 = vld [vmem:[%s15331_s30] ss:$0 sm:$0xff] }
 0x526   :  { %13709 = vmatprep.mubr.msk.bf16.mxu1 %vm15259_vm0, %v15258_v1  ;;  %13708 = vmatpush3.bf16.msra.mxu1 %v2635_v31  ;;  %v13667_v32 = vpop.f32.mrb[69].mxu0  ;;  %v1567_v31 = vadd.f32 %v15854_v26, %v15799_v13  ;;  %v2276_v13 = vadd.f32 %v15642_v5, %v15834_v27 }
 0x527   :  { %13719 = vmatprep.subr.bf16.mxu1 %v15258_v1  ;;  %v2278_v33 = vpop.f32.mrb[70].mxu0 }
 0x528   :  { %v13668_v29 = vpop.f32.mrb[71].mxu0  ;;  %v15837_v34 = vpop.f32.mrb[68].mxu1 }
 0x529   :  { %v13675_v35 = vpop.f32.mrb[69].mxu1  ;;  %v2971_v29 = vadd.f32 %v1567_v31, %v15452_v7  ;;  %v2328_v7 = vadd.f32 %v15647_v9, %v15837_v34  ;;  %v14891_v31 = vld [vmem:[%s15336_s6] sm:$0xff]  }
 0x52a   :  { %v2330_v36 = vpop.f32.mrb[70].mxu1 }
 0x52b   :  { %v13676_v37 = vpop.f32.mrb[71].mxu1 }
 0x52c   :  { %v2975_v37 = vsel %vm264_vm1, %v2971_v29, 0.0 }
 0x5ec   :  { %v2381_v41 = vpop.f32.mrb[72].mxu0 }
 0x5ed   :  { %v2525_v42 = vmul.f32 0.35355338, %v2381_v41  ;;  %v13681_v47 = vpop.f32.mrb[73].mxu0 }
 0x5ee   :  { %v2384_v48 = vpop.f32.mrb[74].mxu0  ;;  %v2583_v47 = vpack.c.bf16 %v2276_v13, %v2276_v13  ;;  %v14893_v13 = vld [vmem:[%s15336_s6 + $0x10] sm:$0xff]  }
 0x5ef   :  { %v13682_v49 = vpop.f32.mrb[75].mxu0  ;;  %v2529_v50 = vadd.f32 %v2525_v42, %v15842_v40 }
 0x5f0   :  { %v2427_v51 = vpop.f32.mrb[72].mxu1  ;;  %v2681_v5 = vsel %vm1184_vm3, %v2583_v47, 0 }
 0x5f1   :  { %v2526_v52 = vmul.f32 0.35355338, %v2427_v51  ;;  %v13687_v45 = vpop.f32.mrb[73].mxu1  ;;  %v2533_v53 = vsel %vm936_vm2, %v2529_v50, -inf }
 0x5f2   :  { %v2430_v55 = vpop.f32.mrb[74].mxu1  ;;  %2534 = vmax.xlane.f32.xlu0 %v2533_v53 }
 0x5f3   :  { %v13688_v54 = vpop.f32.mrb[75].mxu1  ;;  %v2530_v56 = vadd.f32 %v2526_v52, %v15842_v40  ;;  %v2584_v55 = vpack.c.bf16 %v2328_v7, %v2328_v7 }
 0x5f4   :  { %v2473_v58 = vpop.f32.mrb[76].mxu0 }
 0x5f5   :  { %v2527_v59 = vmul.f32 0.35355338, %v2473_v58  ;;  %v13693_v46 = vpop.f32.mrb[77].mxu0  ;;  %v2536_v62 = vsel %vm936_vm2, %v2530_v56, -inf }
 0x5f6   :  { %2537 = vmax.xlane.f32.xlu1 %v2536_v62  ;;  %v2476_v0 = vpop.f32.mrb[78].mxu0 }
 0x5f7   :  { %v13694_v3 = vpop.f32.mrb[79].mxu0  ;;  %v2531_v57 = vadd.f32 %v2527_v59, %v15842_v40  ;;  %v2727_v59 = vsel %vm1184_vm3, %v2584_v55, 0  ;;  %v14899_v55 = vld [vmem:[%s17379_s5] sm:$0xff]  }
 0x5f8   :  { %v2519_v4 = vpop.f32.mrb[76].mxu1 }
 0x5f9   :  { %v2528_v8 = vmul.f32 0.35355338, %v2519_v4  ;;  %v13699_v63 = vpop.f32.mrb[77].mxu1  ;;  %v2539_v10 = vsel %vm936_vm2, %v2531_v57, -inf }
 0x5fa   :  { %v2522_v11 = vpop.f32.mrb[78].mxu1  ;;  %2540 = vmax.xlane.f32.xlu0 %v2539_v10 }
 0x5fb   :  { %v13700_v60 = vpop.f32.mrb[79].mxu1  ;;  %v2532_v12 = vadd.f32 %v2528_v8, %v15842_v40  ;;  %v1630_v8 = vld [vmem:[%s15326_s24 + $0x4] sm:$0xf] }
 0x5fc   :  { %v2823_v63 = vsel %vm1184_vm3, %v1630_v8, 0  ;;  %v14912_v8 = vld [vmem:[%s17381_s17 + $0x28] sm:$0xff]  }
 0x5fd   :  { %v2542_v14 = vsel %vm936_vm2, %v2532_v12, -inf }
 0x5fe   :  { %2543 = vmax.xlane.f32.xlu1 %v2542_v14 }
 0x67f   :  { %v2535_v2 = vpop.xlane.xlu0 %2534 }
 0x680   :  { %v2545_v15 = vsub.f32 %v2529_v50, %v2535_v2 }
 0x682   :  { %v2549_v16 = vmul.f32 1.442695, %v2545_v15 }
 0x683   :  { %v2538_v17 = vpop.xlane.xlu1 %2537 }
 0x684   :  { %15065 = vpow2.f32 %v2549_v16  ;;  %v2546_v18 = vsub.f32 %v2530_v56, %v2538_v17 }
 0x686   :  { %v2551_v19 = vmul.f32 1.442695, %v2546_v18 }
 0x687   :  { %v2541_v43 = vpop.xlane.xlu0 %2540 }
 0x688   :  { %15067 = vpow2.f32 %v2551_v19  ;;  %v2547_v21 = vsub.f32 %v2531_v57, %v2541_v43  ;;  %v1629_v57 = vld [vmem:[%s15326_s24] sm:$0xf]  ;;  %v1632_v19 = vld [vmem:[%s15326_s24 + $0xc] sm:$0xf] }
 0x689   :  { %v2777_v4 = vsel %vm1184_vm3, %v1629_v57, 0  ;;  %v14910_v57 = vld [vmem:[%s17381_s17 + $0x18] sm:$0xff]  }
 0x68a   :  { %v2553_v22 = vmul.f32 1.442695, %v2547_v21 }
 0x68b   :  { %v2544_v20 = vpop.xlane.xlu1 %2543 }
 0x68c   :  { %15069 = vpow2.f32 %v2553_v22  ;;  %v2548_v44 = vsub.f32 %v2532_v12, %v2544_v20  ;;  %v1631_v12 = vld [vmem:[%s15326_s24 + $0x8] sm:$0xf] }
 0x68d   :  { %v2869_v16 = vsel %vm1184_vm3, %v1631_v12, 0 }
 0x68e   :  { %v15066_v23 = vpop.eup %15065  ;;  %v2555_v24 = vmul.f32 1.442695, %v2548_v44 }
 0x68f   :  { %v2557_v25 = vsel %vm936_vm2, %v15066_v23, 0.0 }
 0x690   :  { %15071 = vpow2.f32 %v2555_v24  ;;  %2558 = vadd.xlane.f32.xlu0 %v2557_v25  ;;  %v15899_v24 = vld [vmem:[%s15396_s4] ss:$0 sm:$0xff] }
 0x692   :  { %v15068_v28 = vpop.eup %15067 }
 0x693   :  { %v2560_v30 = vsel %vm936_vm2, %v15068_v28, 0.0 }
 0x694   :  { %2561 = vadd.xlane.f32.xlu1 %v2560_v30 }
 0x696   :  { %v15070_v32 = vpop.eup %15069 }
 0x697   :  { %v2563_v33 = vsel %vm936_vm2, %v15070_v32, 0.0 }
 0x698   :  { %2564 = vadd.xlane.f32.xlu0 %v2563_v33 }
 0x69a   :  { %v15072_v35 = vpop.eup %15071 }
 0x69b   :  { %v2566_v36 = vsel %vm936_vm2, %v15072_v35, 0.0 }
 0x69c   :  { %2567 = vadd.xlane.f32.xlu1 %v2566_v36  ;;  %2976 = vadd.xlane.f32.xlu0 %v2975_v37  ;;  %v15908_v36 = vld [vmem:[%s17378_s0] ss:$0 sm:$0xff] }
 0x71d   :  { %v2559_v38 = vpop.xlane.xlu0 %2558 }
 0x71e   :  { %15073 = vrcp.f32 %v2559_v38 }
 0x721   :  { %v2562_v39 = vpop.xlane.xlu1 %2561 }
 0x722   :  { %15075 = vrcp.f32 %v2562_v39  ;;  %v14892_v39 = vld [vmem:[%s15336_s6 + $0x8] sm:$0xff]  }
 0x725   :  { %v2565_v41 = vpop.xlane.xlu0 %2564 }
 0x726   :  { %15077 = vrcp.f32 %v2565_v41 }
 0x728   :  { %v15074_v42 = vpop.eup %15073 }
 0x729   :  { %v2573_v48 = vmul.f32 %v15074_v42, %v15066_v23  ;;  %v2568_v49 = vpop.xlane.xlu1 %2567  ;;  %v2977_v50 = vpop.xlane.xlu0 %2976  ;;  %v2915_v23 = vsel %vm1184_vm3, %v1632_v19, 0 }
 0x72a   :  { %15079 = vrcp.f32 %v2568_v49  ;;  %v2982_v51 = vmul.f32 0.03125, %v2977_v50  ;;  %v14894_v49 = vld [vmem:[%s15336_s6 + $0x18] sm:$0xff]   ;;  %v14895_v50 = vld [vmem:[%s15336_s6 + $0x20] sm:$0xff]  }
 0x72b   :  { %v2577_v52 = vpack.c.bf16 %v2573_v48, %v2573_v48 }
 0x72c   :  { %v15076_v45 = vpop.eup %15075  ;;  %v2984_v53 = vsub.f32 %v2971_v29, %v2982_v51 }
 0x72d   :  { %v2574_v54 = vmul.f32 %v15076_v45, %v15068_v28  ;;  %13704 = vmatmul.mubr.msk.bf16.vlgmr.msra.gmra.mrb[80].mxu0 %vm936_vm2, %v2577_v52  ;;  %v14896_v52 = vld [vmem:[%s15336_s6 + $0x28] sm:$0xff]   ;;  %v14897_v45 = vld [vmem:[%s15336_s6 + $0x30] sm:$0xff]  }
 0x72e   :  { %13714 = vmatpush3.bf16.msra.mxu0 %v2681_v5  ;;  %v2986_v27 = vmul.f32 %v2984_v53, %v2984_v53  ;;  %13715 = vmatprep.mubr.msk.bf16.mxu0 %vm15259_vm0, %v15258_v1  ;;  %v14901_v5 = vld [vmem:[%s17379_s5 + $0x10] sm:$0xff]  }
 0x72f   :  { %v2578_v9 = vpack.c.bf16 %v2574_v54, %v2574_v54  ;;  %13725 = vmatprep.subr.bf16.mxu0 %v15258_v1  ;;  %v14900_v54 = vld [vmem:[%s17379_s5 + $0x8] sm:$0xff]  }
 0x730   :  { %v15078_v34 = vpop.eup %15077  ;;  %v2988_v56 = vsel %vm264_vm1, %v2986_v27, 0.0  ;;  %v146_v27 = vld [vmem:[%s17380_s13] sm:$0xff] }
 0x731   :  { %v2575_v58 = vmul.f32 %v15078_v34, %v15070_v32  ;;  %13710 = vmatmul.mubr.msk.bf16.vlgmr.msra.gmra.mrb[80].mxu1 %vm936_vm2, %v2578_v9  ;;  %2989 = vadd.xlane.f32.xlu1 %v2988_v56  ;;  %v15951_v9 = vpack.c.bf16 %v146_v27, %v146_v27  ;;  %v14902_v34 = vld [vmem:[%s17379_s5 + $0x18] sm:$0xff]   ;;  %v14903_v56 = vld [vmem:[%s17379_s5 + $0x20] sm:$0xff]  }
 0x732   :  { %13720 = vmatpush3.bf16.msra.mxu1 %v2727_v59  ;;  %13721 = vmatprep.mubr.msk.bf16.mxu1 %vm15259_vm0, %v15258_v1  ;;  %v14905_v59 = vld [vmem:[%s17379_s5 + $0x30] sm:$0xff]  }
 0x733   :  { %v2579_v46 = vpack.c.bf16 %v2575_v58, %v2575_v58  ;;  %13731 = vmatprep.subr.bf16.mxu1 %v15258_v1  ;;  %v14904_v58 = vld [vmem:[%s17379_s5 + $0x28] sm:$0xff]  }
 0x734   :  { %v15080_v62 = vpop.eup %15079 }
 0x735   :  { %v2576_v0 = vmul.f32 %v15080_v62, %v15072_v35  ;;  %13716 = vmatmul.mubr.msk.bf16.vlgmr.msra.gmra.mrb[84].mxu0 %vm936_vm2, %v2579_v46  ;;  %v14906_v46 = vld [vmem:[%s17379_s5 + $0x38] sm:$0xff]   ;;  %v14907_v62 = vld [vmem:[%s17381_s17] sm:$0xff]  }
 0x736   :  { %13727 = vmatprep.mubr.msk.bf16.mxu0 %vm15259_vm0, %v15258_v1  ;;  %13726 = vmatpush3.bf16.msra.mxu0 %v2777_v4  ;;  %v14911_v4 = vld [vmem:[%s17381_s17 + $0x20] sm:$0xff]  }
 0x737   :  { %v2580_v3 = vpack.c.bf16 %v2576_v0, %v2576_v0  ;;  %13737 = vmatprep.subr.bf16.mxu0 %v15258_v1  ;;  %v14908_v0 = vld [vmem:[%s17381_s17 + $0x10] sm:$0xff]  }
 0x739   :  { %13722 = vmatmul.mubr.msk.bf16.vlgmr.msra.gmra.mrb[84].mxu1 %vm936_vm2, %v2580_v3  ;;  %v14909_v3 = vld [vmem:[%s17381_s17 + $0x8] sm:$0xff]  }
 0x73a   :  { %13733 = vmatprep.mubr.msk.bf16.mxu1 %vm15259_vm0, %v15258_v1  ;;  %13732 = vmatpush3.bf16.msra.mxu1 %v2823_v63  ;;  %v14913_v63 = vld [vmem:[%s17381_s17 + $0x30] sm:$0xff]  }
 0x73b   :  { %13743 = vmatprep.subr.bf16.mxu1 %v15258_v1 }
 0x7be   :  { %v2990_v10 = vpop.xlane.xlu1 %2989 }
 0x7bf   :  { %v2994_v11 = vmul.f32 0.03125, %v2990_v10  ;;  %v14914_v10 = vld [vmem:[%s17381_s17 + $0x38] sm:$0xff]  }
 0x7c1   :  { %v2996_v60 = vadd.f32 1e-05, %v2994_v11 }
 0x7c3   :  { %15081 = vrsqrt.f32 %v2996_v60 }
 0x7cd   :  { %v15082_v17 = vpop.eup %15081 }
 0x7ce   :  { %v3000_v22 = vmul.f32 %v15082_v17, %v2984_v53  ;;  %v14898_v53 = vld [vmem:[%s15336_s6 + $0x38] sm:$0xff]  }
 0x7d0   :  { %v3008_v32 = vmul.f32 %v15899_v24, %v3000_v22 }
 0x7d2   :  { %v15917_v47 = vadd.f32 %v15908_v36, %v3008_v32 }
 0x7d4   :  { %v3018_v51 = vpack.c.bf16 %v15917_v47, %v15917_v47 }
 0x800   :  { %v2625_v14 = vpop.f32.mrb[80].mxu0 }
 0x801   :  { %v2769_v2 = vpack.c.bf16 %v2625_v14, %v2625_v14  ;;  %v13705_v15 = vpop.f32.mrb[81].mxu0 }
 0x802   :  { %v2628_v18 = vpop.f32.mrb[82].mxu0 }
 0x803   :  { %v13706_v43 = vpop.f32.mrb[83].mxu0  ;;  %13728 = vmatmul.mubr.msk.bf16.vlgmr.msra.gmra.mrb[88].mxu0 %vm936_vm2, %v2769_v2 }
 0x804   :  { %v2671_v21 = vpop.f32.mrb[80].mxu1  ;;  %13738 = vmatpush3.bf16.msra.mxu0 %v2869_v16  ;;  %13739 = vmatprep.mubr.msk.bf16.mxu0 %vm15259_vm0, %v15258_v1 }
 0x805   :  { %v2770_v20 = vpack.c.bf16 %v2671_v21, %v2671_v21  ;;  %v13711_v44 = vpop.f32.mrb[81].mxu1  ;;  %13749 = vmatprep.subr.bf16.mxu0 %v15258_v1 }
 0x806   :  { %v2674_v25 = vpop.f32.mrb[82].mxu1 }
 0x807   :  { %v13712_v28 = vpop.f32.mrb[83].mxu1  ;;  %13734 = vmatmul.mubr.msk.bf16.vlgmr.msra.gmra.mrb[88].mxu1 %vm936_vm2, %v2770_v20 }
 0x808   :  { %v2717_v30 = vpop.f32.mrb[84].mxu0  ;;  %13744 = vmatpush3.bf16.msra.mxu1 %v2915_v23  ;;  %13745 = vmatprep.mubr.msk.bf16.mxu1 %vm15259_vm0, %v15258_v1 }
 0x809   :  { %v2771_v33 = vpack.c.bf16 %v2717_v30, %v2717_v30  ;;  %v13717_v29 = vpop.f32.mrb[85].mxu0  ;;  %13757 = vmatprep.subr.bf16.mxu1 %v15258_v1 }
 0x80a   :  { %v2720_v35 = vpop.f32.mrb[86].mxu0 }
 0x80b   :  { %v13718_v37 = vpop.f32.mrb[87].mxu0  ;;  %13740 = vmatmul.mubr.msk.bf16.vlgmr.msra.gmra.mrb[92].mxu0 %vm936_vm2, %v2771_v33 }
 0x80c   :  { %v2763_v38 = vpop.f32.mrb[84].mxu1  ;;  %13750 = vmatpush3.bf16.msra.mxu0 %v14891_v31  ;;  %13753 = vmatprep.mubr.msk.bf16.mxu0 %vm15259_vm0, %v15258_v1 }
 0x80d   :  { %v2772_v41 = vpack.c.bf16 %v2763_v38, %v2763_v38  ;;  %v13723_v42 = vpop.f32.mrb[85].mxu1  ;;  %13751 = vmatprep.subr.bf16.mxu0 %v15258_v1 }
 0x80e   :  { %v2766_v7 = vpop.f32.mrb[86].mxu1 }
 0x80f   :  { %v13724_v48 = vpop.f32.mrb[87].mxu1  ;;  %13746 = vmatmul.mubr.msk.bf16.vlgmr.msra.gmra.mrb[92].mxu1 %vm936_vm2, %v2772_v41 }
 0x810   :  { %13752 = vmatpush3.bf16.msra.mxu0 %v14892_v39  ;;  %13758 = vmatpush3.bf16.msra.mxu1 %v14893_v13 }
 0x811   :  { %13759 = vmatprep.subr.bf16.mxu1 %v15258_v1  ;;  %13765 = vmatprep.subr.bf16.mxu0 %v15258_v1 }
 0x812   :  { %13761 = vmatprep.mubr.msk.bf16.mxu1 %vm15259_vm0, %v15258_v1 }
 0x813   :  { %13754 = vmatmul.mubr.msk.bf16.vlgmr.msra.gmra.mrb[96].mxu0 %vm264_vm1, %v3018_v51 }
 0x814   :  { %13760 = vmatpush3.bf16.msra.mxu1 %v14894_v49  ;;  %13766 = vmatpush3.bf16.msra.mxu0 %v14895_v50 }
 0x815   :  { %13767 = vmatprep.subr.bf16.mxu0 %v15258_v1  ;;  %13773 = vmatprep.subr.bf16.mxu1 %v15258_v1 }
 0x816   :  { %13769 = vmatprep.mubr.msk.bf16.mxu0 %vm15259_vm0, %v15258_v1 }
 0x817   :  { %13762 = vmatmul.mubr.msk.bf16.vlgmr.msra.gmra.mrb[96].mxu1 %vm264_vm1, %v3018_v51 }
 0x818   :  { %13768 = vmatpush3.bf16.msra.mxu0 %v14896_v52  ;;  %13774 = vmatpush3.bf16.msra.mxu1 %v14897_v45 }
 0x819   :  { %13775 = vmatprep.subr.bf16.mxu1 %v15258_v1  ;;  %13781 = vmatprep.subr.bf16.mxu0 %v15258_v1 }
 0x81a   :  { %13777 = vmatprep.mubr.msk.bf16.mxu1 %vm15259_vm0, %v15258_v1 }
 0x81b   :  { %13770 = vmatmul.mubr.msk.bf16.vlgmr.msra.gmra.mrb[100].mxu0 %vm264_vm1, %v3018_v51 }
 0x81c   :  { %13776 = vmatpush3.bf16.msra.mxu1 %v14898_v53  ;;  %13782 = vmatpush3.bf16.msra.mxu0 %v14899_v55  ;;  %v16022_v55 = vld [vmem:[%s17382_s21] ss:$0 sm:$0xff] }
 0x81d   :  { %13783 = vmatprep.subr.bf16.mxu0 %v15258_v1  ;;  %13789 = vmatprep.subr.bf16.mxu1 %v15258_v1 }
 0x81e   :  { %13785 = vmatprep.mubr.msk.bf16.mxu0 %vm15259_vm0, %v15258_v1 }
 0x81f   :  { %13778 = vmatmul.mubr.msk.bf16.vlgmr.msra.gmra.mrb[100].mxu1 %vm264_vm1, %v3018_v51 }
 0x820   :  { %13784 = vmatpush3.bf16.msra.mxu0 %v14900_v54  ;;  %13790 = vmatpush3.bf16.msra.mxu1 %v14901_v5 }
 0x821   :  { %13791 = vmatprep.subr.bf16.mxu1 %v15258_v1  ;;  %13797 = vmatprep.subr.bf16.mxu0 %v15258_v1 }
 0x822   :  { %13793 = vmatprep.mubr.msk.bf16.mxu1 %vm15259_vm0, %v15258_v1 }
 0x823   :  { %13786 = vmatmul.mubr.msk.bf16.vlgmr.msra.gmra.mrb[104].mxu0 %vm264_vm1, %v15951_v9 }
 0x824   :  { %13792 = vmatpush3.bf16.msra.mxu1 %v14902_v34  ;;  %13798 = vmatpush3.bf16.msra.mxu0 %v14903_v56 }
 0x825   :  { %13799 = vmatprep.subr.bf16.mxu0 %v15258_v1  ;;  %13805 = vmatprep.subr.bf16.mxu1 %v15258_v1 }
 0x826   :  { %13801 = vmatprep.mubr.msk.bf16.mxu0 %vm15259_vm0, %v15258_v1 }
 0x827   :  { %13794 = vmatmul.mubr.msk.bf16.vlgmr.msra.gmra.mrb[104].mxu1 %vm264_vm1, %v15951_v9 }
 0x828   :  { %13800 = vmatpush3.bf16.msra.mxu0 %v14904_v58  ;;  %13806 = vmatpush3.bf16.msra.mxu1 %v14905_v59  ;;  %v16026_v58 = vld [vmem:[%s17382_s21 + $0x1] ss:$0 sm:$0xff] }
 0x829   :  { %13807 = vmatprep.subr.bf16.mxu1 %v15258_v1  ;;  %13809 = vmatprep.mubr.msk.bf16.mxu1 %vm15259_vm0, %v15258_v1 }
 0x82a   :  { %13813 = vmatprep.subr.bf16.mxu0 %v15258_v1 }
 0x82b   :  { %13802 = vmatmul.mubr.msk.bf16.vlgmr.msra.gmra.mrb[108].mxu0 %vm264_vm1, %v15951_v9 }
 0x82c   :  { %13808 = vmatpush3.bf16.msra.mxu1 %v14906_v46  ;;  %13817 = vmatprep.mubr.msk.bf16.mxu0 %vm15259_vm0, %v15258_v1 }
 0x82d   :  { %13821 = vmatprep.subr.bf16.mxu1 %v15258_v1  ;;  %13814 = vmatpush3.bf16.msra.mxu0 %v14907_v62  ;;  %v16029_v62 = vld [vmem:[%s17383_s7] ss:$0 sm:$0xff] }
 0x82e   :  { %13815 = vmatprep.subr.bf16.mxu0 %v15258_v1 }
 0x82f   :  { %13810 = vmatmul.mubr.msk.bf16.vlgmr.msra.gmra.mrb[108].mxu1 %vm264_vm1, %v15951_v9 }
 0x830   :  { %13825 = vmatprep.mubr.msk.bf16.mxu1 %vm15259_vm0, %v15258_v1  ;;  %13822 = vmatpush3.bf16.msra.mxu1 %v14908_v0 }
 0x831   :  { %13823 = vmatprep.subr.bf16.mxu1 %v15258_v1  ;;  %13816 = vmatpush3.bf16.msra.mxu0 %v14909_v3 }
 0x832   :  { %13829 = vmatprep.subr.bf16.mxu0 %v15258_v1 }
 0x834   :  { %13824 = vmatpush3.bf16.msra.mxu1 %v14910_v57  ;;  %13818 = vmatmul.mubr.msk.bf16.vlgmr.msra.gmra.mrb[112].mxu0 %vm264_vm1, %v15951_v9 }
 0x835   :  { %13837 = vmatprep.subr.bf16.mxu1 %v15258_v1  ;;  %13830 = vmatpush3.bf16.msra.mxu0 %v14911_v4 }
 0x836   :  { %13833 = vmatprep.mubr.msk.bf16.mxu0 %vm15259_vm0, %v15258_v1  ;;  %13831 = vmatprep.subr.bf16.mxu0 %v15258_v1 }
 0x837   :  { %13826 = vmatmul.mubr.msk.bf16.vlgmr.msra.gmra.mrb[112].mxu1 %vm264_vm1, %v15951_v9 }
 0x838   :  { %13841 = vmatprep.mubr.msk.bf16.mxu1 %vm15259_vm0, %v15258_v1  ;;  %13838 = vmatpush3.bf16.msra.mxu1 %v14913_v63  ;;  %v16034_v63 = vld [vmem:[%s17382_s21 + $0x2] ss:$0 sm:$0xff] }
 0x839   :  { %13832 = vmatpush3.bf16.msra.mxu0 %v14912_v8  ;;  %13839 = vmatprep.subr.bf16.mxu1 %v15258_v1 }
 0x83a   :  { %13845 = vmatprep.subr.bf16.mxu0 %v15258_v1 }
 0x83c   :  { %13834 = vmatmul.mubr.msk.bf16.vlgmr.msra.gmra.mrb[116].mxu0 %vm264_vm1, %v15951_v9  ;;  %13840 = vmatpush3.bf16.msra.mxu1 %v14914_v10 }
 0x83d   :  { %13847 = vmatprep.mubr.msk.bf16.mxu0 %vm15259_vm0, %v15258_v1  ;;  %13851 = vmatprep.subr.bf16.mxu1 %v15258_v1 }
 0x83f   :  { %13842 = vmatmul.mubr.msk.bf16.vlgmr.msra.gmra.mrb[116].mxu1 %vm264_vm1, %v15951_v9 }
 0x840   :  { %13853 = vmatprep.mubr.msk.bf16.mxu1 %vm15259_vm0, %v15258_v1 }
 0x8d6   :  { %v2813_v11 = vpop.f32.mrb[88].mxu0 }
 0x8d7   :  { %v13729_v60 = vpop.f32.mrb[89].mxu0  ;;  %v2957_v15 = vsel %vm264_vm1, %v2813_v11, 0.0 }
 0x8d8   :  { %v2816_v12 = vpop.f32.mrb[90].mxu0 }
 0x8d9   :  { %v13730_v14 = vpop.f32.mrb[91].mxu0  ;;  %v16039_v12 = vld [vmem:[%s17383_s7 + $0x1] ss:$0 sm:$0xff] }
 0x8da   :  { %v2859_v2 = vpop.f32.mrb[88].mxu1 }
 0x8db   :  { %v2958_v16 = vsel %vm264_vm1, %v2859_v2, 0.0  ;;  %v13735_v17 = vpop.f32.mrb[89].mxu1 }
 0x8dc   :  { %v2959_v18 = vadd.f32 %v2958_v16, %v2957_v15  ;;  %v2862_v19 = vpop.f32.mrb[90].mxu1 }
 0x8dd   :  { %v13736_v43 = vpop.f32.mrb[91].mxu1 }
 0x8de   :  { %v2905_v21 = vpop.f32.mrb[92].mxu0 }
 0x8df   :  { %v2960_v22 = vsel %vm264_vm1, %v2905_v21, 0.0  ;;  %v13741_v20 = vpop.f32.mrb[93].mxu0 }
 0x8e0   :  { %v2961_v44 = vadd.f32 %v2960_v22, %v2959_v18  ;;  %v2908_v23 = vpop.f32.mrb[94].mxu0  ;;  %v16044_v18 = vld [vmem:[%s17382_s21 + $0x3] ss:$0 sm:$0xff]  ;;  %v16049_v20 = vld [vmem:[%s17383_s7 + $0x2] ss:$0 sm:$0xff] }
 0x8e1   :  { %v13742_v25 = vpop.f32.mrb[95].mxu0 }
 0x8e2   :  { %v2951_v28 = vpop.f32.mrb[92].mxu1 }
 0x8e3   :  { %v2962_v30 = vsel %vm264_vm1, %v2951_v28, 0.0  ;;  %v13747_v31 = vpop.f32.mrb[93].mxu1 }
 0x8e4   :  { %v16019_v32 = vadd.f32 %v2962_v30, %v2961_v44  ;;  %v2954_v33 = vpop.f32.mrb[94].mxu1 }
 0x8e5   :  { %v13748_v29 = vpop.f32.mrb[95].mxu1 }
 0x8e6   :  { %v3157_v35 = vpop.f32.mrb[96].mxu0 }
 0x8e7   :  { %v13755_v37 = vpop.f32.mrb[97].mxu0  ;;  %v3158_v10 = vadd.f32 %v16029_v62, %v3157_v35 }
 0x8e8   :  { %v3160_v38 = vpop.f32.mrb[98].mxu0  ;;  %v16059_v37 = vld [vmem:[%s17383_s7 + $0x3] ss:$0 sm:$0xff] }
 0x8e9   :  { %v13756_v39 = vpop.f32.mrb[99].mxu0  ;;  %v3786_v19 = vpack.c.bf16 %v3158_v10, %v3158_v10 }
 0x8ea   :  { %v3209_v13 = vpop.f32.mrb[96].mxu1 }
 0x8eb   :  { %v13763_v41 = vpop.f32.mrb[97].mxu1  ;;  %v3210_v43 = vadd.f32 %v16039_v12, %v3209_v13 }
 0x8ec   :  { %v3212_v42 = vpop.f32.mrb[98].mxu1 }
 0x8ed   :  { %v13764_v7 = vpop.f32.mrb[99].mxu1  ;;  %v3787_v31 = vpack.c.bf16 %v3210_v43, %v3210_v43  ;;  %v16074_v42 = vld [vmem:[%s17384_s10] ss:$0 sm:$0xff] }
 0x8ee   :  { %v3261_v48 = vpop.f32.mrb[100].mxu0 }
 0x8ef   :  { %v13771_v49 = vpop.f32.mrb[101].mxu0  ;;  %v3262_v33 = vadd.f32 %v16049_v20, %v3261_v48  ;;  %v16077_v48 = vld [vmem:[%s17384_s10 + $0x1] ss:$0 sm:$0xff] }
 0x8f0   :  { %v3264_v50 = vpop.f32.mrb[102].mxu0 }
 0x8f1   :  { %v13772_v51 = vpop.f32.mrb[103].mxu0  ;;  %v3788_v39 = vpack.c.bf16 %v3262_v33, %v3262_v33 }
 0x8f2   :  { %v3313_v52 = vpop.f32.mrb[100].mxu1 }
 0x8f3   :  { %v13779_v45 = vpop.f32.mrb[101].mxu1  ;;  %v3314_v13 = vadd.f32 %v16059_v37, %v3313_v52 }
 0x8f4   :  { %v3316_v53 = vpop.f32.mrb[102].mxu1 }
 0x8f5   :  { %v13780_v54 = vpop.f32.mrb[103].mxu1  ;;  %v3789_v41 = vpack.c.bf16 %v3314_v13, %v3314_v13 }
 0x8f6   :  { %v3392_v5 = vpop.f32.mrb[104].mxu0 }
 0x8f7   :  { %v3393_v27 = vadd.f32 %v16022_v55, %v3392_v5  ;;  %v13787_v34 = vpop.f32.mrb[105].mxu0 }
 0x8f8   :  { %v3395_v56 = vpop.f32.mrb[106].mxu0 }
 0x8f9   :  { %v3790_v59 = vpack.c.bf16 %v3393_v27, %v3393_v27  ;;  %v13788_v46 = vpop.f32.mrb[107].mxu0 }
 0x8fa   :  { %v3444_v0 = vpop.f32.mrb[104].mxu1 }
 0x8fb   :  { %v3445_v3 = vadd.f32 %v16026_v58, %v3444_v0  ;;  %v13795_v57 = vpop.f32.mrb[105].mxu1  ;;  %v3798_v4 = vsel %vm936_vm2, %v3790_v59, 0 }
 0x8fc   :  { %v3447_v8 = vpop.f32.mrb[106].mxu1  ;;  %13846 = vmatpush3.bf16.xpose.msra.mxu0 %v3798_v4 }
 0x8fd   :  { %v3791_v11 = vpack.c.bf16 %v3445_v3, %v3445_v3  ;;  %v13796_v60 = vpop.f32.mrb[107].mxu1  ;;  %13857 = vmatprep.subr.bf16.mxu0 %v15258_v1 }
 0x8fe   :  { %v3496_v14 = vpop.f32.mrb[108].mxu0 }
 0x8ff   :  { %v3497_v2 = vadd.f32 %v16034_v63, %v3496_v14  ;;  %v13803_v15 = vpop.f32.mrb[109].mxu0  ;;  %v3844_v16 = vsel %vm936_vm2, %v3791_v11, 0 }
 0x900   :  { %v3499_v17 = vpop.f32.mrb[110].mxu0  ;;  %13852 = vmatpush3.bf16.xpose.msra.mxu1 %v3844_v16 }
 0x901   :  { %v3792_v21 = vpack.c.bf16 %v3497_v2, %v3497_v2  ;;  %v13804_v22 = vpop.f32.mrb[111].mxu0  ;;  %13863 = vmatprep.subr.bf16.mxu1 %v15258_v1 }
 0x902   :  { %v3548_v44 = vpop.f32.mrb[108].mxu1 }
 0x903   :  { %v3549_v23 = vadd.f32 %v16044_v18, %v3548_v44  ;;  %v13811_v25 = vpop.f32.mrb[109].mxu1  ;;  %13848 = vmatmul.mubr.msk.bf16.vlgmr.msra.gmra.mrb[120].mxu0 %vm936_vm2, %v3786_v19  ;;  %v3890_v28 = vsel %vm936_vm2, %v3792_v21, 0 }
 0x904   :  { %v3551_v30 = vpop.f32.mrb[110].mxu1  ;;  %13858 = vmatpush3.bf16.xpose.msra.mxu0 %v3890_v28  ;;  %13859 = vmatprep.mubr.msk.bf16.mxu0 %vm15259_vm0, %v15258_v1 }
 0x905   :  { %v3793_v29 = vpack.c.bf16 %v3549_v23, %v3549_v23  ;;  %v13812_v35 = vpop.f32.mrb[111].mxu1  ;;  %13869 = vmatprep.subr.bf16.mxu0 %v15258_v1 }
 0x907   :  { %13854 = vmatmul.mubr.msk.bf16.vlgmr.msra.gmra.mrb[120].mxu1 %vm936_vm2, %v3787_v31  ;;  %v3936_v38 = vsel %vm936_vm2, %v3793_v29, 0  ;;  %v3624_v7 = vpop.f32.mrb[112].mxu0 }
 0x908   :  { %13864 = vmatpush3.bf16.xpose.msra.mxu1 %v3936_v38  ;;  %13865 = vmatprep.mubr.msk.bf16.mxu1 %vm15259_vm0, %v15258_v1  ;;  %v3625_v49 = vadd.f32 %v16074_v42, %v3624_v7  ;;  %v13819_v50 = vpop.f32.mrb[113].mxu0 }
 0x909   :  { %13875 = vmatprep.subr.bf16.mxu1 %v15258_v1  ;;  %v3627_v51 = vpop.f32.mrb[114].mxu0 }
 0x90a   :  { %v3676_v52 = vpop.f32.mrb[112].mxu1  ;;  %v4030_v45 = vpack.c.bf16 %v3625_v49, %v3625_v49  ;;  %v13820_v54 = vpop.f32.mrb[115].mxu0 }
 0x90b   :  { %13860 = vmatmul.mubr.msk.bf16.vlgmr.msra.gmra.mrb[124].mxu0 %vm936_vm2, %v3788_v39  ;;  %v3677_v53 = vadd.f32 %v16077_v48, %v3676_v52  ;;  %v13827_v5 = vpop.f32.mrb[113].mxu1 }
 0x90c   :  { %13871 = vmatprep.mubr.msk.bf16.mxu0 %vm15259_vm0, %v15258_v1  ;;  %v3679_v27 = vpop.f32.mrb[114].mxu1  ;;  %v4038_v59 = vsel %vm1184_vm3, %v4030_v45, 0 }
 0x90d   :  { %v4031_v34 = vpack.c.bf16 %v3677_v53, %v3677_v53  ;;  %v13828_v56 = vpop.f32.mrb[115].mxu1  ;;  %13870 = vmatpush3.bf16.msra.mxu0 %v4038_v59 }
 0x90e   :  { %13881 = vmatprep.subr.bf16.mxu0 %v15258_v1 }
 0x90f   :  { %13866 = vmatmul.mubr.msk.bf16.vlgmr.msra.gmra.mrb[124].mxu1 %vm936_vm2, %v3789_v41  ;;  %v4084_v46 = vsel %vm1184_vm3, %v4031_v34, 0  ;;  %v16084_v0 = vpop.f32.mrb[116].mxu0 }
 0x910   :  { %13877 = vmatprep.mubr.msk.bf16.mxu1 %vm15259_vm0, %v15258_v1  ;;  %13876 = vmatpush3.bf16.msra.mxu1 %v4084_v46  ;;  %v13835_v3 = vpop.f32.mrb[117].mxu0 }
 0x911   :  { %13887 = vmatprep.subr.bf16.mxu1 %v15258_v1  ;;  %v3731_v57 = vpop.f32.mrb[118].mxu0 }
 0x912   :  { %v13836_v4 = vpop.f32.mrb[119].mxu0  ;;  %v16087_v8 = vpop.f32.mrb[116].mxu1 }
 0x913   :  { %v13843_v10 = vpop.f32.mrb[117].mxu1 }
 0x914   :  { %v3783_v11 = vpop.f32.mrb[118].mxu1 }
 0x915   :  { %v13844_v60 = vpop.f32.mrb[119].mxu1  ;;  %v2970_v11 = vadd.f32 %v15854_v26, %v16019_v32 }
 0x9d6   :  { %v3834_v14 = vpop.f32.mrb[120].mxu0 }
 0x9d7   :  { %v13849_v2 = vpop.f32.mrb[121].mxu0  ;;  %v3978_v15 = vmul.f32 0.35355338, %v3834_v14 }
 0x9d8   :  { %v3837_v16 = vpop.f32.mrb[122].mxu0  ;;  %v2972_v2 = vadd.f32 %v2970_v11, %v15689_v6 }
 0x9d9   :  { %v13850_v17 = vpop.f32.mrb[123].mxu0  ;;  %v3982_v19 = vsel %vm936_vm2, %v3978_v15, -inf }
 0x9da   :  { %v3880_v43 = vpop.f32.mrb[120].mxu1  ;;  %3983 = vmax.xlane.f32.xlu0 %v3982_v19  ;;  %v2978_v17 = vsel %vm264_vm1, %v2972_v2, 0.0 }
 0x9db   :  { %v13855_v21 = vpop.f32.mrb[121].mxu1  ;;  %v3979_v22 = vmul.f32 0.35355338, %v3880_v43 }
 0x9dc   :  { %v3883_v44 = vpop.f32.mrb[122].mxu1  ;;  %v16102_v21 = vld [vmem:[%s17384_s10 + $0x2] ss:$0 sm:$0xff] }
 0x9dd   :  { %v13856_v23 = vpop.f32.mrb[123].mxu1  ;;  %v3985_v25 = vsel %vm936_vm2, %v3979_v22, -inf  ;;  %v3729_v26 = vadd.f32 %v16102_v21, %v16084_v0 }
 0x9de   :  { %3986 = vmax.xlane.f32.xlu1 %v3985_v25  ;;  %v3926_v28 = vpop.f32.mrb[124].mxu0 }
 0x9df   :  { %v13861_v30 = vpop.f32.mrb[125].mxu0  ;;  %v3980_v31 = vmul.f32 0.35355338, %v3926_v28  ;;  %v4032_v44 = vpack.c.bf16 %v3729_v26, %v3729_v26 }
 0x9e0   :  { %v3929_v33 = vpop.f32.mrb[126].mxu0 }
 0x9e1   :  { %v13862_v29 = vpop.f32.mrb[127].mxu0  ;;  %v3988_v35 = vsel %vm936_vm2, %v3980_v31, -inf  ;;  %v4130_v0 = vsel %vm1184_vm3, %v4032_v44, 0 }
 0x9e2   :  { %v3972_v38 = vpop.f32.mrb[124].mxu1  ;;  %3989 = vmax.xlane.f32.xlu0 %v3988_v35 }
 0x9e3   :  { %v13867_v39 = vpop.f32.mrb[125].mxu1  ;;  %v3981_v13 = vmul.f32 0.35355338, %v3972_v38 }
 0x9e4   :  { %v3975_v41 = vpop.f32.mrb[126].mxu1 }
 0x9e5   :  { %v13868_v7 = vpop.f32.mrb[127].mxu1  ;;  %v3991_v49 = vsel %vm936_vm2, %v3981_v13, -inf }
 0x9e6   :  { %3992 = vmax.xlane.f32.xlu1 %v3991_v49 }
 0xa67   :  { %v3984_v50 = vpop.xlane.xlu0 %3983 }
 0xa68   :  { %v3994_v51 = vsub.f32 %v3978_v15, %v3984_v50 }
 0xa6a   :  { %v3998_v52 = vmul.f32 1.442695, %v3994_v51 }
 0xa6b   :  { %v3987_v45 = vpop.xlane.xlu1 %3986 }
 0xa6c   :  { %15083 = vpow2.f32 %v3998_v52  ;;  %v3995_v53 = vsub.f32 %v3979_v22, %v3987_v45  ;;  %v16107_v22 = vld [vmem:[%s17384_s10 + $0x3] ss:$0 sm:$0xff] }
 0xa6d   :  { %v3781_v23 = vadd.f32 %v16107_v22, %v16087_v8 }
 0xa6e   :  { %v4000_v54 = vmul.f32 1.442695, %v3995_v53 }
 0xa6f   :  { %v3990_v5 = vpop.xlane.xlu0 %3989  ;;  %v4033_v38 = vpack.c.bf16 %v3781_v23, %v3781_v23  ;;  %v14915_v23 = vld [vmem:[%s15336_s6] sm:$0xff]  }
 0xa70   :  { %15085 = vpow2.f32 %v4000_v54  ;;  %v3996_v27 = vsub.f32 %v3980_v31, %v3990_v5  ;;  %v3079_v54 = vld [vmem:[%s17385_s11] sm:$0xf] }
 0xa71   :  { %v4176_v50 = vsel %vm1184_vm3, %v4033_v38, 0  ;;  %v4226_v5 = vsel %vm1184_vm3, %v3079_v54, 0  ;;  %v14917_v38 = vld [vmem:[%s15336_s6 + $0x10] sm:$0xff]   ;;  %v147_v54 = vld [vmem:[%s17380_s13 + $0x8] sm:$0xff] }
 0xa72   :  { %v4002_v34 = vmul.f32 1.442695, %v3996_v27  ;;  %v3080_v27 = vld [vmem:[%s17385_s11 + $0x4] sm:$0xf] }
 0xa73   :  { %v3993_v56 = vpop.xlane.xlu1 %3992 }
 0xa74   :  { %15087 = vpow2.f32 %v4002_v34  ;;  %v3997_v59 = vsub.f32 %v3981_v13, %v3993_v56  ;;  %v4272_v34 = vsel %vm1184_vm3, %v3080_v27, 0  ;;  %v14926_v27 = vld [vmem:[%s17379_s5 + $0x18] sm:$0xff]  }
 0xa76   :  { %v15084_v46 = vpop.eup %15083  ;;  %v4004_v3 = vmul.f32 1.442695, %v3997_v59 }
 0xa77   :  { %v4006_v57 = vsel %vm936_vm2, %v15084_v46, 0.0 }
 0xa78   :  { %15089 = vpow2.f32 %v4004_v3  ;;  %4007 = vadd.xlane.f32.xlu0 %v4006_v57  ;;  %v3081_v3 = vld [vmem:[%s17385_s11 + $0x8] sm:$0xf] }
 0xa79   :  { %v4318_v11 = vsel %vm1184_vm3, %v3081_v3, 0  ;;  %v14931_v3 = vld [vmem:[%s17381_s17] sm:$0xff]  }
 0xa7a   :  { %v15086_v4 = vpop.eup %15085 }
 0xa7b   :  { %v4009_v10 = vsel %vm936_vm2, %v15086_v4, 0.0 }
 0xa7c   :  { %4010 = vadd.xlane.f32.xlu1 %v4009_v10 }
 0xa7e   :  { %v15088_v60 = vpop.eup %15087 }
 0xa7f   :  { %v4012_v14 = vsel %vm936_vm2, %v15088_v60, 0.0 }
 0xa80   :  { %4013 = vadd.xlane.f32.xlu0 %v4012_v14 }
 0xa82   :  { %v15090_v15 = vpop.eup %15089 }
 0xa83   :  { %v4015_v16 = vsel %vm936_vm2, %v15090_v15, 0.0 }
 0xa84   :  { %4016 = vadd.xlane.f32.xlu1 %v4015_v16  ;;  %2979 = vadd.xlane.f32.xlu0 %v2978_v17 }
 0xb05   :  { %v4008_v19 = vpop.xlane.xlu0 %4007 }
 0xb06   :  { %15091 = vrcp.f32 %v4008_v19 }
 0xb09   :  { %v4011_v43 = vpop.xlane.xlu1 %4010 }
 0xb0a   :  { %15093 = vrcp.f32 %v4011_v43 }
 0xb0d   :  { %v4014_v32 = vpop.xlane.xlu0 %4013 }
 0xb0e   :  { %15095 = vrcp.f32 %v4014_v32 }
 0xb10   :  { %v15092_v6 = vpop.eup %15091 }
 0xb11   :  { %v4022_v25 = vmul.f32 %v15092_v6, %v15084_v46  ;;  %v4017_v28 = vpop.xlane.xlu1 %4016  ;;  %v2980_v30 = vpop.xlane.xlu0 %2979 }
 0xb12   :  { %15097 = vrcp.f32 %v4017_v28  ;;  %v2983_v31 = vmul.f32 0.03125, %v2980_v30 }
 0xb13   :  { %v4026_v33 = vpack.c.bf16 %v4022_v25, %v4022_v25 }
 0xb14   :  { %v15094_v29 = vpop.eup %15093  ;;  %v2985_v35 = vsub.f32 %v2972_v2, %v2983_v31  ;;  %v3082_v2 = vld [vmem:[%s17385_s11 + $0xc] sm:$0xf] }
 0xb15   :  { %v4023_v39 = vmul.f32 %v15094_v29, %v15086_v4  ;;  %13872 = vmatmul.mubr.msk.bf16.vlgmr.msra.gmra.mrb[128].mxu0 %vm936_vm2, %v4026_v33  ;;  %v4364_v26 = vsel %vm1184_vm3, %v3082_v2, 0  ;;  %v14938_v2 = vld [vmem:[%s17381_s17 + $0x38] sm:$0xff]  }
 0xb16   :  { %13882 = vmatpush3.bf16.msra.mxu0 %v4130_v0  ;;  %v2987_v13 = vmul.f32 %v2985_v35, %v2985_v35  ;;  %13883 = vmatprep.mubr.msk.bf16.mxu0 %vm15259_vm0, %v15258_v1 }
 0xb17   :  { %v4027_v8 = vpack.c.bf16 %v4023_v39, %v4023_v39  ;;  %13893 = vmatprep.subr.bf16.mxu0 %v15258_v1 }
 0xb18   :  { %v15096_v41 = vpop.eup %15095  ;;  %v2991_v7 = vsel %vm264_vm1, %v2987_v13, 0.0 }
 0xb19   :  { %v4024_v49 = vmul.f32 %v15096_v41, %v15088_v60  ;;  %13878 = vmatmul.mubr.msk.bf16.vlgmr.msra.gmra.mrb[128].mxu1 %vm936_vm2, %v4027_v8  ;;  %2992 = vadd.xlane.f32.xlu1 %v2991_v7  ;;  %v14918_v41 = vld [vmem:[%s15336_s6 + $0x18] sm:$0xff]   ;;  %v14919_v7 = vld [vmem:[%s15336_s6 + $0x20] sm:$0xff]  }
 0xb1a   :  { %13888 = vmatpush3.bf16.msra.mxu1 %v4176_v50  ;;  %13889 = vmatprep.mubr.msk.bf16.mxu1 %vm15259_vm0, %v15258_v1  ;;  %v14921_v50 = vld [vmem:[%s15336_s6 + $0x30] sm:$0xff]  }
 0xb1b   :  { %v4028_v51 = vpack.c.bf16 %v4024_v49, %v4024_v49  ;;  %13899 = vmatprep.subr.bf16.mxu1 %v15258_v1 }
 0xb1c   :  { %v15098_v52 = vpop.eup %15097 }
 0xb1d   :  { %v4025_v45 = vmul.f32 %v15098_v52, %v15090_v15  ;;  %13884 = vmatmul.mubr.msk.bf16.vlgmr.msra.gmra.mrb[132].mxu0 %vm936_vm2, %v4028_v51  ;;  %v14922_v51 = vld [vmem:[%s15336_s6 + $0x38] sm:$0xff]   ;;  %v14923_v52 = vld [vmem:[%s17379_s5] sm:$0xff]  }
 0xb1e   :  { %13895 = vmatprep.mubr.msk.bf16.mxu0 %vm15259_vm0, %v15258_v1  ;;  %13894 = vmatpush3.bf16.msra.mxu0 %v4226_v5  ;;  %v16189_v5 = vpack.c.bf16 %v147_v54, %v147_v54 }
 0xb1f   :  { %v4029_v53 = vpack.c.bf16 %v4025_v45, %v4025_v45  ;;  %13905 = vmatprep.subr.bf16.mxu0 %v15258_v1  ;;  %v14924_v45 = vld [vmem:[%s17379_s5 + $0x8] sm:$0xff]  }
 0xb21   :  { %13890 = vmatmul.mubr.msk.bf16.vlgmr.msra.gmra.mrb[132].mxu1 %vm936_vm2, %v4029_v53  ;;  %v14925_v53 = vld [vmem:[%s17379_s5 + $0x10] sm:$0xff]  }
 0xb22   :  { %13901 = vmatprep.mubr.msk.bf16.mxu1 %vm15259_vm0, %v15258_v1  ;;  %13900 = vmatpush3.bf16.msra.mxu1 %v4272_v34  ;;  %v14927_v34 = vld [vmem:[%s17379_s5 + $0x20] sm:$0xff]  }
 0xb23   :  { %13911 = vmatprep.subr.bf16.mxu1 %v15258_v1 }
 0xba6   :  { %v2993_v56 = vpop.xlane.xlu1 %2992 }
 0xba7   :  { %v2995_v59 = vmul.f32 0.03125, %v2993_v56  ;;  %v14928_v56 = vld [vmem:[%s17379_s5 + $0x28] sm:$0xff]  }
 0xba9   :  { %v2997_v46 = vadd.f32 1e-05, %v2995_v59  ;;  %v14929_v59 = vld [vmem:[%s17379_s5 + $0x30] sm:$0xff]  }
 0xbab   :  { %15099 = vrsqrt.f32 %v2997_v46  ;;  %v14930_v46 = vld [vmem:[%s17379_s5 + $0x38] sm:$0xff]  }
 0xbb5   :  { %v15100_v60 = vpop.eup %15099 }
 0xbb6   :  { %v3001_v17 = vmul.f32 %v15100_v60, %v2985_v35  ;;  %v14916_v35 = vld [vmem:[%s15336_s6 + $0x8] sm:$0xff]  }
 0xbb7   :  { %v14936_v60 = vld [vmem:[%s17381_s17 + $0x28] sm:$0xff]  }
 0xbb8   :  { %v3009_v25 = vmul.f32 %v15899_v24, %v3001_v17 }
 0xbba   :  { %v16155_v24 = vadd.f32 %v15908_v36, %v3009_v25  ;;  %v14920_v36 = vld [vmem:[%s15336_s6 + $0x28] sm:$0xff]  }
 0xbbc   :  { %v4420_v49 = vpack.c.bf16 %v16155_v24, %v16155_v24 }
 0xbe8   :  { %v4074_v57 = vpop.f32.mrb[128].mxu0 }
 0xbe9   :  { %v4218_v4 = vpack.c.bf16 %v4074_v57, %v4074_v57  ;;  %v13873_v10 = vpop.f32.mrb[129].mxu0  ;;  %v14932_v57 = vld [vmem:[%s17381_s17 + $0x10] sm:$0xff]  }
 0xbea   :  { %v4077_v14 = vpop.f32.mrb[130].mxu0  ;;  %v14934_v10 = vld [vmem:[%s17381_s17 + $0x18] sm:$0xff]  }
 0xbeb   :  { %v13874_v15 = vpop.f32.mrb[131].mxu0  ;;  %13896 = vmatmul.mubr.msk.bf16.vlgmr.msra.gmra.mrb[136].mxu0 %vm936_vm2, %v4218_v4  ;;  %v14933_v4 = vld [vmem:[%s17381_s17 + $0x8] sm:$0xff]   ;;  %v14937_v14 = vld [vmem:[%s17381_s17 + $0x30] sm:$0xff]  }
 0xbec   :  { %v4120_v16 = vpop.f32.mrb[128].mxu1  ;;  %13906 = vmatpush3.bf16.msra.mxu0 %v4318_v11  ;;  %13907 = vmatprep.mubr.msk.bf16.mxu0 %vm15259_vm0, %v15258_v1  ;;  %v14935_v11 = vld [vmem:[%s17381_s17 + $0x20] sm:$0xff]  }
 0xbed   :  { %v4219_v19 = vpack.c.bf16 %v4120_v16, %v4120_v16  ;;  %v13879_v43 = vpop.f32.mrb[129].mxu1  ;;  %13917 = vmatprep.subr.bf16.mxu0 %v15258_v1 }
 0xbee   :  { %v4123_v32 = vpop.f32.mrb[130].mxu1 }
 0xbef   :  { %v13880_v6 = vpop.f32.mrb[131].mxu1  ;;  %13902 = vmatmul.mubr.msk.bf16.vlgmr.msra.gmra.mrb[136].mxu1 %vm936_vm2, %v4219_v19 }
 0xbf0   :  { %v4166_v44 = vpop.f32.mrb[132].mxu0  ;;  %13912 = vmatpush3.bf16.msra.mxu1 %v4364_v26  ;;  %13913 = vmatprep.mubr.msk.bf16.mxu1 %vm15259_vm0, %v15258_v1 }
 0xbf1   :  { %v4220_v28 = vpack.c.bf16 %v4166_v44, %v4166_v44  ;;  %v13885_v30 = vpop.f32.mrb[133].mxu0  ;;  %13925 = vmatprep.subr.bf16.mxu1 %v15258_v1 }
 0xbf2   :  { %v4169_v31 = vpop.f32.mrb[134].mxu0 }
 0xbf3   :  { %v13886_v33 = vpop.f32.mrb[135].mxu0  ;;  %13908 = vmatmul.mubr.msk.bf16.vlgmr.msra.gmra.mrb[140].mxu0 %vm936_vm2, %v4220_v28 }
 0xbf4   :  { %v4212_v29 = vpop.f32.mrb[132].mxu1  ;;  %13918 = vmatpush3.bf16.msra.mxu0 %v14915_v23  ;;  %13921 = vmatprep.mubr.msk.bf16.mxu0 %vm15259_vm0, %v15258_v1 }
 0xbf5   :  { %v4221_v39 = vpack.c.bf16 %v4212_v29, %v4212_v29  ;;  %v13891_v0 = vpop.f32.mrb[133].mxu1  ;;  %13919 = vmatprep.subr.bf16.mxu0 %v15258_v1 }
 0xbf6   :  { %v4215_v13 = vpop.f32.mrb[134].mxu1 }
 0xbf7   :  { %v13892_v8 = vpop.f32.mrb[135].mxu1  ;;  %13914 = vmatmul.mubr.msk.bf16.vlgmr.msra.gmra.mrb[140].mxu1 %vm936_vm2, %v4221_v39 }
 0xbf8   :  { %13920 = vmatpush3.bf16.msra.mxu0 %v14916_v35  ;;  %13926 = vmatpush3.bf16.msra.mxu1 %v14917_v38 }
 0xbf9   :  { %13927 = vmatprep.subr.bf16.mxu1 %v15258_v1  ;;  %13933 = vmatprep.subr.bf16.mxu0 %v15258_v1 }
 0xbfa   :  { %13929 = vmatprep.mubr.msk.bf16.mxu1 %vm15259_vm0, %v15258_v1 }
 0xbfb   :  { %13922 = vmatmul.mubr.msk.bf16.vlgmr.msra.gmra.mrb[144].mxu0 %vm264_vm1, %v4420_v49 }
 0xbfc   :  { %13928 = vmatpush3.bf16.msra.mxu1 %v14918_v41  ;;  %13934 = vmatpush3.bf16.msra.mxu0 %v14919_v7 }
 0xbfd   :  { %13935 = vmatprep.subr.bf16.mxu0 %v15258_v1  ;;  %13941 = vmatprep.subr.bf16.mxu1 %v15258_v1 }
 0xbfe   :  { %13937 = vmatprep.mubr.msk.bf16.mxu0 %vm15259_vm0, %v15258_v1 }
 0xbff   :  { %13930 = vmatmul.mubr.msk.bf16.vlgmr.msra.gmra.mrb[144].mxu1 %vm264_vm1, %v4420_v49 }
 0xc00   :  { %13936 = vmatpush3.bf16.msra.mxu0 %v14920_v36  ;;  %13942 = vmatpush3.bf16.msra.mxu1 %v14921_v50 }
 0xc01   :  { %13943 = vmatprep.subr.bf16.mxu1 %v15258_v1  ;;  %13949 = vmatprep.subr.bf16.mxu0 %v15258_v1 }
 0xc02   :  { %13945 = vmatprep.mubr.msk.bf16.mxu1 %vm15259_vm0, %v15258_v1 }
 0xc03   :  { %13938 = vmatmul.mubr.msk.bf16.vlgmr.msra.gmra.mrb[148].mxu0 %vm264_vm1, %v4420_v49 }
 0xc04   :  { %13944 = vmatpush3.bf16.msra.mxu1 %v14922_v51  ;;  %13950 = vmatpush3.bf16.msra.mxu0 %v14923_v52 }
 0xc05   :  { %13951 = vmatprep.subr.bf16.mxu0 %v15258_v1  ;;  %13957 = vmatprep.subr.bf16.mxu1 %v15258_v1 }
 0xc06   :  { %13953 = vmatprep.mubr.msk.bf16.mxu0 %vm15259_vm0, %v15258_v1 }
 0xc07   :  { %13946 = vmatmul.mubr.msk.bf16.vlgmr.msra.gmra.mrb[148].mxu1 %vm264_vm1, %v4420_v49 }
 0xc08   :  { %13952 = vmatpush3.bf16.msra.mxu0 %v14924_v45  ;;  %13958 = vmatpush3.bf16.msra.mxu1 %v14925_v53 }
 0xc09   :  { %13959 = vmatprep.subr.bf16.mxu1 %v15258_v1  ;;  %13965 = vmatprep.subr.bf16.mxu0 %v15258_v1 }
 0xc0a   :  { %13961 = vmatprep.mubr.msk.bf16.mxu1 %vm15259_vm0, %v15258_v1 }
 0xc0b   :  { %13954 = vmatmul.mubr.msk.bf16.vlgmr.msra.gmra.mrb[152].mxu0 %vm264_vm1, %v16189_v5 }
 0xc0c   :  { %13960 = vmatpush3.bf16.msra.mxu1 %v14926_v27  ;;  %13966 = vmatpush3.bf16.msra.mxu0 %v14927_v34 }
 0xc0d   :  { %13967 = vmatprep.subr.bf16.mxu0 %v15258_v1  ;;  %13973 = vmatprep.subr.bf16.mxu1 %v15258_v1 }
 0xc0e   :  { %13969 = vmatprep.mubr.msk.bf16.mxu0 %vm15259_vm0, %v15258_v1 }
 0xc0f   :  { %13962 = vmatmul.mubr.msk.bf16.vlgmr.msra.gmra.mrb[152].mxu1 %vm264_vm1, %v16189_v5 }
 0xc10   :  { %13968 = vmatpush3.bf16.msra.mxu0 %v14928_v56  ;;  %13974 = vmatpush3.bf16.msra.mxu1 %v14929_v59 }
 0xc11   :  { %13975 = vmatprep.subr.bf16.mxu1 %v15258_v1  ;;  %13977 = vmatprep.mubr.msk.bf16.mxu1 %vm15259_vm0, %v15258_v1 }
 0xc12   :  { %13981 = vmatprep.subr.bf16.mxu0 %v15258_v1 }
 0xc13   :  { %13970 = vmatmul.mubr.msk.bf16.vlgmr.msra.gmra.mrb[156].mxu0 %vm264_vm1, %v16189_v5 }
 0xc14   :  { %13976 = vmatpush3.bf16.msra.mxu1 %v14930_v46  ;;  %13985 = vmatprep.mubr.msk.bf16.mxu0 %vm15259_vm0, %v15258_v1 }
 0xc15   :  { %13989 = vmatprep.subr.bf16.mxu1 %v15258_v1  ;;  %13982 = vmatpush3.bf16.msra.mxu0 %v14931_v3 }
 0xc16   :  { %13983 = vmatprep.subr.bf16.mxu0 %v15258_v1 }
 0xc17   :  { %13978 = vmatmul.mubr.msk.bf16.vlgmr.msra.gmra.mrb[156].mxu1 %vm264_vm1, %v16189_v5 }
 0xc18   :  { %13993 = vmatprep.mubr.msk.bf16.mxu1 %vm15259_vm0, %v15258_v1  ;;  %13990 = vmatpush3.bf16.msra.mxu1 %v14932_v57 }
 0xc19   :  { %13991 = vmatprep.subr.bf16.mxu1 %v15258_v1  ;;  %13984 = vmatpush3.bf16.msra.mxu0 %v14933_v4 }
 0xc1a   :  { %13997 = vmatprep.subr.bf16.mxu0 %v15258_v1 }
 0xc1c   :  { %13992 = vmatpush3.bf16.msra.mxu1 %v14934_v10  ;;  %13986 = vmatmul.mubr.msk.bf16.vlgmr.msra.gmra.mrb[160].mxu0 %vm264_vm1, %v16189_v5 }
 0xc1d   :  { %14005 = vmatprep.subr.bf16.mxu1 %v15258_v1  ;;  %13998 = vmatpush3.bf16.msra.mxu0 %v14935_v11 }
 0xc1e   :  { %14001 = vmatprep.mubr.msk.bf16.mxu0 %vm15259_vm0, %v15258_v1  ;;  %13999 = vmatprep.subr.bf16.mxu0 %v15258_v1 }
 0xc1f   :  { %13994 = vmatmul.mubr.msk.bf16.vlgmr.msra.gmra.mrb[160].mxu1 %vm264_vm1, %v16189_v5 }
 0xc20   :  { %14009 = vmatprep.mubr.msk.bf16.mxu1 %vm15259_vm0, %v15258_v1  ;;  %14006 = vmatpush3.bf16.msra.mxu1 %v14937_v14 }
 0xc21   :  { %14000 = vmatpush3.bf16.msra.mxu0 %v14936_v60  ;;  %14007 = vmatprep.subr.bf16.mxu1 %v15258_v1 }
 0xc22   :  { %14013 = vmatprep.subr.bf16.mxu0 %v15258_v1 }
 0xc24   :  { %14002 = vmatmul.mubr.msk.bf16.vlgmr.msra.gmra.mrb[164].mxu0 %vm264_vm1, %v16189_v5  ;;  %14008 = vmatpush3.bf16.msra.mxu1 %v14938_v2 }
 0xc25   :  { %14015 = vmatprep.mubr.msk.bf16.mxu0 %vm15259_vm0, %v15258_v1  ;;  %14019 = vmatprep.subr.bf16.mxu1 %v15258_v1 }
 0xc27   :  { %14010 = vmatmul.mubr.msk.bf16.vlgmr.msra.gmra.mrb[164].mxu1 %vm264_vm1, %v16189_v5 }
 0xc28   :  { %14021 = vmatprep.mubr.msk.bf16.mxu1 %vm15259_vm0, %v15258_v1 }
 0xcbe   :  { %v4262_v15 = vpop.f32.mrb[136].mxu0 }
 0xcbf   :  { %v13897_v16 = vpop.f32.mrb[137].mxu0  ;;  %v4406_v26 = vsel %vm264_vm1, %v4262_v15, 0.0 }
 0xcc0   :  { %v4265_v17 = vpop.f32.mrb[138].mxu0 }
 0xcc1   :  { %v13898_v19 = vpop.f32.mrb[139].mxu0 }
 0xcc2   :  { %v4308_v43 = vpop.f32.mrb[136].mxu1 }
 0xcc3   :  { %v4407_v32 = vsel %vm264_vm1, %v4308_v43, 0.0  ;;  %v13903_v6 = vpop.f32.mrb[137].mxu1 }
 0xcc4   :  { %v4408_v44 = vadd.f32 %v4407_v32, %v4406_v26  ;;  %v4311_v23 = vpop.f32.mrb[138].mxu1 }
 0xcc5   :  { %v13904_v25 = vpop.f32.mrb[139].mxu1 }
 0xcc6   :  { %v4354_v28 = vpop.f32.mrb[140].mxu0 }
 0xcc7   :  { %v4409_v30 = vsel %vm264_vm1, %v4354_v28, 0.0  ;;  %v13909_v31 = vpop.f32.mrb[141].mxu0 }
 0xcc8   :  { %v4410_v33 = vadd.f32 %v4409_v30, %v4408_v44  ;;  %v4357_v29 = vpop.f32.mrb[142].mxu0 }
 0xcc9   :  { %v13910_v35 = vpop.f32.mrb[143].mxu0 }
 0xcca   :  { %v4400_v38 = vpop.f32.mrb[140].mxu1 }
 0xccb   :  { %v4411_v39 = vsel %vm264_vm1, %v4400_v38, 0.0  ;;  %v13915_v0 = vpop.f32.mrb[141].mxu1 }
 0xccc   :  { %v16257_v13 = vadd.f32 %v4411_v39, %v4410_v33  ;;  %v4403_v8 = vpop.f32.mrb[142].mxu1 }
 0xccd   :  { %v13916_v41 = vpop.f32.mrb[143].mxu1 }
 0xcce   :  { %v4559_v7 = vpop.f32.mrb[144].mxu0 }
 0xccf   :  { %v13923_v49 = vpop.f32.mrb[145].mxu0  ;;  %v4560_v26 = vadd.f32 %v16029_v62, %v4559_v7 }
 0xcd0   :  { %v4562_v36 = vpop.f32.mrb[146].mxu0 }
 0xcd1   :  { %v13924_v50 = vpop.f32.mrb[147].mxu0  ;;  %v5188_v30 = vpack.c.bf16 %v4560_v26, %v4560_v26 }
 0xcd2   :  { %v4611_v51 = vpop.f32.mrb[144].mxu1 }
 0xcd3   :  { %v13931_v52 = vpop.f32.mrb[145].mxu1 }
 0xcd4   :  { %v4614_v45 = vpop.f32.mrb[146].mxu1 }
 0xcd5   :  { %v13932_v53 = vpop.f32.mrb[147].mxu1 }
 0xcd6   :  { %v4663_v54 = vpop.f32.mrb[148].mxu0 }
 0xcd7   :  { %v13939_v27 = vpop.f32.mrb[149].mxu0 }
 0xcd8   :  { %v4666_v34 = vpop.f32.mrb[150].mxu0 }
 0xcd9   :  { %v13940_v56 = vpop.f32.mrb[151].mxu0 }
 0xcda   :  { %v4715_v59 = vpop.f32.mrb[148].mxu1 }
 0xcdb   :  { %v13947_v46 = vpop.f32.mrb[149].mxu1  ;;  %v4716_v7 = vadd.f32 %v16059_v37, %v4715_v59 }
 0xcdc   :  { %v4718_v3 = vpop.f32.mrb[150].mxu1 }
 0xcdd   :  { %v13948_v57 = vpop.f32.mrb[151].mxu1 }
 0xcde   :  { %v4794_v4 = vpop.f32.mrb[152].mxu0 }
 0xcdf   :  { %v4795_v10 = vadd.f32 %v16022_v55, %v4794_v4  ;;  %v13955_v11 = vpop.f32.mrb[153].mxu0 }
 0xce0   :  { %v4797_v60 = vpop.f32.mrb[154].mxu0 }
 0xce1   :  { %v5192_v14 = vpack.c.bf16 %v4795_v10, %v4795_v10  ;;  %v13956_v2 = vpop.f32.mrb[155].mxu0 }
 0xce2   :  { %v4846_v15 = vpop.f32.mrb[152].mxu1 }
 0xce3   :  { %v5200_v16 = vsel %vm936_vm2, %v5192_v14, 0  ;;  %v4847_v17 = vadd.f32 %v16026_v58, %v4846_v15  ;;  %v13963_v19 = vpop.f32.mrb[153].mxu1  ;;  %v4612_v58 = vadd.f32 %v16039_v12, %v4611_v51  ;;  %v4664_v12 = vadd.f32 %v16049_v20, %v4663_v54 }
 0xce4   :  { %v4849_v43 = vpop.f32.mrb[154].mxu1  ;;  %14014 = vmatpush3.bf16.xpose.msra.mxu0 %v5200_v16  ;;  %v5191_v20 = vpack.c.bf16 %v4716_v7, %v4716_v7 }
 0xce5   :  { %v5193_v32 = vpack.c.bf16 %v4847_v17, %v4847_v17  ;;  %v13964_v6 = vpop.f32.mrb[155].mxu1  ;;  %14025 = vmatprep.subr.bf16.mxu0 %v15258_v1 }
 0xce6   :  { %v4898_v44 = vpop.f32.mrb[156].mxu0 }
 0xce7   :  { %v5246_v55 = vsel %vm936_vm2, %v5193_v32, 0  ;;  %v4899_v23 = vadd.f32 %v16034_v63, %v4898_v44  ;;  %v13971_v25 = vpop.f32.mrb[157].mxu0  ;;  %v5189_v63 = vpack.c.bf16 %v4612_v58, %v4612_v58 }
 0xce8   :  { %v4901_v28 = vpop.f32.mrb[158].mxu0  ;;  %14020 = vmatpush3.bf16.xpose.msra.mxu1 %v5246_v55 }
 0xce9   :  { %v5194_v31 = vpack.c.bf16 %v4899_v23, %v4899_v23  ;;  %v13972_v33 = vpop.f32.mrb[159].mxu0  ;;  %14031 = vmatprep.subr.bf16.mxu1 %v15258_v1 }
 0xcea   :  { %v4950_v62 = vpop.f32.mrb[156].mxu1 }
 0xceb   :  { %v5292_v29 = vsel %vm936_vm2, %v5194_v31, 0  ;;  %v4951_v35 = vadd.f32 %v16044_v18, %v4950_v62  ;;  %v13979_v38 = vpop.f32.mrb[157].mxu1  ;;  %14016 = vmatmul.mubr.msk.bf16.vlgmr.msra.gmra.mrb[168].mxu0 %vm936_vm2, %v5188_v30  ;;  %v5190_v18 = vpack.c.bf16 %v4664_v12, %v4664_v12 }
 0xcec   :  { %v4953_v39 = vpop.f32.mrb[158].mxu1  ;;  %14026 = vmatpush3.bf16.xpose.msra.mxu0 %v5292_v29  ;;  %14027 = vmatprep.mubr.msk.bf16.mxu0 %vm15259_vm0, %v15258_v1 }
 0xced   :  { %v5195_v0 = vpack.c.bf16 %v4951_v35, %v4951_v35  ;;  %v13980_v8 = vpop.f32.mrb[159].mxu1  ;;  %14037 = vmatprep.subr.bf16.mxu0 %v15258_v1 }
 0xcef   :  { %v5338_v41 = vsel %vm936_vm2, %v5195_v0, 0  ;;  %14022 = vmatmul.mubr.msk.bf16.vlgmr.msra.gmra.mrb[168].mxu1 %vm936_vm2, %v5189_v63  ;;  %v5026_v49 = vpop.f32.mrb[160].mxu0 }
 0xcf0   :  { %14032 = vmatpush3.bf16.xpose.msra.mxu1 %v5338_v41  ;;  %14033 = vmatprep.mubr.msk.bf16.mxu1 %vm15259_vm0, %v15258_v1  ;;  %v5027_v36 = vadd.f32 %v16074_v42, %v5026_v49  ;;  %v13987_v50 = vpop.f32.mrb[161].mxu0 }
 0xcf1   :  { %14043 = vmatprep.subr.bf16.mxu1 %v15258_v1  ;;  %v5029_v51 = vpop.f32.mrb[162].mxu0 }
 0xcf2   :  { %v5078_v52 = vpop.f32.mrb[160].mxu1  ;;  %v5432_v37 = vpack.c.bf16 %v5027_v36, %v5027_v36  ;;  %v13988_v53 = vpop.f32.mrb[163].mxu0 }
 0xcf3   :  { %14028 = vmatmul.mubr.msk.bf16.vlgmr.msra.gmra.mrb[172].mxu0 %vm936_vm2, %v5190_v18  ;;  %v5079_v45 = vadd.f32 %v16077_v48, %v5078_v52  ;;  %v13995_v54 = vpop.f32.mrb[161].mxu1 }
 0xcf4   :  { %14039 = vmatprep.mubr.msk.bf16.mxu0 %vm15259_vm0, %v15258_v1  ;;  %v5081_v27 = vpop.f32.mrb[162].mxu1  ;;  %v5440_v34 = vsel %vm1184_vm3, %v5432_v37, 0 }
 0xcf5   :  { %v5433_v56 = vpack.c.bf16 %v5079_v45, %v5079_v45  ;;  %v13996_v59 = vpop.f32.mrb[163].mxu1  ;;  %14038 = vmatpush3.bf16.msra.mxu0 %v5440_v34  ;;  %v16303_v45 = vld [vmem:[%s17386_s15] ss:$0 sm:$0xff] }
 0xcf6   :  { %14049 = vmatprep.subr.bf16.mxu0 %v15258_v1  ;;  %v4419_v54 = vadd.f32 %v16303_v45, %v16257_v13 }
 0xcf7   :  { %14034 = vmatmul.mubr.msk.bf16.vlgmr.msra.gmra.mrb[172].mxu1 %vm936_vm2, %v5191_v20  ;;  %v5486_v46 = vsel %vm1184_vm3, %v5433_v56, 0  ;;  %v16292_v42 = vpop.f32.mrb[164].mxu0 }
 0xcf8   :  { %14045 = vmatprep.mubr.msk.bf16.mxu1 %vm15259_vm0, %v15258_v1  ;;  %14044 = vmatpush3.bf16.msra.mxu1 %v5486_v46  ;;  %v14003_v3 = vpop.f32.mrb[165].mxu0  ;;  %v5822_v59 = vadd.f32 %v4419_v54, %v15917_v47  ;;  %v5131_v13 = vadd.f32 %v16102_v21, %v16292_v42 }
 0xcf9   :  { %14055 = vmatprep.subr.bf16.mxu1 %v15258_v1  ;;  %v5133_v57 = vpop.f32.mrb[166].mxu0 }
 0xcfa   :  { %v14004_v48 = vpop.f32.mrb[167].mxu0  ;;  %v16295_v4 = vpop.f32.mrb[164].mxu1  ;;  %v5826_v57 = vsel %vm264_vm1, %v5822_v59, 0.0 }
 0xcfb   :  { %v14011_v10 = vpop.f32.mrb[165].mxu1  ;;  %v5183_v47 = vadd.f32 %v16107_v22, %v16295_v4 }
 0xcfc   :  { %v5185_v11 = vpop.f32.mrb[166].mxu1 }
 0xcfd   :  { %v14012_v60 = vpop.f32.mrb[167].mxu1 }
 0xdbe   :  { %v5236_v14 = vpop.f32.mrb[168].mxu0 }
 0xdbf   :  { %v5380_v2 = vmul.f32 0.35355338, %v5236_v14  ;;  %v14017_v15 = vpop.f32.mrb[169].mxu0  ;;  %v5434_v14 = vpack.c.bf16 %v5131_v13, %v5131_v13 }
 0xdc0   :  { %v5239_v16 = vpop.f32.mrb[170].mxu0 }
 0xdc1   :  { %v14018_v17 = vpop.f32.mrb[171].mxu0  ;;  %v5384_v19 = vsel %vm936_vm2, %v5380_v2, -inf }
 0xdc2   :  { %v5282_v43 = vpop.f32.mrb[168].mxu1  ;;  %5385 = vmax.xlane.f32.xlu0 %v5384_v19 }
 0xdc3   :  { %v5381_v26 = vmul.f32 0.35355338, %v5282_v43  ;;  %v14023_v32 = vpop.f32.mrb[169].mxu1 }
 0xdc4   :  { %v5285_v6 = vpop.f32.mrb[170].mxu1  ;;  %v5532_v32 = vsel %vm1184_vm3, %v5434_v14, 0 }
 0xdc5   :  { %v14024_v44 = vpop.f32.mrb[171].mxu1  ;;  %v5387_v55 = vsel %vm936_vm2, %v5381_v26, -inf  ;;  %v5435_v6 = vpack.c.bf16 %v5183_v47, %v5183_v47 }
 0xdc6   :  { %5388 = vmax.xlane.f32.xlu1 %v5387_v55  ;;  %v5328_v23 = vpop.f32.mrb[172].mxu0 }
 0xdc7   :  { %v5382_v25 = vmul.f32 0.35355338, %v5328_v23  ;;  %v14029_v28 = vpop.f32.mrb[173].mxu0  ;;  %v5578_v55 = vsel %vm1184_vm3, %v5435_v6, 0 }
 0xdc8   :  { %v5331_v30 = vpop.f32.mrb[174].mxu0 }
 0xdc9   :  { %v14030_v58 = vpop.f32.mrb[175].mxu0  ;;  %v5390_v31 = vsel %vm936_vm2, %v5382_v25, -inf }
 0xdca   :  { %v5374_v33 = vpop.f32.mrb[172].mxu1  ;;  %5391 = vmax.xlane.f32.xlu0 %v5390_v31  ;;  %v4481_v31 = vld [vmem:[%s17385_s11] sm:$0xf] }
 0xdcb   :  { %v5383_v62 = vmul.f32 0.35355338, %v5374_v33  ;;  %v14035_v29 = vpop.f32.mrb[173].mxu1  ;;  %v5628_v33 = vsel %vm1184_vm3, %v4481_v31, 0 }
 0xdcc   :  { %v5377_v35 = vpop.f32.mrb[174].mxu1 }
 0xdcd   :  { %v14036_v38 = vpop.f32.mrb[175].mxu1  ;;  %v5393_v39 = vsel %vm936_vm2, %v5383_v62, -inf  ;;  %v4483_v35 = vld [vmem:[%s17385_s11 + $0x8] sm:$0xf] }
 0xdce   :  { %5394 = vmax.xlane.f32.xlu1 %v5393_v39 }
 0xe4f   :  { %v5386_v63 = vpop.xlane.xlu0 %5385 }
 0xe50   :  { %v5396_v12 = vsub.f32 %v5380_v2, %v5386_v63 }
 0xe52   :  { %v5400_v0 = vmul.f32 1.442695, %v5396_v12  ;;  %v5720_v12 = vsel %vm1184_vm3, %v4483_v35, 0  ;;  %v14940_v35 = vld [vmem:[%s17387_s16 + $0x8] sm:$0xff]  }
 0xe53   :  { %v5389_v8 = vpop.xlane.xlu1 %5388 }
 0xe54   :  { %15101 = vpow2.f32 %v5400_v0  ;;  %v5397_v41 = vsub.f32 %v5381_v26, %v5389_v8  ;;  %v4484_v8 = vld [vmem:[%s17385_s11 + $0xc] sm:$0xf] }
 0xe56   :  { %v5402_v18 = vmul.f32 1.442695, %v5397_v41 }
 0xe57   :  { %v5392_v7 = vpop.xlane.xlu0 %5391 }
 0xe58   :  { %15103 = vpow2.f32 %v5402_v18  ;;  %v5398_v20 = vsub.f32 %v5382_v25, %v5392_v7 }
 0xe5a   :  { %v5404_v49 = vmul.f32 1.442695, %v5398_v20 }
 0xe5b   :  { %v5395_v36 = vpop.xlane.xlu1 %5394 }
 0xe5c   :  { %15105 = vpow2.f32 %v5404_v49  ;;  %v5399_v50 = vsub.f32 %v5383_v62, %v5395_v36  ;;  %v4482_v62 = vld [vmem:[%s17385_s11 + $0x4] sm:$0xf]  ;;  %v5766_v49 = vsel %vm1184_vm3, %v4484_v8, 0 }
 0xe5d   :  { %v5674_v29 = vsel %vm1184_vm3, %v4482_v62, 0 }
 0xe5e   :  { %v15102_v51 = vpop.eup %15101  ;;  %v5406_v52 = vmul.f32 1.442695, %v5399_v50 }
 0xe5f   :  { %v5408_v37 = vsel %vm936_vm2, %v15102_v51, 0.0 }
 0xe60   :  { %15107 = vpow2.f32 %v5406_v52  ;;  %5409 = vadd.xlane.f32.xlu0 %v5408_v37 }
 0xe62   :  { %v15104_v53 = vpop.eup %15103 }
 0xe63   :  { %v5411_v27 = vsel %vm936_vm2, %v15104_v53, 0.0 }
 0xe64   :  { %5412 = vadd.xlane.f32.xlu1 %v5411_v27 }
 0xe66   :  { %v15106_v34 = vpop.eup %15105 }
 0xe67   :  { %v5414_v56 = vsel %vm936_vm2, %v15106_v34, 0.0 }
 0xe68   :  { %5415 = vadd.xlane.f32.xlu0 %v5414_v56 }
 0xe6a   :  { %v15108_v46 = vpop.eup %15107 }
 0xe6b   :  { %v5417_v3 = vsel %vm936_vm2, %v15108_v46, 0.0 }
 0xe6c   :  { %5418 = vadd.xlane.f32.xlu1 %v5417_v3  ;;  %5827 = vadd.xlane.f32.xlu0 %v5826_v57 }
 0xeed   :  { %v5410_v48 = vpop.xlane.xlu0 %5409 }
 0xeee   :  { %15109 = vrcp.f32 %v5410_v48 }
 0xef1   :  { %v5413_v10 = vpop.xlane.xlu1 %5412 }
 0xef2   :  { %15111 = vrcp.f32 %v5413_v10 }
 0xef5   :  { %v5416_v11 = vpop.xlane.xlu0 %5415 }
 0xef6   :  { %15113 = vrcp.f32 %v5416_v11 }
 0xef8   :  { %v15110_v60 = vpop.eup %15109 }
 0xef9   :  { %v5424_v2 = vmul.f32 %v15110_v60, %v15102_v51  ;;  %v5419_v15 = vpop.xlane.xlu1 %5418  ;;  %v5828_v16 = vpop.xlane.xlu0 %5827 }
 0xefa   :  { %15115 = vrcp.f32 %v5419_v15  ;;  %v5832_v17 = vmul.f32 0.03125, %v5828_v16 }
 0xefb   :  { %v5428_v19 = vpack.c.bf16 %v5424_v2, %v5424_v2 }
 0xefc   :  { %v15112_v43 = vpop.eup %15111  ;;  %v16316_v26 = vsub.f32 %v5822_v59, %v5832_v17 }
 0xefd   :  { %v5425_v21 = vmul.f32 %v15112_v43, %v15104_v53  ;;  %14040 = vmatmul.mubr.msk.bf16.vlgmr.msra.gmra.mrb[176].mxu0 %vm936_vm2, %v5428_v19 }
 0xefe   :  { %14050 = vmatpush3.bf16.msra.mxu0 %v5532_v32  ;;  %v5836_v42 = vmul.f32 %v16316_v26, %v16316_v26  ;;  %14051 = vmatprep.mubr.msk.bf16.mxu0 %vm15259_vm0, %v15258_v1 }
 0xeff   :  { %v5429_v22 = vpack.c.bf16 %v5425_v21, %v5425_v21  ;;  %14061 = vmatprep.subr.bf16.mxu0 %v15258_v1 }
 0xf00   :  { %v15114_v4 = vpop.eup %15113  ;;  %v5838_v44 = vsel %vm264_vm1, %v5836_v42, 0.0 }
 0xf01   :  { %v5426_v23 = vmul.f32 %v15114_v4, %v15106_v34  ;;  %14046 = vmatmul.mubr.msk.bf16.vlgmr.msra.gmra.mrb[176].mxu1 %vm936_vm2, %v5429_v22  ;;  %5839 = vadd.xlane.f32.xlu0 %v5838_v44 }
 0xf02   :  { %14056 = vmatpush3.bf16.msra.mxu1 %v5578_v55  ;;  %14057 = vmatprep.mubr.msk.bf16.mxu1 %vm15259_vm0, %v15258_v1 }
 0xf03   :  { %v5430_v25 = vpack.c.bf16 %v5426_v23, %v5426_v23  ;;  %14067 = vmatprep.subr.bf16.mxu1 %v15258_v1 }
 0xf04   :  { %v15116_v28 = vpop.eup %15115 }
 0xf05   :  { %v5427_v30 = vmul.f32 %v15116_v28, %v15108_v46  ;;  %14052 = vmatmul.mubr.msk.bf16.vlgmr.msra.gmra.mrb[180].mxu0 %vm936_vm2, %v5430_v25 }
 0xf06   :  { %14063 = vmatprep.mubr.msk.bf16.mxu0 %vm15259_vm0, %v15258_v1  ;;  %14062 = vmatpush3.bf16.msra.mxu0 %v5628_v33 }
 0xf07   :  { %v5431_v58 = vpack.c.bf16 %v5427_v30, %v5427_v30  ;;  %14073 = vmatprep.subr.bf16.mxu0 %v15258_v1 }
 0xf09   :  { %14058 = vmatmul.mubr.msk.bf16.vlgmr.msra.gmra.mrb[180].mxu1 %vm936_vm2, %v5431_v58 }
 0xf0a   :  { %14069 = vmatprep.mubr.msk.bf16.mxu1 %vm15259_vm0, %v15258_v1  ;;  %14068 = vmatpush3.bf16.msra.mxu1 %v5674_v29  ;;  %v14939_v29 = vld [vmem:[%s17387_s16] sm:$0xff]  }
 0xf0b   :  { %14079 = vmatprep.subr.bf16.mxu1 %v15258_v1 }
 0xfd0   :  { %v5476_v38 = vpop.f32.mrb[176].mxu0 }
 0xfd1   :  { %v5620_v39 = vpack.c.bf16 %v5476_v38, %v5476_v38  ;;  %v14041_v63 = vpop.f32.mrb[177].mxu0  ;;  %v5840_v38 = vpop.xlane.xlu0 %5839 }
 0xfd2   :  { %v5479_v0 = vpop.f32.mrb[178].mxu0 }
 0xfd3   :  { %v14042_v41 = vpop.f32.mrb[179].mxu0  ;;  %14064 = vmatmul.mubr.msk.bf16.vlgmr.msra.gmra.mrb[184].mxu0 %vm936_vm2, %v5620_v39  ;;  %v5844_v39 = vmul.f32 0.03125, %v5840_v38  ;;  %v14951_v38 = vld [vmem:[%s15296_s25 + $0x58] sm:$0xff]  }
 0xfd4   :  { %v5522_v18 = vpop.f32.mrb[176].mxu1  ;;  %14074 = vmatpush3.bf16.msra.mxu0 %v5720_v12  ;;  %14075 = vmatprep.mubr.msk.bf16.mxu0 %vm15259_vm0, %v15258_v1 }
 0xfd5   :  { %v5621_v7 = vpack.c.bf16 %v5522_v18, %v5522_v18  ;;  %v14047_v20 = vpop.f32.mrb[177].mxu1  ;;  %14085 = vmatprep.subr.bf16.mxu0 %v15258_v1  ;;  %v5846_v63 = vadd.f32 1e-05, %v5844_v39  ;;  %v14952_v39 = vld [vmem:[%s15306_s3 + $0x48] sm:$0xff]  }
 0xfd6   :  { %v5525_v36 = vpop.f32.mrb[178].mxu1 }
 0xfd7   :  { %v14048_v50 = vpop.f32.mrb[179].mxu1  ;;  %14070 = vmatmul.mubr.msk.bf16.vlgmr.msra.gmra.mrb[184].mxu1 %vm936_vm2, %v5621_v7  ;;  %15117 = vrsqrt.f32 %v5846_v63  ;;  %v12356_v7 = vld [vmem:[%s17389_s22] ss:$0 sm:$0xff]  ;;  %v14953_v63 = vld [vmem:[%s15296_s25 + $0x70] sm:$0xff]  }
 0xfd8   :  { %v5568_v51 = vpop.f32.mrb[180].mxu0  ;;  %14080 = vmatpush3.bf16.msra.mxu1 %v5766_v49  ;;  %14081 = vmatprep.mubr.msk.bf16.mxu1 %vm15259_vm0, %v15258_v1  ;;  %v12357_v50 = vld [vmem:[%s17390_s23] ss:$0 sm:$0xff] }
 0xfd9   :  { %v5622_v52 = vpack.c.bf16 %v5568_v51, %v5568_v51  ;;  %v14053_v37 = vpop.f32.mrb[181].mxu0  ;;  %14093 = vmatprep.subr.bf16.mxu1 %v15258_v1 }
 0xfda   :  { %v5571_v53 = vpop.f32.mrb[182].mxu0 }
 0xfdb   :  { %v14054_v54 = vpop.f32.mrb[183].mxu0  ;;  %14076 = vmatmul.mubr.msk.bf16.vlgmr.msra.gmra.mrb[188].mxu0 %vm936_vm2, %v5622_v52 }
 0xfdc   :  { %v5614_v27 = vpop.f32.mrb[180].mxu1  ;;  %14089 = vmatprep.mubr.msk.bf16.mxu0 %vm15259_vm0, %v15258_v1  ;;  %14086 = vmatpush3.bf16.msra.mxu0 %v14939_v29  ;;  %v14943_v54 = vld [vmem:[%s17388_s18 + $0x10] sm:$0xff]  }
 0xfdd   :  { %v5623_v34 = vpack.c.bf16 %v5614_v27, %v5614_v27  ;;  %v14059_v56 = vpop.f32.mrb[181].mxu1  ;;  %14087 = vmatprep.subr.bf16.mxu0 %v15258_v1  ;;  %v12358_v27 = vld [vmem:[%s17391_s26] ss:$0 sm:$0xff] }
 0xfde   :  { %v5617_v59 = vpop.f32.mrb[182].mxu1 }
 0xfdf   :  { %v14060_v46 = vpop.f32.mrb[183].mxu1  ;;  %14082 = vmatmul.mubr.msk.bf16.vlgmr.msra.gmra.mrb[188].mxu1 %vm936_vm2, %v5623_v34 }
 0xfe0   :  { %14101 = vmatprep.mubr.msk.bf16.mxu1 %vm15259_vm0, %v15258_v1  ;;  %14088 = vmatpush3.bf16.msra.mxu0 %v14940_v35  ;;  %v14949_v35 = vld [vmem:[%s15296_s25 + $0x50] sm:$0xff]  }
 0xfe1   :  { %14105 = vmatprep.subr.bf16.mxu0 %v15258_v1  ;;  %v15118_v41 = vpop.eup %15117 }
 0xfe2   :  { %v5850_v18 = vmul.f32 %v15118_v41, %v16316_v26  ;;  %v14944_v26 = vld [vmem:[%s17388_s18 + $0x18] sm:$0xff]   ;;  %v14957_v41 = vld [vmem:[%s15306_s3 + $0x50] sm:$0xff]  }
 0xfe4   :  { %v5858_v49 = vmul.f32 %v12356_v7, %v5850_v18  ;;  %v14958_v18 = vld [vmem:[%s15316_s14 + $0x40] sm:$0xff]  }
 0xfe6   :  { %v5866_v52 = vadd.f32 %v12357_v50, %v5858_v49  ;;  %v14961_v49 = vld [vmem:[%s15306_s3 + $0x70] sm:$0xff]  }
0x10a6   :  { %v5664_v3 = vpop.f32.mrb[184].mxu0 }
0x10a7   :  { %v14065_v57 = vpop.f32.mrb[185].mxu0  ;;  %v5808_v11 = vsel %vm264_vm1, %v5664_v3, 0.0 }
0x10a8   :  { %v5667_v48 = vpop.f32.mrb[186].mxu0 }
0x10a9   :  { %v14066_v10 = vpop.f32.mrb[187].mxu0 }
0x10aa   :  { %v5710_v13 = vpop.f32.mrb[184].mxu1 }
0x10ab   :  { %v5809_v60 = vsel %vm264_vm1, %v5710_v13, 0.0  ;;  %v14071_v14 = vpop.f32.mrb[185].mxu1 }
0x10ac   :  { %v5810_v47 = vadd.f32 %v5809_v60, %v5808_v11  ;;  %v5713_v2 = vpop.f32.mrb[186].mxu1  ;;  %v12362_v11 = vld [vmem:[%s17392_s28] ss:$0 sm:$0xff] }
0x10ad   :  { %v14072_v15 = vpop.f32.mrb[187].mxu1 }
0x10ae   :  { %v5756_v16 = vpop.f32.mrb[188].mxu0 }
0x10af   :  { %v5811_v17 = vsel %vm264_vm1, %v5756_v16, 0.0  ;;  %v14077_v19 = vpop.f32.mrb[189].mxu0 }
0x10b0   :  { %v5812_v43 = vadd.f32 %v5811_v17, %v5810_v47  ;;  %v5759_v32 = vpop.f32.mrb[190].mxu0 }
0x10b1   :  { %v14078_v6 = vpop.f32.mrb[191].mxu0 }
0x10b2   :  { %v5802_v21 = vpop.f32.mrb[188].mxu1 }
0x10b3   :  { %v5813_v42 = vsel %vm264_vm1, %v5802_v21, 0.0  ;;  %v14083_v22 = vpop.f32.mrb[189].mxu1 }
0x10b4   :  { %v5814_v4 = vadd.f32 %v5813_v42, %v5812_v43  ;;  %v5805_v44 = vpop.f32.mrb[190].mxu1  ;;  %v14945_v22 = vld [vmem:[%s15296_s25 + $0x40] sm:$0xff]  }
0x10b5   :  { %v14084_v55 = vpop.f32.mrb[191].mxu1  ;;  %v14947_v44 = vld [vmem:[%s15296_s25 + $0x48] sm:$0xff]  }
0x10b6   :  { %v5821_v23 = vadd.f32 %v16303_v45, %v5814_v4  ;;  %v14942_v45 = vld [vmem:[%s17388_s18 + $0x8] sm:$0xff]   ;;  %v14946_v4 = vld [vmem:[%s15296_s25 + $0x60] sm:$0xff]  }
0x10b7   :  { %v14948_v55 = vld [vmem:[%s15296_s25 + $0x68] sm:$0xff]  }
0x10b8   :  { %v5823_v25 = vadd.f32 %v5821_v23, %v16155_v24  ;;  %v14941_v24 = vld [vmem:[%s17388_s18] sm:$0xff]  }
0x10b9   :  { %14094 = vmatpush3.bf16.msra.mxu1 %v14941_v24  ;;  %v14950_v24 = vld [vmem:[%s15306_s3 + $0x40] sm:$0xff]  }
0x10ba   :  { %v5829_v28 = vsel %vm264_vm1, %v5823_v25, 0.0  ;;  %14095 = vmatprep.subr.bf16.mxu1 %v15258_v1 }
0x10bb   :  { %5830 = vadd.xlane.f32.xlu1 %v5829_v28 }
0x10bd   :  { %14096 = vmatpush3.bf16.msra.mxu1 %v14942_v45 }
0x10be   :  { %14097 = vmatprep.subr.bf16.mxu1 %v15258_v1 }
0x10c1   :  { %14098 = vmatpush3.bf16.msra.mxu1 %v14943_v54  ;;  %v14967_v54 = vld [vmem:[%s15316_s14 + $0x70] sm:$0xff]  }
0x10c2   :  { %14099 = vmatprep.subr.bf16.mxu1 %v15258_v1 }
0x10c5   :  { %14100 = vmatpush3.bf16.msra.mxu1 %v14944_v26  ;;  %v14968_v26 = vld [vmem:[%s15316_s14 + $0x78] sm:$0xff]  }
0x10c6   :  { %14121 = vmatprep.subr.bf16.mxu1 %v15258_v1 }
0x1148   :  { %v5831_v30 = vpop.xlane.xlu1 %5830 }
0x1149   :  { %v5833_v58 = vmul.f32 0.03125, %v5831_v30 }
0x114b   :  { %v5835_v31 = vsub.f32 %v5823_v25, %v5833_v58  ;;  %v16408_v58 = vld [vmem:[%s17393_s1] ss:$0 sm:$0xff] }
0x114d   :  { %v5837_v33 = vmul.f32 %v5835_v31, %v5835_v31 }
0x114f   :  { %v5841_v62 = vsel %vm264_vm1, %v5837_v33, 0.0  ;;  %v16411_v33 = vld [vmem:[%s15421_s12] ss:$0 sm:$0xff] }
0x1150   :  { %5842 = vadd.xlane.f32.xlu1 %v5841_v62 }
0x11dd   :  { %v5843_v12 = vpop.xlane.xlu1 %5842 }
0x11de   :  { %v5845_v0 = vmul.f32 0.03125, %v5843_v12  ;;  %v14954_v12 = vld [vmem:[%s15306_s3 + $0x60] sm:$0xff]  }
0x11e0   :  { %v5847_v8 = vadd.f32 1e-05, %v5845_v0  ;;  %v14955_v0 = vld [vmem:[%s15296_s25 + $0x78] sm:$0xff]  }
0x11e2   :  { %15119 = vrsqrt.f32 %v5847_v8  ;;  %v14956_v8 = vld [vmem:[%s15306_s3 + $0x68] sm:$0xff]  }
0x11ec   :  { %v15120_v20 = vpop.eup %15119 }
0x11ed   :  { %v5851_v36 = vmul.f32 %v15120_v20, %v5835_v31  ;;  %v14960_v20 = vld [vmem:[%s15316_s14 + $0x48] sm:$0xff]  }
0x11ef   :  { %v5859_v51 = vmul.f32 %v12356_v7, %v5851_v36  ;;  %v14959_v7 = vld [vmem:[%s15306_s3 + $0x58] sm:$0xff]   ;;  %v14962_v36 = vld [vmem:[%s15316_s14 + $0x60] sm:$0xff]  }
0x11f1   :  { %v16380_v37 = vadd.f32 %v12357_v50, %v5859_v51  ;;  %v14963_v50 = vld [vmem:[%s15306_s3 + $0x78] sm:$0xff]   ;;  %v14964_v51 = vld [vmem:[%s15316_s14 + $0x68] sm:$0xff]  }
0x11f3   :  { %v5873_v53 = vpack.c.bf16 %v16380_v37, %v5866_v52 }
0x11f5   :  { %14090 = vmatmul.mubr.msk.bf16.vlgmr.msra.gmra.mrb[192].mxu0 %vm264_vm1, %v5873_v53  ;;  %v14966_v53 = vld [vmem:[%s15316_s14 + $0x58] sm:$0xff]  }
0x11f6   :  { %14109 = vmatprep.mubr.msk.bf16.mxu0 %vm15259_vm0, %v15258_v1  ;;  %14106 = vmatpush3.bf16.msra.mxu0 %v14945_v22 }
0x11f7   :  { %14107 = vmatprep.subr.bf16.mxu0 %v15258_v1 }
0x11fa   :  { %14108 = vmatpush3.bf16.msra.mxu0 %v14947_v44 }
0x11fb   :  { %14113 = vmatprep.subr.bf16.mxu0 %v15258_v1 }
0x12c8   :  { %v5929_v34 = vpop.f32.mrb[192].mxu0 }
0x12c9   :  { %v5930_v56 = vadd.f32 %v12358_v27, %v5929_v34  ;;  %v14091_v59 = vpop.f32.mrb[193].mxu0 }
0x12ca   :  { %v5932_v46 = vpop.f32.mrb[194].mxu0 }
0x12cb   :  { %v5933_v3 = vadd.f32 %v12358_v27, %v5932_v46  ;;  %v14092_v57 = vpop.f32.mrb[195].mxu0  ;;  %v5936_v48 = vmax.f32 %v5930_v56, 0.0 }
0x12cd   :  { %v5937_v10 = vmax.f32 %v5933_v3, 0.0 }
0x12cf   :  { %v5947_v13 = vpack.c.bf16 %v5937_v10, %v5936_v48  ;;  %v16510_v10 = vld [vmem:[%s15311_s8 + $0x4] ss:$0 sm:$0xff] }
0x12d1   :  { %14102 = vmatmul.mubr.msk.bf16.vlgmr.msra.gmra.mrb[192].mxu1 %vm5978_vm4, %v5947_v13 }
0x12d2   :  { %14125 = vmatprep.mubr.msk.bf16.mxu1 %vm15259_vm0, %v15258_v1  ;;  %14122 = vmatpush3.bf16.msra.mxu1 %v14946_v4 }
0x12d3   :  { %14123 = vmatprep.subr.bf16.mxu1 %v15258_v1 }
0x12d6   :  { %14124 = vmatpush3.bf16.msra.mxu1 %v14948_v55 }
0x12d7   :  { %14137 = vmatprep.subr.bf16.mxu1 %v15258_v1 }
0x13a4   :  { %v6016_v60 = vpop.f32.mrb[192].mxu1 }
0x13a5   :  { %v6017_v14 = vadd.f32 %v12362_v11, %v6016_v60  ;;  %v14103_v47 = vpop.f32.mrb[193].mxu1 }
0x13a6   :  { %v6019_v2 = vpop.f32.mrb[194].mxu1 }
0x13a7   :  { %v16395_v15 = vadd.f32 %v12362_v11, %v6019_v2  ;;  %v14104_v16 = vpop.f32.mrb[195].mxu1  ;;  %v6023_v17 = vadd.f32 %v6017_v14, %v5866_v52  ;;  %v14965_v52 = vld [vmem:[%s15316_s14 + $0x50] sm:$0xff]  }
0x13a9   :  { %v6027_v19 = vsel %vm264_vm1, %v6023_v17, 0.0 }
0x13aa   :  { %6028 = vadd.xlane.f32.xlu0 %v6027_v19 }
0x1437   :  { %v6029_v43 = vpop.xlane.xlu0 %6028 }
0x1438   :  { %v6033_v32 = vmul.f32 0.03125, %v6029_v43 }
0x143a   :  { %v6035_v6 = vsub.f32 %v6023_v17, %v6033_v32  ;;  %v16514_v32 = vld [vmem:[%s15301_s29 + $0x4] ss:$0 sm:$0xff] }
0x143c   :  { %v6037_v21 = vmul.f32 %v6035_v6, %v6035_v6 }
0x143e   :  { %v6039_v42 = vsel %vm264_vm1, %v6037_v21, 0.0  ;;  %v16518_v21 = vld [vmem:[%s15311_s8 + $0x6] ss:$0 sm:$0xff] }
0x143f   :  { %6040 = vadd.xlane.f32.xlu1 %v6039_v42 }
0x14cc   :  { %v6041_v23 = vpop.xlane.xlu1 %6040 }
0x14cd   :  { %v6045_v25 = vmul.f32 0.03125, %v6041_v23 }
0x14cf   :  { %v6047_v28 = vadd.f32 1e-05, %v6045_v25 }
0x14d1   :  { %15121 = vrsqrt.f32 %v6047_v28 }
0x14db   :  { %v15122_v30 = vpop.eup %15121 }
0x14dc   :  { %v6051_v31 = vmul.f32 %v15122_v30, %v6035_v6 }
0x14de   :  { %v6059_v62 = vmul.f32 %v16408_v58, %v6051_v31 }
0x14e0   :  { %v16415_v29 = vadd.f32 %v16411_v33, %v6059_v62 }
0x14e2   :  { %v16421_v45 = vpack.c.bf16 %v16415_v29, %v16415_v29 }
0x14e4   :  { %14110 = vmatmul.mubr.msk.bf16.vlgmr.msra.gmra.mrb[196].mxu0 %vm264_vm1, %v16421_v45  ;;  %14126 = vmatmul.mubr.msk.bf16.vlgmr.msra.gmra.mrb[196].mxu1 %vm264_vm1, %v16421_v45 }
0x14e5   :  { %14114 = vmatpush3.bf16.msra.mxu0 %v14949_v35  ;;  %14138 = vmatpush3.bf16.msra.mxu1 %v14950_v24  ;;  %v16524_v24 = vld [vmem:[%s15301_s29 + $0x6] ss:$0 sm:$0xff] }
0x14e6   :  { %14115 = vmatprep.subr.bf16.mxu0 %v15258_v1  ;;  %14139 = vmatprep.subr.bf16.mxu1 %v15258_v1 }
0x14e7   :  { %14117 = vmatprep.mubr.msk.bf16.mxu0 %vm15259_vm0, %v15258_v1  ;;  %14141 = vmatprep.mubr.msk.bf16.mxu1 %vm15259_vm0, %v15258_v1 }
0x14e9   :  { %14116 = vmatpush3.bf16.msra.mxu0 %v14951_v38  ;;  %14140 = vmatpush3.bf16.msra.mxu1 %v14952_v39  ;;  %v16529_v38 = vld [vmem:[%s15311_s8 + $0x5] ss:$0 sm:$0xff]  ;;  %v16532_v39 = vld [vmem:[%s15321_s19 + $0x4] ss:$0 sm:$0xff] }
0x14ea   :  { %14129 = vmatprep.subr.bf16.mxu0 %v15258_v1  ;;  %14153 = vmatprep.subr.bf16.mxu1 %v15258_v1 }
0x14ec   :  { %14118 = vmatmul.mubr.msk.bf16.vlgmr.msra.gmra.mrb[200].mxu0 %vm264_vm1, %v16421_v45  ;;  %14142 = vmatmul.mubr.msk.bf16.vlgmr.msra.gmra.mrb[200].mxu1 %vm264_vm1, %v16421_v45 }
0x14ed   :  { %14130 = vmatpush3.bf16.msra.mxu0 %v14953_v63  ;;  %14154 = vmatpush3.bf16.msra.mxu1 %v14954_v12 }
0x14ee   :  { %14131 = vmatprep.subr.bf16.mxu0 %v15258_v1  ;;  %14155 = vmatprep.subr.bf16.mxu1 %v15258_v1 }
0x14ef   :  { %14133 = vmatprep.mubr.msk.bf16.mxu0 %vm15259_vm0, %v15258_v1  ;;  %14157 = vmatprep.mubr.msk.bf16.mxu1 %vm15259_vm0, %v15258_v1 }
0x14f1   :  { %14132 = vmatpush3.bf16.msra.mxu0 %v14955_v0  ;;  %14156 = vmatpush3.bf16.msra.mxu1 %v14956_v8 }
0x14f2   :  { %14145 = vmatprep.subr.bf16.mxu0 %v15258_v1  ;;  %14169 = vmatprep.subr.bf16.mxu1 %v15258_v1 }
0x14f4   :  { %14134 = vmatmul.mubr.msk.bf16.vlgmr.msra.gmra.mrb[204].mxu0 %vm264_vm1, %v16421_v45  ;;  %14158 = vmatmul.mubr.msk.bf16.vlgmr.msra.gmra.mrb[204].mxu1 %vm264_vm1, %v16421_v45 }
0x14f5   :  { %14146 = vmatpush3.bf16.msra.mxu0 %v14957_v41  ;;  %14170 = vmatpush3.bf16.msra.mxu1 %v14958_v18 }
0x14f6   :  { %14147 = vmatprep.subr.bf16.mxu0 %v15258_v1  ;;  %14171 = vmatprep.subr.bf16.mxu1 %v15258_v1 }
0x14f7   :  { %14149 = vmatprep.mubr.msk.bf16.mxu0 %vm15259_vm0, %v15258_v1  ;;  %14173 = vmatprep.mubr.msk.bf16.mxu1 %vm15259_vm0, %v15258_v1 }
0x14f9   :  { %14148 = vmatpush3.bf16.msra.mxu0 %v14959_v7  ;;  %14172 = vmatpush3.bf16.msra.mxu1 %v14960_v20 }
0x14fa   :  { %14161 = vmatprep.subr.bf16.mxu0 %v15258_v1  ;;  %14185 = vmatprep.subr.bf16.mxu1 %v15258_v1 }
0x14fc   :  { %14150 = vmatmul.mubr.msk.bf16.vlgmr.msra.gmra.mrb[208].mxu0 %vm264_vm1, %v16421_v45  ;;  %14174 = vmatmul.mubr.msk.bf16.vlgmr.msra.gmra.mrb[208].mxu1 %vm264_vm1, %v16421_v45 }
0x14fd   :  { %14162 = vmatpush3.bf16.msra.mxu0 %v14961_v49  ;;  %14186 = vmatpush3.bf16.msra.mxu1 %v14962_v36 }
0x14fe   :  { %14163 = vmatprep.subr.bf16.mxu0 %v15258_v1  ;;  %14187 = vmatprep.subr.bf16.mxu1 %v15258_v1 }
0x14ff   :  { %14165 = vmatprep.mubr.msk.bf16.mxu0 %vm15259_vm0, %v15258_v1  ;;  %14189 = vmatprep.mubr.msk.bf16.mxu1 %vm15259_vm0, %v15258_v1 }
0x1501   :  { %14164 = vmatpush3.bf16.msra.mxu0 %v14963_v50  ;;  %14188 = vmatpush3.bf16.msra.mxu1 %v14964_v51 }
0x1502   :  { %14177 = vmatprep.subr.bf16.mxu0 %v15258_v1  ;;  %14201 = vmatprep.subr.bf16.mxu1 %v15258_v1 }
0x1504   :  { %14166 = vmatmul.mubr.msk.bf16.vlgmr.msra.gmra.mrb[212].mxu0 %vm264_vm1, %v16421_v45  ;;  %14190 = vmatmul.mubr.msk.bf16.vlgmr.msra.gmra.mrb[212].mxu1 %vm264_vm1, %v16421_v45 }
0x1505   :  { %14178 = vmatpush3.bf16.msra.mxu0 %v14965_v52  ;;  %14181 = vmatprep.mubr.msk.bf16.mxu0 %vm15259_vm0, %v15258_v1 }
0x1506   :  { %14179 = vmatprep.subr.bf16.mxu0 %v15258_v1  ;;  %14203 = vmatprep.mubr.msk.bf16.mxu1 %vm15259_vm0, %v15258_v1 }
0x1509   :  { %14180 = vmatpush3.bf16.msra.mxu0 %v14966_v53 }
0x150a   :  { %14193 = vmatprep.subr.bf16.mxu0 %v15258_v1 }
0x150c   :  { %14182 = vmatmul.mubr.msk.bf16.vlgmr.msra.gmra.mrb[216].mxu0 %vm264_vm1, %v16421_v45 }
0x150d   :  { %14194 = vmatpush3.bf16.msra.mxu0 %v14967_v54  ;;  %14197 = vmatprep.mubr.msk.bf16.mxu0 %vm15259_vm0, %v15258_v1  ;;  %v16541_v54 = vld [vmem:[%s15301_s29 + $0x5] ss:$0 sm:$0xff] }
0x150e   :  { %14195 = vmatprep.subr.bf16.mxu0 %v15258_v1 }
0x1511   :  { %14196 = vmatpush3.bf16.msra.mxu0 %v14968_v26 }
0x1512   :  { %14207 = vmatprep.subr.bf16.mxu0 %v15258_v1 }
0x1514   :  { %14198 = vmatmul.mubr.msk.bf16.vlgmr.msra.gmra.mrb[220].mxu0 %vm264_vm1, %v16421_v45 }
0x1515   :  { %14209 = vmatprep.mubr.msk.bf16.mxu0 %vm15259_vm0, %v15258_v1 }
0x15b7   :  { %v6216_v27 = vpop.f32.mrb[196].mxu0  ;;  %v6320_v34 = vpop.f32.mrb[196].mxu1 }
0x15b8   :  { %v14111_v56 = vpop.f32.mrb[197].mxu0  ;;  %v14127_v59 = vpop.f32.mrb[197].mxu1  ;;  %v6217_v42 = vadd.f32 %v16514_v32, %v6216_v27  ;;  %v6321_v63 = vadd.f32 %v16524_v24, %v6320_v34  ;;  %v16547_v34 = vld [vmem:[%s15311_s8 + $0x7] ss:$0 sm:$0xff] }
0x15b9   :  { %v6219_v46 = vpop.f32.mrb[198].mxu0  ;;  %v6323_v3 = vpop.f32.mrb[198].mxu1 }
0x15ba   :  { %v14112_v57 = vpop.f32.mrb[199].mxu0  ;;  %v14128_v48 = vpop.f32.mrb[199].mxu1  ;;  %v6842_v30 = vpack.c.bf16 %v6217_v42, %v6217_v42  ;;  %v6844_v36 = vpack.c.bf16 %v6321_v63, %v6321_v63 }
0x15bf   :  { %v6268_v13 = vpop.f32.mrb[200].mxu0  ;;  %v6448_v11 = vpop.f32.mrb[200].mxu1 }
0x15c0   :  { %v6449_v60 = vadd.f32 %v16510_v10, %v6448_v11  ;;  %v14119_v14 = vpop.f32.mrb[201].mxu0  ;;  %v14143_v47 = vpop.f32.mrb[201].mxu1  ;;  %v6269_v56 = vadd.f32 %v16541_v54, %v6268_v13 }
0x15c1   :  { %v6271_v2 = vpop.f32.mrb[202].mxu0  ;;  %v6451_v16 = vpop.f32.mrb[202].mxu1 }
0x15c2   :  { %v6846_v17 = vpack.c.bf16 %v6449_v60, %v6449_v60  ;;  %v14120_v19 = vpop.f32.mrb[203].mxu0  ;;  %v14144_v43 = vpop.f32.mrb[203].mxu1  ;;  %v6843_v14 = vpack.c.bf16 %v6269_v56, %v6269_v56  ;;  %v16558_v16 = vld [vmem:[%s15301_s29 + $0x7] ss:$0 sm:$0xff] }
0x15c3   :  { %v16563_v19 = vld [vmem:[%s15321_s19 + $0x5] ss:$0 sm:$0xff] }
0x15c4   :  { %v6854_v6 = vsel %vm936_vm2, %v6846_v17, 0 }
0x15c5   :  { %14202 = vmatpush3.bf16.xpose.msra.mxu1 %v6854_v6 }
0x15c6   :  { %14213 = vmatprep.subr.bf16.mxu1 %v15258_v1 }
0x15c7   :  { %v6372_v22 = vpop.f32.mrb[204].mxu0  ;;  %v6552_v4 = vpop.f32.mrb[204].mxu1 }
0x15c8   :  { %v6553_v44 = vadd.f32 %v16518_v21, %v6552_v4  ;;  %v14135_v55 = vpop.f32.mrb[205].mxu0  ;;  %v14159_v23 = vpop.f32.mrb[205].mxu1  ;;  %v6373_v43 = vadd.f32 %v16558_v16, %v6372_v22 }
0x15c9   :  { %v6375_v25 = vpop.f32.mrb[206].mxu0  ;;  %v6555_v28 = vpop.f32.mrb[206].mxu1 }
0x15ca   :  { %v6848_v31 = vpack.c.bf16 %v6553_v44, %v6553_v44  ;;  %v14136_v62 = vpop.f32.mrb[207].mxu0  ;;  %v14160_v35 = vpop.f32.mrb[207].mxu1  ;;  %v6845_v55 = vpack.c.bf16 %v6373_v43, %v6373_v43 }
0x15cc   :  { %v6946_v45 = vsel %vm936_vm2, %v6848_v31, 0  ;;  %14204 = vmatmul.mubr.msk.bf16.vlgmr.msra.gmra.mrb[216].mxu1 %vm936_vm2, %v6842_v30 }
0x15cd   :  { %14214 = vmatpush3.bf16.xpose.msra.mxu1 %v6946_v45  ;;  %14215 = vmatprep.mubr.msk.bf16.mxu1 %vm15259_vm0, %v15258_v1 }
0x15ce   :  { %14225 = vmatprep.subr.bf16.mxu1 %v15258_v1 }
0x15cf   :  { %v6500_v12 = vpop.f32.mrb[208].mxu0  ;;  %v6680_v0 = vpop.f32.mrb[208].mxu1 }
0x15d0   :  { %v6501_v8 = vadd.f32 %v16529_v38, %v6500_v12  ;;  %v6681_v41 = vadd.f32 %v16532_v39, %v6680_v0  ;;  %v14151_v18 = vpop.f32.mrb[209].mxu0  ;;  %v14175_v7 = vpop.f32.mrb[209].mxu1 }
0x15d1   :  { %v6503_v20 = vpop.f32.mrb[210].mxu0  ;;  %v6683_v49 = vpop.f32.mrb[210].mxu1 }
0x15d2   :  { %v6847_v50 = vpack.c.bf16 %v6501_v8, %v6501_v8  ;;  %v7090_v51 = vpack.c.bf16 %v6681_v41, %v6681_v41  ;;  %v14152_v52 = vpop.f32.mrb[211].mxu0  ;;  %v14176_v53 = vpop.f32.mrb[211].mxu1 }
0x15d4   :  { %v6900_v26 = vsel %vm936_vm2, %v6847_v50, 0  ;;  %v7098_v27 = vsel %vm1184_vm3, %v7090_v51, 0  ;;  %14216 = vmatmul.mubr.msk.bf16.vlgmr.msra.gmra.mrb[220].mxu1 %vm936_vm2, %v6844_v36 }
0x15d5   :  { %14208 = vmatpush3.bf16.xpose.msra.mxu0 %v6900_v26  ;;  %14226 = vmatpush3.bf16.msra.mxu1 %v7098_v27 }
0x15d6   :  { %14219 = vmatprep.subr.bf16.mxu0 %v15258_v1  ;;  %14227 = vmatprep.mubr.msk.bf16.mxu1 %vm15259_vm0, %v15258_v1 }
0x15d7   :  { %v6604_v59 = vpop.f32.mrb[212].mxu0  ;;  %v16553_v46 = vpop.f32.mrb[212].mxu1  ;;  %14237 = vmatprep.subr.bf16.mxu1 %v15258_v1 }
0x15d8   :  { %v6605_v3 = vadd.f32 %v16547_v34, %v6604_v59  ;;  %v14167_v57 = vpop.f32.mrb[213].mxu0  ;;  %v14191_v48 = vpop.f32.mrb[213].mxu1 }
0x15d9   :  { %v6607_v11 = vpop.f32.mrb[214].mxu0  ;;  %v6787_v60 = vpop.f32.mrb[214].mxu1 }
0x15da   :  { %v6849_v47 = vpack.c.bf16 %v6605_v3, %v6605_v3  ;;  %v14168_v13 = vpop.f32.mrb[215].mxu0  ;;  %v14192_v2 = vpop.f32.mrb[215].mxu1 }
0x15dc   :  { %v6992_v17 = vsel %vm936_vm2, %v6849_v47, 0  ;;  %14210 = vmatmul.mubr.msk.bf16.vlgmr.msra.gmra.mrb[224].mxu0 %vm936_vm2, %v6843_v14 }
0x15dd   :  { %14220 = vmatpush3.bf16.xpose.msra.mxu0 %v6992_v17  ;;  %14221 = vmatprep.mubr.msk.bf16.mxu0 %vm15259_vm0, %v15258_v1 }
0x15de   :  { %14231 = vmatprep.subr.bf16.mxu0 %v15258_v1 }
0x15df   :  { %v6732_v6 = vpop.f32.mrb[216].mxu0 }
0x15e0   :  { %v6733_v42 = vadd.f32 %v16563_v19, %v6732_v6  ;;  %v14183_v4 = vpop.f32.mrb[217].mxu0 }
0x15e1   :  { %v6735_v44 = vpop.f32.mrb[218].mxu0 }
0x15e2   :  { %v7091_v23 = vpack.c.bf16 %v6733_v42, %v6733_v42  ;;  %v14184_v25 = vpop.f32.mrb[219].mxu0 }
0x15e4   :  { %v7144_v28 = vsel %vm1184_vm3, %v7091_v23, 0  ;;  %14222 = vmatmul.mubr.msk.bf16.vlgmr.msra.gmra.mrb[228].mxu0 %vm936_vm2, %v6845_v55 }
0x15e5   :  { %14232 = vmatpush3.bf16.msra.mxu0 %v7144_v28  ;;  %14233 = vmatprep.mubr.msk.bf16.mxu0 %vm15259_vm0, %v15258_v1 }
0x15e6   :  { %14243 = vmatprep.subr.bf16.mxu0 %v15258_v1 }
0x15e7   :  { %v16575_v22 = vpop.f32.mrb[220].mxu0 }
0x15e8   :  { %v14199_v30 = vpop.f32.mrb[221].mxu0 }
0x15e9   :  { %v6839_v31 = vpop.f32.mrb[222].mxu0 }
0x15ea   :  { %v14200_v62 = vpop.f32.mrb[223].mxu0 }
0x15eb   :  { %v6024_v62 = vadd.f32 %v16395_v15, %v16380_v37 }
0x169f   :  { %v6890_v35 = vpop.f32.mrb[216].mxu1 }
0x16a0   :  { %v7034_v45 = vmul.f32 0.35355338, %v6890_v35  ;;  %v14205_v63 = vpop.f32.mrb[217].mxu1 }
0x16a1   :  { %v6893_v12 = vpop.f32.mrb[218].mxu1  ;;  %v6030_v63 = vsel %vm264_vm1, %v6024_v62, 0.0 }
0x16a2   :  { %v14206_v0 = vpop.f32.mrb[219].mxu1  ;;  %v7038_v8 = vadd.f32 %v7034_v45, %v15627_v61 }
0x16a4   :  { %v7042_v41 = vsel %vm936_vm2, %v7038_v8, -inf }
0x16a5   :  { %7043 = vmax.xlane.f32.xlu0 %v7042_v41 }
0x16a7   :  { %v6982_v18 = vpop.f32.mrb[220].mxu1 }
0x16a8   :  { %v7036_v7 = vmul.f32 0.35355338, %v6982_v18  ;;  %v14217_v20 = vpop.f32.mrb[221].mxu1 }
0x16a9   :  { %v6985_v49 = vpop.f32.mrb[222].mxu1 }
0x16aa   :  { %v14218_v36 = vpop.f32.mrb[223].mxu1  ;;  %v7040_v50 = vadd.f32 %v7036_v7, %v15627_v61  ;;  %v16593_v7 = vld [vmem:[%s15321_s19 + $0x6] ss:$0 sm:$0xff] }
0x16ab   :  { %v6785_v37 = vadd.f32 %v16593_v7, %v16553_v46 }
0x16ac   :  { %v7048_v51 = vsel %vm936_vm2, %v7040_v50, -inf }
0x16ad   :  { %7049 = vmax.xlane.f32.xlu0 %v7048_v51  ;;  %v7092_v49 = vpack.c.bf16 %v6785_v37, %v6785_v37 }
0x16af   :  { %v6936_v52 = vpop.f32.mrb[224].mxu0 }
0x16b0   :  { %v7035_v53 = vmul.f32 0.35355338, %v6936_v52  ;;  %v14211_v26 = vpop.f32.mrb[225].mxu0 }
0x16b1   :  { %v6939_v27 = vpop.f32.mrb[226].mxu0  ;;  %v7190_v26 = vsel %vm1184_vm3, %v7092_v49, 0 }
0x16b2   :  { %v14212_v56 = vpop.f32.mrb[227].mxu0  ;;  %v7039_v59 = vadd.f32 %v7035_v53, %v15627_v61 }
0x16b4   :  { %v7045_v3 = vsel %vm936_vm2, %v7039_v59, -inf }
0x16b5   :  { %7046 = vmax.xlane.f32.xlu1 %v7045_v3 }
0x16b7   :  { %v7028_v57 = vpop.f32.mrb[228].mxu0 }
0x16b8   :  { %v7037_v48 = vmul.f32 0.35355338, %v7028_v57  ;;  %v14223_v11 = vpop.f32.mrb[229].mxu0  ;;  %v16604_v57 = vld [vmem:[%s15321_s19 + $0x7] ss:$0 sm:$0xff] }
0x16b9   :  { %v7031_v60 = vpop.f32.mrb[230].mxu0  ;;  %v6837_v11 = vadd.f32 %v16604_v57, %v16575_v22 }
0x16ba   :  { %v14224_v14 = vpop.f32.mrb[231].mxu0  ;;  %v7041_v47 = vadd.f32 %v7037_v48, %v15627_v61 }
0x16bc   :  { %v7051_v13 = vsel %vm936_vm2, %v7041_v47, -inf }
0x16bd   :  { %7052 = vmax.xlane.f32.xlu1 %v7051_v13 }
0x1732   :  { %v7044_v2 = vpop.xlane.xlu0 %7043 }
0x1733   :  { %v7054_v17 = vsub.f32 %v7038_v8, %v7044_v2 }
0x1735   :  { %v7058_v43 = vmul.f32 1.442695, %v7054_v17 }
0x1737   :  { %15123 = vpow2.f32 %v7058_v43 }
0x173a   :  { %v7050_v6 = vpop.xlane.xlu0 %7049 }
0x173b   :  { %v7056_v42 = vsub.f32 %v7040_v50, %v7050_v6 }
0x173d   :  { %v7062_v4 = vmul.f32 1.442695, %v7056_v42  ;;  %v12430_v42 = vld [vmem:[%s15326_s24 + $0x10] sm:$0xf] }
0x173f   :  { %15125 = vpow2.f32 %v7062_v4  ;;  %v7286_v4 = vsel %vm1184_vm3, %v12430_v42, 0  ;;  %v14980_v42 = vld [vmem:[%s15306_s3 + $0x68] sm:$0xff]  }
0x1741   :  { %v15124_v44 = vpop.eup %15123 }
0x1742   :  { %v7047_v55 = vpop.xlane.xlu1 %7046  ;;  %v7066_v23 = vsel %vm936_vm2, %v15124_v44, 0.0 }
0x1743   :  { %v7055_v25 = vsub.f32 %v7039_v59, %v7047_v55  ;;  %7067 = vadd.xlane.f32.xlu0 %v7066_v23 }
0x1745   :  { %v7060_v28 = vmul.f32 1.442695, %v7055_v25 }
0x1747   :  { %15127 = vpow2.f32 %v7060_v28 }
0x1749   :  { %v15126_v61 = vpop.eup %15125 }
0x174a   :  { %v7053_v30 = vpop.xlane.xlu1 %7052  ;;  %v7072_v31 = vsel %vm936_vm2, %v15126_v61, 0.0 }
0x174b   :  { %v7057_v35 = vsub.f32 %v7041_v47, %v7053_v30  ;;  %7073 = vadd.xlane.f32.xlu0 %v7072_v31  ;;  %v7093_v47 = vpack.c.bf16 %v6837_v11, %v6837_v11  ;;  %v14974_v11 = vld [vmem:[%s15306_s3 + $0x40] sm:$0xff]  }
0x174d   :  { %v7064_v45 = vmul.f32 1.442695, %v7057_v35  ;;  %v7236_v17 = vsel %vm1184_vm3, %v7093_v47, 0 }
0x174f   :  { %15129 = vpow2.f32 %v7064_v45  ;;  %6031 = vadd.xlane.f32.xlu0 %v6030_v63 }
0x1751   :  { %v15128_v12 = vpop.eup %15127 }
0x1752   :  { %v7069_v0 = vsel %vm936_vm2, %v15128_v12, 0.0 }
0x1753   :  { %7070 = vadd.xlane.f32.xlu1 %v7069_v0 }
0x1759   :  { %v15130_v8 = vpop.eup %15129 }
0x175a   :  { %v7075_v41 = vsel %vm936_vm2, %v15130_v8, 0.0 }
0x175b   :  { %7076 = vadd.xlane.f32.xlu1 %v7075_v41  ;;  %v14969_v41 = vld [vmem:[%s15296_s25 + $0x40] sm:$0xff]  }
0x17d0   :  { %v7068_v18 = vpop.xlane.xlu0 %7067 }
0x17d1   :  { %15131 = vrcp.f32 %v7068_v18 }
0x17d8   :  { %v7074_v15 = vpop.xlane.xlu0 %7073 }
0x17d9   :  { %15133 = vrcp.f32 %v7074_v15 }
0x17db   :  { %v15132_v20 = vpop.eup %15131 }
0x17dc   :  { %v7082_v36 = vmul.f32 %v15132_v20, %v15124_v44  ;;  %v6032_v50 = vpop.xlane.xlu0 %6031  ;;  %v12431_v44 = vld [vmem:[%s15326_s24 + $0x14] sm:$0xf] }
0x17dd   :  { %v6034_v51 = vmul.f32 0.03125, %v6032_v50  ;;  %v7332_v55 = vsel %vm1184_vm3, %v12431_v44, 0  ;;  %v14982_v44 = vld [vmem:[%s15316_s14 + $0x40] sm:$0xff]  }
0x17de   :  { %v7086_v52 = vpack.c.bf16 %v7082_v36, %v7082_v36  ;;  %v14970_v36 = vld [vmem:[%s15296_s25 + $0x48] sm:$0xff]  }
0x17df   :  { %v6036_v53 = vsub.f32 %v6024_v62, %v6034_v51  ;;  %v12433_v51 = vld [vmem:[%s15326_s24 + $0x1c] sm:$0xf] }
0x17e0   :  { %14228 = vmatmul.mubr.msk.bf16.vlgmr.msra.gmra.mrb[224].mxu1 %vm936_vm2, %v7086_v52  ;;  %v7071_v27 = vpop.xlane.xlu1 %7070 }
0x17e1   :  { %14238 = vmatpush3.bf16.msra.mxu1 %v7190_v26  ;;  %15135 = vrcp.f32 %v7071_v27  ;;  %v6038_v56 = vmul.f32 %v6036_v53, %v6036_v53  ;;  %14239 = vmatprep.mubr.msk.bf16.mxu1 %vm15259_vm0, %v15258_v1 }
0x17e2   :  { %14249 = vmatprep.subr.bf16.mxu1 %v15258_v1 }
0x17e3   :  { %v15134_v46 = vpop.eup %15133  ;;  %v6042_v59 = vsel %vm264_vm1, %v6038_v56, 0.0 }
0x17e4   :  { %v7084_v3 = vmul.f32 %v15134_v46, %v15126_v61  ;;  %6043 = vadd.xlane.f32.xlu1 %v6042_v59  ;;  %v12432_v61 = vld [vmem:[%s15326_s24 + $0x18] sm:$0xf]  ;;  %v14972_v59 = vld [vmem:[%s15296_s25 + $0x68] sm:$0xff]  }
0x17e5   :  { %v7378_v35 = vsel %vm1184_vm3, %v12432_v61, 0  ;;  %v14987_v61 = vld [vmem:[%s15306_s3 + $0x78] sm:$0xff]  }
0x17e6   :  { %v7088_v48 = vpack.c.bf16 %v7084_v3, %v7084_v3 }
0x17e8   :  { %14240 = vmatmul.mubr.msk.bf16.vlgmr.msra.gmra.mrb[228].mxu1 %vm936_vm2, %v7088_v48  ;;  %v7077_v60 = vpop.xlane.xlu1 %7076  ;;  %v14973_v48 = vld [vmem:[%s15296_s25 + $0x50] sm:$0xff]  }
0x17e9   :  { %15137 = vrcp.f32 %v7077_v60  ;;  %14251 = vmatprep.mubr.msk.bf16.mxu1 %vm15259_vm0, %v15258_v1  ;;  %14250 = vmatpush3.bf16.msra.mxu1 %v7286_v4  ;;  %v14981_v4 = vld [vmem:[%s15306_s3 + $0x50] sm:$0xff]  }
0x17ea   :  { %14261 = vmatprep.subr.bf16.mxu1 %v15258_v1 }
0x17eb   :  { %v15136_v14 = vpop.eup %15135 }
0x17ec   :  { %v7083_v13 = vmul.f32 %v15136_v14, %v15128_v12 }
0x17ee   :  { %v7087_v2 = vpack.c.bf16 %v7083_v13, %v7083_v13 }
0x17f0   :  { %14234 = vmatmul.mubr.msk.bf16.vlgmr.msra.gmra.mrb[232].mxu0 %vm936_vm2, %v7087_v2  ;;  %v14975_v2 = vld [vmem:[%s15296_s25 + $0x58] sm:$0xff]  }
0x17f1   :  { %14244 = vmatpush3.bf16.msra.mxu0 %v7236_v17  ;;  %14245 = vmatprep.mubr.msk.bf16.mxu0 %vm15259_vm0, %v15258_v1  ;;  %v14976_v17 = vld [vmem:[%s15306_s3 + $0x48] sm:$0xff]  }
0x17f2   :  { %14255 = vmatprep.subr.bf16.mxu0 %v15258_v1 }
0x17f3   :  { %v15138_v22 = vpop.eup %15137 }
0x17f4   :  { %v7085_v43 = vmul.f32 %v15138_v22, %v15130_v8  ;;  %v14977_v22 = vld [vmem:[%s15296_s25 + $0x70] sm:$0xff]  }
0x17f6   :  { %v7089_v6 = vpack.c.bf16 %v7085_v43, %v7085_v43  ;;  %v14978_v43 = vld [vmem:[%s15306_s3 + $0x60] sm:$0xff]  }
0x17f8   :  { %14246 = vmatmul.mubr.msk.bf16.vlgmr.msra.gmra.mrb[236].mxu0 %vm936_vm2, %v7089_v6  ;;  %v14979_v6 = vld [vmem:[%s15296_s25 + $0x78] sm:$0xff]  }
0x17f9   :  { %14257 = vmatprep.mubr.msk.bf16.mxu0 %vm15259_vm0, %v15258_v1  ;;  %14256 = vmatpush3.bf16.msra.mxu0 %v7332_v55  ;;  %v14983_v55 = vld [vmem:[%s15306_s3 + $0x58] sm:$0xff]  }
0x17fa   :  { %14267 = vmatprep.subr.bf16.mxu0 %v15258_v1 }
0x1871   :  { %v6044_v23 = vpop.xlane.xlu1 %6043 }
0x1872   :  { %v6046_v25 = vmul.f32 0.03125, %v6044_v23  ;;  %v14984_v23 = vld [vmem:[%s15316_s14 + $0x48] sm:$0xff]  }
0x1874   :  { %v6048_v28 = vadd.f32 1e-05, %v6046_v25  ;;  %v14985_v25 = vld [vmem:[%s15306_s3 + $0x70] sm:$0xff]  }
0x1876   :  { %15139 = vrsqrt.f32 %v6048_v28  ;;  %v14986_v28 = vld [vmem:[%s15316_s14 + $0x60] sm:$0xff]  }
0x1880   :  { %v15140_v45 = vpop.eup %15139 }
0x1881   :  { %v6052_v0 = vmul.f32 %v15140_v45, %v6036_v53  ;;  %v14992_v45 = vld [vmem:[%s15316_s14 + $0x78] sm:$0xff]  }
0x1883   :  { %v6060_v18 = vmul.f32 %v16408_v58, %v6052_v0  ;;  %v14971_v58 = vld [vmem:[%s15296_s25 + $0x60] sm:$0xff]  }
0x1885   :  { %v16638_v50 = vadd.f32 %v16411_v33, %v6060_v18  ;;  %v7424_v33 = vsel %vm1184_vm3, %v12433_v51, 0 }
0x1887   :  { %v16645_v53 = vpack.c.bf16 %v16638_v50, %v16638_v50 }
0x18b3   :  { %v7134_v30 = vpop.f32.mrb[224].mxu1 }
0x18b4   :  { %v7278_v31 = vpack.c.bf16 %v7134_v30, %v7134_v30  ;;  %v14229_v62 = vpop.f32.mrb[225].mxu1  ;;  %v14988_v30 = vld [vmem:[%s15316_s14 + $0x68] sm:$0xff]  }
0x18b5   :  { %v7137_v63 = vpop.f32.mrb[226].mxu1  ;;  %v14990_v62 = vld [vmem:[%s15316_s14 + $0x58] sm:$0xff]  }
0x18b6   :  { %v14230_v12 = vpop.f32.mrb[227].mxu1  ;;  %14252 = vmatmul.mubr.msk.bf16.vlgmr.msra.gmra.mrb[232].mxu1 %vm936_vm2, %v7278_v31  ;;  %v14989_v31 = vld [vmem:[%s15316_s14 + $0x50] sm:$0xff]  }
0x18b7   :  { %14262 = vmatpush3.bf16.msra.mxu1 %v7378_v35  ;;  %14263 = vmatprep.mubr.msk.bf16.mxu1 %vm15259_vm0, %v15258_v1  ;;  %v14991_v35 = vld [vmem:[%s15316_s14 + $0x70] sm:$0xff]  }
0x18b8   :  { %14273 = vmatprep.subr.bf16.mxu1 %v15258_v1 }
0x18bb   :  { %v7226_v8 = vpop.f32.mrb[228].mxu1 }
0x18bc   :  { %v7280_v37 = vpack.c.bf16 %v7226_v8, %v7226_v8  ;;  %v14241_v15 = vpop.f32.mrb[229].mxu1 }
0x18bd   :  { %v7229_v20 = vpop.f32.mrb[230].mxu1 }
0x18be   :  { %v14242_v49 = vpop.f32.mrb[231].mxu1  ;;  %14264 = vmatmul.mubr.msk.bf16.vlgmr.msra.gmra.mrb[236].mxu1 %vm936_vm2, %v7280_v37 }
0x18bf   :  { %14274 = vmatpush3.bf16.msra.mxu1 %v14969_v41  ;;  %14277 = vmatprep.mubr.msk.bf16.mxu1 %vm15259_vm0, %v15258_v1 }
0x18c0   :  { %14275 = vmatprep.subr.bf16.mxu1 %v15258_v1 }
0x18c3   :  { %v7180_v52 = vpop.f32.mrb[232].mxu0  ;;  %14276 = vmatpush3.bf16.msra.mxu1 %v14970_v36 }
0x18c4   :  { %v7279_v26 = vpack.c.bf16 %v7180_v52, %v7180_v52  ;;  %v14235_v27 = vpop.f32.mrb[233].mxu0  ;;  %14289 = vmatprep.subr.bf16.mxu1 %v15258_v1 }
0x18c5   :  { %v7183_v56 = vpop.f32.mrb[234].mxu0 }
0x18c6   :  { %v14236_v46 = vpop.f32.mrb[235].mxu0  ;;  %14258 = vmatmul.mubr.msk.bf16.vlgmr.msra.gmra.mrb[240].mxu0 %vm936_vm2, %v7279_v26  ;;  %14278 = vmatmul.mubr.msk.bf16.vlgmr.msra.gmra.mrb[240].mxu1 %vm264_vm1, %v16645_v53 }
0x18c7   :  { %14268 = vmatpush3.bf16.msra.mxu0 %v7424_v33  ;;  %14290 = vmatpush3.bf16.msra.mxu1 %v14971_v58 }
0x18c8   :  { %14291 = vmatprep.subr.bf16.mxu1 %v15258_v1  ;;  %14269 = vmatprep.mubr.msk.bf16.mxu0 %vm15259_vm0, %v15258_v1 }
0x18c9   :  { %14293 = vmatprep.mubr.msk.bf16.mxu1 %vm15259_vm0, %v15258_v1  ;;  %14281 = vmatprep.subr.bf16.mxu0 %v15258_v1 }
0x18cb   :  { %v7272_v3 = vpop.f32.mrb[236].mxu0  ;;  %14292 = vmatpush3.bf16.msra.mxu1 %v14972_v59 }
0x18cc   :  { %v7281_v60 = vpack.c.bf16 %v7272_v3, %v7272_v3  ;;  %v14247_v14 = vpop.f32.mrb[237].mxu0  ;;  %14305 = vmatprep.subr.bf16.mxu1 %v15258_v1 }
0x18cd   :  { %v7275_v47 = vpop.f32.mrb[238].mxu0 }
0x18ce   :  { %v14248_v13 = vpop.f32.mrb[239].mxu0  ;;  %14270 = vmatmul.mubr.msk.bf16.vlgmr.msra.gmra.mrb[244].mxu0 %vm936_vm2, %v7281_v60  ;;  %14294 = vmatmul.mubr.msk.bf16.vlgmr.msra.gmra.mrb[244].mxu1 %vm264_vm1, %v16645_v53 }
0x18cf   :  { %14282 = vmatpush3.bf16.msra.mxu0 %v14973_v48  ;;  %14306 = vmatpush3.bf16.msra.mxu1 %v14974_v11 }
0x18d0   :  { %14283 = vmatprep.subr.bf16.mxu0 %v15258_v1  ;;  %14307 = vmatprep.subr.bf16.mxu1 %v15258_v1 }
0x18d1   :  { %14285 = vmatprep.mubr.msk.bf16.mxu0 %vm15259_vm0, %v15258_v1  ;;  %14309 = vmatprep.mubr.msk.bf16.mxu1 %vm15259_vm0, %v15258_v1 }
0x18d3   :  { %14284 = vmatpush3.bf16.msra.mxu0 %v14975_v2  ;;  %14308 = vmatpush3.bf16.msra.mxu1 %v14976_v17 }
0x18d4   :  { %14297 = vmatprep.subr.bf16.mxu0 %v15258_v1  ;;  %14321 = vmatprep.subr.bf16.mxu1 %v15258_v1 }
0x18d6   :  { %14286 = vmatmul.mubr.msk.bf16.vlgmr.msra.gmra.mrb[248].mxu0 %vm264_vm1, %v16645_v53  ;;  %14310 = vmatmul.mubr.msk.bf16.vlgmr.msra.gmra.mrb[248].mxu1 %vm264_vm1, %v16645_v53 }
0x18d7   :  { %14298 = vmatpush3.bf16.msra.mxu0 %v14977_v22  ;;  %14322 = vmatpush3.bf16.msra.mxu1 %v14978_v43 }
0x18d8   :  { %14299 = vmatprep.subr.bf16.mxu0 %v15258_v1  ;;  %14323 = vmatprep.subr.bf16.mxu1 %v15258_v1 }
0x18d9   :  { %14301 = vmatprep.mubr.msk.bf16.mxu0 %vm15259_vm0, %v15258_v1  ;;  %14325 = vmatprep.mubr.msk.bf16.mxu1 %vm15259_vm0, %v15258_v1 }
0x18db   :  { %14300 = vmatpush3.bf16.msra.mxu0 %v14979_v6  ;;  %14324 = vmatpush3.bf16.msra.mxu1 %v14980_v42 }
0x18dc   :  { %14313 = vmatprep.subr.bf16.mxu0 %v15258_v1  ;;  %14337 = vmatprep.subr.bf16.mxu1 %v15258_v1 }
0x18de   :  { %14302 = vmatmul.mubr.msk.bf16.vlgmr.msra.gmra.mrb[252].mxu0 %vm264_vm1, %v16645_v53  ;;  %14326 = vmatmul.mubr.msk.bf16.vlgmr.msra.gmra.mrb[252].mxu1 %vm264_vm1, %v16645_v53 }
0x18df   :  { %14314 = vmatpush3.bf16.msra.mxu0 %v14981_v4  ;;  %14338 = vmatpush3.bf16.msra.mxu1 %v14982_v44 }
0x18e0   :  { %14315 = vmatprep.subr.bf16.mxu0 %v15258_v1  ;;  %14339 = vmatprep.subr.bf16.mxu1 %v15258_v1 }
0x18e1   :  { %14317 = vmatprep.mubr.msk.bf16.mxu0 %vm15259_vm0, %v15258_v1  ;;  %14341 = vmatprep.mubr.msk.bf16.mxu1 %vm15259_vm0, %v15258_v1 }
0x18e3   :  { %14316 = vmatpush3.bf16.msra.mxu0 %v14983_v55  ;;  %14340 = vmatpush3.bf16.msra.mxu1 %v14984_v23 }
0x18e4   :  { %14329 = vmatprep.subr.bf16.mxu0 %v15258_v1  ;;  %14353 = vmatprep.subr.bf16.mxu1 %v15258_v1 }
0x18e6   :  { %14318 = vmatmul.mubr.msk.bf16.vlgmr.msra.gmra.mrb[0].mxu0 %vm264_vm1, %v16645_v53  ;;  %14342 = vmatmul.mubr.msk.bf16.vlgmr.msra.gmra.mrb[0].mxu1 %vm264_vm1, %v16645_v53 }
0x18e7   :  { %14330 = vmatpush3.bf16.msra.mxu0 %v14985_v25  ;;  %14354 = vmatpush3.bf16.msra.mxu1 %v14986_v28 }
0x18e8   :  { %14331 = vmatprep.subr.bf16.mxu0 %v15258_v1  ;;  %14355 = vmatprep.subr.bf16.mxu1 %v15258_v1 }
0x18e9   :  { %14333 = vmatprep.mubr.msk.bf16.mxu0 %vm15259_vm0, %v15258_v1  ;;  %14357 = vmatprep.mubr.msk.bf16.mxu1 %vm15259_vm0, %v15258_v1 }
0x18eb   :  { %14332 = vmatpush3.bf16.msra.mxu0 %v14987_v61  ;;  %14356 = vmatpush3.bf16.msra.mxu1 %v14988_v30 }
0x18ec   :  { %14345 = vmatprep.subr.bf16.mxu0 %v15258_v1  ;;  %14369 = vmatprep.subr.bf16.mxu1 %v15258_v1 }
0x18ee   :  { %14334 = vmatmul.mubr.msk.bf16.vlgmr.msra.gmra.mrb[4].mxu0 %vm264_vm1, %v16645_v53  ;;  %14358 = vmatmul.mubr.msk.bf16.vlgmr.msra.gmra.mrb[4].mxu1 %vm264_vm1, %v16645_v53 }
0x18ef   :  { %14346 = vmatpush3.bf16.msra.mxu0 %v14989_v31  ;;  %14349 = vmatprep.mubr.msk.bf16.mxu0 %vm15259_vm0, %v15258_v1 }
0x18f0   :  { %14347 = vmatprep.subr.bf16.mxu0 %v15258_v1  ;;  %14371 = vmatprep.mubr.msk.bf16.mxu1 %vm15259_vm0, %v15258_v1 }
0x18f3   :  { %14348 = vmatpush3.bf16.msra.mxu0 %v14990_v62 }
0x18f4   :  { %14361 = vmatprep.subr.bf16.mxu0 %v15258_v1 }
0x18f6   :  { %14350 = vmatmul.mubr.msk.bf16.vlgmr.msra.gmra.mrb[8].mxu0 %vm264_vm1, %v16645_v53 }
0x18f7   :  { %14362 = vmatpush3.bf16.msra.mxu0 %v14991_v35  ;;  %14365 = vmatprep.mubr.msk.bf16.mxu0 %vm15259_vm0, %v15258_v1 }
0x18f8   :  { %14363 = vmatprep.subr.bf16.mxu0 %v15258_v1 }
0x18fb   :  { %14364 = vmatpush3.bf16.msra.mxu0 %v14992_v45 }
0x18fc   :  { %14375 = vmatprep.subr.bf16.mxu0 %v15258_v1 }
0x18fe   :  { %14366 = vmatmul.mubr.msk.bf16.vlgmr.msra.gmra.mrb[12].mxu0 %vm264_vm1, %v16645_v53 }
0x18ff   :  { %14377 = vmatprep.mubr.msk.bf16.mxu0 %vm15259_vm0, %v15258_v1 }
0x1989   :  { %v7322_v63 = vpop.f32.mrb[232].mxu1 }
0x198a   :  { %v14253_v12 = vpop.f32.mrb[233].mxu1  ;;  %v7466_v36 = vsel %vm264_vm1, %v7322_v63, 0.0 }
0x198b   :  { %v7325_v0 = vpop.f32.mrb[234].mxu1 }
0x198c   :  { %v14254_v8 = vpop.f32.mrb[235].mxu1 }
0x1991   :  { %v7414_v41 = vpop.f32.mrb[236].mxu1 }
0x1992   :  { %v14265_v18 = vpop.f32.mrb[237].mxu1  ;;  %v7469_v33 = vsel %vm264_vm1, %v7414_v41, 0.0 }
0x1993   :  { %v7417_v37 = vpop.f32.mrb[238].mxu1 }
0x1994   :  { %v14266_v15 = vpop.f32.mrb[239].mxu1 }
0x1999   :  { %v7368_v20 = vpop.f32.mrb[240].mxu0  ;;  %v7619_v49 = vpop.f32.mrb[240].mxu1 }
0x199a   :  { %v7467_v51 = vsel %vm264_vm1, %v7368_v20, 0.0  ;;  %v14259_v52 = vpop.f32.mrb[241].mxu0  ;;  %v14279_v58 = vpop.f32.mrb[241].mxu1  ;;  %v7620_v31 = vadd.f32 %v16514_v32, %v7619_v49 }
0x199b   :  { %v7468_v53 = vadd.f32 %v7467_v51, %v7466_v36  ;;  %v7371_v26 = vpop.f32.mrb[242].mxu0  ;;  %v7622_v27 = vpop.f32.mrb[242].mxu1 }
0x199c   :  { %v14260_v56 = vpop.f32.mrb[243].mxu0  ;;  %v14280_v46 = vpop.f32.mrb[243].mxu1  ;;  %v8245_v8 = vpack.c.bf16 %v7620_v31, %v7620_v31 }
0x199d   :  { %v7470_v59 = vadd.f32 %v7469_v33, %v7468_v53 }
0x19a1   :  { %v7460_v3 = vpop.f32.mrb[244].mxu0  ;;  %v7723_v48 = vpop.f32.mrb[244].mxu1 }
0x19a2   :  { %v7471_v11 = vsel %vm264_vm1, %v7460_v3, 0.0  ;;  %v14271_v60 = vpop.f32.mrb[245].mxu0  ;;  %v14295_v14 = vpop.f32.mrb[245].mxu1  ;;  %v7724_v32 = vadd.f32 %v16524_v24, %v7723_v48 }
0x19a3   :  { %v16751_v47 = vadd.f32 %v7471_v11, %v7470_v59  ;;  %v7463_v13 = vpop.f32.mrb[246].mxu0  ;;  %v7726_v2 = vpop.f32.mrb[246].mxu1 }
0x19a4   :  { %v14272_v17 = vpop.f32.mrb[247].mxu0  ;;  %v14296_v22 = vpop.f32.mrb[247].mxu1  ;;  %v8247_v26 = vpack.c.bf16 %v7724_v32, %v7724_v32 }
0x19a9   :  { %v7671_v43 = vpop.f32.mrb[248].mxu0  ;;  %v7851_v6 = vpop.f32.mrb[248].mxu1 }
0x19aa   :  { %v7852_v42 = vadd.f32 %v16510_v10, %v7851_v6  ;;  %v14287_v4 = vpop.f32.mrb[249].mxu0  ;;  %v14311_v44 = vpop.f32.mrb[249].mxu1 }
0x19ab   :  { %v7674_v55 = vpop.f32.mrb[250].mxu0  ;;  %v7854_v23 = vpop.f32.mrb[250].mxu1 }
0x19ac   :  { %v8249_v25 = vpack.c.bf16 %v7852_v42, %v7852_v42  ;;  %v14288_v28 = vpop.f32.mrb[251].mxu0  ;;  %v14312_v61 = vpop.f32.mrb[251].mxu1 }
0x19ae   :  { %v8257_v30 = vsel %vm936_vm2, %v8249_v25, 0 }
0x19af   :  { %14370 = vmatpush3.bf16.xpose.msra.mxu1 %v8257_v30 }
0x19b0   :  { %14381 = vmatprep.subr.bf16.mxu1 %v15258_v1 }
0x19b1   :  { %v7775_v62 = vpop.f32.mrb[252].mxu0  ;;  %v7955_v35 = vpop.f32.mrb[252].mxu1 }
0x19b2   :  { %v7956_v45 = vadd.f32 %v16518_v21, %v7955_v35  ;;  %v14303_v63 = vpop.f32.mrb[253].mxu0  ;;  %v14327_v10 = vpop.f32.mrb[253].mxu1  ;;  %v7776_v6 = vadd.f32 %v16558_v16, %v7775_v62 }
0x19b3   :  { %v7778_v12 = vpop.f32.mrb[254].mxu0  ;;  %v7958_v0 = vpop.f32.mrb[254].mxu1 }
0x19b4   :  { %v8251_v41 = vpack.c.bf16 %v7956_v45, %v7956_v45  ;;  %v14304_v18 = vpop.f32.mrb[255].mxu0  ;;  %v14328_v37 = vpop.f32.mrb[255].mxu1  ;;  %v8248_v55 = vpack.c.bf16 %v7776_v6, %v7776_v6 }
0x19b6   :  { %v8349_v15 = vsel %vm936_vm2, %v8251_v41, 0  ;;  %14372 = vmatmul.mubr.msk.bf16.vlgmr.msra.gmra.mrb[8].mxu1 %vm936_vm2, %v8245_v8 }
0x19b7   :  { %14382 = vmatpush3.bf16.xpose.msra.mxu1 %v8349_v15  ;;  %14383 = vmatprep.mubr.msk.bf16.mxu1 %vm15259_vm0, %v15258_v1 }
0x19b8   :  { %14393 = vmatprep.subr.bf16.mxu1 %v15258_v1 }
0x19b9   :  { %v7903_v21 = vpop.f32.mrb[0].mxu0  ;;  %v8083_v20 = vpop.f32.mrb[0].mxu1 }
0x19ba   :  { %v7904_v49 = vadd.f32 %v16529_v38, %v7903_v21  ;;  %v8084_v36 = vadd.f32 %v16532_v39, %v8083_v20  ;;  %v14319_v51 = vpop.f32.mrb[1].mxu0  ;;  %v14343_v52 = vpop.f32.mrb[1].mxu1  ;;  %v7672_v38 = vadd.f32 %v16541_v54, %v7671_v43 }
0x19bb   :  { %v7906_v58 = vpop.f32.mrb[2].mxu0  ;;  %v8086_v53 = vpop.f32.mrb[2].mxu1 }
0x19bc   :  { %v8250_v27 = vpack.c.bf16 %v7904_v49, %v7904_v49  ;;  %v8493_v33 = vpack.c.bf16 %v8084_v36, %v8084_v36  ;;  %v14320_v56 = vpop.f32.mrb[3].mxu0  ;;  %v14344_v46 = vpop.f32.mrb[3].mxu1  ;;  %v8246_v2 = vpack.c.bf16 %v7672_v38, %v7672_v38 }
0x19be   :  { %v8303_v59 = vsel %vm936_vm2, %v8250_v27, 0  ;;  %v8501_v24 = vsel %vm1184_vm3, %v8493_v33, 0  ;;  %14384 = vmatmul.mubr.msk.bf16.vlgmr.msra.gmra.mrb[12].mxu1 %vm936_vm2, %v8247_v26 }
0x19bf   :  { %14376 = vmatpush3.bf16.xpose.msra.mxu0 %v8303_v59  ;;  %14394 = vmatpush3.bf16.msra.mxu1 %v8501_v24 }
0x19c0   :  { %14387 = vmatprep.subr.bf16.mxu0 %v15258_v1  ;;  %14395 = vmatprep.mubr.msk.bf16.mxu1 %vm15259_vm0, %v15258_v1 }
0x19c1   :  { %v8007_v39 = vpop.f32.mrb[4].mxu0  ;;  %v16773_v3 = vpop.f32.mrb[4].mxu1  ;;  %14405 = vmatprep.subr.bf16.mxu1 %v15258_v1 }
0x19c2   :  { %v8008_v48 = vadd.f32 %v16547_v34, %v8007_v39  ;;  %v14335_v11 = vpop.f32.mrb[5].mxu0  ;;  %v14359_v60 = vpop.f32.mrb[5].mxu1 }
0x19c3   :  { %v8010_v14 = vpop.f32.mrb[6].mxu0  ;;  %v8190_v13 = vpop.f32.mrb[6].mxu1 }
0x19c4   :  { %v8252_v17 = vpack.c.bf16 %v8008_v48, %v8008_v48  ;;  %v14336_v22 = vpop.f32.mrb[7].mxu0  ;;  %v14360_v54 = vpop.f32.mrb[7].mxu1 }
0x19c6   :  { %v8395_v43 = vsel %vm936_vm2, %v8252_v17, 0  ;;  %14378 = vmatmul.mubr.msk.bf16.vlgmr.msra.gmra.mrb[16].mxu0 %vm936_vm2, %v8246_v2  ;;  %v16801_v17 = vld [vmem:[%s15331_s30 + $0x1] ss:$0 sm:$0xff] }
0x19c7   :  { %14388 = vmatpush3.bf16.xpose.msra.mxu0 %v8395_v43  ;;  %14389 = vmatprep.mubr.msk.bf16.mxu0 %vm15259_vm0, %v15258_v1  ;;  %v7479_v54 = vadd.f32 %v16801_v17, %v16751_v47 }
0x19c8   :  { %14399 = vmatprep.subr.bf16.mxu0 %v15258_v1 }
0x19c9   :  { %v8135_v34 = vpop.f32.mrb[8].mxu0 }
0x19ca   :  { %v8136_v42 = vadd.f32 %v16563_v19, %v8135_v34  ;;  %v14351_v4 = vpop.f32.mrb[9].mxu0 }
0x19cb   :  { %v8138_v44 = vpop.f32.mrb[10].mxu0 }
0x19cc   :  { %v8494_v23 = vpack.c.bf16 %v8136_v42, %v8136_v42  ;;  %v14352_v25 = vpop.f32.mrb[11].mxu0  ;;  %v8883_v42 = vadd.f32 %v7479_v54, %v16415_v29  ;;  %v8188_v29 = vadd.f32 %v16593_v7, %v16773_v3 }
0x19ce   :  { %v8547_v28 = vsel %vm1184_vm3, %v8494_v23, 0  ;;  %14390 = vmatmul.mubr.msk.bf16.vlgmr.msra.gmra.mrb[20].mxu0 %vm936_vm2, %v8248_v55  ;;  %v8889_v55 = vsel %vm264_vm1, %v8883_v42, 0.0 }
0x19cf   :  { %14400 = vmatpush3.bf16.msra.mxu0 %v8547_v28  ;;  %14401 = vmatprep.mubr.msk.bf16.mxu0 %vm15259_vm0, %v15258_v1 }
0x19d0   :  { %14411 = vmatprep.subr.bf16.mxu0 %v15258_v1 }
0x19d1   :  { %v16789_v16 = vpop.f32.mrb[12].mxu0 }
0x19d2   :  { %v14367_v61 = vpop.f32.mrb[13].mxu0 }
0x19d3   :  { %v8242_v30 = vpop.f32.mrb[14].mxu0 }
0x19d4   :  { %v14368_v19 = vpop.f32.mrb[15].mxu0 }
0x1a89   :  { %v8293_v31 = vpop.f32.mrb[8].mxu1 }
0x1a8a   :  { %v8437_v62 = vmul.f32 0.35355338, %v8293_v31  ;;  %v14373_v35 = vpop.f32.mrb[9].mxu1  ;;  %v8495_v31 = vpack.c.bf16 %v8188_v29, %v8188_v29 }
0x1a8b   :  { %v8296_v45 = vpop.f32.mrb[10].mxu1 }
0x1a8c   :  { %v14374_v63 = vpop.f32.mrb[11].mxu1  ;;  %v8441_v10 = vadd.f32 %v8437_v62, %v15842_v40 }
0x1a8e   :  { %v8445_v12 = vsel %vm936_vm2, %v8441_v10, -inf }
0x1a8f   :  { %8446 = vmax.xlane.f32.xlu0 %v8445_v12  ;;  %v8593_v12 = vsel %vm1184_vm3, %v8495_v31, 0  ;;  %v14996_v31 = vld [vmem:[%s15336_s6 + $0x68] sm:$0xff]  }
0x1a91   :  { %v8385_v0 = vpop.f32.mrb[12].mxu1 }
0x1a92   :  { %v8439_v8 = vmul.f32 0.35355338, %v8385_v0  ;;  %v14385_v41 = vpop.f32.mrb[13].mxu1 }
0x1a93   :  { %v8388_v18 = vpop.f32.mrb[14].mxu1 }
0x1a94   :  { %v14386_v37 = vpop.f32.mrb[15].mxu1  ;;  %v8443_v15 = vadd.f32 %v8439_v8, %v15842_v40 }
0x1a95   :  { %v8240_v37 = vadd.f32 %v16604_v57, %v16789_v16 }
0x1a96   :  { %v8451_v32 = vsel %vm936_vm2, %v8443_v15, -inf }
0x1a97   :  { %8452 = vmax.xlane.f32.xlu0 %v8451_v32 }
0x1a99   :  { %v8339_v21 = vpop.f32.mrb[16].mxu0 }
0x1a9a   :  { %v8438_v20 = vmul.f32 0.35355338, %v8339_v21  ;;  %v14379_v49 = vpop.f32.mrb[17].mxu0  ;;  %v8496_v21 = vpack.c.bf16 %v8240_v37, %v8240_v37  ;;  %v15004_v37 = vld [vmem:[%s17379_s5 + $0x68] sm:$0xff]  }
0x1a9b   :  { %v8342_v36 = vpop.f32.mrb[18].mxu0 }
0x1a9c   :  { %v14380_v51 = vpop.f32.mrb[19].mxu0  ;;  %v8442_v52 = vadd.f32 %v8438_v20, %v15842_v40  ;;  %v8639_v36 = vsel %vm1184_vm3, %v8496_v21, 0  ;;  %v15007_v21 = vld [vmem:[%s17379_s5 + $0x70] sm:$0xff]  }
0x1a9e   :  { %v8448_v58 = vsel %vm936_vm2, %v8442_v52, -inf }
0x1a9f   :  { %8449 = vmax.xlane.f32.xlu1 %v8448_v58 }
0x1aa1   :  { %v8431_v53 = vpop.f32.mrb[20].mxu0 }
0x1aa2   :  { %v8440_v26 = vmul.f32 0.35355338, %v8431_v53  ;;  %v14391_v27 = vpop.f32.mrb[21].mxu0  ;;  %v12557_v53 = vld [vmem:[%s15326_s24 + $0x14] sm:$0xf] }
0x1aa3   :  { %v8434_v33 = vpop.f32.mrb[22].mxu0 }
0x1aa4   :  { %v14392_v56 = vpop.f32.mrb[23].mxu0  ;;  %v8444_v46 = vadd.f32 %v8440_v26, %v15842_v40  ;;  %v8735_v26 = vsel %vm1184_vm3, %v12557_v53, 0  ;;  %v15016_v53 = vld [vmem:[%s17381_s17 + $0x78] sm:$0xff]  }
0x1aa6   :  { %v8454_v59 = vsel %vm936_vm2, %v8444_v46, -inf }
0x1aa7   :  { %8455 = vmax.xlane.f32.xlu1 %v8454_v59 }
0x1b1c   :  { %v8447_v24 = vpop.xlane.xlu0 %8446 }
0x1b1d   :  { %v8457_v38 = vsub.f32 %v8441_v10, %v8447_v24 }
0x1b1f   :  { %v8461_v39 = vmul.f32 1.442695, %v8457_v38 }
0x1b21   :  { %15141 = vpow2.f32 %v8461_v39 }
0x1b24   :  { %v8453_v48 = vpop.xlane.xlu0 %8452 }
0x1b25   :  { %v8459_v11 = vsub.f32 %v8443_v15, %v8453_v48 }
0x1b27   :  { %v8465_v60 = vmul.f32 1.442695, %v8459_v11 }
0x1b29   :  { %15143 = vpow2.f32 %v8465_v60 }
0x1b2b   :  { %v15142_v14 = vpop.eup %15141 }
0x1b2c   :  { %v8450_v13 = vpop.xlane.xlu1 %8449  ;;  %v8469_v2 = vsel %vm936_vm2, %v15142_v14, 0.0 }
0x1b2d   :  { %v8458_v22 = vsub.f32 %v8442_v52, %v8450_v13  ;;  %8470 = vadd.xlane.f32.xlu0 %v8469_v2  ;;  %v12556_v52 = vld [vmem:[%s15326_s24 + $0x10] sm:$0xf]  ;;  %v16844_v13 = vld [vmem:[%s15396_s4 + $0x1] ss:$0 sm:$0xff] }
0x1b2e   :  { %v8689_v58 = vsel %vm1184_vm3, %v12556_v52, 0  ;;  %v15014_v52 = vld [vmem:[%s17381_s17 + $0x58] sm:$0xff]  }
0x1b2f   :  { %v8463_v40 = vmul.f32 1.442695, %v8458_v22  ;;  %v14993_v22 = vld [vmem:[%s15336_s6 + $0x40] sm:$0xff]  }
0x1b31   :  { %15145 = vpow2.f32 %v8463_v40 }
0x1b33   :  { %v15144_v43 = vpop.eup %15143 }
0x1b34   :  { %v8456_v6 = vpop.xlane.xlu1 %8455  ;;  %v8475_v34 = vsel %vm936_vm2, %v15144_v43, 0.0 }
0x1b35   :  { %v8460_v4 = vsub.f32 %v8444_v46, %v8456_v6  ;;  %8476 = vadd.xlane.f32.xlu0 %v8475_v34  ;;  %v12558_v46 = vld [vmem:[%s15326_s24 + $0x18] sm:$0xf]  ;;  %v16849_v6 = vld [vmem:[%s17378_s0 + $0x1] ss:$0 sm:$0xff] }
0x1b36   :  { %v8781_v39 = vsel %vm1184_vm3, %v12558_v46, 0 }
0x1b37   :  { %v8467_v44 = vmul.f32 1.442695, %v8460_v4  ;;  %v14994_v4 = vld [vmem:[%s15336_s6 + $0x48] sm:$0xff]  }
0x1b39   :  { %15147 = vpow2.f32 %v8467_v44  ;;  %8890 = vadd.xlane.f32.xlu0 %v8889_v55  ;;  %v12559_v55 = vld [vmem:[%s15326_s24 + $0x1c] sm:$0xf] }
0x1b3a   :  { %v8827_v29 = vsel %vm1184_vm3, %v12559_v55, 0 }
0x1b3b   :  { %v15146_v23 = vpop.eup %15145 }
0x1b3c   :  { %v8472_v25 = vsel %vm936_vm2, %v15146_v23, 0.0 }
0x1b3d   :  { %8473 = vadd.xlane.f32.xlu1 %v8472_v25  ;;  %v14995_v25 = vld [vmem:[%s15336_s6 + $0x60] sm:$0xff]  }
0x1b43   :  { %v15148_v28 = vpop.eup %15147 }
0x1b44   :  { %v8478_v47 = vsel %vm936_vm2, %v15148_v28, 0.0 }
0x1b45   :  { %8479 = vadd.xlane.f32.xlu1 %v8478_v47 }
0x1bba   :  { %v8471_v61 = vpop.xlane.xlu0 %8470 }
0x1bbb   :  { %15149 = vrcp.f32 %v8471_v61 }
0x1bc2   :  { %v8477_v30 = vpop.xlane.xlu0 %8476 }
0x1bc3   :  { %15151 = vrcp.f32 %v8477_v30 }
0x1bc5   :  { %v15150_v19 = vpop.eup %15149 }
0x1bc6   :  { %v8485_v62 = vmul.f32 %v15150_v19, %v15142_v14  ;;  %v8891_v35 = vpop.xlane.xlu0 %8890 }
0x1bc7   :  { %v8895_v45 = vmul.f32 0.03125, %v8891_v35  ;;  %v14997_v35 = vld [vmem:[%s15336_s6 + $0x50] sm:$0xff]  }
0x1bc8   :  { %v8489_v63 = vpack.c.bf16 %v8485_v62, %v8485_v62 }
0x1bc9   :  { %v8897_v10 = vsub.f32 %v8883_v42, %v8895_v45  ;;  %v14998_v45 = vld [vmem:[%s17379_s5 + $0x40] sm:$0xff]  }
0x1bca   :  { %14396 = vmatmul.mubr.msk.bf16.vlgmr.msra.gmra.mrb[16].mxu1 %vm936_vm2, %v8489_v63  ;;  %v8474_v0 = vpop.xlane.xlu1 %8473 }
0x1bcb   :  { %14406 = vmatpush3.bf16.msra.mxu1 %v8593_v12  ;;  %15153 = vrcp.f32 %v8474_v0  ;;  %v8899_v8 = vmul.f32 %v8897_v10, %v8897_v10  ;;  %14407 = vmatprep.mubr.msk.bf16.mxu1 %vm15259_vm0, %v15258_v1 }
0x1bcc   :  { %14417 = vmatprep.subr.bf16.mxu1 %v15258_v1 }
0x1bcd   :  { %v15152_v7 = vpop.eup %15151  ;;  %v8901_v3 = vsel %vm264_vm1, %v8899_v8, 0.0  ;;  %v14999_v8 = vld [vmem:[%s15336_s6 + $0x58] sm:$0xff]  }
0x1bce   :  { %v8487_v41 = vmul.f32 %v15152_v7, %v15144_v43  ;;  %8902 = vadd.xlane.f32.xlu1 %v8901_v3  ;;  %v15000_v7 = vld [vmem:[%s17379_s5 + $0x48] sm:$0xff]   ;;  %v15001_v3 = vld [vmem:[%s15336_s6 + $0x70] sm:$0xff]  }
0x1bd0   :  { %v8491_v18 = vpack.c.bf16 %v8487_v41, %v8487_v41  ;;  %v15002_v41 = vld [vmem:[%s17379_s5 + $0x60] sm:$0xff]  }
0x1bd2   :  { %14408 = vmatmul.mubr.msk.bf16.vlgmr.msra.gmra.mrb[20].mxu1 %vm936_vm2, %v8491_v18  ;;  %v8480_v15 = vpop.xlane.xlu1 %8479  ;;  %v15003_v18 = vld [vmem:[%s15336_s6 + $0x78] sm:$0xff]  }
0x1bd3   :  { %15155 = vrcp.f32 %v8480_v15  ;;  %14419 = vmatprep.mubr.msk.bf16.mxu1 %vm15259_vm0, %v15258_v1  ;;  %14418 = vmatpush3.bf16.msra.mxu1 %v8689_v58  ;;  %v15005_v15 = vld [vmem:[%s17379_s5 + $0x50] sm:$0xff]  }
0x1bd4   :  { %14429 = vmatprep.subr.bf16.mxu1 %v15258_v1  ;;  %v15015_v58 = vld [vmem:[%s17381_s17 + $0x70] sm:$0xff]  }
0x1bd5   :  { %v15154_v32 = vpop.eup %15153 }
0x1bd6   :  { %v8486_v20 = vmul.f32 %v15154_v32, %v15146_v23  ;;  %v15006_v32 = vld [vmem:[%s17379_s5 + $0x58] sm:$0xff]  }
0x1bd8   :  { %v8490_v49 = vpack.c.bf16 %v8486_v20, %v8486_v20  ;;  %v15008_v20 = vld [vmem:[%s17379_s5 + $0x78] sm:$0xff]  }
0x1bda   :  { %14402 = vmatmul.mubr.msk.bf16.vlgmr.msra.gmra.mrb[24].mxu0 %vm936_vm2, %v8490_v49  ;;  %v15009_v49 = vld [vmem:[%s17381_s17 + $0x40] sm:$0xff]  }
0x1bdb   :  { %14412 = vmatpush3.bf16.msra.mxu0 %v8639_v36  ;;  %14413 = vmatprep.mubr.msk.bf16.mxu0 %vm15259_vm0, %v15258_v1  ;;  %v15010_v36 = vld [vmem:[%s17381_s17 + $0x48] sm:$0xff]  }
0x1bdc   :  { %14423 = vmatprep.subr.bf16.mxu0 %v15258_v1 }
0x1bdd   :  { %v15156_v57 = vpop.eup %15155 }
0x1bde   :  { %v8488_v16 = vmul.f32 %v15156_v57, %v15148_v28  ;;  %v15011_v57 = vld [vmem:[%s17381_s17 + $0x60] sm:$0xff]  }
0x1be0   :  { %v8492_v51 = vpack.c.bf16 %v8488_v16, %v8488_v16  ;;  %v15012_v16 = vld [vmem:[%s17381_s17 + $0x68] sm:$0xff]  }
0x1be2   :  { %14414 = vmatmul.mubr.msk.bf16.vlgmr.msra.gmra.mrb[28].mxu0 %vm936_vm2, %v8492_v51  ;;  %v15013_v51 = vld [vmem:[%s17381_s17 + $0x50] sm:$0xff]  }
0x1be3   :  { %14425 = vmatprep.mubr.msk.bf16.mxu0 %vm15259_vm0, %v15258_v1  ;;  %14424 = vmatpush3.bf16.msra.mxu0 %v8735_v26 }
0x1be4   :  { %14435 = vmatprep.subr.bf16.mxu0 %v15258_v1 }
0x1c5b   :  { %v8903_v27 = vpop.xlane.xlu1 %8902 }
0x1c5c   :  { %v8907_v33 = vmul.f32 0.03125, %v8903_v27 }
0x1c5e   :  { %v8909_v56 = vadd.f32 1e-05, %v8907_v33 }
0x1c60   :  { %15157 = vrsqrt.f32 %v8909_v56 }
0x1c6a   :  { %v15158_v48 = vpop.eup %15157 }
0x1c6b   :  { %v8913_v14 = vmul.f32 %v15158_v48, %v8897_v10 }
0x1c6d   :  { %v8921_v40 = vmul.f32 %v16844_v13, %v8913_v14 }
0x1c6f   :  { %v16856_v44 = vadd.f32 %v16849_v6, %v8921_v40 }
0x1c71   :  { %v8931_v28 = vpack.c.bf16 %v16856_v44, %v16856_v44 }
0x1c9d   :  { %v8537_v59 = vpop.f32.mrb[16].mxu1 }
0x1c9e   :  { %v8681_v24 = vpack.c.bf16 %v8537_v59, %v8537_v59  ;;  %v14397_v38 = vpop.f32.mrb[17].mxu1 }
0x1c9f   :  { %v8540_v11 = vpop.f32.mrb[18].mxu1 }
0x1ca0   :  { %v14398_v60 = vpop.f32.mrb[19].mxu1  ;;  %14420 = vmatmul.mubr.msk.bf16.vlgmr.msra.gmra.mrb[24].mxu1 %vm936_vm2, %v8681_v24 }
0x1ca1   :  { %14430 = vmatpush3.bf16.msra.mxu1 %v8781_v39  ;;  %14431 = vmatprep.mubr.msk.bf16.mxu1 %vm15259_vm0, %v15258_v1 }
0x1ca2   :  { %14441 = vmatprep.subr.bf16.mxu1 %v15258_v1 }
0x1ca5   :  { %v8629_v2 = vpop.f32.mrb[20].mxu1 }
0x1ca6   :  { %v8683_v54 = vpack.c.bf16 %v8629_v2, %v8629_v2  ;;  %v14409_v43 = vpop.f32.mrb[21].mxu1 }
0x1ca7   :  { %v8632_v34 = vpop.f32.mrb[22].mxu1 }
0x1ca8   :  { %v14410_v42 = vpop.f32.mrb[23].mxu1  ;;  %14432 = vmatmul.mubr.msk.bf16.vlgmr.msra.gmra.mrb[28].mxu1 %vm936_vm2, %v8683_v54 }
0x1ca9   :  { %14442 = vmatpush3.bf16.msra.mxu1 %v14993_v22  ;;  %14445 = vmatprep.mubr.msk.bf16.mxu1 %vm15259_vm0, %v15258_v1 }
0x1caa   :  { %14443 = vmatprep.subr.bf16.mxu1 %v15258_v1 }
0x1cad   :  { %v8583_v23 = vpop.f32.mrb[24].mxu0  ;;  %14444 = vmatpush3.bf16.msra.mxu1 %v14994_v4 }
0x1cae   :  { %v8682_v47 = vpack.c.bf16 %v8583_v23, %v8583_v23  ;;  %v14403_v61 = vpop.f32.mrb[25].mxu0  ;;  %14457 = vmatprep.subr.bf16.mxu1 %v15258_v1 }
0x1caf   :  { %v8586_v30 = vpop.f32.mrb[26].mxu0 }
0x1cb0   :  { %v14404_v19 = vpop.f32.mrb[27].mxu0  ;;  %14426 = vmatmul.mubr.msk.bf16.vlgmr.msra.gmra.mrb[32].mxu0 %vm936_vm2, %v8682_v47  ;;  %14446 = vmatmul.mubr.msk.bf16.vlgmr.msra.gmra.mrb[32].mxu1 %vm264_vm1, %v8931_v28 }
0x1cb1   :  { %14436 = vmatpush3.bf16.msra.mxu0 %v8827_v29  ;;  %14458 = vmatpush3.bf16.msra.mxu1 %v14995_v25 }
0x1cb2   :  { %14459 = vmatprep.subr.bf16.mxu1 %v15258_v1  ;;  %14437 = vmatprep.mubr.msk.bf16.mxu0 %vm15259_vm0, %v15258_v1 }
0x1cb3   :  { %14461 = vmatprep.mubr.msk.bf16.mxu1 %vm15259_vm0, %v15258_v1  ;;  %14449 = vmatprep.subr.bf16.mxu0 %v15258_v1 }
0x1cb5   :  { %v8675_v62 = vpop.f32.mrb[28].mxu0  ;;  %14460 = vmatpush3.bf16.msra.mxu1 %v14996_v31  ;;  %v16966_v31 = vld [vmem:[%s17382_s21 + $0x4] ss:$0 sm:$0xff] }
0x1cb6   :  { %v8684_v63 = vpack.c.bf16 %v8675_v62, %v8675_v62  ;;  %v14415_v10 = vpop.f32.mrb[29].mxu0  ;;  %14473 = vmatprep.subr.bf16.mxu1 %v15258_v1 }
0x1cb7   :  { %v8678_v12 = vpop.f32.mrb[30].mxu0 }
0x1cb8   :  { %v14416_v0 = vpop.f32.mrb[31].mxu0  ;;  %14438 = vmatmul.mubr.msk.bf16.vlgmr.msra.gmra.mrb[36].mxu0 %vm936_vm2, %v8684_v63  ;;  %14462 = vmatmul.mubr.msk.bf16.vlgmr.msra.gmra.mrb[36].mxu1 %vm264_vm1, %v8931_v28 }
0x1cb9   :  { %14450 = vmatpush3.bf16.msra.mxu0 %v14997_v35  ;;  %14474 = vmatpush3.bf16.msra.mxu1 %v14998_v45 }
0x1cba   :  { %14451 = vmatprep.subr.bf16.mxu0 %v15258_v1  ;;  %14475 = vmatprep.subr.bf16.mxu1 %v15258_v1 }
0x1cbb   :  { %14453 = vmatprep.mubr.msk.bf16.mxu0 %vm15259_vm0, %v15258_v1  ;;  %14477 = vmatprep.mubr.msk.bf16.mxu1 %vm15259_vm0, %v15258_v1 }
0x1cbd   :  { %14452 = vmatpush3.bf16.msra.mxu0 %v14999_v8  ;;  %14476 = vmatpush3.bf16.msra.mxu1 %v15000_v7 }
0x1cbe   :  { %14465 = vmatprep.subr.bf16.mxu0 %v15258_v1  ;;  %14489 = vmatprep.subr.bf16.mxu1 %v15258_v1 }
0x1cc0   :  { %14454 = vmatmul.mubr.msk.bf16.vlgmr.msra.gmra.mrb[40].mxu0 %vm264_vm1, %v8931_v28  ;;  %14478 = vmatmul.mubr.msk.bf16.vlgmr.msra.gmra.mrb[40].mxu1 %vm264_vm1, %v15951_v9 }
0x1cc1   :  { %14466 = vmatpush3.bf16.msra.mxu0 %v15001_v3  ;;  %14490 = vmatpush3.bf16.msra.mxu1 %v15002_v41  ;;  %v16970_v41 = vld [vmem:[%s17383_s7 + $0x4] ss:$0 sm:$0xff] }
0x1cc2   :  { %14467 = vmatprep.subr.bf16.mxu0 %v15258_v1  ;;  %14491 = vmatprep.subr.bf16.mxu1 %v15258_v1 }
0x1cc3   :  { %14469 = vmatprep.mubr.msk.bf16.mxu0 %vm15259_vm0, %v15258_v1  ;;  %14493 = vmatprep.mubr.msk.bf16.mxu1 %vm15259_vm0, %v15258_v1 }
0x1cc5   :  { %14468 = vmatpush3.bf16.msra.mxu0 %v15003_v18  ;;  %14492 = vmatpush3.bf16.msra.mxu1 %v15004_v37  ;;  %v16974_v37 = vld [vmem:[%s17382_s21 + $0x6] ss:$0 sm:$0xff] }
0x1cc6   :  { %14481 = vmatprep.subr.bf16.mxu0 %v15258_v1  ;;  %14505 = vmatprep.subr.bf16.mxu1 %v15258_v1 }
0x1cc8   :  { %14470 = vmatmul.mubr.msk.bf16.vlgmr.msra.gmra.mrb[44].mxu0 %vm264_vm1, %v8931_v28  ;;  %14494 = vmatmul.mubr.msk.bf16.vlgmr.msra.gmra.mrb[44].mxu1 %vm264_vm1, %v15951_v9 }
0x1cc9   :  { %14482 = vmatpush3.bf16.msra.mxu0 %v15005_v15  ;;  %14485 = vmatprep.mubr.msk.bf16.mxu0 %vm15259_vm0, %v15258_v1 }
0x1cca   :  { %14483 = vmatprep.subr.bf16.mxu0 %v15258_v1  ;;  %14509 = vmatprep.mubr.msk.bf16.mxu1 %vm15259_vm0, %v15258_v1 }
0x1ccb   :  { %14506 = vmatpush3.bf16.msra.mxu1 %v15009_v49 }
0x1ccc   :  { %14507 = vmatprep.subr.bf16.mxu1 %v15258_v1 }
0x1ccd   :  { %14484 = vmatpush3.bf16.msra.mxu0 %v15006_v32 }
0x1cce   :  { %14497 = vmatprep.subr.bf16.mxu0 %v15258_v1 }
0x1ccf   :  { %14508 = vmatpush3.bf16.msra.mxu1 %v15010_v36 }
0x1cd0   :  { %14486 = vmatmul.mubr.msk.bf16.vlgmr.msra.gmra.mrb[48].mxu0 %vm264_vm1, %v15951_v9  ;;  %14521 = vmatprep.subr.bf16.mxu1 %v15258_v1 }
0x1cd1   :  { %14498 = vmatpush3.bf16.msra.mxu0 %v15007_v21  ;;  %14501 = vmatprep.mubr.msk.bf16.mxu0 %vm15259_vm0, %v15258_v1 }
0x1cd2   :  { %14499 = vmatprep.subr.bf16.mxu0 %v15258_v1  ;;  %14510 = vmatmul.mubr.msk.bf16.vlgmr.msra.gmra.mrb[48].mxu1 %vm264_vm1, %v15951_v9 }
0x1cd3   :  { %14522 = vmatpush3.bf16.msra.mxu1 %v15011_v57  ;;  %14525 = vmatprep.mubr.msk.bf16.mxu1 %vm15259_vm0, %v15258_v1 }
0x1cd4   :  { %14523 = vmatprep.subr.bf16.mxu1 %v15258_v1 }
0x1cd5   :  { %14500 = vmatpush3.bf16.msra.mxu0 %v15008_v20 }
0x1cd6   :  { %14513 = vmatprep.subr.bf16.mxu0 %v15258_v1 }
0x1cd7   :  { %14524 = vmatpush3.bf16.msra.mxu1 %v15012_v16 }
0x1cd8   :  { %14502 = vmatmul.mubr.msk.bf16.vlgmr.msra.gmra.mrb[52].mxu0 %vm264_vm1, %v15951_v9  ;;  %14537 = vmatprep.subr.bf16.mxu1 %v15258_v1 }
0x1cd9   :  { %14517 = vmatprep.mubr.msk.bf16.mxu0 %vm15259_vm0, %v15258_v1  ;;  %14514 = vmatpush3.bf16.msra.mxu0 %v15013_v51 }
0x1cda   :  { %14515 = vmatprep.subr.bf16.mxu0 %v15258_v1  ;;  %14526 = vmatmul.mubr.msk.bf16.vlgmr.msra.gmra.mrb[52].mxu1 %vm264_vm1, %v15951_v9 }
0x1cdb   :  { %14539 = vmatprep.mubr.msk.bf16.mxu1 %vm15259_vm0, %v15258_v1 }
0x1cdd   :  { %14516 = vmatpush3.bf16.msra.mxu0 %v15014_v52 }
0x1cde   :  { %14529 = vmatprep.subr.bf16.mxu0 %v15258_v1 }
0x1ce0   :  { %14518 = vmatmul.mubr.msk.bf16.vlgmr.msra.gmra.mrb[56].mxu0 %vm264_vm1, %v15951_v9 }
0x1ce1   :  { %14533 = vmatprep.mubr.msk.bf16.mxu0 %vm15259_vm0, %v15258_v1  ;;  %14530 = vmatpush3.bf16.msra.mxu0 %v15015_v58 }
0x1ce2   :  { %14531 = vmatprep.subr.bf16.mxu0 %v15258_v1 }
0x1ce5   :  { %14532 = vmatpush3.bf16.msra.mxu0 %v15016_v53 }
0x1ce6   :  { %14543 = vmatprep.subr.bf16.mxu0 %v15258_v1 }
0x1ce8   :  { %14534 = vmatmul.mubr.msk.bf16.vlgmr.msra.gmra.mrb[60].mxu0 %vm264_vm1, %v15951_v9 }
0x1ce9   :  { %14545 = vmatprep.mubr.msk.bf16.mxu0 %vm15259_vm0, %v15258_v1 }
0x1d73   :  { %v8725_v26 = vpop.f32.mrb[24].mxu1 }
0x1d74   :  { %v14421_v27 = vpop.f32.mrb[25].mxu1  ;;  %v8869_v11 = vsel %vm264_vm1, %v8725_v26, 0.0  ;;  %v16980_v26 = vld [vmem:[%s17383_s7 + $0x6] ss:$0 sm:$0xff] }
0x1d75   :  { %v8728_v33 = vpop.f32.mrb[26].mxu1 }
0x1d76   :  { %v14422_v56 = vpop.f32.mrb[27].mxu1  ;;  %v16985_v33 = vld [vmem:[%s17382_s21 + $0x5] ss:$0 sm:$0xff] }
0x1d7b   :  { %v8817_v46 = vpop.f32.mrb[28].mxu1 }
0x1d7c   :  { %v14433_v59 = vpop.f32.mrb[29].mxu1  ;;  %v8872_v54 = vsel %vm264_vm1, %v8817_v46, 0.0 }
0x1d7d   :  { %v8820_v24 = vpop.f32.mrb[30].mxu1 }
0x1d7e   :  { %v14434_v38 = vpop.f32.mrb[31].mxu1 }
0x1d83   :  { %v8771_v39 = vpop.f32.mrb[32].mxu0  ;;  %v9078_v48 = vpop.f32.mrb[32].mxu1 }
0x1d84   :  { %v8870_v60 = vsel %vm264_vm1, %v8771_v39, 0.0  ;;  %v14427_v14 = vpop.f32.mrb[33].mxu0  ;;  %v14447_v2 = vpop.f32.mrb[33].mxu1  ;;  %v9079_v15 = vadd.f32 %v16970_v41, %v9078_v48 }
0x1d85   :  { %v8871_v9 = vadd.f32 %v8870_v60, %v8869_v11  ;;  %v8774_v22 = vpop.f32.mrb[34].mxu0  ;;  %v9081_v40 = vpop.f32.mrb[34].mxu1  ;;  %v16993_v60 = vld [vmem:[%s17383_s7 + $0x5] ss:$0 sm:$0xff]  ;;  %v16998_v2 = vld [vmem:[%s17382_s21 + $0x7] ss:$0 sm:$0xff] }
0x1d86   :  { %v14428_v43 = vpop.f32.mrb[35].mxu0  ;;  %v14448_v34 = vpop.f32.mrb[35].mxu1  ;;  %v9704_v51 = vpack.c.bf16 %v9079_v15, %v9079_v15 }
0x1d87   :  { %v8873_v42 = vadd.f32 %v8872_v54, %v8871_v9 }
0x1d8b   :  { %v8863_v4 = vpop.f32.mrb[36].mxu0  ;;  %v9182_v55 = vpop.f32.mrb[36].mxu1 }
0x1d8c   :  { %v8874_v23 = vsel %vm264_vm1, %v8863_v4, 0.0  ;;  %v14439_v25 = vpop.f32.mrb[37].mxu0  ;;  %v14463_v28 = vpop.f32.mrb[37].mxu1  ;;  %v9183_v56 = vadd.f32 %v16980_v26, %v9182_v55  ;;  %v17006_v55 = vld [vmem:[%s17383_s7 + $0x7] ss:$0 sm:$0xff] }
0x1d8d   :  { %v16963_v47 = vadd.f32 %v8874_v23, %v8873_v42  ;;  %v8866_v61 = vpop.f32.mrb[38].mxu0  ;;  %v9185_v29 = vpop.f32.mrb[38].mxu1 }
0x1d8e   :  { %v14440_v30 = vpop.f32.mrb[39].mxu0  ;;  %v14464_v19 = vpop.f32.mrb[39].mxu1  ;;  %v9706_v39 = vpack.c.bf16 %v9183_v56, %v9183_v56  ;;  %v17018_v61 = vld [vmem:[%s17384_s10 + $0x4] ss:$0 sm:$0xff] }
0x1d93   :  { %v9130_v62 = vpop.f32.mrb[40].mxu0  ;;  %v9310_v35 = vpop.f32.mrb[40].mxu1 }
0x1d94   :  { %v9311_v45 = vadd.f32 %v16966_v31, %v9310_v35  ;;  %v14455_v63 = vpop.f32.mrb[41].mxu0  ;;  %v14479_v10 = vpop.f32.mrb[41].mxu1  ;;  %v9131_v9 = vadd.f32 %v16993_v60, %v9130_v62 }
0x1d95   :  { %v9133_v12 = vpop.f32.mrb[42].mxu0  ;;  %v9313_v0 = vpop.f32.mrb[42].mxu1 }
0x1d96   :  { %v9708_v8 = vpack.c.bf16 %v9311_v45, %v9311_v45  ;;  %v14456_v7 = vpop.f32.mrb[43].mxu0  ;;  %v14480_v3 = vpop.f32.mrb[43].mxu1  ;;  %v9705_v34 = vpack.c.bf16 %v9131_v9, %v9131_v9 }
0x1d97   :  { %v17026_v7 = vld [vmem:[%s17384_s10 + $0x5] ss:$0 sm:$0xff] }
0x1d98   :  { %v9716_v18 = vsel %vm936_vm2, %v9708_v8, 0 }
0x1d99   :  { %14538 = vmatpush3.bf16.xpose.msra.mxu1 %v9716_v18 }
0x1d9a   :  { %14549 = vmatprep.subr.bf16.mxu1 %v15258_v1 }
0x1d9b   :  { %v9234_v32 = vpop.f32.mrb[44].mxu0  ;;  %v9414_v21 = vpop.f32.mrb[44].mxu1 }
0x1d9c   :  { %v9415_v20 = vadd.f32 %v16974_v37, %v9414_v21  ;;  %v14471_v49 = vpop.f32.mrb[45].mxu0  ;;  %v14495_v36 = vpop.f32.mrb[45].mxu1  ;;  %v9235_v25 = vadd.f32 %v17006_v55, %v9234_v32 }
0x1d9d   :  { %v9237_v57 = vpop.f32.mrb[46].mxu0  ;;  %v9417_v16 = vpop.f32.mrb[46].mxu1 }
0x1d9e   :  { %v9710_v52 = vpack.c.bf16 %v9415_v20, %v9415_v20  ;;  %v14472_v58 = vpop.f32.mrb[47].mxu0  ;;  %v14496_v53 = vpop.f32.mrb[47].mxu1  ;;  %v9707_v28 = vpack.c.bf16 %v9235_v25, %v9235_v25 }
0x1da0   :  { %v9808_v27 = vsel %vm936_vm2, %v9710_v52, 0  ;;  %14540 = vmatmul.mubr.msk.bf16.vlgmr.msra.gmra.mrb[56].mxu1 %vm936_vm2, %v9704_v51 }
0x1da1   :  { %14550 = vmatpush3.bf16.xpose.msra.mxu1 %v9808_v27  ;;  %14551 = vmatprep.mubr.msk.bf16.mxu1 %vm15259_vm0, %v15258_v1 }
0x1da2   :  { %14561 = vmatprep.subr.bf16.mxu1 %v15258_v1 }
0x1da3   :  { %v9362_v46 = vpop.f32.mrb[48].mxu0 }
0x1da4   :  { %v9363_v59 = vadd.f32 %v16985_v33, %v9362_v46  ;;  %v14487_v24 = vpop.f32.mrb[49].mxu0 }
0x1da5   :  { %v9365_v38 = vpop.f32.mrb[50].mxu0  ;;  %v9542_v29 = vpop.f32.mrb[48].mxu1 }
0x1da6   :  { %v9709_v48 = vpack.c.bf16 %v9363_v59, %v9363_v59  ;;  %v14488_v11 = vpop.f32.mrb[51].mxu0  ;;  %v9543_v30 = vadd.f32 %v17018_v61, %v9542_v29  ;;  %v14511_v19 = vpop.f32.mrb[49].mxu1 }
0x1da7   :  { %v9545_v62 = vpop.f32.mrb[50].mxu1 }
0x1da8   :  { %v9762_v14 = vsel %vm936_vm2, %v9709_v48, 0  ;;  %14552 = vmatmul.mubr.msk.bf16.vlgmr.msra.gmra.mrb[60].mxu1 %vm936_vm2, %v9706_v39  ;;  %v9948_v35 = vpack.c.bf16 %v9543_v30, %v9543_v30  ;;  %v14512_v45 = vpop.f32.mrb[51].mxu1 }
0x1da9   :  { %14544 = vmatpush3.bf16.xpose.msra.mxu0 %v9762_v14  ;;  %14563 = vmatprep.mubr.msk.bf16.mxu1 %vm15259_vm0, %v15258_v1 }
0x1daa   :  { %14555 = vmatprep.subr.bf16.mxu0 %v15258_v1  ;;  %v9956_v63 = vsel %vm1184_vm3, %v9948_v35, 0 }
0x1dab   :  { %v9466_v22 = vpop.f32.mrb[52].mxu0  ;;  %14562 = vmatpush3.bf16.msra.mxu1 %v9956_v63 }
0x1dac   :  { %v9467_v40 = vadd.f32 %v16998_v2, %v9466_v22  ;;  %v14503_v54 = vpop.f32.mrb[53].mxu0  ;;  %14573 = vmatprep.subr.bf16.mxu1 %v15258_v1 }
0x1dad   :  { %v9469_v43 = vpop.f32.mrb[54].mxu0  ;;  %v17023_v10 = vpop.f32.mrb[52].mxu1 }
0x1dae   :  { %v9711_v42 = vpack.c.bf16 %v9467_v40, %v9467_v40  ;;  %v14504_v4 = vpop.f32.mrb[55].mxu0  ;;  %v14527_v12 = vpop.f32.mrb[53].mxu1 }
0x1daf   :  { %v9649_v0 = vpop.f32.mrb[54].mxu1 }
0x1db0   :  { %v9854_v23 = vsel %vm936_vm2, %v9711_v42, 0  ;;  %14546 = vmatmul.mubr.msk.bf16.vlgmr.msra.gmra.mrb[64].mxu0 %vm936_vm2, %v9705_v34  ;;  %v14528_v8 = vpop.f32.mrb[55].mxu1 }
0x1db1   :  { %14556 = vmatpush3.bf16.xpose.msra.mxu0 %v9854_v23  ;;  %14557 = vmatprep.mubr.msk.bf16.mxu0 %vm15259_vm0, %v15258_v1 }
0x1db2   :  { %14567 = vmatprep.subr.bf16.mxu0 %v15258_v1 }
0x1db3   :  { %v9594_v3 = vpop.f32.mrb[56].mxu0 }
0x1db4   :  { %v9595_v18 = vadd.f32 %v17026_v7, %v9594_v3  ;;  %v14519_v15 = vpop.f32.mrb[57].mxu0 }
0x1db5   :  { %v9597_v32 = vpop.f32.mrb[58].mxu0 }
0x1db6   :  { %v9949_v21 = vpack.c.bf16 %v9595_v18, %v9595_v18  ;;  %v14520_v20 = vpop.f32.mrb[59].mxu0  ;;  %v8882_v18 = vadd.f32 %v16801_v17, %v16963_v47 }
0x1db8   :  { %14558 = vmatmul.mubr.msk.bf16.vlgmr.msra.gmra.mrb[68].mxu0 %vm936_vm2, %v9707_v28  ;;  %v10002_v49 = vsel %vm1184_vm3, %v9949_v21, 0  ;;  %v8884_v20 = vadd.f32 %v8882_v18, %v16638_v50 }
0x1db9   :  { %14569 = vmatprep.mubr.msk.bf16.mxu0 %vm15259_vm0, %v15258_v1  ;;  %14568 = vmatpush3.bf16.msra.mxu0 %v10002_v49 }
0x1dba   :  { %14579 = vmatprep.subr.bf16.mxu0 %v15258_v1 }
0x1dbb   :  { %v17031_v36 = vpop.f32.mrb[60].mxu0 }
0x1dbc   :  { %v14535_v57 = vpop.f32.mrb[61].mxu0 }
0x1dbd   :  { %v9701_v16 = vpop.f32.mrb[62].mxu0 }
0x1dbe   :  { %v14536_v51 = vpop.f32.mrb[63].mxu0  ;;  %v8892_v16 = vsel %vm264_vm1, %v8884_v20, 0.0 }
0x1e73   :  { %v9752_v52 = vpop.f32.mrb[56].mxu1 }
0x1e74   :  { %v9896_v58 = vmul.f32 0.35355338, %v9752_v52  ;;  %v14541_v53 = vpop.f32.mrb[57].mxu1 }
0x1e75   :  { %v9755_v27 = vpop.f32.mrb[58].mxu1  ;;  %v17046_v53 = vld [vmem:[%s17384_s10 + $0x6] ss:$0 sm:$0xff] }
0x1e76   :  { %v14542_v56 = vpop.f32.mrb[59].mxu1  ;;  %v9900_v46 = vsel %vm936_vm2, %v9896_v58, -inf  ;;  %v9647_v50 = vadd.f32 %v17046_v53, %v17023_v10 }
0x1e77   :  { %9901 = vmax.xlane.f32.xlu0 %v9900_v46 }
0x1e78   :  { %v9950_v46 = vpack.c.bf16 %v9647_v50, %v9647_v50 }
0x1e7b   :  { %v9844_v59 = vpop.f32.mrb[60].mxu1 }
0x1e7c   :  { %v9898_v24 = vmul.f32 0.35355338, %v9844_v59  ;;  %v14553_v38 = vpop.f32.mrb[61].mxu1 }
0x1e7d   :  { %v9847_v39 = vpop.f32.mrb[62].mxu1 }
0x1e7e   :  { %v14554_v48 = vpop.f32.mrb[63].mxu1  ;;  %v9906_v11 = vsel %vm936_vm2, %v9898_v24, -inf }
0x1e7f   :  { %9907 = vmax.xlane.f32.xlu0 %v9906_v11  ;;  %v10048_v11 = vsel %vm1184_vm3, %v9950_v46, 0 }
0x1e83   :  { %v9798_v14 = vpop.f32.mrb[64].mxu0 }
0x1e84   :  { %v9897_v9 = vmul.f32 0.35355338, %v9798_v14  ;;  %v14547_v22 = vpop.f32.mrb[65].mxu0 }
0x1e85   :  { %v9801_v40 = vpop.f32.mrb[66].mxu0 }
0x1e86   :  { %v14548_v54 = vpop.f32.mrb[67].mxu0  ;;  %v9903_v43 = vsel %vm936_vm2, %v9897_v9, -inf }
0x1e87   :  { %9904 = vmax.xlane.f32.xlu1 %v9903_v43  ;;  %v17057_v54 = vld [vmem:[%s17384_s10 + $0x7] ss:$0 sm:$0xff] }
0x1e8b   :  { %v9890_v34 = vpop.f32.mrb[68].mxu0 }
0x1e8c   :  { %v9899_v42 = vmul.f32 0.35355338, %v9890_v34  ;;  %v14559_v4 = vpop.f32.mrb[69].mxu0  ;;  %v9699_v34 = vadd.f32 %v17057_v54, %v17031_v36 }
0x1e8d   :  { %v9893_v23 = vpop.f32.mrb[70].mxu0 }
0x1e8e   :  { %v14560_v25 = vpop.f32.mrb[71].mxu0  ;;  %v9909_v28 = vsel %vm936_vm2, %v9899_v42, -inf  ;;  %v9951_v23 = vpack.c.bf16 %v9699_v34, %v9699_v34 }
0x1e8f   :  { %9910 = vmax.xlane.f32.xlu1 %v9909_v28 }
0x1f04   :  { %v9902_v29 = vpop.xlane.xlu0 %9901 }
0x1f05   :  { %v9912_v30 = vsub.f32 %v9896_v58, %v9902_v29  ;;  %v10094_v29 = vsel %vm1184_vm3, %v9951_v23, 0  ;;  %v15023_v23 = vld [vmem:[%s15336_s6 + $0x58] sm:$0xff]  }
0x1f07   :  { %v9916_v19 = vmul.f32 1.442695, %v9912_v30 }
0x1f09   :  { %15159 = vpow2.f32 %v9916_v19 }
0x1f0c   :  { %v9908_v62 = vpop.xlane.xlu0 %9907 }
0x1f0d   :  { %v9914_v35 = vsub.f32 %v9898_v24, %v9908_v62  ;;  %v12686_v62 = vld [vmem:[%s17385_s11 + $0x10] sm:$0xf] }
0x1f0f   :  { %v9920_v45 = vmul.f32 1.442695, %v9914_v35  ;;  %v10144_v35 = vsel %vm1184_vm3, %v12686_v62, 0  ;;  %v15030_v62 = vld [vmem:[%s17379_s5 + $0x58] sm:$0xff]  }
0x1f11   :  { %15161 = vpow2.f32 %v9920_v45  ;;  %v12687_v45 = vld [vmem:[%s17385_s11 + $0x14] sm:$0xf] }
0x1f13   :  { %v15160_v63 = vpop.eup %15159 }
0x1f14   :  { %v9905_v12 = vpop.xlane.xlu1 %9904  ;;  %v9924_v0 = vsel %vm936_vm2, %v15160_v63, 0.0 }
0x1f15   :  { %v9913_v8 = vsub.f32 %v9897_v9, %v9905_v12  ;;  %9925 = vadd.xlane.f32.xlu0 %v9924_v0 }
0x1f17   :  { %v9918_v3 = vmul.f32 1.442695, %v9913_v8 }
0x1f19   :  { %15163 = vpow2.f32 %v9918_v3  ;;  %v12688_v3 = vld [vmem:[%s17385_s11 + $0x18] sm:$0xf] }
0x1f1b   :  { %v15162_v15 = vpop.eup %15161 }
0x1f1c   :  { %v9911_v32 = vpop.xlane.xlu1 %9910  ;;  %v9930_v21 = vsel %vm936_vm2, %v15162_v15, 0.0 }
0x1f1d   :  { %v9915_v49 = vsub.f32 %v9899_v42, %v9911_v32  ;;  %9931 = vadd.xlane.f32.xlu0 %v9930_v21  ;;  %v10236_v21 = vsel %vm1184_vm3, %v12688_v3, 0  ;;  %v15037_v3 = vld [vmem:[%s17381_s17 + $0x50] sm:$0xff]  }
0x1f1f   :  { %v9922_v57 = vmul.f32 1.442695, %v9915_v49 }
0x1f21   :  { %15165 = vpow2.f32 %v9922_v57  ;;  %8893 = vadd.xlane.f32.xlu0 %v8892_v16 }
0x1f23   :  { %v15164_v51 = vpop.eup %15163 }
0x1f24   :  { %v9927_v52 = vsel %vm936_vm2, %v15164_v51, 0.0 }
0x1f25   :  { %9928 = vadd.xlane.f32.xlu1 %v9927_v52  ;;  %v15017_v52 = vld [vmem:[%s15336_s6 + $0x40] sm:$0xff]  }
0x1f2b   :  { %v15166_v17 = vpop.eup %15165 }
0x1f2c   :  { %v9933_v47 = vsel %vm936_vm2, %v15166_v17, 0.0 }
0x1f2d   :  { %9934 = vadd.xlane.f32.xlu1 %v9933_v47 }
0x1fa2   :  { %v9926_v58 = vpop.xlane.xlu0 %9925 }
0x1fa3   :  { %15167 = vrcp.f32 %v9926_v58 }
0x1faa   :  { %v9932_v27 = vpop.xlane.xlu0 %9931 }
0x1fab   :  { %15169 = vrcp.f32 %v9932_v27 }
0x1fad   :  { %v15168_v56 = vpop.eup %15167 }
0x1fae   :  { %v9940_v59 = vmul.f32 %v15168_v56, %v15160_v63  ;;  %v8894_v24 = vpop.xlane.xlu0 %8893  ;;  %v10190_v63 = vsel %vm1184_vm3, %v12687_v45, 0  ;;  %v15018_v56 = vld [vmem:[%s15336_s6 + $0x48] sm:$0xff]   ;;  %v15032_v45 = vld [vmem:[%s17379_s5 + $0x78] sm:$0xff]  }
0x1faf   :  { %v8896_v38 = vmul.f32 0.03125, %v8894_v24 }
0x1fb0   :  { %v9944_v39 = vpack.c.bf16 %v9940_v59, %v9940_v59  ;;  %v12689_v59 = vld [vmem:[%s17385_s11 + $0x1c] sm:$0xf] }
0x1fb1   :  { %v8898_v48 = vsub.f32 %v8884_v20, %v8896_v38 }
0x1fb2   :  { %14564 = vmatmul.mubr.msk.bf16.vlgmr.msra.gmra.mrb[64].mxu1 %vm936_vm2, %v9944_v39  ;;  %v9929_v14 = vpop.xlane.xlu1 %9928 }
0x1fb3   :  { %14574 = vmatpush3.bf16.msra.mxu1 %v10048_v11  ;;  %15171 = vrcp.f32 %v9929_v14  ;;  %v8900_v9 = vmul.f32 %v8898_v48, %v8898_v48  ;;  %14575 = vmatprep.mubr.msk.bf16.mxu1 %vm15259_vm0, %v15258_v1  ;;  %v10282_v11 = vsel %vm1184_vm3, %v12689_v59, 0 }
0x1fb4   :  { %14585 = vmatprep.subr.bf16.mxu1 %v15258_v1 }
0x1fb5   :  { %v15170_v10 = vpop.eup %15169  ;;  %v8904_v22 = vsel %vm264_vm1, %v8900_v9, 0.0  ;;  %v15020_v9 = vld [vmem:[%s15336_s6 + $0x68] sm:$0xff]  }
0x1fb6   :  { %v9942_v40 = vmul.f32 %v15170_v10, %v15162_v15  ;;  %8905 = vadd.xlane.f32.xlu1 %v8904_v22  ;;  %v15021_v22 = vld [vmem:[%s15336_s6 + $0x50] sm:$0xff]  }
0x1fb8   :  { %v9946_v43 = vpack.c.bf16 %v9942_v40, %v9942_v40  ;;  %v15022_v40 = vld [vmem:[%s17379_s5 + $0x40] sm:$0xff]  }
0x1fba   :  { %14576 = vmatmul.mubr.msk.bf16.vlgmr.msra.gmra.mrb[68].mxu1 %vm936_vm2, %v9946_v43  ;;  %v9935_v42 = vpop.xlane.xlu1 %9934 }
0x1fbb   :  { %15173 = vrcp.f32 %v9935_v42  ;;  %14587 = vmatprep.mubr.msk.bf16.mxu1 %vm15259_vm0, %v15258_v1  ;;  %14586 = vmatpush3.bf16.msra.mxu1 %v10144_v35  ;;  %v15031_v35 = vld [vmem:[%s17379_s5 + $0x70] sm:$0xff]  }
0x1fbc   :  { %14597 = vmatprep.subr.bf16.mxu1 %v15258_v1 }
0x1fbd   :  { %v15172_v4 = vpop.eup %15171 }
0x1fbe   :  { %v9941_v25 = vmul.f32 %v15172_v4, %v15164_v51 }
0x1fc0   :  { %v9945_v28 = vpack.c.bf16 %v9941_v25, %v9941_v25  ;;  %v15024_v25 = vld [vmem:[%s17379_s5 + $0x48] sm:$0xff]  }
0x1fc2   :  { %14570 = vmatmul.mubr.msk.bf16.vlgmr.msra.gmra.mrb[72].mxu0 %vm936_vm2, %v9945_v28  ;;  %v15025_v28 = vld [vmem:[%s15336_s6 + $0x70] sm:$0xff]  }
0x1fc3   :  { %14580 = vmatpush3.bf16.msra.mxu0 %v10094_v29  ;;  %14581 = vmatprep.mubr.msk.bf16.mxu0 %vm15259_vm0, %v15258_v1  ;;  %v15026_v29 = vld [vmem:[%s17379_s5 + $0x60] sm:$0xff]  }
0x1fc4   :  { %14591 = vmatprep.subr.bf16.mxu0 %v15258_v1 }
0x1fc5   :  { %v15174_v36 = vpop.eup %15173 }
0x1fc6   :  { %v9943_v30 = vmul.f32 %v15174_v36, %v15166_v17  ;;  %v15027_v36 = vld [vmem:[%s15336_s6 + $0x78] sm:$0xff]  }
0x1fc8   :  { %v9947_v19 = vpack.c.bf16 %v9943_v30, %v9943_v30  ;;  %v15028_v30 = vld [vmem:[%s17379_s5 + $0x68] sm:$0xff]  }
0x1fca   :  { %14582 = vmatmul.mubr.msk.bf16.vlgmr.msra.gmra.mrb[76].mxu0 %vm936_vm2, %v9947_v19  ;;  %v15029_v19 = vld [vmem:[%s17379_s5 + $0x50] sm:$0xff]  }
0x1fcb   :  { %14593 = vmatprep.mubr.msk.bf16.mxu0 %vm15259_vm0, %v15258_v1  ;;  %14592 = vmatpush3.bf16.msra.mxu0 %v10190_v63  ;;  %v15033_v63 = vld [vmem:[%s17381_s17 + $0x40] sm:$0xff]  }
0x1fcc   :  { %14603 = vmatprep.subr.bf16.mxu0 %v15258_v1 }
0x2043   :  { %v8906_v12 = vpop.xlane.xlu1 %8905 }
0x2044   :  { %v8908_v0 = vmul.f32 0.03125, %v8906_v12  ;;  %v15034_v12 = vld [vmem:[%s17381_s17 + $0x48] sm:$0xff]  }
0x2046   :  { %v8910_v8 = vadd.f32 1e-05, %v8908_v0  ;;  %v15035_v0 = vld [vmem:[%s17381_s17 + $0x60] sm:$0xff]  }
0x2048   :  { %15175 = vrsqrt.f32 %v8910_v8  ;;  %v15036_v8 = vld [vmem:[%s17381_s17 + $0x68] sm:$0xff]  }
0x2052   :  { %v15176_v20 = vpop.eup %15175 }
0x2053   :  { %v8914_v16 = vmul.f32 %v15176_v20, %v8898_v48 }
0x2055   :  { %v8922_v17 = vmul.f32 %v16844_v13, %v8914_v16  ;;  %v15019_v13 = vld [vmem:[%s15336_s6 + $0x60] sm:$0xff]  }
0x2057   :  { %v17091_v46 = vadd.f32 %v16849_v6, %v8922_v17 }
0x2059   :  { %v10338_v38 = vpack.c.bf16 %v17091_v46, %v17091_v46 }
0x2085   :  { %v9992_v18 = vpop.f32.mrb[64].mxu1 }
0x2086   :  { %v10136_v15 = vpack.c.bf16 %v9992_v18, %v9992_v18  ;;  %v14565_v32 = vpop.f32.mrb[65].mxu1  ;;  %v15038_v18 = vld [vmem:[%s17381_s17 + $0x58] sm:$0xff]  }
0x2087   :  { %v9995_v49 = vpop.f32.mrb[66].mxu1  ;;  %v15040_v32 = vld [vmem:[%s17381_s17 + $0x78] sm:$0xff]  }
0x2088   :  { %v14566_v57 = vpop.f32.mrb[67].mxu1  ;;  %14588 = vmatmul.mubr.msk.bf16.vlgmr.msra.gmra.mrb[72].mxu1 %vm936_vm2, %v10136_v15  ;;  %v15039_v15 = vld [vmem:[%s17381_s17 + $0x70] sm:$0xff]  }
0x2089   :  { %14598 = vmatpush3.bf16.msra.mxu1 %v10236_v21  ;;  %14599 = vmatprep.mubr.msk.bf16.mxu1 %vm15259_vm0, %v15258_v1 }
0x208a   :  { %14609 = vmatprep.subr.bf16.mxu1 %v15258_v1 }
0x208d   :  { %v10084_v51 = vpop.f32.mrb[68].mxu1 }
0x208e   :  { %v10138_v47 = vpack.c.bf16 %v10084_v51, %v10084_v51  ;;  %v14577_v58 = vpop.f32.mrb[69].mxu1 }
0x208f   :  { %v10087_v50 = vpop.f32.mrb[70].mxu1 }
0x2090   :  { %v14578_v27 = vpop.f32.mrb[71].mxu1  ;;  %14600 = vmatmul.mubr.msk.bf16.vlgmr.msra.gmra.mrb[76].mxu1 %vm936_vm2, %v10138_v47 }
0x2091   :  { %14610 = vmatpush3.bf16.msra.mxu1 %v15017_v52  ;;  %14613 = vmatprep.mubr.msk.bf16.mxu1 %vm15259_vm0, %v15258_v1 }
0x2092   :  { %14611 = vmatprep.subr.bf16.mxu1 %v15258_v1 }
0x2095   :  { %v10038_v24 = vpop.f32.mrb[72].mxu0  ;;  %14612 = vmatpush3.bf16.msra.mxu1 %v15018_v56 }
0x2096   :  { %v10137_v39 = vpack.c.bf16 %v10038_v24, %v10038_v24  ;;  %v14571_v48 = vpop.f32.mrb[73].mxu0  ;;  %14625 = vmatprep.subr.bf16.mxu1 %v15258_v1 }
0x2097   :  { %v10041_v6 = vpop.f32.mrb[74].mxu0 }
0x2098   :  { %v14572_v14 = vpop.f32.mrb[75].mxu0  ;;  %14594 = vmatmul.mubr.msk.bf16.vlgmr.msra.gmra.mrb[80].mxu0 %vm936_vm2, %v10137_v39  ;;  %14614 = vmatmul.mubr.msk.bf16.vlgmr.msra.gmra.mrb[80].mxu1 %vm264_vm1, %v10338_v38 }
0x2099   :  { %14604 = vmatpush3.bf16.msra.mxu0 %v10282_v11  ;;  %14626 = vmatpush3.bf16.msra.mxu1 %v15019_v13 }
0x209a   :  { %14627 = vmatprep.subr.bf16.mxu1 %v15258_v1  ;;  %14605 = vmatprep.mubr.msk.bf16.mxu0 %vm15259_vm0, %v15258_v1 }
0x209b   :  { %14629 = vmatprep.mubr.msk.bf16.mxu1 %vm15259_vm0, %v15258_v1  ;;  %14617 = vmatprep.subr.bf16.mxu0 %v15258_v1 }
0x209d   :  { %v10130_v10 = vpop.f32.mrb[76].mxu0  ;;  %14628 = vmatpush3.bf16.msra.mxu1 %v15020_v9 }
0x209e   :  { %v10139_v43 = vpack.c.bf16 %v10130_v10, %v10130_v10  ;;  %v14583_v34 = vpop.f32.mrb[77].mxu0  ;;  %14641 = vmatprep.subr.bf16.mxu1 %v15258_v1 }
0x209f   :  { %v10133_v42 = vpop.f32.mrb[78].mxu0 }
0x20a0   :  { %v14584_v4 = vpop.f32.mrb[79].mxu0  ;;  %14606 = vmatmul.mubr.msk.bf16.vlgmr.msra.gmra.mrb[84].mxu0 %vm936_vm2, %v10139_v43  ;;  %14630 = vmatmul.mubr.msk.bf16.vlgmr.msra.gmra.mrb[84].mxu1 %vm264_vm1, %v10338_v38 }
0x20a1   :  { %14618 = vmatpush3.bf16.msra.mxu0 %v15021_v22  ;;  %14642 = vmatpush3.bf16.msra.mxu1 %v15022_v40 }
0x20a2   :  { %14619 = vmatprep.subr.bf16.mxu0 %v15258_v1  ;;  %14643 = vmatprep.subr.bf16.mxu1 %v15258_v1 }
0x20a3   :  { %14621 = vmatprep.mubr.msk.bf16.mxu0 %vm15259_vm0, %v15258_v1  ;;  %14645 = vmatprep.mubr.msk.bf16.mxu1 %vm15259_vm0, %v15258_v1 }
0x20a5   :  { %14620 = vmatpush3.bf16.msra.mxu0 %v15023_v23  ;;  %14644 = vmatpush3.bf16.msra.mxu1 %v15024_v25 }
0x20a6   :  { %14633 = vmatprep.subr.bf16.mxu0 %v15258_v1  ;;  %14657 = vmatprep.subr.bf16.mxu1 %v15258_v1 }
0x20a8   :  { %14622 = vmatmul.mubr.msk.bf16.vlgmr.msra.gmra.mrb[88].mxu0 %vm264_vm1, %v10338_v38  ;;  %14646 = vmatmul.mubr.msk.bf16.vlgmr.msra.gmra.mrb[88].mxu1 %vm264_vm1, %v16189_v5 }
0x20a9   :  { %14634 = vmatpush3.bf16.msra.mxu0 %v15025_v28  ;;  %14658 = vmatpush3.bf16.msra.mxu1 %v15026_v29 }
0x20aa   :  { %14635 = vmatprep.subr.bf16.mxu0 %v15258_v1  ;;  %14659 = vmatprep.subr.bf16.mxu1 %v15258_v1 }
0x20ab   :  { %14637 = vmatprep.mubr.msk.bf16.mxu0 %vm15259_vm0, %v15258_v1  ;;  %14661 = vmatprep.mubr.msk.bf16.mxu1 %vm15259_vm0, %v15258_v1 }
0x20ad   :  { %14636 = vmatpush3.bf16.msra.mxu0 %v15027_v36  ;;  %14660 = vmatpush3.bf16.msra.mxu1 %v15028_v30 }
0x20ae   :  { %14649 = vmatprep.subr.bf16.mxu0 %v15258_v1  ;;  %14673 = vmatprep.subr.bf16.mxu1 %v15258_v1 }
0x20b0   :  { %14638 = vmatmul.mubr.msk.bf16.vlgmr.msra.gmra.mrb[92].mxu0 %vm264_vm1, %v10338_v38  ;;  %14662 = vmatmul.mubr.msk.bf16.vlgmr.msra.gmra.mrb[92].mxu1 %vm264_vm1, %v16189_v5 }
0x20b1   :  { %14650 = vmatpush3.bf16.msra.mxu0 %v15029_v19  ;;  %14653 = vmatprep.mubr.msk.bf16.mxu0 %vm15259_vm0, %v15258_v1 }
0x20b2   :  { %14651 = vmatprep.subr.bf16.mxu0 %v15258_v1  ;;  %14677 = vmatprep.mubr.msk.bf16.mxu1 %vm15259_vm0, %v15258_v1 }
0x20b3   :  { %14674 = vmatpush3.bf16.msra.mxu1 %v15033_v63 }
0x20b4   :  { %14675 = vmatprep.subr.bf16.mxu1 %v15258_v1 }
0x20b5   :  { %14652 = vmatpush3.bf16.msra.mxu0 %v15030_v62 }
0x20b6   :  { %14665 = vmatprep.subr.bf16.mxu0 %v15258_v1 }
0x20b7   :  { %14676 = vmatpush3.bf16.msra.mxu1 %v15034_v12 }
0x20b8   :  { %14654 = vmatmul.mubr.msk.bf16.vlgmr.msra.gmra.mrb[96].mxu0 %vm264_vm1, %v16189_v5  ;;  %14689 = vmatprep.subr.bf16.mxu1 %v15258_v1 }
0x20b9   :  { %14666 = vmatpush3.bf16.msra.mxu0 %v15031_v35  ;;  %14669 = vmatprep.mubr.msk.bf16.mxu0 %vm15259_vm0, %v15258_v1 }
0x20ba   :  { %14667 = vmatprep.subr.bf16.mxu0 %v15258_v1  ;;  %14678 = vmatmul.mubr.msk.bf16.vlgmr.msra.gmra.mrb[96].mxu1 %vm264_vm1, %v16189_v5 }
0x20bb   :  { %14690 = vmatpush3.bf16.msra.mxu1 %v15035_v0  ;;  %14693 = vmatprep.mubr.msk.bf16.mxu1 %vm15259_vm0, %v15258_v1 }
0x20bc   :  { %14691 = vmatprep.subr.bf16.mxu1 %v15258_v1 }
0x20bd   :  { %14668 = vmatpush3.bf16.msra.mxu0 %v15032_v45 }
0x20be   :  { %14681 = vmatprep.subr.bf16.mxu0 %v15258_v1 }
0x20bf   :  { %14692 = vmatpush3.bf16.msra.mxu1 %v15036_v8 }
0x20c0   :  { %14670 = vmatmul.mubr.msk.bf16.vlgmr.msra.gmra.mrb[100].mxu0 %vm264_vm1, %v16189_v5  ;;  %14705 = vmatprep.subr.bf16.mxu1 %v15258_v1 }
0x20c1   :  { %14685 = vmatprep.mubr.msk.bf16.mxu0 %vm15259_vm0, %v15258_v1  ;;  %14682 = vmatpush3.bf16.msra.mxu0 %v15037_v3 }
0x20c2   :  { %14683 = vmatprep.subr.bf16.mxu0 %v15258_v1  ;;  %14694 = vmatmul.mubr.msk.bf16.vlgmr.msra.gmra.mrb[100].mxu1 %vm264_vm1, %v16189_v5 }
0x20c3   :  { %14707 = vmatprep.mubr.msk.bf16.mxu1 %vm15259_vm0, %v15258_v1 }
0x20c5   :  { %14684 = vmatpush3.bf16.msra.mxu0 %v15038_v18 }
0x20c6   :  { %14697 = vmatprep.subr.bf16.mxu0 %v15258_v1 }
0x20c8   :  { %14686 = vmatmul.mubr.msk.bf16.vlgmr.msra.gmra.mrb[104].mxu0 %vm264_vm1, %v16189_v5 }
0x20c9   :  { %14701 = vmatprep.mubr.msk.bf16.mxu0 %vm15259_vm0, %v15258_v1  ;;  %14698 = vmatpush3.bf16.msra.mxu0 %v15039_v15 }
0x20ca   :  { %14699 = vmatprep.subr.bf16.mxu0 %v15258_v1 }
0x20cd   :  { %14700 = vmatpush3.bf16.msra.mxu0 %v15040_v32 }
0x20ce   :  { %14711 = vmatprep.subr.bf16.mxu0 %v15258_v1 }
0x20d0   :  { %14702 = vmatmul.mubr.msk.bf16.vlgmr.msra.gmra.mrb[108].mxu0 %vm264_vm1, %v16189_v5 }
0x20d1   :  { %14713 = vmatprep.mubr.msk.bf16.mxu0 %vm15259_vm0, %v15258_v1 }
0x215b   :  { %v10180_v21 = vpop.f32.mrb[72].mxu1 }
0x215c   :  { %v14589_v20 = vpop.f32.mrb[73].mxu1  ;;  %v10324_v50 = vsel %vm264_vm1, %v10180_v21, 0.0 }
0x215d   :  { %v10183_v49 = vpop.f32.mrb[74].mxu1 }
0x215e   :  { %v14590_v57 = vpop.f32.mrb[75].mxu1 }
0x2163   :  { %v10272_v16 = vpop.f32.mrb[76].mxu1 }
0x2164   :  { %v14601_v51 = vpop.f32.mrb[77].mxu1  ;;  %v10327_v38 = vsel %vm264_vm1, %v10272_v16, 0.0 }
0x2165   :  { %v10275_v52 = vpop.f32.mrb[78].mxu1 }
0x2166   :  { %v14602_v17 = vpop.f32.mrb[79].mxu1 }
0x216b   :  { %v10226_v47 = vpop.f32.mrb[80].mxu0  ;;  %v10477_v58 = vpop.f32.mrb[80].mxu1 }
0x216c   :  { %v10325_v27 = vsel %vm264_vm1, %v10226_v47, 0.0  ;;  %v14595_v56 = vpop.f32.mrb[81].mxu0  ;;  %v14615_v59 = vpop.f32.mrb[81].mxu1  ;;  %v10478_v12 = vadd.f32 %v16970_v41, %v10477_v58 }
0x216d   :  { %v10326_v5 = vadd.f32 %v10325_v27, %v10324_v50  ;;  %v10229_v24 = vpop.f32.mrb[82].mxu0  ;;  %v10480_v13 = vpop.f32.mrb[82].mxu1 }
0x216e   :  { %v14596_v39 = vpop.f32.mrb[83].mxu0  ;;  %v14616_v48 = vpop.f32.mrb[83].mxu1  ;;  %v11103_v21 = vpack.c.bf16 %v10478_v12, %v10478_v12 }
0x216f   :  { %v10328_v11 = vadd.f32 %v10327_v38, %v10326_v5 }
0x2173   :  { %v10318_v6 = vpop.f32.mrb[84].mxu0  ;;  %v10581_v14 = vpop.f32.mrb[84].mxu1 }
0x2174   :  { %v10329_v9 = vsel %vm264_vm1, %v10318_v6, 0.0  ;;  %v14607_v10 = vpop.f32.mrb[85].mxu0  ;;  %v14631_v22 = vpop.f32.mrb[85].mxu1  ;;  %v10582_v41 = vadd.f32 %v16980_v26, %v10581_v14 }
0x2175   :  { %v17198_v40 = vadd.f32 %v10329_v9, %v10328_v11  ;;  %v10321_v43 = vpop.f32.mrb[86].mxu0  ;;  %v10584_v34 = vpop.f32.mrb[86].mxu1 }
0x2176   :  { %v14608_v42 = vpop.f32.mrb[87].mxu0  ;;  %v14632_v4 = vpop.f32.mrb[87].mxu1  ;;  %v11105_v47 = vpack.c.bf16 %v10582_v41, %v10582_v41 }
0x217b   :  { %v10529_v23 = vpop.f32.mrb[88].mxu0  ;;  %v10709_v25 = vpop.f32.mrb[88].mxu1 }
0x217c   :  { %v10710_v28 = vadd.f32 %v16966_v31, %v10709_v25  ;;  %v14623_v29 = vpop.f32.mrb[89].mxu0  ;;  %v14647_v36 = vpop.f32.mrb[89].mxu1  ;;  %v10530_v26 = vadd.f32 %v16993_v60, %v10529_v23 }
0x217d   :  { %v10532_v30 = vpop.f32.mrb[90].mxu0  ;;  %v10712_v19 = vpop.f32.mrb[90].mxu1 }
0x217e   :  { %v11107_v62 = vpack.c.bf16 %v10710_v28, %v10710_v28  ;;  %v14624_v35 = vpop.f32.mrb[91].mxu0  ;;  %v14648_v45 = vpop.f32.mrb[91].mxu1  ;;  %v11104_v24 = vpack.c.bf16 %v10530_v26, %v10530_v26 }
0x2180   :  { %v11115_v63 = vsel %vm936_vm2, %v11107_v62, 0 }
0x2181   :  { %14706 = vmatpush3.bf16.xpose.msra.mxu1 %v11115_v63 }
0x2182   :  { %14717 = vmatprep.subr.bf16.mxu1 %v15258_v1 }
0x2183   :  { %v10633_v0 = vpop.f32.mrb[92].mxu0  ;;  %v10813_v8 = vpop.f32.mrb[92].mxu1 }
0x2184   :  { %v10814_v3 = vadd.f32 %v16974_v37, %v10813_v8  ;;  %v14639_v18 = vpop.f32.mrb[93].mxu0  ;;  %v14663_v31 = vpop.f32.mrb[93].mxu1  ;;  %v10634_v60 = vadd.f32 %v17006_v55, %v10633_v0 }
0x2185   :  { %v10636_v15 = vpop.f32.mrb[94].mxu0  ;;  %v10816_v32 = vpop.f32.mrb[94].mxu1 }
0x2186   :  { %v11109_v20 = vpack.c.bf16 %v10814_v3, %v10814_v3  ;;  %v14640_v49 = vpop.f32.mrb[95].mxu0  ;;  %v14664_v57 = vpop.f32.mrb[95].mxu1  ;;  %v11106_v48 = vpack.c.bf16 %v10634_v60, %v10634_v60 }
0x2188   :  { %v11207_v16 = vsel %vm936_vm2, %v11109_v20, 0  ;;  %14708 = vmatmul.mubr.msk.bf16.vlgmr.msra.gmra.mrb[104].mxu1 %vm936_vm2, %v11103_v21 }
0x2189   :  { %14718 = vmatpush3.bf16.xpose.msra.mxu1 %v11207_v16  ;;  %14719 = vmatprep.mubr.msk.bf16.mxu1 %vm15259_vm0, %v15258_v1 }
0x218a   :  { %14729 = vmatprep.subr.bf16.mxu1 %v15258_v1 }
0x218b   :  { %v10761_v37 = vpop.f32.mrb[96].mxu0 }
0x218c   :  { %v10762_v51 = vadd.f32 %v16985_v33, %v10761_v37  ;;  %v14655_v52 = vpop.f32.mrb[97].mxu0 }
0x218d   :  { %v10764_v17 = vpop.f32.mrb[98].mxu0 }
0x218e   :  { %v11108_v58 = vpack.c.bf16 %v10762_v51, %v10762_v51  ;;  %v14656_v50 = vpop.f32.mrb[99].mxu0 }
0x2190   :  { %v11161_v27 = vsel %vm936_vm2, %v11108_v58, 0  ;;  %14720 = vmatmul.mubr.msk.bf16.vlgmr.msra.gmra.mrb[108].mxu1 %vm936_vm2, %v11105_v47 }
0x2191   :  { %14712 = vmatpush3.bf16.xpose.msra.mxu0 %v11161_v27  ;;  %14731 = vmatprep.mubr.msk.bf16.mxu1 %vm15259_vm0, %v15258_v1 }
0x2192   :  { %14723 = vmatprep.subr.bf16.mxu0 %v15258_v1 }
0x2193   :  { %v10865_v56 = vpop.f32.mrb[100].mxu0 }
0x2194   :  { %v10866_v33 = vadd.f32 %v16998_v2, %v10865_v56  ;;  %v14671_v59 = vpop.f32.mrb[101].mxu0  ;;  %v10941_v2 = vpop.f32.mrb[96].mxu1 }
0x2195   :  { %v10868_v5 = vpop.f32.mrb[102].mxu0  ;;  %v10942_v11 = vadd.f32 %v17018_v61, %v10941_v2  ;;  %v14679_v6 = vpop.f32.mrb[97].mxu1 }
0x2196   :  { %v11110_v13 = vpack.c.bf16 %v10866_v33, %v10866_v33  ;;  %v14672_v38 = vpop.f32.mrb[103].mxu0  ;;  %v10944_v14 = vpop.f32.mrb[98].mxu1 }
0x2197   :  { %v11347_v9 = vpack.c.bf16 %v10942_v11, %v10942_v11  ;;  %v14680_v10 = vpop.f32.mrb[99].mxu1 }
0x2198   :  { %v11253_v39 = vsel %vm936_vm2, %v11110_v13, 0  ;;  %14714 = vmatmul.mubr.msk.bf16.vlgmr.msra.gmra.mrb[112].mxu0 %vm936_vm2, %v11104_v24  ;;  %v17231_v55 = vpop.f32.mrb[100].mxu1 }
0x2199   :  { %14724 = vmatpush3.bf16.xpose.msra.mxu0 %v11253_v39  ;;  %14725 = vmatprep.mubr.msk.bf16.mxu0 %vm15259_vm0, %v15258_v1  ;;  %v11355_v22 = vsel %vm1184_vm3, %v11347_v9, 0  ;;  %v14695_v43 = vpop.f32.mrb[101].mxu1  ;;  %v17244_v39 = vld [vmem:[%s17386_s15 + $0x1] ss:$0 sm:$0xff] }
0x219a   :  { %14735 = vmatprep.subr.bf16.mxu0 %v15258_v1  ;;  %14730 = vmatpush3.bf16.msra.mxu1 %v11355_v22  ;;  %v11048_v34 = vpop.f32.mrb[102].mxu1  ;;  %v10337_v2 = vadd.f32 %v17244_v39, %v17198_v40 }
0x219b   :  { %14741 = vmatprep.subr.bf16.mxu1 %v15258_v1  ;;  %v14696_v42 = vpop.f32.mrb[103].mxu1  ;;  %v10993_v4 = vpop.f32.mrb[104].mxu0 }
0x219c   :  { %v10994_v23 = vadd.f32 %v17026_v7, %v10993_v4  ;;  %v14687_v25 = vpop.f32.mrb[105].mxu0  ;;  %v11737_v9 = vadd.f32 %v10337_v2, %v16856_v44  ;;  %v11046_v44 = vadd.f32 %v17046_v53, %v17231_v55 }
0x219d   :  { %v10996_v28 = vpop.f32.mrb[106].mxu0 }
0x219e   :  { %v11348_v61 = vpack.c.bf16 %v10994_v23, %v10994_v23  ;;  %v14688_v29 = vpop.f32.mrb[107].mxu0  ;;  %v11743_v43 = vsel %vm264_vm1, %v11737_v9, 0.0 }
0x21a0   :  { %14726 = vmatmul.mubr.msk.bf16.vlgmr.msra.gmra.mrb[116].mxu0 %vm936_vm2, %v11106_v48  ;;  %v11401_v36 = vsel %vm1184_vm3, %v11348_v61, 0  ;;  %v11349_v61 = vpack.c.bf16 %v11046_v44, %v11046_v44 }
0x21a1   :  { %14737 = vmatprep.mubr.msk.bf16.mxu0 %vm15259_vm0, %v15258_v1  ;;  %14736 = vmatpush3.bf16.msra.mxu0 %v11401_v36 }
0x21a2   :  { %14747 = vmatprep.subr.bf16.mxu0 %v15258_v1 }
0x21a3   :  { %v17236_v30 = vpop.f32.mrb[108].mxu0 }
0x21a4   :  { %v14703_v19 = vpop.f32.mrb[109].mxu0 }
0x21a5   :  { %v11100_v62 = vpop.f32.mrb[110].mxu0 }
0x21a6   :  { %v14704_v35 = vpop.f32.mrb[111].mxu0 }
0x225b   :  { %v11151_v45 = vpop.f32.mrb[104].mxu1 }
0x225c   :  { %v11295_v63 = vmul.f32 0.35355338, %v11151_v45  ;;  %v14709_v12 = vpop.f32.mrb[105].mxu1  ;;  %v11447_v45 = vsel %vm1184_vm3, %v11349_v61, 0 }
0x225d   :  { %v11154_v0 = vpop.f32.mrb[106].mxu1 }
0x225e   :  { %v14710_v8 = vpop.f32.mrb[107].mxu1  ;;  %v11299_v7 = vsel %vm936_vm2, %v11295_v63, -inf }
0x225f   :  { %11300 = vmax.xlane.f32.xlu0 %v11299_v7  ;;  %v11098_v7 = vadd.f32 %v17057_v54, %v17236_v30 }
0x2263   :  { %v11243_v3 = vpop.f32.mrb[108].mxu1 }
0x2264   :  { %v11297_v18 = vmul.f32 0.35355338, %v11243_v3  ;;  %v14721_v31 = vpop.f32.mrb[109].mxu1 }
0x2265   :  { %v11246_v15 = vpop.f32.mrb[110].mxu1  ;;  %v11350_v31 = vpack.c.bf16 %v11098_v7, %v11098_v7 }
0x2266   :  { %v14722_v32 = vpop.f32.mrb[111].mxu1  ;;  %v11305_v21 = vsel %vm936_vm2, %v11297_v18, -inf }
0x2267   :  { %11306 = vmax.xlane.f32.xlu0 %v11305_v21  ;;  %v11493_v21 = vsel %vm1184_vm3, %v11350_v31, 0 }
0x226b   :  { %v11197_v20 = vpop.f32.mrb[112].mxu0 }
0x226c   :  { %v11296_v49 = vmul.f32 0.35355338, %v11197_v20  ;;  %v14715_v57 = vpop.f32.mrb[113].mxu0 }
0x226d   :  { %v11200_v16 = vpop.f32.mrb[114].mxu0 }
0x226e   :  { %v14716_v41 = vpop.f32.mrb[115].mxu0  ;;  %v11302_v37 = vsel %vm936_vm2, %v11296_v49, -inf  ;;  %v12813_v16 = vld [vmem:[%s17385_s11 + $0x14] sm:$0xf] }
0x226f   :  { %11303 = vmax.xlane.f32.xlu1 %v11302_v37  ;;  %v11589_v41 = vsel %vm1184_vm3, %v12813_v16, 0  ;;  %v12814_v37 = vld [vmem:[%s17385_s11 + $0x18] sm:$0xf] }
0x2273   :  { %v11289_v51 = vpop.f32.mrb[116].mxu0 }
0x2274   :  { %v11298_v52 = vmul.f32 0.35355338, %v11289_v51  ;;  %v14727_v17 = vpop.f32.mrb[117].mxu0 }
0x2275   :  { %v11292_v47 = vpop.f32.mrb[118].mxu0 }
0x2276   :  { %v14728_v58 = vpop.f32.mrb[119].mxu0  ;;  %v11308_v50 = vsel %vm936_vm2, %v11298_v52, -inf  ;;  %v11635_v47 = vsel %vm1184_vm3, %v12814_v37, 0 }
0x2277   :  { %11309 = vmax.xlane.f32.xlu1 %v11308_v50 }
0x22ec   :  { %v11301_v27 = vpop.xlane.xlu0 %11300 }
0x22ed   :  { %v11311_v26 = vsub.f32 %v11295_v63, %v11301_v27 }
0x22ef   :  { %v11315_v56 = vmul.f32 1.442695, %v11311_v26 }
0x22f1   :  { %15177 = vpow2.f32 %v11315_v56 }
0x22f4   :  { %v11307_v33 = vpop.xlane.xlu0 %11306 }
0x22f5   :  { %v11313_v59 = vsub.f32 %v11297_v18, %v11307_v33 }
0x22f7   :  { %v11319_v5 = vmul.f32 1.442695, %v11313_v59 }
0x22f9   :  { %15179 = vpow2.f32 %v11319_v5  ;;  %v12815_v5 = vld [vmem:[%s17385_s11 + $0x1c] sm:$0xf] }
0x22fb   :  { %v15178_v24 = vpop.eup %15177 }
0x22fc   :  { %v11304_v13 = vpop.xlane.xlu1 %11303  ;;  %v11323_v38 = vsel %vm936_vm2, %v15178_v24, 0.0 }
0x22fd   :  { %v11312_v60 = vsub.f32 %v11296_v49, %v11304_v13  ;;  %11324 = vadd.xlane.f32.xlu0 %v11323_v38  ;;  %v12812_v49 = vld [vmem:[%s17385_s11 + $0x10] sm:$0xf] }
0x22fe   :  { %v11543_v57 = vsel %vm1184_vm3, %v12812_v49, 0  ;;  %v15042_v49 = vld [vmem:[%s17387_s16 + $0x18] sm:$0xff]  }
0x22ff   :  { %v11317_v48 = vmul.f32 1.442695, %v11312_v60  ;;  %v11681_v60 = vsel %vm1184_vm3, %v12815_v5, 0 }
0x2301   :  { %15181 = vpow2.f32 %v11317_v48 }
0x2303   :  { %v15180_v11 = vpop.eup %15179 }
0x2304   :  { %v11310_v6 = vpop.xlane.xlu1 %11309  ;;  %v11329_v14 = vsel %vm936_vm2, %v15180_v11, 0.0 }
0x2305   :  { %v11314_v10 = vsub.f32 %v11298_v52, %v11310_v6  ;;  %11330 = vadd.xlane.f32.xlu0 %v11329_v14 }
0x2307   :  { %v11321_v22 = vmul.f32 1.442695, %v11314_v10 }
0x2309   :  { %15183 = vpow2.f32 %v11321_v22  ;;  %11744 = vadd.xlane.f32.xlu0 %v11743_v43 }
0x230b   :  { %v15182_v34 = vpop.eup %15181 }
0x230c   :  { %v11326_v42 = vsel %vm936_vm2, %v15182_v34, 0.0 }
0x230d   :  { %11327 = vadd.xlane.f32.xlu1 %v11326_v42 }
0x2313   :  { %v15184_v4 = vpop.eup %15183 }
0x2314   :  { %v11332_v40 = vsel %vm936_vm2, %v15184_v4, 0.0 }
0x2315   :  { %11333 = vadd.xlane.f32.xlu1 %v11332_v40 }
0x238a   :  { %v11325_v23 = vpop.xlane.xlu0 %11324 }
0x238b   :  { %15185 = vrcp.f32 %v11325_v23 }
0x2392   :  { %v11331_v25 = vpop.xlane.xlu0 %11330 }
0x2393   :  { %15187 = vrcp.f32 %v11331_v25 }
0x2395   :  { %v15186_v28 = vpop.eup %15185 }
0x2396   :  { %v11339_v29 = vmul.f32 %v15186_v28, %v15178_v24  ;;  %v11745_v36 = vpop.xlane.xlu0 %11744 }
0x2397   :  { %v11749_v19 = vmul.f32 0.03125, %v11745_v36 }
0x2398   :  { %v11343_v62 = vpack.c.bf16 %v11339_v29, %v11339_v29 }
0x2399   :  { %v17255_v35 = vsub.f32 %v11737_v9, %v11749_v19 }
0x239a   :  { %14732 = vmatmul.mubr.msk.bf16.vlgmr.msra.gmra.mrb[112].mxu1 %vm936_vm2, %v11343_v62  ;;  %v11328_v63 = vpop.xlane.xlu1 %11327 }
0x239b   :  { %14742 = vmatpush3.bf16.msra.mxu1 %v11447_v45  ;;  %15189 = vrcp.f32 %v11328_v63  ;;  %v11753_v53 = vmul.f32 %v17255_v35, %v17255_v35  ;;  %14743 = vmatprep.mubr.msk.bf16.mxu1 %vm15259_vm0, %v15258_v1 }
0x239c   :  { %14753 = vmatprep.subr.bf16.mxu1 %v15258_v1 }
0x239d   :  { %v15188_v55 = vpop.eup %15187  ;;  %v11755_v12 = vsel %vm264_vm1, %v11753_v53, 0.0 }
0x239e   :  { %v11341_v0 = vmul.f32 %v15188_v55, %v15180_v11  ;;  %11756 = vadd.xlane.f32.xlu0 %v11755_v12 }
0x23a0   :  { %v11345_v8 = vpack.c.bf16 %v11341_v0, %v11341_v0 }
0x23a2   :  { %14744 = vmatmul.mubr.msk.bf16.vlgmr.msra.gmra.mrb[116].mxu1 %vm936_vm2, %v11345_v8  ;;  %v11334_v3 = vpop.xlane.xlu1 %11333 }
0x23a3   :  { %15191 = vrcp.f32 %v11334_v3  ;;  %14755 = vmatprep.mubr.msk.bf16.mxu1 %vm15259_vm0, %v15258_v1  ;;  %14754 = vmatpush3.bf16.msra.mxu1 %v11543_v57 }
0x23a4   :  { %14765 = vmatprep.subr.bf16.mxu1 %v15258_v1 }
0x23a5   :  { %v15190_v18 = vpop.eup %15189 }
0x23a6   :  { %v11340_v15 = vmul.f32 %v15190_v18, %v15182_v34 }
0x23a8   :  { %v11344_v32 = vpack.c.bf16 %v11340_v15, %v11340_v15 }
0x23aa   :  { %14738 = vmatmul.mubr.msk.bf16.vlgmr.msra.gmra.mrb[120].mxu0 %vm936_vm2, %v11344_v32 }
0x23ab   :  { %14748 = vmatpush3.bf16.msra.mxu0 %v11493_v21  ;;  %14749 = vmatprep.mubr.msk.bf16.mxu0 %vm15259_vm0, %v15258_v1 }
0x23ac   :  { %14759 = vmatprep.subr.bf16.mxu0 %v15258_v1 }
0x23ad   :  { %v15192_v54 = vpop.eup %15191 }
0x23ae   :  { %v11342_v30 = vmul.f32 %v15192_v54, %v15184_v4 }
0x23b0   :  { %v11346_v20 = vpack.c.bf16 %v11342_v30, %v11342_v30 }
0x23b2   :  { %14750 = vmatmul.mubr.msk.bf16.vlgmr.msra.gmra.mrb[124].mxu0 %vm936_vm2, %v11346_v20  ;;  %v15041_v20 = vld [vmem:[%s17387_s16 + $0x10] sm:$0xff]  }
0x23b3   :  { %14761 = vmatprep.mubr.msk.bf16.mxu0 %vm15259_vm0, %v15258_v1  ;;  %14760 = vmatpush3.bf16.msra.mxu0 %v11589_v41 }
0x23b4   :  { %14771 = vmatprep.subr.bf16.mxu0 %v15258_v1 }
0x242b   :  { %v11757_v57 = vpop.xlane.xlu0 %11756 }
0x242c   :  { %v11761_v16 = vmul.f32 0.03125, %v11757_v57 }
0x242e   :  { %v11763_v41 = vadd.f32 1e-05, %v11761_v16  ;;  %v12909_v16 = vld [vmem:[%s15421_s12 + $0x1] ss:$0 sm:$0xff] }
0x2430   :  { %15193 = vrsqrt.f32 %v11763_v41 }
0x246d   :  { %v11391_v51 = vpop.f32.mrb[112].mxu1 }
0x246e   :  { %v11535_v52 = vpack.c.bf16 %v11391_v51, %v11391_v51  ;;  %v14733_v17 = vpop.f32.mrb[113].mxu1 }
0x246f   :  { %v11394_v58 = vpop.f32.mrb[114].mxu1  ;;  %v15194_v17 = vpop.eup %15193 }
0x2470   :  { %v14734_v50 = vpop.f32.mrb[115].mxu1  ;;  %14756 = vmatmul.mubr.msk.bf16.vlgmr.msra.gmra.mrb[120].mxu1 %vm936_vm2, %v11535_v52  ;;  %v12880_v58 = vld [vmem:[%s17389_s22 + $0x1] ss:$0 sm:$0xff] }
0x2471   :  { %14766 = vmatpush3.bf16.msra.mxu1 %v11635_v47  ;;  %14767 = vmatprep.mubr.msk.bf16.mxu1 %vm15259_vm0, %v15258_v1  ;;  %v11767_v47 = vmul.f32 %v15194_v17, %v17255_v35  ;;  %v15046_v35 = vld [vmem:[%s17388_s18 + $0x38] sm:$0xff]  }
0x2472   :  { %14777 = vmatprep.subr.bf16.mxu1 %v15258_v1 }
0x2475   :  { %v11483_v27 = vpop.f32.mrb[116].mxu1 }
0x2476   :  { %v11537_v26 = vpack.c.bf16 %v11483_v27, %v11483_v27  ;;  %v14745_v56 = vpop.f32.mrb[117].mxu1  ;;  %v11775_v27 = vmul.f32 %v12880_v58, %v11767_v47 }
0x2477   :  { %v11486_v33 = vpop.f32.mrb[118].mxu1  ;;  %v12881_v56 = vld [vmem:[%s17390_s23 + $0x1] ss:$0 sm:$0xff] }
0x2478   :  { %v14746_v59 = vpop.f32.mrb[119].mxu1  ;;  %14768 = vmatmul.mubr.msk.bf16.vlgmr.msra.gmra.mrb[124].mxu1 %vm936_vm2, %v11537_v26 }
0x2479   :  { %14781 = vmatprep.mubr.msk.bf16.mxu1 %vm15259_vm0, %v15258_v1  ;;  %14778 = vmatpush3.bf16.msra.mxu1 %v15041_v20  ;;  %v11783_v59 = vadd.f32 %v12881_v56, %v11775_v27  ;;  %v12908_v20 = vld [vmem:[%s17393_s1 + $0x1] ss:$0 sm:$0xff] }
0x247a   :  { %14779 = vmatprep.subr.bf16.mxu1 %v15258_v1 }
0x247d   :  { %v11437_v24 = vpop.f32.mrb[120].mxu0  ;;  %14780 = vmatpush3.bf16.msra.mxu1 %v15042_v49 }
0x247e   :  { %v11536_v13 = vpack.c.bf16 %v11437_v24, %v11437_v24  ;;  %v14739_v38 = vpop.f32.mrb[121].mxu0  ;;  %14797 = vmatprep.subr.bf16.mxu1 %v15258_v1 }
0x247f   :  { %v11440_v48 = vpop.f32.mrb[122].mxu0  ;;  %v12887_v38 = vld [vmem:[%s17391_s26 + $0x1] ss:$0 sm:$0xff] }
0x2480   :  { %v14740_v2 = vpop.f32.mrb[123].mxu0  ;;  %14762 = vmatmul.mubr.msk.bf16.vlgmr.msra.gmra.mrb[128].mxu0 %vm936_vm2, %v11536_v13  ;;  %v15045_v13 = vld [vmem:[%s17388_s18 + $0x30] sm:$0xff]  }
0x2481   :  { %14772 = vmatpush3.bf16.msra.mxu0 %v11681_v60  ;;  %14773 = vmatprep.mubr.msk.bf16.mxu0 %vm15259_vm0, %v15258_v1 }
0x2482   :  { %14785 = vmatprep.subr.bf16.mxu0 %v15258_v1 }
0x2485   :  { %v11529_v11 = vpop.f32.mrb[124].mxu0 }
0x2486   :  { %v11538_v6 = vpack.c.bf16 %v11529_v11, %v11529_v11  ;;  %v14751_v14 = vpop.f32.mrb[125].mxu0 }
0x2487   :  { %v11532_v9 = vpop.f32.mrb[126].mxu0 }
0x2488   :  { %v14752_v10 = vpop.f32.mrb[127].mxu0  ;;  %14774 = vmatmul.mubr.msk.bf16.vlgmr.msra.gmra.mrb[132].mxu0 %vm936_vm2, %v11538_v6 }
0x2489   :  { %14793 = vmatprep.mubr.msk.bf16.mxu0 %vm15259_vm0, %v15258_v1 }
0x2543   :  { %v11579_v22 = vpop.f32.mrb[120].mxu1 }
0x2544   :  { %v14757_v43 = vpop.f32.mrb[121].mxu1  ;;  %v11723_v28 = vsel %vm264_vm1, %v11579_v22, 0.0 }
0x2545   :  { %v11582_v34 = vpop.f32.mrb[122].mxu1  ;;  %v12900_v43 = vld [vmem:[%s17392_s28 + $0x1] ss:$0 sm:$0xff] }
0x2546   :  { %v14758_v42 = vpop.f32.mrb[123].mxu1 }
0x254b   :  { %v11671_v4 = vpop.f32.mrb[124].mxu1 }
0x254c   :  { %v14769_v40 = vpop.f32.mrb[125].mxu1  ;;  %v11726_v62 = vsel %vm264_vm1, %v11671_v4, 0.0 }
0x254d   :  { %v11674_v23 = vpop.f32.mrb[126].mxu1 }
0x254e   :  { %v14770_v44 = vpop.f32.mrb[127].mxu1 }
0x2553   :  { %v11625_v25 = vpop.f32.mrb[128].mxu0 }
0x2554   :  { %v11724_v61 = vsel %vm264_vm1, %v11625_v25, 0.0  ;;  %v14763_v29 = vpop.f32.mrb[129].mxu0 }
0x2555   :  { %v11725_v36 = vadd.f32 %v11724_v61, %v11723_v28  ;;  %v11628_v19 = vpop.f32.mrb[130].mxu0 }
0x2556   :  { %v14764_v45 = vpop.f32.mrb[131].mxu0 }
0x2557   :  { %v11727_v63 = vadd.f32 %v11726_v62, %v11725_v36 }
0x255b   :  { %v11717_v53 = vpop.f32.mrb[132].mxu0 }
0x255c   :  { %v11728_v55 = vsel %vm264_vm1, %v11717_v53, 0.0  ;;  %v14775_v12 = vpop.f32.mrb[133].mxu0 }
0x255d   :  { %v11729_v0 = vadd.f32 %v11728_v55, %v11727_v63  ;;  %v11720_v8 = vpop.f32.mrb[134].mxu0 }
0x255e   :  { %v14776_v7 = vpop.f32.mrb[135].mxu0 }
0x255f   :  { %v11736_v3 = vadd.f32 %v17244_v39, %v11729_v0  ;;  %v15044_v39 = vld [vmem:[%s17388_s18 + $0x28] sm:$0xff]   ;;  %v15047_v7 = vld [vmem:[%s15426_s9] sm:$0xff]  }
0x2561   :  { %v11738_v18 = vadd.f32 %v11736_v3, %v17091_v46  ;;  %v15043_v46 = vld [vmem:[%s17388_s18 + $0x20] sm:$0xff]   ;;  %v15048_v3 = vld [vmem:[%s15426_s9 + $0x8] sm:$0xff]   ;;  %s15260_s9 = smov [#allocation2]  }
0x2562   :  { %14786 = vmatpush3.bf16.msra.mxu0 %v15043_v46  ;;  %s12066_s25 = sshll.u32 %s15260_s9, 4  ;;  %s12067_s25 = int_to_ptr.vmem [resolvable:$true] %s12066_s25 }
0x2563   :  { %v11746_v31 = vsel %vm264_vm1, %v11738_v18, 0.0  ;;  %14787 = vmatprep.subr.bf16.mxu0 %v15258_v1  ;;  %s15201_s29 = scalar_lea.vmem %s12067_s25, 256  ;;  %p15206_p1 = scmp.lt.s32.totalorder %s12067_s25, %s12067_s25 }
0x2564   :  { %11747 = vadd.xlane.f32.xlu1 %v11746_v31  ;;  %p15202_p0 = scmp.ne.s32.totalorder %s12067_s25, %s15201_s29  ;;  %p15207_p2 = scmp.lt.s32.totalorder %s15201_s29, %s15201_s29 }
0x2566   :  { %14788 = vmatpush3.bf16.msra.mxu0 %v15044_v39  ;;  %p15208_p3 = por %p15207_p2, %p15206_p1 }
0x2567   :  { %14789 = vmatprep.subr.bf16.mxu0 %v15258_v1 }
0x2568   :  { %p15209_p4 = pnand %p15208_p3, %p15202_p0 }
0x256a   :  { %14790 = vmatpush3.bf16.msra.mxu0 %v15045_v13 }
0x256b   :  { %14791 = vmatprep.subr.bf16.mxu0 %v15258_v1 }
0x256e   :  { %14792 = vmatpush3.bf16.msra.mxu0 %v15046_v35 }
0x25f1   :  { %v11748_v15 = vpop.xlane.xlu1 %11747 }
0x25f2   :  { %v11750_v32 = vmul.f32 0.03125, %v11748_v15 }
0x25f4   :  { %v11752_v21 = vsub.f32 %v11738_v18, %v11750_v32 }
0x25f6   :  { %v11754_v54 = vmul.f32 %v11752_v21, %v11752_v21 }
0x25f8   :  { %v11758_v30 = vsel %vm264_vm1, %v11754_v54, 0.0 }
0x25f9   :  { %11759 = vadd.xlane.f32.xlu1 %v11758_v30 }
0x2686   :  { %v11760_v37 = vpop.xlane.xlu1 %11759 }
0x2687   :  { %v11762_v51 = vmul.f32 0.03125, %v11760_v37 }
0x2689   :  { %v11764_v52 = vadd.f32 1e-05, %v11762_v51 }
0x268b   :  { %15195 = vrsqrt.f32 %v11764_v52  ;;  %v12910_v52 = vld [vmem:[%s15431_s27] ss:$0 sm:$0xff] }
0x2695   :  { %v15196_v50 = vpop.eup %15195 }
0x2696   :  { %v11768_v26 = vmul.f32 %v15196_v50, %v11752_v21 }
0x2698   :  { %v11776_v33 = vmul.f32 %v12880_v58, %v11768_v26 }
0x269a   :  { %v11784_v5 = vadd.f32 %v12881_v56, %v11776_v33 }
0x269c   :  { %v11792_v24 = vpack.c.bf16 %v11784_v5, %v11783_v59 }
0x269e   :  { %14782 = vmatmul.mubr.msk.bf16.vlgmr.msra.gmra.mrb[128].mxu1 %vm264_vm1, %v11792_v24 }
0x269f   :  { %14801 = vmatprep.mubr.msk.bf16.mxu1 %vm15259_vm0, %v15258_v1  ;;  %14798 = vmatpush3.bf16.msra.mxu1 %v15047_v7 }
0x26a0   :  { %14799 = vmatprep.subr.bf16.mxu1 %v15258_v1 }
0x26a3   :  { %14800 = vmatpush3.bf16.msra.mxu1 %v15048_v3 }
0x2771   :  { %v11848_v60 = vpop.f32.mrb[128].mxu1 }
0x2772   :  { %v11849_v48 = vadd.f32 %v12887_v38, %v11848_v60  ;;  %v14783_v2 = vpop.f32.mrb[129].mxu1 }
0x2773   :  { %v11851_v11 = vpop.f32.mrb[130].mxu1 }
0x2774   :  { %v11852_v6 = vadd.f32 %v12887_v38, %v11851_v11  ;;  %v14784_v14 = vpop.f32.mrb[131].mxu1  ;;  %v11855_v9 = vmax.f32 %v11849_v48, 0.0 }
0x2776   :  { %v11856_v10 = vmax.f32 %v11852_v6, 0.0 }
0x2778   :  { %v11868_v22 = vpack.c.bf16 %v11856_v10, %v11855_v9 }
0x277a   :  { %14794 = vmatmul.mubr.msk.bf16.vlgmr.msra.gmra.mrb[136].mxu0 %vm5978_vm4, %v11868_v22 }
0x284d   :  { %v11936_v34 = vpop.f32.mrb[136].mxu0 }
0x284e   :  { %v11937_v42 = vadd.f32 %v12900_v43, %v11936_v34  ;;  %v14795_v4 = vpop.f32.mrb[137].mxu0 }
0x284f   :  { %v11939_v40 = vpop.f32.mrb[138].mxu0 }
0x2850   :  { %v11940_v23 = vadd.f32 %v12900_v43, %v11939_v40  ;;  %v14796_v44 = vpop.f32.mrb[139].mxu0  ;;  %v11943_v25 = vadd.f32 %v11937_v42, %v11783_v59 }
0x2852   :  { %v11949_v28 = vsel %vm264_vm1, %v11943_v25, 0.0  ;;  %v11944_v61 = vadd.f32 %v11940_v23, %v11784_v5 }
0x2853   :  { %11950 = vadd.xlane.f32.xlu0 %v11949_v28 }
0x2854   :  { %v11952_v29 = vsel %vm264_vm1, %v11944_v61, 0.0 }
0x2855   :  { %11953 = vadd.xlane.f32.xlu1 %v11952_v29 }
0x28e0   :  { %v11951_v36 = vpop.xlane.xlu0 %11950 }
0x28e1   :  { %v11955_v19 = vmul.f32 0.03125, %v11951_v36 }
0x28e2   :  { %v11954_v62 = vpop.xlane.xlu1 %11953 }
0x28e3   :  { %v11957_v45 = vsub.f32 %v11943_v25, %v11955_v19  ;;  %v11956_v63 = vmul.f32 0.03125, %v11954_v62 }
0x28e5   :  { %v11958_v53 = vsub.f32 %v11944_v61, %v11956_v63  ;;  %v11959_v55 = vmul.f32 %v11957_v45, %v11957_v45 }
0x28e7   :  { %v11961_v12 = vsel %vm264_vm1, %v11959_v55, 0.0  ;;  %v11960_v0 = vmul.f32 %v11958_v53, %v11958_v53 }
0x28e8   :  { %11962 = vadd.xlane.f32.xlu0 %v11961_v12 }
0x28e9   :  { %v11964_v8 = vsel %vm264_vm1, %v11960_v0, 0.0 }
0x28ea   :  { %11965 = vadd.xlane.f32.xlu1 %v11964_v8 }
0x2975   :  { %v11963_v18 = vpop.xlane.xlu0 %11962 }
0x2976   :  { %v11967_v31 = vmul.f32 0.03125, %v11963_v18 }
0x2977   :  { %v11966_v15 = vpop.xlane.xlu1 %11965 }
0x2978   :  { %v11969_v32 = vadd.f32 1e-05, %v11967_v31  ;;  %v11968_v21 = vmul.f32 0.03125, %v11966_v15 }
0x297a   :  { %15197 = vrsqrt.f32 %v11969_v32  ;;  %v11970_v54 = vadd.f32 1e-05, %v11968_v21 }
0x297c   :  { %15199 = vrsqrt.f32 %v11970_v54 }
0x2984   :  { %v15198_v30 = vpop.eup %15197 }
0x2985   :  { %v11973_v49 = vmul.f32 %v15198_v30, %v11957_v45 }
0x2986   :  { %v15200_v46 = vpop.eup %15199 }
0x2987   :  { %v11981_v39 = vmul.f32 %v12908_v20, %v11973_v49  ;;  %v11974_v57 = vmul.f32 %v15200_v46, %v11958_v53 }
0x2989   :  { %v11982_v1 = vmul.f32 %v12908_v20, %v11974_v57  ;;  %v11989_v41 = vadd.f32 %v12909_v16, %v11981_v39 }
0x298b   :  { %v11990_v37 = vadd.f32 %v12909_v16, %v11982_v1 }
0x298d   :  { %v11996_v51 = vpack.c.bf16 %v11990_v37, %v11989_v41 }
0x298f   :  { %14802 = vmatmul.mubr.msk.bf16.vlgmr.msra.gmra.mrb[132].mxu1 %vm264_vm1, %v11996_v51 }
0x2a62   :  { %v12052_v17 = vpop.f32.mrb[132].mxu1 }
0x2a63   :  { %v12053_v47 = vadd.f32 %v12910_v52, %v12052_v17  ;;  %v14803_v58 = vpop.f32.mrb[133].mxu1 }
0x2a64   :  { %v12055_v50 = vpop.f32.mrb[134].mxu1 }
0x2a65   :  { %12059 = vst [vmem:[#allocation2] sm:$0xff] %v12053_v47  ;;  %v12056_v27 = vadd.f32 %v12910_v52, %v12055_v50  ;;  %v14804_v26 = vpop.f32.mrb[135].mxu1 }
0x2a67   :  { %12060 = vst [vmem:[#allocation2 + $0x8] sm:$0xff] %v12056_v27 }
0x2a68   :  { %15212 = shalt.err (!%p15209_p4)
}
0x2a69   :  { %s15213_s3 = scalar_lea.hbm %s15436_s20, 256 }
0x2a6a   :  { %p15214_p5 = scmp.ne.s32.totalorder %s15436_s20, %s15213_s3  ;;  %p15217_p6 = scmp.lt.u32.totalorder %s15213_s3, %s15436_s20 }
0x2a6c   :  { %p15219_p7 = pnand %p15217_p6, %p15214_p5 }
0x2a6e   :  { %15222 = shalt.err (!%p15219_p7)
}
0x2a6f   :  { %s15261_s8 = smov 128   ;;  %s15262_s14 = smov 8  }
0x2a70   :  { %12072 = dma.vmem_to_hbm [thread:$0]  %s12067_s25, 256, %s15436_s20, [#allocation3], %s15261_s8, %s15261_s8, %s15262_s14  }
0x2a71   :  { %15223 = dma.done.wait [#allocation3], 256  }
0x2a72   :  { %15224 = vsyncadd [#allocation3], 4294967040 }
0x2a73   :  { %12076 = vsyncpa [#allocation3], 1 }

</bundles_post_ra>
